<compile_context>
chip_gen: v6e
topology: v6e:2x2x1
jax: 0.10.0
libtpu: 0.0.40
codegen_flags: <defaults>
</compile_context>

<pallas_src>
import functools

import jax
import jax.numpy as jnp
from jax.experimental import pallas as pl
from jax.experimental.pallas import tpu as pltpu

EPS = 1e-5      # nn.BatchNorm2d default eps
CPAD = 128      # all channel / output dims padded to one lane width


# ----------------------------- Pallas kernels ------------------------------ #
def _conv_relu_bn_kernel(p_ref, w_ref, b_ref, g_ref, beta_ref, o_ref):
    """patches (M, K) @ w (K, 128) + bias -> ReLU -> BatchNorm (batch stats)."""
    acc = jnp.dot(p_ref[...], w_ref[...], preferred_element_type=jnp.float32)
    acc = jnp.maximum(acc + b_ref[...], 0.0)               # conv bias + ReLU
    # One-pass biased batch statistics (training-mode BatchNorm2d semantics).
    inv_m = 1.0 / acc.shape[0]
    mean = jnp.sum(acc, axis=0, keepdims=True) * inv_m
    var = jnp.sum(acc * acc, axis=0, keepdims=True) * inv_m - mean * mean
    scale = g_ref[...] * jax.lax.rsqrt(var + EPS)          # (1, 128)
    shift = beta_ref[...] - mean * scale
    o_ref[...] = acc * scale + shift                       # lane-dense store


def _fc_kernel(x_ref, w_ref, b_ref, o_ref):
    o_ref[...] = jnp.dot(x_ref[...], w_ref[...],
                         preferred_element_type=jnp.float32) + b_ref[...]


def conv_relu_bn(patches, w, b, gamma, beta):
    m = patches.shape[0]
    return pl.pallas_call(
        _conv_relu_bn_kernel,
        out_shape=jax.ShapeDtypeStruct((m, CPAD), jnp.float32),
        in_specs=[pl.BlockSpec(memory_space=pltpu.MemorySpace.VMEM)] * 5,
        out_specs=pl.BlockSpec(memory_space=pltpu.MemorySpace.VMEM),
    )(patches, w, b, gamma, beta)


def fc_matmul(x, w, b):
    return pl.pallas_call(
        _fc_kernel,
        out_shape=jax.ShapeDtypeStruct((x.shape[0], CPAD), jnp.float32),
        in_specs=[pl.BlockSpec(memory_space=pltpu.MemorySpace.VMEM)] * 3,
        out_specs=pl.BlockSpec(memory_space=pltpu.MemorySpace.VMEM),
    )(x, w, b)


# ------------------------------- JAX glue ---------------------------------- #
def im2col(x_nhwc, kh, kw, stride, pad):
    """(B,H,W,C) -> (B*OH*OW, KH*KW*C); K ordered (kh, kw, c) to match weights."""
    x = jnp.pad(x_nhwc, ((0, 0), (pad, pad), (pad, pad), (0, 0)))
    n, hp, wp, c = x.shape
    oh = (hp - kh) // stride + 1
    ow = (wp - kw) // stride + 1
    cols = [x[:, i:i + stride * oh:stride, j:j + stride * ow:stride, :]
            for i in range(kh) for j in range(kw)]
    p = jnp.concatenate(cols, axis=-1)                     # (B, OH, OW, KH*KW*C)
    return p.reshape(n * oh * ow, kh * kw * c), (n, oh, ow)


# ------------------------- parameter pre-layout ----------------------------- #
def _prep_conv(w_t, b, cin_pad):
    """torch (Cout,Cin,KH,KW) weight -> (KH*KW*cin_pad, CPAD); bias -> (1,CPAD)."""
    cout, cin, kh, kw = w_t.shape
    w = jnp.transpose(w_t, (2, 3, 1, 0))                   # (KH, KW, Cin, Cout)
    w = jnp.pad(w, ((0, 0), (0, 0), (0, cin_pad - cin), (0, CPAD - cout)))
    return (w.reshape(kh * kw * cin_pad, CPAD),
            jnp.pad(b, (0, CPAD - cout)).reshape(1, CPAD))


def _prep_bn(cout):
    g = jnp.pad(jnp.ones((cout,), jnp.float32), (0, CPAD - cout))  # gamma=0 on pad
    return g.reshape(1, CPAD), jnp.zeros((1, CPAD), jnp.float32)


def _prep_fc(fc_w, fc_b, oh, ow, c_real):
    """torch (N, 2240) [flatten order (C,H,W)] -> (OH*OW*CPAD, CPAD), rows
    permuted to the NHWC(+channel-pad) flatten order produced by the kernels."""
    n_act = fc_w.shape[0]
    w = fc_w.reshape(n_act, c_real, oh, ow)
    w = jnp.transpose(w, (2, 3, 1, 0))                     # (OH, OW, C, N)
    w = jnp.pad(w, ((0, 0), (0, 0), (0, CPAD - c_real), (0, CPAD - n_act)))
    return (w.reshape(oh * ow * CPAD, CPAD),
            jnp.pad(fc_b, (0, CPAD - n_act)).reshape(1, CPAD))


def init_params(key, num_action):
    ks = jax.random.split(key, 8)

    def u(k, shape, fan_in):
        bound = 1.0 / jnp.sqrt(float(fan_in))
        return jax.random.uniform(k, shape, jnp.float32, -bound, bound)

    # Conceptual torch-layout parameters, then laid out once for the kernels.
    c1w, c1b = u(ks[0], (32, 4, 8, 8), 4 * 8 * 8), u(ks[1], (32,), 4 * 8 * 8)
    c2w, c2b = u(ks[2], (64, 32, 4, 4), 32 * 4 * 4), u(ks[3], (64,), 32 * 4 * 4)
    c3w, c3b = u(ks[4], (64, 64, 3, 3), 64 * 3 * 3), u(ks[5], (64,), 64 * 3 * 3)
    fcw, fcb = u(ks[6], (num_action, 2240), 2240), u(ks[7], (num_action,), 2240)

    p = {}
    p["conv1_w"], p["conv1_b"] = _prep_conv(c1w, c1b, cin_pad=4)
    p["conv2_w"], p["conv2_b"] = _prep_conv(c2w, c2b, cin_pad=CPAD)
    p["conv3_w"], p["conv3_b"] = _prep_conv(c3w, c3b, cin_pad=CPAD)
    p["bn1_g"], p["bn1_b"] = _prep_bn(32)
    p["bn2_g"], p["bn2_b"] = _prep_bn(64)
    p["bn3_g"], p["bn3_b"] = _prep_bn(64)
    p["fc_w"], p["fc_b"] = _prep_fc(fcw, fcb, oh=5, ow=7, c_real=64)
    return p


# -------------------------------- forward ----------------------------------- #
def _conv_block(x_nhwc, w, b, g, beta, kh, kw, stride, pad):
    patches, (n, oh, ow) = im2col(x_nhwc, kh, kw, stride, pad)
    y = conv_relu_bn(patches, w, b, g, beta)               # (n*oh*ow, 128)
    return y.reshape(n, oh, ow, CPAD)                      # free row-major reshape


def forward(params, x_nchw, num_action):
    x = jnp.transpose(x_nchw, (0, 2, 3, 1))                # NCHW -> NHWC, once
    x = _conv_block(x, params["conv1_w"], params["conv1_b"],
                    params["bn1_g"], params["bn1_b"], 8, 8, 4, 1)
    x = _conv_block(x, params["conv2_w"], params["conv2_b"],
                    params["bn2_g"], params["bn2_b"], 4, 4, 2, 1)
    x = _conv_block(x, params["conv3_w"], params["conv3_b"],
                    params["bn3_g"], params["bn3_b"], 3, 3, 2, 1)
    b = x.shape[0]
    x = x.reshape(b, -1)                 # (B, 5*7*128): free flatten, matches fc_w rows
    out = fc_matmul(x, params["fc_w"], params["fc_b"])     # (B, 128) lane-dense
    return out[:, :num_action]


if __name__ == "__main__":
    key = jax.random.PRNGKey(0)
    k_param, k_x = jax.random.split(key)

    num_action = 6
    # smallest (H, W) consistent with linear_input_size == 2240 (-> 5x7x64 after conv3)
    batch, cin, height, width = 2, 4, 74, 106

    params = init_params(k_param, num_action)
    x = jax.random.normal(k_x, (batch, cin, height, width), jnp.float32)

    fwd = jax.jit(functools.partial(forward, num_action=num_action))
    out = jax.block_until_ready(fwd(params, x))
    assert out.shape == (batch, num_action)
    assert bool(jnp.all(jnp.isfinite(out)))
    print("KERNEL_OK")
</pallas_src>

<mosaic_0001>
module attributes {stable_mosaic.version = 11 : i64} {
  func.func @_conv_relu_bn_kernel(%arg0: memref<936x256xf32, #tpu.memory_space<vmem>>, %arg1: memref<256x128xf32, #tpu.memory_space<vmem>>, %arg2: memref<1x128xf32, #tpu.memory_space<vmem>>, %arg3: memref<1x128xf32, #tpu.memory_space<vmem>>, %arg4: memref<1x128xf32, #tpu.memory_space<vmem>>, %arg5: memref<936x128xf32, #tpu.memory_space<vmem>>) attributes {dimension_semantics = [], scalar_prefetch = 0 : i64, scratch_operands = 0 : i64, tpu.core_type = #tpu.core_type<tc>} {
    %c0 = arith.constant 0 : index
    %c0_0 = arith.constant 0 : index
    %0 = vector.load %arg0[%c0, %c0_0] : memref<936x256xf32, #tpu.memory_space<vmem>>, vector<936x256xf32>
    %c0_1 = arith.constant 0 : index
    %c0_2 = arith.constant 0 : index
    %1 = vector.load %arg1[%c0_1, %c0_2] : memref<256x128xf32, #tpu.memory_space<vmem>>, vector<256x128xf32>
    %cst = arith.constant dense<0.000000e+00> : vector<936x128xf32>
    %2 = tpu.matmul %0, %1, %cst {dimension_numbers = #tpu.dot_dimension_numbers<[1], [0], [0], [1], [0, 0, 1, 1], [], []>} : vector<936x256xf32>, vector<256x128xf32>, vector<936x128xf32> -> vector<936x128xf32>
    %c0_3 = arith.constant 0 : index
    %c0_4 = arith.constant 0 : index
    %3 = vector.load %arg2[%c0_3, %c0_4] : memref<1x128xf32, #tpu.memory_space<vmem>>, vector<1x128xf32>
    %4 = vector.broadcast %3 : vector<1x128xf32> to vector<936x128xf32>
    %5 = arith.addf %2, %4 : vector<936x128xf32>
    %cst_5 = arith.constant 0.000000e+00 : f32
    %6 = vector.broadcast %cst_5 : f32 to vector<936x128xf32>
    %7 = arith.maximumf %5, %6 : vector<936x128xf32>
    %cst_6 = arith.constant dense<0.000000e+00> : vector<128xf32>
    %8 = vector.multi_reduction <add>, %7, %cst_6 [0] : vector<936x128xf32> to vector<128xf32>
    %9 = vector.shape_cast %8 : vector<128xf32> to vector<1x128xf32>
    %cst_7 = arith.constant 0.00106837612 : f32
    %10 = vector.broadcast %cst_7 : f32 to vector<1x128xf32>
    %11 = arith.mulf %9, %10 : vector<1x128xf32>
    %12 = arith.mulf %7, %7 : vector<936x128xf32>
    %cst_8 = arith.constant dense<0.000000e+00> : vector<128xf32>
    %13 = vector.multi_reduction <add>, %12, %cst_8 [0] : vector<936x128xf32> to vector<128xf32>
    %14 = vector.shape_cast %13 : vector<128xf32> to vector<1x128xf32>
    %cst_9 = arith.constant 0.00106837612 : f32
    %15 = vector.broadcast %cst_9 : f32 to vector<1x128xf32>
    %16 = arith.mulf %14, %15 : vector<1x128xf32>
    %17 = arith.mulf %11, %11 : vector<1x128xf32>
    %18 = arith.subf %16, %17 : vector<1x128xf32>
    %c0_10 = arith.constant 0 : index
    %c0_11 = arith.constant 0 : index
    %19 = vector.load %arg3[%c0_10, %c0_11] : memref<1x128xf32, #tpu.memory_space<vmem>>, vector<1x128xf32>
    %cst_12 = arith.constant 9.99999974E-6 : f32
    %20 = vector.broadcast %cst_12 : f32 to vector<1x128xf32>
    %21 = arith.addf %18, %20 : vector<1x128xf32>
    %22 = math.rsqrt %21 : vector<1x128xf32>
    %23 = arith.mulf %19, %22 : vector<1x128xf32>
    %c0_13 = arith.constant 0 : index
    %c0_14 = arith.constant 0 : index
    %24 = vector.load %arg4[%c0_13, %c0_14] : memref<1x128xf32, #tpu.memory_space<vmem>>, vector<1x128xf32>
    %25 = arith.mulf %11, %23 : vector<1x128xf32>
    %26 = arith.subf %24, %25 : vector<1x128xf32>
    %27 = vector.broadcast %23 : vector<1x128xf32> to vector<936x128xf32>
    %28 = arith.mulf %7, %27 : vector<936x128xf32>
    %29 = vector.broadcast %26 : vector<1x128xf32> to vector<936x128xf32>
    %30 = arith.addf %28, %29 : vector<936x128xf32>
    %c0_15 = arith.constant 0 : index
    %c0_16 = arith.constant 0 : index
    %31 = vector.load %arg5[%c0_15, %c0_16] : memref<936x128xf32, #tpu.memory_space<vmem>>, vector<936x128xf32>
    tpu.vector_store %arg5[%c0_15, %c0_16], %30 {strides = array<i32>} : memref<936x128xf32, #tpu.memory_space<vmem>>, vector<936x128xf32>,
    return
  }
}

module attributes {stable_mosaic.version = 11 : i64} {
  func.func @_conv_relu_bn_kernel(%arg0: memref<234x2048xf32, #tpu.memory_space<vmem>>, %arg1: memref<2048x128xf32, #tpu.memory_space<vmem>>, %arg2: memref<1x128xf32, #tpu.memory_space<vmem>>, %arg3: memref<1x128xf32, #tpu.memory_space<vmem>>, %arg4: memref<1x128xf32, #tpu.memory_space<vmem>>, %arg5: memref<234x128xf32, #tpu.memory_space<vmem>>) attributes {dimension_semantics = [], scalar_prefetch = 0 : i64, scratch_operands = 0 : i64, tpu.core_type = #tpu.core_type<tc>} {
    %c0 = arith.constant 0 : index
    %c0_0 = arith.constant 0 : index
    %0 = vector.load %arg0[%c0, %c0_0] : memref<234x2048xf32, #tpu.memory_space<vmem>>, vector<234x2048xf32>
    %c0_1 = arith.constant 0 : index
    %c0_2 = arith.constant 0 : index
    %1 = vector.load %arg1[%c0_1, %c0_2] : memref<2048x128xf32, #tpu.memory_space<vmem>>, vector<2048x128xf32>
    %cst = arith.constant dense<0.000000e+00> : vector<234x128xf32>
    %2 = tpu.matmul %0, %1, %cst {dimension_numbers = #tpu.dot_dimension_numbers<[1], [0], [0], [1], [0, 0, 1, 1], [], []>} : vector<234x2048xf32>, vector<2048x128xf32>, vector<234x128xf32> -> vector<234x128xf32>
    %c0_3 = arith.constant 0 : index
    %c0_4 = arith.constant 0 : index
    %3 = vector.load %arg2[%c0_3, %c0_4] : memref<1x128xf32, #tpu.memory_space<vmem>>, vector<1x128xf32>
    %4 = vector.broadcast %3 : vector<1x128xf32> to vector<234x128xf32>
    %5 = arith.addf %2, %4 : vector<234x128xf32>
    %cst_5 = arith.constant 0.000000e+00 : f32
    %6 = vector.broadcast %cst_5 : f32 to vector<234x128xf32>
    %7 = arith.maximumf %5, %6 : vector<234x128xf32>
    %cst_6 = arith.constant dense<0.000000e+00> : vector<128xf32>
    %8 = vector.multi_reduction <add>, %7, %cst_6 [0] : vector<234x128xf32> to vector<128xf32>
    %9 = vector.shape_cast %8 : vector<128xf32> to vector<1x128xf32>
    %cst_7 = arith.constant 0.00427350448 : f32
    %10 = vector.broadcast %cst_7 : f32 to vector<1x128xf32>
    %11 = arith.mulf %9, %10 : vector<1x128xf32>
    %12 = arith.mulf %7, %7 : vector<234x128xf32>
    %cst_8 = arith.constant dense<0.000000e+00> : vector<128xf32>
    %13 = vector.multi_reduction <add>, %12, %cst_8 [0] : vector<234x128xf32> to vector<128xf32>
    %14 = vector.shape_cast %13 : vector<128xf32> to vector<1x128xf32>
    %cst_9 = arith.constant 0.00427350448 : f32
    %15 = vector.broadcast %cst_9 : f32 to vector<1x128xf32>
    %16 = arith.mulf %14, %15 : vector<1x128xf32>
    %17 = arith.mulf %11, %11 : vector<1x128xf32>
    %18 = arith.subf %16, %17 : vector<1x128xf32>
    %c0_10 = arith.constant 0 : index
    %c0_11 = arith.constant 0 : index
    %19 = vector.load %arg3[%c0_10, %c0_11] : memref<1x128xf32, #tpu.memory_space<vmem>>, vector<1x128xf32>
    %cst_12 = arith.constant 9.99999974E-6 : f32
    %20 = vector.broadcast %cst_12 : f32 to vector<1x128xf32>
    %21 = arith.addf %18, %20 : vector<1x128xf32>
    %22 = math.rsqrt %21 : vector<1x128xf32>
    %23 = arith.mulf %19, %22 : vector<1x128xf32>
    %c0_13 = arith.constant 0 : index
    %c0_14 = arith.constant 0 : index
    %24 = vector.load %arg4[%c0_13, %c0_14] : memref<1x128xf32, #tpu.memory_space<vmem>>, vector<1x128xf32>
    %25 = arith.mulf %11, %23 : vector<1x128xf32>
    %26 = arith.subf %24, %25 : vector<1x128xf32>
    %27 = vector.broadcast %23 : vector<1x128xf32> to vector<234x128xf32>
    %28 = arith.mulf %7, %27 : vector<234x128xf32>
    %29 = vector.broadcast %26 : vector<1x128xf32> to vector<234x128xf32>
    %30 = arith.addf %28, %29 : vector<234x128xf32>
    %c0_15 = arith.constant 0 : index
    %c0_16 = arith.constant 0 : index
    %31 = vector.load %arg5[%c0_15, %c0_16] : memref<234x128xf32, #tpu.memory_space<vmem>>, vector<234x128xf32>
    tpu.vector_store %arg5[%c0_15, %c0_16], %30 {strides = array<i32>} : memref<234x128xf32, #tpu.memory_space<vmem>>, vector<234x128xf32>,
    return
  }
}

module attributes {stable_mosaic.version = 11 : i64} {
  func.func @_conv_relu_bn_kernel(%arg0: memref<70x1152xf32, #tpu.memory_space<vmem>>, %arg1: memref<1152x128xf32, #tpu.memory_space<vmem>>, %arg2: memref<1x128xf32, #tpu.memory_space<vmem>>, %arg3: memref<1x128xf32, #tpu.memory_space<vmem>>, %arg4: memref<1x128xf32, #tpu.memory_space<vmem>>, %arg5: memref<70x128xf32, #tpu.memory_space<vmem>>) attributes {dimension_semantics = [], scalar_prefetch = 0 : i64, scratch_operands = 0 : i64, tpu.core_type = #tpu.core_type<tc>} {
    %c0 = arith.constant 0 : index
    %c0_0 = arith.constant 0 : index
    %0 = vector.load %arg0[%c0, %c0_0] : memref<70x1152xf32, #tpu.memory_space<vmem>>, vector<70x1152xf32>
    %c0_1 = arith.constant 0 : index
    %c0_2 = arith.constant 0 : index
    %1 = vector.load %arg1[%c0_1, %c0_2] : memref<1152x128xf32, #tpu.memory_space<vmem>>, vector<1152x128xf32>
    %cst = arith.constant dense<0.000000e+00> : vector<70x128xf32>
    %2 = tpu.matmul %0, %1, %cst {dimension_numbers = #tpu.dot_dimension_numbers<[1], [0], [0], [1], [0, 0, 1, 1], [], []>} : vector<70x1152xf32>, vector<1152x128xf32>, vector<70x128xf32> -> vector<70x128xf32>
    %c0_3 = arith.constant 0 : index
    %c0_4 = arith.constant 0 : index
    %3 = vector.load %arg2[%c0_3, %c0_4] : memref<1x128xf32, #tpu.memory_space<vmem>>, vector<1x128xf32>
    %4 = vector.broadcast %3 : vector<1x128xf32> to vector<70x128xf32>
    %5 = arith.addf %2, %4 : vector<70x128xf32>
    %cst_5 = arith.constant 0.000000e+00 : f32
    %6 = vector.broadcast %cst_5 : f32 to vector<70x128xf32>
    %7 = arith.maximumf %5, %6 : vector<70x128xf32>
    %cst_6 = arith.constant dense<0.000000e+00> : vector<128xf32>
    %8 = vector.multi_reduction <add>, %7, %cst_6 [0] : vector<70x128xf32> to vector<128xf32>
    %9 = vector.shape_cast %8 : vector<128xf32> to vector<1x128xf32>
    %cst_7 = arith.constant 0.0142857144 : f32
    %10 = vector.broadcast %cst_7 : f32 to vector<1x128xf32>
    %11 = arith.mulf %9, %10 : vector<1x128xf32>
    %12 = arith.mulf %7, %7 : vector<70x128xf32>
    %cst_8 = arith.constant dense<0.000000e+00> : vector<128xf32>
    %13 = vector.multi_reduction <add>, %12, %cst_8 [0] : vector<70x128xf32> to vector<128xf32>
    %14 = vector.shape_cast %13 : vector<128xf32> to vector<1x128xf32>
    %cst_9 = arith.constant 0.0142857144 : f32
    %15 = vector.broadcast %cst_9 : f32 to vector<1x128xf32>
    %16 = arith.mulf %14, %15 : vector<1x128xf32>
    %17 = arith.mulf %11, %11 : vector<1x128xf32>
    %18 = arith.subf %16, %17 : vector<1x128xf32>
    %c0_10 = arith.constant 0 : index
    %c0_11 = arith.constant 0 : index
    %19 = vector.load %arg3[%c0_10, %c0_11] : memref<1x128xf32, #tpu.memory_space<vmem>>, vector<1x128xf32>
    %cst_12 = arith.constant 9.99999974E-6 : f32
    %20 = vector.broadcast %cst_12 : f32 to vector<1x128xf32>
    %21 = arith.addf %18, %20 : vector<1x128xf32>
    %22 = math.rsqrt %21 : vector<1x128xf32>
    %23 = arith.mulf %19, %22 : vector<1x128xf32>
    %c0_13 = arith.constant 0 : index
    %c0_14 = arith.constant 0 : index
    %24 = vector.load %arg4[%c0_13, %c0_14] : memref<1x128xf32, #tpu.memory_space<vmem>>, vector<1x128xf32>
    %25 = arith.mulf %11, %23 : vector<1x128xf32>
    %26 = arith.subf %24, %25 : vector<1x128xf32>
    %27 = vector.broadcast %23 : vector<1x128xf32> to vector<70x128xf32>
    %28 = arith.mulf %7, %27 : vector<70x128xf32>
    %29 = vector.broadcast %26 : vector<1x128xf32> to vector<70x128xf32>
    %30 = arith.addf %28, %29 : vector<70x128xf32>
    %c0_15 = arith.constant 0 : index
    %c0_16 = arith.constant 0 : index
    %31 = vector.load %arg5[%c0_15, %c0_16] : memref<70x128xf32, #tpu.memory_space<vmem>>, vector<70x128xf32>
    tpu.vector_store %arg5[%c0_15, %c0_16], %30 {strides = array<i32>} : memref<70x128xf32, #tpu.memory_space<vmem>>, vector<70x128xf32>,
    return
  }
}

module attributes {stable_mosaic.version = 11 : i64} {
  func.func @_fc_kernel(%arg0: memref<2x4480xf32, #tpu.memory_space<vmem>>, %arg1: memref<4480x128xf32, #tpu.memory_space<vmem>>, %arg2: memref<1x128xf32, #tpu.memory_space<vmem>>, %arg3: memref<2x128xf32, #tpu.memory_space<vmem>>) attributes {dimension_semantics = [], scalar_prefetch = 0 : i64, scratch_operands = 0 : i64, tpu.core_type = #tpu.core_type<tc>} {
    %c0 = arith.constant 0 : index
    %c0_0 = arith.constant 0 : index
    %0 = vector.load %arg0[%c0, %c0_0] : memref<2x4480xf32, #tpu.memory_space<vmem>>, vector<2x4480xf32>
    %c0_1 = arith.constant 0 : index
    %c0_2 = arith.constant 0 : index
    %1 = vector.load %arg1[%c0_1, %c0_2] : memref<4480x128xf32, #tpu.memory_space<vmem>>, vector<4480x128xf32>
    %cst = arith.constant dense<0.000000e+00> : vector<2x128xf32>
    %2 = tpu.matmul %0, %1, %cst {dimension_numbers = #tpu.dot_dimension_numbers<[1], [0], [0], [1], [0, 0, 1, 1], [], []>} : vector<2x4480xf32>, vector<4480x128xf32>, vector<2x128xf32> -> vector<2x128xf32>
    %c0_3 = arith.constant 0 : index
    %c0_4 = arith.constant 0 : index
    %3 = vector.load %arg2[%c0_3, %c0_4] : memref<1x128xf32, #tpu.memory_space<vmem>>, vector<1x128xf32>
    %4 = vector.broadcast %3 : vector<1x128xf32> to vector<2x128xf32>
    %5 = arith.addf %2, %4 : vector<2x128xf32>
    %c0_5 = arith.constant 0 : index
    %c0_6 = arith.constant 0 : index
    %6 = vector.load %arg3[%c0_5, %c0_6] : memref<2x128xf32, #tpu.memory_space<vmem>>, vector<2x128xf32>
    tpu.vector_store %arg3[%c0_5, %c0_6], %5 {strides = array<i32>} : memref<2x128xf32, #tpu.memory_space<vmem>>, vector<2x128xf32>,
    return
  }
}

</mosaic_0001>

<bundles_post_ra>
// kernel: forward.4
= control target key start
LH: loop header
LB: loop body
LE: loop exit
PB: predicated region body
PF: predicated region fallthrough
CT: control target
= control target key end

     0   :  { %v1868_v0 = vmov 0.0   ;;  %s4864_s1 = inlined_call_operand.vmem [shape: f32[256,128], index: 1, kind: input, shape index: {}]   ;;  %s4865_s0 = inlined_call_operand.vmem [shape: f32[936,256], index: 0, kind: input, shape index: {}]   ;;  %s4866_s2 = inlined_call_operand.vmem [shape: f32[1,128], index: 2, kind: input, shape index: {}]   ;;  %s4867_s3 = inlined_call_operand.vmem [shape: f32[1,128], index: 3, kind: input, shape index: {}]   ;;  %s4868_s4 = inlined_call_operand.vmem [shape: f32[1,128], index: 4, kind: input, shape index: {}]   ;;  %s4869_s5 = inlined_call_operand.vmem [shape: f32[936,128], index: 5, kind: output, shape index: {}]  }
   0x1   :  { %293 = vmatprep.subr.mxu0 %v1868_v0  ;;  %v269_v1 = vld [vmem:[%s4864_s1 + $0x78] sm:$0xff]  ;;  %v268_v2 = vld [vmem:[%s4864_s1 + $0x70] sm:$0xff]  ;;  %1800 = vmatprep.subr.mxu1 %v1868_v0  ;;  %v267_v3 = vld [vmem:[%s4864_s1 + $0x68] sm:$0xff] }
   0x2   :  { %294 = vmatpush1.msra.mxu0 %v269_v1  ;;  %1832 = vmatpush1.msra.mxu1 %v269_v1  ;;  %v266_v4 = vld [vmem:[%s4864_s1 + $0x60] sm:$0xff]  ;;  %v265_v5 = vld [vmem:[%s4864_s1 + $0x58] sm:$0xff]  ;;  %v264_v6 = vld [vmem:[%s4864_s1 + $0x50] sm:$0xff] }
   0x3   :  { %295 = vmatprep.subr.mxu0 %v1868_v0  ;;  %1801 = vmatprep.subr.mxu1 %v1868_v0  ;;  %v263_v7 = vld [vmem:[%s4864_s1 + $0x48] sm:$0xff]  ;;  %v262_v9 = vld [vmem:[%s4864_s1 + $0x40] sm:$0xff]  ;;  %v261_v10 = vld [vmem:[%s4864_s1 + $0x38] sm:$0xff] }
   0x4   :  { %296 = vmatpush1.msra.mxu0 %v268_v2  ;;  %1833 = vmatpush1.msra.mxu1 %v268_v2  ;;  %v21_v8 = vld [vmem:[%s4865_s0 + $0x8] sm:$0xff]  ;;  %v260_v11 = vld [vmem:[%s4864_s1 + $0x30] sm:$0xff]  ;;  %v258_v13 = vld [vmem:[%s4864_s1 + $0x20] sm:$0xff] }
   0x5   :  { %297 = vmatprep.subr.mxu0 %v1868_v0  ;;  %1802 = vmatprep.subr.mxu1 %v1868_v0  ;;  %v259_v12 = vld [vmem:[%s4864_s1 + $0x28] sm:$0xff]  ;;  %v257_v14 = vld [vmem:[%s4864_s1 + $0x18] sm:$0xff]  ;;  %v256_v15 = vld [vmem:[%s4864_s1 + $0x10] sm:$0xff] }
   0x6   :  { %298 = vmatpush1.msra.mxu0 %v267_v3  ;;  %1834 = vmatpush1.msra.mxu1 %v267_v3  ;;  %v255_v16 = vld [vmem:[%s4864_s1 + $0x8] sm:$0xff]  ;;  %v254_v17 = vld [vmem:[%s4864_s1] sm:$0xff]  ;;  %v285_v18 = vld [vmem:[%s4864_s1 + $0xf8] sm:$0xff] }
   0x7   :  { %299 = vmatprep.subr.mxu0 %v1868_v0  ;;  %1803 = vmatprep.subr.mxu1 %v1868_v0  ;;  %v284_v19 = vld [vmem:[%s4864_s1 + $0xf0] sm:$0xff]  ;;  %v283_v20 = vld [vmem:[%s4864_s1 + $0xe8] sm:$0xff]  ;;  %v282_v21 = vld [vmem:[%s4864_s1 + $0xe0] sm:$0xff] }
   0x8   :  { %300 = vmatpush1.msra.mxu0 %v266_v4  ;;  %1835 = vmatpush1.msra.mxu1 %v266_v4  ;;  %v281_v22 = vld [vmem:[%s4864_s1 + $0xd8] sm:$0xff]  ;;  %v280_v23 = vld [vmem:[%s4864_s1 + $0xd0] sm:$0xff]  ;;  %v279_v24 = vld [vmem:[%s4864_s1 + $0xc8] sm:$0xff] }
   0x9   :  { %301 = vmatprep.subr.mxu0 %v1868_v0  ;;  %1804 = vmatprep.subr.mxu1 %v1868_v0  ;;  %v278_v25 = vld [vmem:[%s4864_s1 + $0xc0] sm:$0xff]  ;;  %v277_v26 = vld [vmem:[%s4864_s1 + $0xb8] sm:$0xff]  ;;  %v276_v27 = vld [vmem:[%s4864_s1 + $0xb0] sm:$0xff] }
   0xa   :  { %302 = vmatpush1.msra.mxu0 %v265_v5  ;;  %1836 = vmatpush1.msra.mxu1 %v265_v5  ;;  %v275_v28 = vld [vmem:[%s4864_s1 + $0xa8] sm:$0xff]  ;;  %v274_v29 = vld [vmem:[%s4864_s1 + $0xa0] sm:$0xff]  ;;  %v273_v30 = vld [vmem:[%s4864_s1 + $0x98] sm:$0xff] }
   0xb   :  { %303 = vmatprep.subr.mxu0 %v1868_v0  ;;  %1805 = vmatprep.subr.mxu1 %v1868_v0  ;;  %v272_v31 = vld [vmem:[%s4864_s1 + $0x90] sm:$0xff]  ;;  %v271_v32 = vld [vmem:[%s4864_s1 + $0x88] sm:$0xff]  ;;  %v270_v33 = vld [vmem:[%s4864_s1 + $0x80] sm:$0xff] }
   0xc   :  { %304 = vmatpush1.msra.mxu0 %v264_v6  ;;  %357 = vmatprep.mubr.f32.mxu0 %v21_v8  ;;  %v20_v34 = vld [vmem:[%s4865_s0] sm:$0xff]  ;;  %v23_v35 = vld [vmem:[%s4865_s0 + $0x18] sm:$0xff]  ;;  %v138_v37 = vld [vmem:[%s4865_s0 + $0x3b0] sm:$0xff] }
   0xd   :  { %305 = vmatprep.subr.mxu0 %v1868_v0  ;;  %1837 = vmatpush1.msra.mxu1 %v264_v6  ;;  %v139_v36 = vld [vmem:[%s4865_s0 + $0x3b8] sm:$0xff]  ;;  %v141_v38 = vld [vmem:[%s4865_s0 + $0x3c8] sm:$0xff]  ;;  %v22_v39 = vld [vmem:[%s4865_s0 + $0x10] sm:$0xff] }
   0xe   :  { %306 = vmatpush1.msra.mxu0 %v263_v7  ;;  %1806 = vmatprep.subr.mxu1 %v1868_v0  ;;  %v25_v40 = vld [vmem:[%s4865_s0 + $0x28] sm:$0xff]  ;;  %v140_v41 = vld [vmem:[%s4865_s0 + $0x3c0] sm:$0xff]  ;;  %v143_v42 = vld [vmem:[%s4865_s0 + $0x3d8] sm:$0xff] }
   0xf   :  { %307 = vmatprep.subr.mxu0 %v1868_v0  ;;  %1838 = vmatpush1.msra.mxu1 %v263_v7  ;;  %v24_v43 = vld [vmem:[%s4865_s0 + $0x20] sm:$0xff]  ;;  %v27_v44 = vld [vmem:[%s4865_s0 + $0x38] sm:$0xff]  ;;  %v142_v45 = vld [vmem:[%s4865_s0 + $0x3d0] sm:$0xff] }
  0x10   :  { %308 = vmatpush1.msra.mxu0 %v262_v9  ;;  %1807 = vmatprep.subr.mxu1 %v1868_v0  ;;  %v145_v46 = vld [vmem:[%s4865_s0 + $0x3e8] sm:$0xff]  ;;  %v26_v47 = vld [vmem:[%s4865_s0 + $0x30] sm:$0xff]  ;;  %v144_v49 = vld [vmem:[%s4865_s0 + $0x3e0] sm:$0xff] }
  0x11   :  { %309 = vmatprep.subr.mxu0 %v1868_v0  ;;  %1839 = vmatpush1.msra.mxu1 %v262_v9  ;;  %v29_v48 = vld [vmem:[%s4865_s0 + $0x48] sm:$0xff]  ;;  %v147_v50 = vld [vmem:[%s4865_s0 + $0x3f8] sm:$0xff]  ;;  %v28_v51 = vld [vmem:[%s4865_s0 + $0x40] sm:$0xff] }
  0x12   :  { %310 = vmatpush1.msra.mxu0 %v261_v10  ;;  %1808 = vmatprep.subr.mxu1 %v1868_v0  ;;  %v31_v52 = vld [vmem:[%s4865_s0 + $0x58] sm:$0xff]  ;;  %v146_v53 = vld [vmem:[%s4865_s0 + $0x3f0] sm:$0xff]  ;;  %v149_v54 = vld [vmem:[%s4865_s0 + $0x408] sm:$0xff] }
  0x13   :  { %311 = vmatprep.subr.mxu0 %v1868_v0  ;;  %1840 = vmatpush1.msra.mxu1 %v261_v10  ;;  %v30_v55 = vld [vmem:[%s4865_s0 + $0x50] sm:$0xff]  ;;  %v33_v56 = vld [vmem:[%s4865_s0 + $0x68] sm:$0xff]  ;;  %v148_v57 = vld [vmem:[%s4865_s0 + $0x400] sm:$0xff] }
  0x14   :  { %312 = vmatpush1.msra.mxu0 %v260_v11  ;;  %1809 = vmatprep.subr.mxu1 %v1868_v0  ;;  %v151_v58 = vld [vmem:[%s4865_s0 + $0x418] sm:$0xff]  ;;  %v32_v59 = vld [vmem:[%s4865_s0 + $0x60] sm:$0xff]  ;;  %v150_v61 = vld [vmem:[%s4865_s0 + $0x410] sm:$0xff] }
  0x15   :  { %313 = vmatprep.subr.mxu0 %v1868_v0  ;;  %1841 = vmatpush1.msra.mxu1 %v260_v11  ;;  %v35_v60 = vld [vmem:[%s4865_s0 + $0x78] sm:$0xff]  ;;  %v153_v62 = vld [vmem:[%s4865_s0 + $0x428] sm:$0xff]  ;;  %v34_v63 = vld [vmem:[%s4865_s0 + $0x70] sm:$0xff] }
  0x16   :  { %314 = vmatpush1.msra.mxu0 %v259_v12  ;;  %1810 = vmatprep.subr.mxu1 %v1868_v0  ;;  %v152_v1 = vld [vmem:[%s4865_s0 + $0x420] sm:$0xff]  ;;  %v155_v2 = vld [vmem:[%s4865_s0 + $0x438] sm:$0xff]  ;;  %v154_v5 = vld [vmem:[%s4865_s0 + $0x430] sm:$0xff] }
  0x17   :  { %315 = vmatprep.subr.mxu0 %v1868_v0  ;;  %1842 = vmatpush1.msra.mxu1 %v259_v12  ;;  %v36_v3 = vld [vmem:[%s4865_s0 + $0x80] sm:$0xff]  ;;  %v39_v4 = vld [vmem:[%s4865_s0 + $0x98] sm:$0xff]  ;;  %v157_v6 = vld [vmem:[%s4865_s0 + $0x448] sm:$0xff] }
  0x18   :  { %316 = vmatpush1.msra.mxu0 %v258_v13  ;;  %1811 = vmatprep.subr.mxu1 %v1868_v0  ;;  %v38_v7 = vld [vmem:[%s4865_s0 + $0x90] sm:$0xff]  ;;  %v41_v8 = vld [vmem:[%s4865_s0 + $0xa8] sm:$0xff]  ;;  %v156_v9 = vld [vmem:[%s4865_s0 + $0x440] sm:$0xff] }
  0x19   :  { %317 = vmatprep.subr.mxu0 %v1868_v0  ;;  %1843 = vmatpush1.msra.mxu1 %v258_v13  ;;  %v159_v10 = vld [vmem:[%s4865_s0 + $0x458] sm:$0xff]  ;;  %v40_v11 = vld [vmem:[%s4865_s0 + $0xa0] sm:$0xff]  ;;  %v158_v13 = vld [vmem:[%s4865_s0 + $0x450] sm:$0xff] }
  0x1a   :  { %318 = vmatpush1.msra.mxu0 %v257_v14  ;;  %1812 = vmatprep.subr.mxu1 %v1868_v0  ;;  %v43_v12 = vld [vmem:[%s4865_s0 + $0xb8] sm:$0xff] }
  0x1b   :  { %319 = vmatprep.subr.mxu0 %v1868_v0  ;;  %1844 = vmatpush1.msra.mxu1 %v257_v14  ;;  %v161_v14 = vld [vmem:[%s4865_s0 + $0x468] sm:$0xff] }
  0x1c   :  { %320 = vmatpush1.msra.mxu0 %v256_v15  ;;  %1813 = vmatprep.subr.mxu1 %v1868_v0 }
  0x1d   :  { %321 = vmatprep.subr.mxu0 %v1868_v0  ;;  %1845 = vmatpush1.msra.mxu1 %v256_v15  ;;  %v42_v15 = vld [vmem:[%s4865_s0 + $0xb0] sm:$0xff] }
  0x1e   :  { %322 = vmatpush1.msra.mxu0 %v255_v16  ;;  %1814 = vmatprep.subr.mxu1 %v1868_v0 }
  0x1f   :  { %323 = vmatprep.subr.mxu0 %v1868_v0  ;;  %1846 = vmatpush1.msra.mxu1 %v255_v16  ;;  %v45_v16 = vld [vmem:[%s4865_s0 + $0xc8] sm:$0xff] }
  0x20   :  { %324 = vmatpush1.msra.mxu0 %v254_v17  ;;  %1815 = vmatprep.subr.mxu1 %v1868_v0 }
  0x21   :  { %325 = vmatprep.subr.mxu0 %v1868_v0  ;;  %1847 = vmatpush1.msra.mxu1 %v254_v17  ;;  %v160_v17 = vld [vmem:[%s4865_s0 + $0x460] sm:$0xff] }
  0x22   :  { %326 = vmatpush2.msra.mxu0 %v285_v18  ;;  %1816 = vmatprep.subr.mxu1 %v1868_v0 }
  0x23   :  { %327 = vmatprep.subr.mxu0 %v1868_v0  ;;  %1848 = vmatpush2.msra.mxu1 %v285_v18  ;;  %v163_v18 = vld [vmem:[%s4865_s0 + $0x478] sm:$0xff] }
  0x24   :  { %328 = vmatpush2.msra.mxu0 %v284_v19  ;;  %1817 = vmatprep.subr.mxu1 %v1868_v0 }
  0x25   :  { %329 = vmatprep.subr.mxu0 %v1868_v0  ;;  %1849 = vmatpush2.msra.mxu1 %v284_v19  ;;  %v44_v19 = vld [vmem:[%s4865_s0 + $0xc0] sm:$0xff] }
  0x26   :  { %330 = vmatpush2.msra.mxu0 %v283_v20  ;;  %1818 = vmatprep.subr.mxu1 %v1868_v0 }
  0x27   :  { %331 = vmatprep.subr.mxu0 %v1868_v0  ;;  %1850 = vmatpush2.msra.mxu1 %v283_v20  ;;  %v47_v20 = vld [vmem:[%s4865_s0 + $0xd8] sm:$0xff] }
  0x28   :  { %332 = vmatpush2.msra.mxu0 %v282_v21  ;;  %1819 = vmatprep.subr.mxu1 %v1868_v0 }
  0x29   :  { %333 = vmatprep.subr.mxu0 %v1868_v0  ;;  %1851 = vmatpush2.msra.mxu1 %v282_v21  ;;  %v162_v21 = vld [vmem:[%s4865_s0 + $0x470] sm:$0xff] }
  0x2a   :  { %334 = vmatpush2.msra.mxu0 %v281_v22  ;;  %1820 = vmatprep.subr.mxu1 %v1868_v0 }
  0x2b   :  { %335 = vmatprep.subr.mxu0 %v1868_v0  ;;  %1852 = vmatpush2.msra.mxu1 %v281_v22  ;;  %v165_v22 = vld [vmem:[%s4865_s0 + $0x488] sm:$0xff] }
  0x2c   :  { %336 = vmatpush2.msra.mxu0 %v280_v23  ;;  %1821 = vmatprep.subr.mxu1 %v1868_v0 }
  0x2d   :  { %337 = vmatprep.subr.mxu0 %v1868_v0  ;;  %1853 = vmatpush2.msra.mxu1 %v280_v23  ;;  %v46_v23 = vld [vmem:[%s4865_s0 + $0xd0] sm:$0xff] }
  0x2e   :  { %338 = vmatpush2.msra.mxu0 %v279_v24  ;;  %1822 = vmatprep.subr.mxu1 %v1868_v0 }
  0x2f   :  { %339 = vmatprep.subr.mxu0 %v1868_v0  ;;  %1854 = vmatpush2.msra.mxu1 %v279_v24  ;;  %v49_v24 = vld [vmem:[%s4865_s0 + $0xe8] sm:$0xff] }
  0x30   :  { %340 = vmatpush2.msra.mxu0 %v278_v25  ;;  %1823 = vmatprep.subr.mxu1 %v1868_v0 }
  0x31   :  { %341 = vmatprep.subr.mxu0 %v1868_v0  ;;  %1855 = vmatpush2.msra.mxu1 %v278_v25  ;;  %v164_v25 = vld [vmem:[%s4865_s0 + $0x480] sm:$0xff] }
  0x32   :  { %342 = vmatpush2.msra.mxu0 %v277_v26  ;;  %1824 = vmatprep.subr.mxu1 %v1868_v0 }
  0x33   :  { %343 = vmatprep.subr.mxu0 %v1868_v0  ;;  %1856 = vmatpush2.msra.mxu1 %v277_v26  ;;  %v167_v26 = vld [vmem:[%s4865_s0 + $0x498] sm:$0xff] }
  0x34   :  { %344 = vmatpush2.msra.mxu0 %v276_v27  ;;  %1825 = vmatprep.subr.mxu1 %v1868_v0 }
  0x35   :  { %345 = vmatprep.subr.mxu0 %v1868_v0  ;;  %1857 = vmatpush2.msra.mxu1 %v276_v27  ;;  %v48_v27 = vld [vmem:[%s4865_s0 + $0xe0] sm:$0xff] }
  0x36   :  { %346 = vmatpush2.msra.mxu0 %v275_v28  ;;  %1826 = vmatprep.subr.mxu1 %v1868_v0 }
  0x37   :  { %347 = vmatprep.subr.mxu0 %v1868_v0  ;;  %1858 = vmatpush2.msra.mxu1 %v275_v28  ;;  %v51_v28 = vld [vmem:[%s4865_s0 + $0xf8] sm:$0xff] }
  0x38   :  { %348 = vmatpush2.msra.mxu0 %v274_v29  ;;  %1827 = vmatprep.subr.mxu1 %v1868_v0 }
  0x39   :  { %349 = vmatprep.subr.mxu0 %v1868_v0  ;;  %1859 = vmatpush2.msra.mxu1 %v274_v29  ;;  %v166_v29 = vld [vmem:[%s4865_s0 + $0x490] sm:$0xff] }
  0x3a   :  { %350 = vmatpush2.msra.mxu0 %v273_v30  ;;  %1828 = vmatprep.subr.mxu1 %v1868_v0 }
  0x3b   :  { %351 = vmatprep.subr.mxu0 %v1868_v0  ;;  %1860 = vmatpush2.msra.mxu1 %v273_v30  ;;  %v169_v30 = vld [vmem:[%s4865_s0 + $0x4a8] sm:$0xff] }
  0x3c   :  { %352 = vmatpush2.msra.mxu0 %v272_v31  ;;  %1829 = vmatprep.subr.mxu1 %v1868_v0 }
  0x3d   :  { %353 = vmatprep.subr.mxu0 %v1868_v0  ;;  %1861 = vmatpush2.msra.mxu1 %v272_v31  ;;  %v50_v31 = vld [vmem:[%s4865_s0 + $0xf0] sm:$0xff] }
  0x3e   :  { %354 = vmatpush2.msra.mxu0 %v271_v32  ;;  %1830 = vmatprep.subr.mxu1 %v1868_v0 }
  0x3f   :  { %355 = vmatprep.subr.mxu0 %v1868_v0  ;;  %1862 = vmatpush2.msra.mxu1 %v271_v32  ;;  %v53_v32 = vld [vmem:[%s4865_s0 + $0x108] sm:$0xff] }
  0x40   :  { %356 = vmatpush2.msra.mxu0 %v270_v33  ;;  %1831 = vmatprep.subr.mxu1 %v1868_v0  ;;  %v37_v0 = vld [vmem:[%s4865_s0 + $0x88] sm:$0xff] }
  0x41   :  { %358 = vmatmul.mubr.f32.vlgmr.msra.gmra.mxu0 %v20_v34  ;;  %1863 = vmatpush2.msra.mxu1 %v270_v33  ;;  %v168_v33 = vld [vmem:[%s4865_s0 + $0x4a0] sm:$0xff]  ;;  %v171_v34 = vld [vmem:[%s4865_s0 + $0x4b8] sm:$0xff] }
  0x42   :  { %362 = vmatprep.mubr.f32.mxu0 %v23_v35  ;;  %652 = vmatprep.mubr.f32.mxu1 %v139_v36  ;;  %v52_v35 = vld [vmem:[%s4865_s0 + $0x100] sm:$0xff]  ;;  %v55_v36 = vld [vmem:[%s4865_s0 + $0x118] sm:$0xff] }
  0x43   :  { %653 = vmatmul.mubr.f32.vlgmr.msra.gmra.mxu1 %v138_v37  ;;  %v170_v37 = vld [vmem:[%s4865_s0 + $0x4b0] sm:$0xff] }
  0x44   :  { %657 = vmatprep.mubr.f32.mxu1 %v141_v38  ;;  %v173_v38 = vld [vmem:[%s4865_s0 + $0x4c8] sm:$0xff] }
  0x45   :  { %363 = vmatmul.mubr.f32.gmra.mxu0 %v22_v39  ;;  %v54_v39 = vld [vmem:[%s4865_s0 + $0x110] sm:$0xff] }
  0x46   :  { %367 = vmatprep.mubr.f32.mxu0 %v25_v40  ;;  %v57_v40 = vld [vmem:[%s4865_s0 + $0x128] sm:$0xff] }
  0x47   :  { %658 = vmatmul.mubr.f32.gmra.mxu1 %v140_v41  ;;  %v172_v41 = vld [vmem:[%s4865_s0 + $0x4c0] sm:$0xff] }
  0x48   :  { %662 = vmatprep.mubr.f32.mxu1 %v143_v42  ;;  %v175_v42 = vld [vmem:[%s4865_s0 + $0x4d8] sm:$0xff] }
  0x49   :  { %368 = vmatmul.mubr.f32.gmra.mxu0 %v24_v43  ;;  %v56_v43 = vld [vmem:[%s4865_s0 + $0x120] sm:$0xff] }
  0x4a   :  { %372 = vmatprep.mubr.f32.mxu0 %v27_v44  ;;  %v59_v44 = vld [vmem:[%s4865_s0 + $0x138] sm:$0xff] }
  0x4b   :  { %663 = vmatmul.mubr.f32.gmra.mxu1 %v142_v45  ;;  %v174_v45 = vld [vmem:[%s4865_s0 + $0x4d0] sm:$0xff] }
  0x4c   :  { %667 = vmatprep.mubr.f32.mxu1 %v145_v46  ;;  %v177_v46 = vld [vmem:[%s4865_s0 + $0x4e8] sm:$0xff] }
  0x4d   :  { %373 = vmatmul.mubr.f32.gmra.mxu0 %v26_v47  ;;  %v58_v47 = vld [vmem:[%s4865_s0 + $0x130] sm:$0xff] }
  0x4e   :  { %377 = vmatprep.mubr.f32.mxu0 %v29_v48  ;;  %v61_v48 = vld [vmem:[%s4865_s0 + $0x148] sm:$0xff] }
  0x4f   :  { %668 = vmatmul.mubr.f32.gmra.mxu1 %v144_v49  ;;  %v176_v49 = vld [vmem:[%s4865_s0 + $0x4e0] sm:$0xff] }
  0x50   :  { %672 = vmatprep.mubr.f32.mxu1 %v147_v50  ;;  %v179_v50 = vld [vmem:[%s4865_s0 + $0x4f8] sm:$0xff] }
  0x51   :  { %378 = vmatmul.mubr.f32.gmra.mxu0 %v28_v51  ;;  %v60_v51 = vld [vmem:[%s4865_s0 + $0x140] sm:$0xff] }
  0x52   :  { %382 = vmatprep.mubr.f32.mxu0 %v31_v52  ;;  %v63_v52 = vld [vmem:[%s4865_s0 + $0x158] sm:$0xff] }
  0x53   :  { %673 = vmatmul.mubr.f32.gmra.mxu1 %v146_v53  ;;  %v178_v53 = vld [vmem:[%s4865_s0 + $0x4f0] sm:$0xff] }
  0x54   :  { %677 = vmatprep.mubr.f32.mxu1 %v149_v54  ;;  %v181_v54 = vld [vmem:[%s4865_s0 + $0x508] sm:$0xff] }
  0x55   :  { %383 = vmatmul.mubr.f32.gmra.mxu0 %v30_v55  ;;  %v62_v55 = vld [vmem:[%s4865_s0 + $0x150] sm:$0xff] }
  0x56   :  { %387 = vmatprep.mubr.f32.mxu0 %v33_v56  ;;  %v65_v56 = vld [vmem:[%s4865_s0 + $0x168] sm:$0xff] }
  0x57   :  { %678 = vmatmul.mubr.f32.gmra.mxu1 %v148_v57  ;;  %v180_v57 = vld [vmem:[%s4865_s0 + $0x500] sm:$0xff] }
  0x58   :  { %682 = vmatprep.mubr.f32.mxu1 %v151_v58  ;;  %v183_v58 = vld [vmem:[%s4865_s0 + $0x518] sm:$0xff] }
  0x59   :  { %388 = vmatmul.mubr.f32.gmra.mxu0 %v32_v59  ;;  %v64_v59 = vld [vmem:[%s4865_s0 + $0x160] sm:$0xff] }
  0x5a   :  { %392 = vmatprep.mubr.f32.mxu0 %v35_v60  ;;  %v67_v60 = vld [vmem:[%s4865_s0 + $0x178] sm:$0xff] }
  0x5b   :  { %683 = vmatmul.mubr.f32.gmra.mxu1 %v150_v61  ;;  %v182_v61 = vld [vmem:[%s4865_s0 + $0x510] sm:$0xff] }
  0x5c   :  { %687 = vmatprep.mubr.f32.mxu1 %v153_v62  ;;  %v185_v62 = vld [vmem:[%s4865_s0 + $0x528] sm:$0xff] }
  0x5d   :  { %393 = vmatmul.mubr.f32.gmra.mxu0 %v34_v63  ;;  %v66_v63 = vld [vmem:[%s4865_s0 + $0x170] sm:$0xff] }
  0x5e   :  { %397 = vmatprep.mubr.f32.mxu0 %v37_v0  ;;  %v69_v0 = vld [vmem:[%s4865_s0 + $0x188] sm:$0xff] }
  0x5f   :  { %688 = vmatmul.mubr.f32.gmra.mxu1 %v152_v1  ;;  %v184_v1 = vld [vmem:[%s4865_s0 + $0x520] sm:$0xff] }
  0x60   :  { %692 = vmatprep.mubr.f32.mxu1 %v155_v2  ;;  %v187_v2 = vld [vmem:[%s4865_s0 + $0x538] sm:$0xff] }
  0x61   :  { %398 = vmatmul.mubr.f32.gmra.mxu0 %v36_v3  ;;  %v68_v3 = vld [vmem:[%s4865_s0 + $0x180] sm:$0xff] }
  0x62   :  { %402 = vmatprep.mubr.f32.mxu0 %v39_v4  ;;  %v71_v4 = vld [vmem:[%s4865_s0 + $0x198] sm:$0xff] }
  0x63   :  { %693 = vmatmul.mubr.f32.gmra.mxu1 %v154_v5  ;;  %v186_v5 = vld [vmem:[%s4865_s0 + $0x530] sm:$0xff] }
  0x64   :  { %697 = vmatprep.mubr.f32.mxu1 %v157_v6  ;;  %v189_v6 = vld [vmem:[%s4865_s0 + $0x548] sm:$0xff] }
  0x65   :  { %403 = vmatmul.mubr.f32.gmra.mxu0 %v38_v7  ;;  %v70_v7 = vld [vmem:[%s4865_s0 + $0x190] sm:$0xff] }
  0x66   :  { %407 = vmatprep.mubr.f32.mxu0 %v41_v8  ;;  %v73_v8 = vld [vmem:[%s4865_s0 + $0x1a8] sm:$0xff] }
  0x67   :  { %698 = vmatmul.mubr.f32.gmra.mxu1 %v156_v9  ;;  %v188_v9 = vld [vmem:[%s4865_s0 + $0x540] sm:$0xff] }
  0x68   :  { %702 = vmatprep.mubr.f32.mxu1 %v159_v10  ;;  %v191_v10 = vld [vmem:[%s4865_s0 + $0x558] sm:$0xff] }
  0x69   :  { %408 = vmatmul.mubr.f32.gmra.mxu0 %v40_v11  ;;  %v72_v11 = vld [vmem:[%s4865_s0 + $0x1a0] sm:$0xff] }
  0x6a   :  { %412 = vmatprep.mubr.f32.mxu0 %v43_v12  ;;  %v75_v12 = vld [vmem:[%s4865_s0 + $0x1b8] sm:$0xff] }
  0x6b   :  { %703 = vmatmul.mubr.f32.gmra.mxu1 %v158_v13  ;;  %v190_v13 = vld [vmem:[%s4865_s0 + $0x550] sm:$0xff] }
  0x6c   :  { %707 = vmatprep.mubr.f32.mxu1 %v161_v14  ;;  %v193_v14 = vld [vmem:[%s4865_s0 + $0x568] sm:$0xff] }
  0x6d   :  { %413 = vmatmul.mubr.f32.gmra.mxu0 %v42_v15  ;;  %v74_v15 = vld [vmem:[%s4865_s0 + $0x1b0] sm:$0xff] }
  0x6e   :  { %417 = vmatprep.mubr.f32.mxu0 %v45_v16  ;;  %v77_v16 = vld [vmem:[%s4865_s0 + $0x1c8] sm:$0xff] }
  0x6f   :  { %708 = vmatmul.mubr.f32.gmra.mxu1 %v160_v17  ;;  %v192_v17 = vld [vmem:[%s4865_s0 + $0x560] sm:$0xff] }
  0x70   :  { %712 = vmatprep.mubr.f32.mxu1 %v163_v18  ;;  %v195_v18 = vld [vmem:[%s4865_s0 + $0x578] sm:$0xff] }
  0x71   :  { %418 = vmatmul.mubr.f32.gmra.mxu0 %v44_v19  ;;  %v76_v19 = vld [vmem:[%s4865_s0 + $0x1c0] sm:$0xff] }
  0x72   :  { %422 = vmatprep.mubr.f32.mxu0 %v47_v20  ;;  %v79_v20 = vld [vmem:[%s4865_s0 + $0x1d8] sm:$0xff] }
  0x73   :  { %713 = vmatmul.mubr.f32.gmra.mxu1 %v162_v21  ;;  %v194_v21 = vld [vmem:[%s4865_s0 + $0x570] sm:$0xff] }
  0x74   :  { %717 = vmatprep.mubr.f32.mxu1 %v165_v22  ;;  %v197_v22 = vld [vmem:[%s4865_s0 + $0x588] sm:$0xff] }
  0x75   :  { %423 = vmatmul.mubr.f32.gmra.mxu0 %v46_v23  ;;  %v78_v23 = vld [vmem:[%s4865_s0 + $0x1d0] sm:$0xff] }
  0x76   :  { %427 = vmatprep.mubr.f32.mxu0 %v49_v24  ;;  %v81_v24 = vld [vmem:[%s4865_s0 + $0x1e8] sm:$0xff] }
  0x77   :  { %718 = vmatmul.mubr.f32.gmra.mxu1 %v164_v25  ;;  %v196_v25 = vld [vmem:[%s4865_s0 + $0x580] sm:$0xff] }
  0x78   :  { %722 = vmatprep.mubr.f32.mxu1 %v167_v26  ;;  %v199_v26 = vld [vmem:[%s4865_s0 + $0x598] sm:$0xff] }
  0x79   :  { %428 = vmatmul.mubr.f32.gmra.mxu0 %v48_v27  ;;  %v80_v27 = vld [vmem:[%s4865_s0 + $0x1e0] sm:$0xff] }
  0x7a   :  { %432 = vmatprep.mubr.f32.mxu0 %v51_v28  ;;  %v83_v28 = vld [vmem:[%s4865_s0 + $0x1f8] sm:$0xff] }
  0x7b   :  { %723 = vmatmul.mubr.f32.gmra.mxu1 %v166_v29  ;;  %v198_v29 = vld [vmem:[%s4865_s0 + $0x590] sm:$0xff] }
  0x7c   :  { %727 = vmatprep.mubr.f32.mxu1 %v169_v30  ;;  %v201_v30 = vld [vmem:[%s4865_s0 + $0x5a8] sm:$0xff] }
  0x7d   :  { %433 = vmatmul.mubr.f32.gmra.mxu0 %v50_v31  ;;  %v82_v31 = vld [vmem:[%s4865_s0 + $0x1f0] sm:$0xff] }
  0x7e   :  { %437 = vmatprep.mubr.f32.mxu0 %v53_v32  ;;  %v85_v32 = vld [vmem:[%s4865_s0 + $0x208] sm:$0xff] }
  0x7f   :  { %728 = vmatmul.mubr.f32.gmra.mxu1 %v168_v33  ;;  %v200_v33 = vld [vmem:[%s4865_s0 + $0x5a0] sm:$0xff] }
  0x80   :  { %732 = vmatprep.mubr.f32.mxu1 %v171_v34  ;;  %v203_v34 = vld [vmem:[%s4865_s0 + $0x5b8] sm:$0xff] }
  0x81   :  { %438 = vmatmul.mubr.f32.gmra.mxu0 %v52_v35  ;;  %v84_v35 = vld [vmem:[%s4865_s0 + $0x200] sm:$0xff] }
  0x82   :  { %442 = vmatprep.mubr.f32.mxu0 %v55_v36  ;;  %v87_v36 = vld [vmem:[%s4865_s0 + $0x218] sm:$0xff] }
  0x83   :  { %733 = vmatmul.mubr.f32.gmra.mxu1 %v170_v37  ;;  %v202_v37 = vld [vmem:[%s4865_s0 + $0x5b0] sm:$0xff] }
  0x84   :  { %737 = vmatprep.mubr.f32.mxu1 %v173_v38  ;;  %v205_v38 = vld [vmem:[%s4865_s0 + $0x5c8] sm:$0xff] }
  0x85   :  { %443 = vmatmul.mubr.f32.gmra.mxu0 %v54_v39  ;;  %v86_v39 = vld [vmem:[%s4865_s0 + $0x210] sm:$0xff] }
  0x86   :  { %447 = vmatprep.mubr.f32.mxu0 %v57_v40  ;;  %v89_v40 = vld [vmem:[%s4865_s0 + $0x228] sm:$0xff] }
  0x87   :  { %738 = vmatmul.mubr.f32.gmra.mxu1 %v172_v41  ;;  %v204_v41 = vld [vmem:[%s4865_s0 + $0x5c0] sm:$0xff] }
  0x88   :  { %742 = vmatprep.mubr.f32.mxu1 %v175_v42  ;;  %v207_v42 = vld [vmem:[%s4865_s0 + $0x5d8] sm:$0xff] }
  0x89   :  { %448 = vmatmul.mubr.f32.gmra.mxu0 %v56_v43  ;;  %v88_v43 = vld [vmem:[%s4865_s0 + $0x220] sm:$0xff] }
  0x8a   :  { %452 = vmatprep.mubr.f32.mxu0 %v59_v44  ;;  %v91_v44 = vld [vmem:[%s4865_s0 + $0x238] sm:$0xff] }
  0x8b   :  { %743 = vmatmul.mubr.f32.gmra.mxu1 %v174_v45  ;;  %v206_v45 = vld [vmem:[%s4865_s0 + $0x5d0] sm:$0xff] }
  0x8c   :  { %747 = vmatprep.mubr.f32.mxu1 %v177_v46  ;;  %v209_v46 = vld [vmem:[%s4865_s0 + $0x5e8] sm:$0xff] }
  0x8d   :  { %453 = vmatmul.mubr.f32.gmra.mxu0 %v58_v47  ;;  %v90_v47 = vld [vmem:[%s4865_s0 + $0x230] sm:$0xff] }
  0x8e   :  { %457 = vmatprep.mubr.f32.mxu0 %v61_v48  ;;  %v93_v48 = vld [vmem:[%s4865_s0 + $0x248] sm:$0xff] }
  0x8f   :  { %748 = vmatmul.mubr.f32.gmra.mxu1 %v176_v49  ;;  %v208_v49 = vld [vmem:[%s4865_s0 + $0x5e0] sm:$0xff] }
  0x90   :  { %752 = vmatprep.mubr.f32.mxu1 %v179_v50  ;;  %v211_v50 = vld [vmem:[%s4865_s0 + $0x5f8] sm:$0xff] }
  0x91   :  { %458 = vmatmul.mubr.f32.gmra.mxu0 %v60_v51  ;;  %v92_v51 = vld [vmem:[%s4865_s0 + $0x240] sm:$0xff] }
  0x92   :  { %462 = vmatprep.mubr.f32.mxu0 %v63_v52  ;;  %v95_v52 = vld [vmem:[%s4865_s0 + $0x258] sm:$0xff] }
  0x93   :  { %753 = vmatmul.mubr.f32.gmra.mxu1 %v178_v53  ;;  %v210_v53 = vld [vmem:[%s4865_s0 + $0x5f0] sm:$0xff] }
  0x94   :  { %757 = vmatprep.mubr.f32.mxu1 %v181_v54  ;;  %v213_v54 = vld [vmem:[%s4865_s0 + $0x608] sm:$0xff] }
  0x95   :  { %463 = vmatmul.mubr.f32.gmra.mxu0 %v62_v55  ;;  %v94_v55 = vld [vmem:[%s4865_s0 + $0x250] sm:$0xff] }
  0x96   :  { %467 = vmatprep.mubr.f32.mxu0 %v65_v56  ;;  %v97_v56 = vld [vmem:[%s4865_s0 + $0x268] sm:$0xff] }
  0x97   :  { %758 = vmatmul.mubr.f32.gmra.mxu1 %v180_v57  ;;  %v212_v57 = vld [vmem:[%s4865_s0 + $0x600] sm:$0xff] }
  0x98   :  { %762 = vmatprep.mubr.f32.mxu1 %v183_v58  ;;  %v215_v58 = vld [vmem:[%s4865_s0 + $0x618] sm:$0xff] }
  0x99   :  { %468 = vmatmul.mubr.f32.gmra.mxu0 %v64_v59  ;;  %v96_v59 = vld [vmem:[%s4865_s0 + $0x260] sm:$0xff] }
  0x9a   :  { %472 = vmatprep.mubr.f32.mxu0 %v67_v60  ;;  %v99_v60 = vld [vmem:[%s4865_s0 + $0x278] sm:$0xff] }
  0x9b   :  { %763 = vmatmul.mubr.f32.gmra.mxu1 %v182_v61  ;;  %v214_v61 = vld [vmem:[%s4865_s0 + $0x610] sm:$0xff] }
  0x9c   :  { %767 = vmatprep.mubr.f32.mxu1 %v185_v62  ;;  %v217_v62 = vld [vmem:[%s4865_s0 + $0x628] sm:$0xff] }
  0x9d   :  { %473 = vmatmul.mubr.f32.gmra.mxu0 %v66_v63  ;;  %v98_v63 = vld [vmem:[%s4865_s0 + $0x270] sm:$0xff] }
  0x9e   :  { %477 = vmatprep.mubr.f32.mxu0 %v69_v0  ;;  %v101_v0 = vld [vmem:[%s4865_s0 + $0x288] sm:$0xff] }
  0x9f   :  { %768 = vmatmul.mubr.f32.gmra.mxu1 %v184_v1  ;;  %v216_v1 = vld [vmem:[%s4865_s0 + $0x620] sm:$0xff] }
  0xa0   :  { %772 = vmatprep.mubr.f32.mxu1 %v187_v2  ;;  %v219_v2 = vld [vmem:[%s4865_s0 + $0x638] sm:$0xff] }
  0xa1   :  { %478 = vmatmul.mubr.f32.gmra.mxu0 %v68_v3  ;;  %v100_v3 = vld [vmem:[%s4865_s0 + $0x280] sm:$0xff] }
  0xa2   :  { %482 = vmatprep.mubr.f32.mxu0 %v71_v4  ;;  %v103_v4 = vld [vmem:[%s4865_s0 + $0x298] sm:$0xff] }
  0xa3   :  { %773 = vmatmul.mubr.f32.gmra.mxu1 %v186_v5  ;;  %v218_v5 = vld [vmem:[%s4865_s0 + $0x630] sm:$0xff] }
  0xa4   :  { %777 = vmatprep.mubr.f32.mxu1 %v189_v6  ;;  %v221_v6 = vld [vmem:[%s4865_s0 + $0x648] sm:$0xff] }
  0xa5   :  { %483 = vmatmul.mubr.f32.gmra.mxu0 %v70_v7  ;;  %v102_v7 = vld [vmem:[%s4865_s0 + $0x290] sm:$0xff] }
  0xa6   :  { %487 = vmatprep.mubr.f32.mxu0 %v73_v8  ;;  %v105_v8 = vld [vmem:[%s4865_s0 + $0x2a8] sm:$0xff] }
  0xa7   :  { %778 = vmatmul.mubr.f32.gmra.mxu1 %v188_v9  ;;  %v220_v9 = vld [vmem:[%s4865_s0 + $0x640] sm:$0xff] }
  0xa8   :  { %782 = vmatprep.mubr.f32.mxu1 %v191_v10  ;;  %v223_v10 = vld [vmem:[%s4865_s0 + $0x658] sm:$0xff] }
  0xa9   :  { %488 = vmatmul.mubr.f32.gmra.mxu0 %v72_v11  ;;  %v104_v11 = vld [vmem:[%s4865_s0 + $0x2a0] sm:$0xff] }
  0xaa   :  { %492 = vmatprep.mubr.f32.mxu0 %v75_v12  ;;  %v107_v12 = vld [vmem:[%s4865_s0 + $0x2b8] sm:$0xff] }
  0xab   :  { %783 = vmatmul.mubr.f32.gmra.mxu1 %v190_v13  ;;  %v222_v13 = vld [vmem:[%s4865_s0 + $0x650] sm:$0xff] }
  0xac   :  { %787 = vmatprep.mubr.f32.mxu1 %v193_v14  ;;  %v225_v14 = vld [vmem:[%s4865_s0 + $0x668] sm:$0xff] }
  0xad   :  { %493 = vmatmul.mubr.f32.gmra.mxu0 %v74_v15  ;;  %v106_v15 = vld [vmem:[%s4865_s0 + $0x2b0] sm:$0xff] }
  0xae   :  { %497 = vmatprep.mubr.f32.mxu0 %v77_v16  ;;  %v109_v16 = vld [vmem:[%s4865_s0 + $0x2c8] sm:$0xff] }
  0xaf   :  { %788 = vmatmul.mubr.f32.gmra.mxu1 %v192_v17  ;;  %v224_v17 = vld [vmem:[%s4865_s0 + $0x660] sm:$0xff] }
  0xb0   :  { %792 = vmatprep.mubr.f32.mxu1 %v195_v18  ;;  %v227_v18 = vld [vmem:[%s4865_s0 + $0x678] sm:$0xff] }
  0xb1   :  { %498 = vmatmul.mubr.f32.gmra.mxu0 %v76_v19  ;;  %v108_v19 = vld [vmem:[%s4865_s0 + $0x2c0] sm:$0xff] }
  0xb2   :  { %502 = vmatprep.mubr.f32.mxu0 %v79_v20  ;;  %v111_v20 = vld [vmem:[%s4865_s0 + $0x2d8] sm:$0xff] }
  0xb3   :  { %793 = vmatmul.mubr.f32.gmra.mxu1 %v194_v21  ;;  %v226_v21 = vld [vmem:[%s4865_s0 + $0x670] sm:$0xff] }
  0xb4   :  { %797 = vmatprep.mubr.f32.mxu1 %v197_v22  ;;  %v229_v22 = vld [vmem:[%s4865_s0 + $0x688] sm:$0xff] }
  0xb5   :  { %503 = vmatmul.mubr.f32.gmra.mxu0 %v78_v23  ;;  %v110_v23 = vld [vmem:[%s4865_s0 + $0x2d0] sm:$0xff] }
  0xb6   :  { %507 = vmatprep.mubr.f32.mxu0 %v81_v24  ;;  %v113_v24 = vld [vmem:[%s4865_s0 + $0x2e8] sm:$0xff] }
  0xb7   :  { %798 = vmatmul.mubr.f32.gmra.mxu1 %v196_v25  ;;  %v228_v25 = vld [vmem:[%s4865_s0 + $0x680] sm:$0xff] }
  0xb8   :  { %802 = vmatprep.mubr.f32.mxu1 %v199_v26  ;;  %v231_v26 = vld [vmem:[%s4865_s0 + $0x698] sm:$0xff] }
  0xb9   :  { %508 = vmatmul.mubr.f32.gmra.mxu0 %v80_v27  ;;  %v112_v27 = vld [vmem:[%s4865_s0 + $0x2e0] sm:$0xff] }
  0xba   :  { %512 = vmatprep.mubr.f32.mxu0 %v83_v28  ;;  %v115_v28 = vld [vmem:[%s4865_s0 + $0x2f8] sm:$0xff] }
  0xbb   :  { %803 = vmatmul.mubr.f32.gmra.mxu1 %v198_v29  ;;  %v230_v29 = vld [vmem:[%s4865_s0 + $0x690] sm:$0xff] }
  0xbc   :  { %807 = vmatprep.mubr.f32.mxu1 %v201_v30  ;;  %v233_v30 = vld [vmem:[%s4865_s0 + $0x6a8] sm:$0xff] }
  0xbd   :  { %513 = vmatmul.mubr.f32.gmra.mxu0 %v82_v31  ;;  %v114_v31 = vld [vmem:[%s4865_s0 + $0x2f0] sm:$0xff] }
  0xbe   :  { %517 = vmatprep.mubr.f32.mxu0 %v85_v32  ;;  %v117_v32 = vld [vmem:[%s4865_s0 + $0x308] sm:$0xff] }
  0xbf   :  { %808 = vmatmul.mubr.f32.gmra.mxu1 %v200_v33  ;;  %v232_v33 = vld [vmem:[%s4865_s0 + $0x6a0] sm:$0xff] }
  0xc0   :  { %812 = vmatprep.mubr.f32.mxu1 %v203_v34  ;;  %v235_v34 = vld [vmem:[%s4865_s0 + $0x6b8] sm:$0xff] }
  0xc1   :  { %518 = vmatmul.mubr.f32.gmra.mxu0 %v84_v35  ;;  %v116_v35 = vld [vmem:[%s4865_s0 + $0x300] sm:$0xff] }
  0xc2   :  { %522 = vmatprep.mubr.f32.mxu0 %v87_v36  ;;  %v119_v36 = vld [vmem:[%s4865_s0 + $0x318] sm:$0xff] }
  0xc3   :  { %813 = vmatmul.mubr.f32.gmra.mxu1 %v202_v37  ;;  %v234_v37 = vld [vmem:[%s4865_s0 + $0x6b0] sm:$0xff] }
  0xc4   :  { %817 = vmatprep.mubr.f32.mxu1 %v205_v38 }
  0xc5   :  { %523 = vmatmul.mubr.f32.gmra.mxu0 %v86_v39  ;;  %v237_v39 = vld [vmem:[%s4865_s0 + $0x6c8] sm:$0xff] }
  0xc6   :  { %527 = vmatprep.mubr.f32.mxu0 %v89_v40  ;;  %v118_v40 = vld [vmem:[%s4865_s0 + $0x310] sm:$0xff] }
  0xc7   :  { %818 = vmatmul.mubr.f32.gmra.mxu1 %v204_v41 }
  0xc8   :  { %822 = vmatprep.mubr.f32.mxu1 %v207_v42  ;;  %v121_v42 = vld [vmem:[%s4865_s0 + $0x328] sm:$0xff] }
  0xc9   :  { %528 = vmatmul.mubr.f32.gmra.mxu0 %v88_v43 }
  0xca   :  { %532 = vmatprep.mubr.f32.mxu0 %v91_v44  ;;  %v236_v44 = vld [vmem:[%s4865_s0 + $0x6c0] sm:$0xff] }
  0xcb   :  { %823 = vmatmul.mubr.f32.gmra.mxu1 %v206_v45 }
  0xcc   :  { %827 = vmatprep.mubr.f32.mxu1 %v209_v46 }
  0xcd   :  { %533 = vmatmul.mubr.f32.gmra.mxu0 %v90_v47  ;;  %v239_v47 = vld [vmem:[%s4865_s0 + $0x6d8] sm:$0xff] }
  0xce   :  { %537 = vmatprep.mubr.f32.mxu0 %v93_v48  ;;  %v120_v48 = vld [vmem:[%s4865_s0 + $0x320] sm:$0xff] }
  0xcf   :  { %828 = vmatmul.mubr.f32.gmra.mxu1 %v208_v49 }
  0xd0   :  { %832 = vmatprep.mubr.f32.mxu1 %v211_v50  ;;  %v123_v50 = vld [vmem:[%s4865_s0 + $0x338] sm:$0xff] }
  0xd1   :  { %538 = vmatmul.mubr.f32.gmra.mxu0 %v92_v51 }
  0xd2   :  { %542 = vmatprep.mubr.f32.mxu0 %v95_v52  ;;  %v238_v52 = vld [vmem:[%s4865_s0 + $0x6d0] sm:$0xff] }
  0xd3   :  { %833 = vmatmul.mubr.f32.gmra.mxu1 %v210_v53 }
  0xd4   :  { %837 = vmatprep.mubr.f32.mxu1 %v213_v54 }
  0xd5   :  { %543 = vmatmul.mubr.f32.gmra.mxu0 %v94_v55  ;;  %v241_v55 = vld [vmem:[%s4865_s0 + $0x6e8] sm:$0xff] }
  0xd6   :  { %547 = vmatprep.mubr.f32.mxu0 %v97_v56  ;;  %v122_v56 = vld [vmem:[%s4865_s0 + $0x330] sm:$0xff] }
  0xd7   :  { %838 = vmatmul.mubr.f32.gmra.mxu1 %v212_v57 }
  0xd8   :  { %842 = vmatprep.mubr.f32.mxu1 %v215_v58  ;;  %v125_v58 = vld [vmem:[%s4865_s0 + $0x348] sm:$0xff] }
  0xd9   :  { %548 = vmatmul.mubr.f32.gmra.mxu0 %v96_v59 }
  0xda   :  { %552 = vmatprep.mubr.f32.mxu0 %v99_v60  ;;  %v240_v60 = vld [vmem:[%s4865_s0 + $0x6e0] sm:$0xff] }
  0xdb   :  { %843 = vmatmul.mubr.f32.gmra.mxu1 %v214_v61 }
  0xdc   :  { %847 = vmatprep.mubr.f32.mxu1 %v217_v62 }
  0xdd   :  { %553 = vmatmul.mubr.f32.gmra.mxu0 %v98_v63  ;;  %v243_v63 = vld [vmem:[%s4865_s0 + $0x6f8] sm:$0xff] }
  0xde   :  { %557 = vmatprep.mubr.f32.mxu0 %v101_v0  ;;  %v124_v0 = vld [vmem:[%s4865_s0 + $0x340] sm:$0xff] }
  0xdf   :  { %848 = vmatmul.mubr.f32.gmra.mxu1 %v216_v1 }
  0xe0   :  { %852 = vmatprep.mubr.f32.mxu1 %v219_v2  ;;  %v127_v2 = vld [vmem:[%s4865_s0 + $0x358] sm:$0xff] }
  0xe1   :  { %558 = vmatmul.mubr.f32.gmra.mxu0 %v100_v3 }
  0xe2   :  { %562 = vmatprep.mubr.f32.mxu0 %v103_v4  ;;  %v242_v4 = vld [vmem:[%s4865_s0 + $0x6f0] sm:$0xff] }
  0xe3   :  { %853 = vmatmul.mubr.f32.gmra.mxu1 %v218_v5 }
  0xe4   :  { %857 = vmatprep.mubr.f32.mxu1 %v221_v6 }
  0xe5   :  { %563 = vmatmul.mubr.f32.gmra.mxu0 %v102_v7  ;;  %v245_v7 = vld [vmem:[%s4865_s0 + $0x708] sm:$0xff] }
  0xe6   :  { %567 = vmatprep.mubr.f32.mxu0 %v105_v8  ;;  %v126_v8 = vld [vmem:[%s4865_s0 + $0x350] sm:$0xff] }
  0xe7   :  { %858 = vmatmul.mubr.f32.gmra.mxu1 %v220_v9 }
  0xe8   :  { %862 = vmatprep.mubr.f32.mxu1 %v223_v10  ;;  %v129_v10 = vld [vmem:[%s4865_s0 + $0x368] sm:$0xff] }
  0xe9   :  { %568 = vmatmul.mubr.f32.gmra.mxu0 %v104_v11 }
  0xea   :  { %572 = vmatprep.mubr.f32.mxu0 %v107_v12  ;;  %v244_v12 = vld [vmem:[%s4865_s0 + $0x700] sm:$0xff] }
  0xeb   :  { %863 = vmatmul.mubr.f32.gmra.mxu1 %v222_v13 }
  0xec   :  { %867 = vmatprep.mubr.f32.mxu1 %v225_v14 }
  0xed   :  { %573 = vmatmul.mubr.f32.gmra.mxu0 %v106_v15  ;;  %v247_v15 = vld [vmem:[%s4865_s0 + $0x718] sm:$0xff] }
  0xee   :  { %577 = vmatprep.mubr.f32.mxu0 %v109_v16  ;;  %v128_v16 = vld [vmem:[%s4865_s0 + $0x360] sm:$0xff] }
  0xef   :  { %868 = vmatmul.mubr.f32.gmra.mxu1 %v224_v17 }
  0xf0   :  { %872 = vmatprep.mubr.f32.mxu1 %v227_v18  ;;  %v131_v18 = vld [vmem:[%s4865_s0 + $0x378] sm:$0xff] }
  0xf1   :  { %578 = vmatmul.mubr.f32.gmra.mxu0 %v108_v19 }
  0xf2   :  { %582 = vmatprep.mubr.f32.mxu0 %v111_v20  ;;  %v246_v20 = vld [vmem:[%s4865_s0 + $0x710] sm:$0xff] }
  0xf3   :  { %873 = vmatmul.mubr.f32.gmra.mxu1 %v226_v21 }
  0xf4   :  { %877 = vmatprep.mubr.f32.mxu1 %v229_v22 }
  0xf5   :  { %583 = vmatmul.mubr.f32.gmra.mxu0 %v110_v23  ;;  %v249_v23 = vld [vmem:[%s4865_s0 + $0x728] sm:$0xff] }
  0xf6   :  { %587 = vmatprep.mubr.f32.mxu0 %v113_v24  ;;  %v130_v24 = vld [vmem:[%s4865_s0 + $0x370] sm:$0xff] }
  0xf7   :  { %878 = vmatmul.mubr.f32.gmra.mxu1 %v228_v25 }
  0xf8   :  { %882 = vmatprep.mubr.f32.mxu1 %v231_v26  ;;  %v133_v26 = vld [vmem:[%s4865_s0 + $0x388] sm:$0xff] }
  0xf9   :  { %588 = vmatmul.mubr.f32.gmra.mxu0 %v112_v27 }
  0xfa   :  { %592 = vmatprep.mubr.f32.mxu0 %v115_v28  ;;  %v248_v28 = vld [vmem:[%s4865_s0 + $0x720] sm:$0xff] }
  0xfb   :  { %883 = vmatmul.mubr.f32.gmra.mxu1 %v230_v29 }
  0xfc   :  { %887 = vmatprep.mubr.f32.mxu1 %v233_v30 }
  0xfd   :  { %593 = vmatmul.mubr.f32.gmra.mxu0 %v114_v31  ;;  %v251_v31 = vld [vmem:[%s4865_s0 + $0x738] sm:$0xff] }
  0xfe   :  { %597 = vmatprep.mubr.f32.mxu0 %v117_v32  ;;  %v132_v32 = vld [vmem:[%s4865_s0 + $0x380] sm:$0xff] }
  0xff   :  { %888 = vmatmul.mubr.f32.gmra.mxu1 %v232_v33 }
 0x100   :  { %892 = vmatprep.mubr.f32.mxu1 %v235_v34  ;;  %v135_v34 = vld [vmem:[%s4865_s0 + $0x398] sm:$0xff] }
 0x101   :  { %v2650_v38 = vpop.f32.mrf.mxu0  ;;  %598 = vmatmul.mubr.f32.gmra.mxu0 %v116_v35 }
 0x102   :  { %602 = vmatprep.mubr.f32.mxu0 %v119_v36  ;;  %v250_v36 = vld [vmem:[%s4865_s0 + $0x730] sm:$0xff] }
 0x103   :  { %v361_v41 = vpop.f32.mrf.mxu0  ;;  %v2661_v43 = vpop.f32.mrf.mxu1  ;;  %893 = vmatmul.mubr.f32.gmra.mxu1 %v234_v37 }
 0x104   :  { %897 = vmatprep.mubr.f32.mxu1 %v237_v39  ;;  %v134_v41 = vld [vmem:[%s4865_s0 + $0x390] sm:$0xff] }
 0x105   :  { %v2666_v45 = vpop.f32.mrf.mxu0  ;;  %603 = vmatmul.mubr.f32.gmra.mxu0 %v118_v40  ;;  %v656_v46 = vpop.f32.mrf.mxu1  ;;  %v253_v40 = vld [vmem:[%s4865_s0 + $0x748] sm:$0xff] }
 0x106   :  { %607 = vmatprep.mubr.f32.mxu0 %v121_v42 }
 0x107   :  { %v366_v49 = vpop.f32.mrf.mxu0  ;;  %v2677_v51 = vpop.f32.mrf.mxu1  ;;  %898 = vmatmul.mubr.f32.gmra.mxu1 %v236_v44  ;;  %v137_v44 = vld [vmem:[%s4865_s0 + $0x3a8] sm:$0xff] }
 0x108   :  { %902 = vmatprep.mubr.f32.mxu1 %v239_v47  ;;  %v252_v47 = vld [vmem:[%s4865_s0 + $0x740] sm:$0xff] }
 0x109   :  { %v2682_v53 = vpop.f32.mrf.mxu0  ;;  %608 = vmatmul.mubr.f32.gmra.mxu0 %v120_v48  ;;  %v661_v54 = vpop.f32.mrf.mxu1 }
 0x10a   :  { %612 = vmatprep.mubr.f32.mxu0 %v123_v50  ;;  %v136_v50 = vld [vmem:[%s4865_s0 + $0x3a0] sm:$0xff] }
 0x10b   :  { %v371_v57 = vpop.f32.mrf.mxu0  ;;  %v2693_v59 = vpop.f32.mrf.mxu1  ;;  %903 = vmatmul.mubr.f32.gmra.mxu1 %v238_v52 }
 0x10c   :  { %907 = vmatprep.mubr.f32.mxu1 %v241_v55 }
 0x10d   :  { %v2698_v61 = vpop.f32.mrf.mxu0  ;;  %613 = vmatmul.mubr.f32.gmra.mxu0 %v122_v56  ;;  %v666_v62 = vpop.f32.mrf.mxu1 }
 0x10e   :  { %617 = vmatprep.mubr.f32.mxu0 %v125_v58 }
 0x10f   :  { %v376_v1 = vpop.f32.mrf.mxu0  ;;  %v2709_v3 = vpop.f32.mrf.mxu1  ;;  %908 = vmatmul.mubr.f32.gmra.mxu1 %v240_v60 }
 0x110   :  { %912 = vmatprep.mubr.f32.mxu1 %v243_v63 }
 0x111   :  { %v2714_v5 = vpop.f32.mrf.mxu0  ;;  %618 = vmatmul.mubr.f32.gmra.mxu0 %v124_v0  ;;  %v671_v6 = vpop.f32.mrf.mxu1 }
 0x112   :  { %622 = vmatprep.mubr.f32.mxu0 %v127_v2 }
 0x113   :  { %v381_v9 = vpop.f32.mrf.mxu0  ;;  %v2725_v11 = vpop.f32.mrf.mxu1  ;;  %913 = vmatmul.mubr.f32.gmra.mxu1 %v242_v4 }
 0x114   :  { %917 = vmatprep.mubr.f32.mxu1 %v245_v7 }
 0x115   :  { %v2730_v13 = vpop.f32.mrf.mxu0  ;;  %623 = vmatmul.mubr.f32.gmra.mxu0 %v126_v8  ;;  %v676_v14 = vpop.f32.mrf.mxu1 }
 0x116   :  { %627 = vmatprep.mubr.f32.mxu0 %v129_v10 }
 0x117   :  { %v386_v17 = vpop.f32.mrf.mxu0  ;;  %v2741_v19 = vpop.f32.mrf.mxu1  ;;  %918 = vmatmul.mubr.f32.gmra.mxu1 %v244_v12 }
 0x118   :  { %922 = vmatprep.mubr.f32.mxu1 %v247_v15 }
 0x119   :  { %v2746_v21 = vpop.f32.mrf.mxu0  ;;  %628 = vmatmul.mubr.f32.gmra.mxu0 %v128_v16  ;;  %v681_v22 = vpop.f32.mrf.mxu1 }
 0x11a   :  { %632 = vmatprep.mubr.f32.mxu0 %v131_v18 }
 0x11b   :  { %v391_v25 = vpop.f32.mrf.mxu0  ;;  %v2757_v27 = vpop.f32.mrf.mxu1  ;;  %923 = vmatmul.mubr.f32.gmra.mxu1 %v246_v20 }
 0x11c   :  { %927 = vmatprep.mubr.f32.mxu1 %v249_v23 }
 0x11d   :  { %v2762_v29 = vpop.f32.mrf.mxu0  ;;  %633 = vmatmul.mubr.f32.gmra.mxu0 %v130_v24  ;;  %v686_v30 = vpop.f32.mrf.mxu1 }
 0x11e   :  { %637 = vmatprep.mubr.f32.mxu0 %v133_v26 }
 0x11f   :  { %v396_v33 = vpop.f32.mrf.mxu0  ;;  %v2773_v35 = vpop.f32.mrf.mxu1  ;;  %928 = vmatmul.mubr.f32.gmra.mxu1 %v248_v28 }
 0x120   :  { %932 = vmatprep.mubr.f32.mxu1 %v251_v31 }
 0x121   :  { %v2778_v37 = vpop.f32.mrf.mxu0  ;;  %638 = vmatmul.mubr.f32.gmra.mxu0 %v132_v32  ;;  %v691_v39 = vpop.f32.mrf.mxu1 }
 0x122   :  { %642 = vmatprep.mubr.f32.mxu0 %v135_v34 }
 0x123   :  { %v401_v42 = vpop.f32.mrf.mxu0  ;;  %v2789_v46 = vpop.f32.mrf.mxu1  ;;  %933 = vmatmul.mubr.f32.gmra.mxu1 %v250_v36 }
 0x124   :  { %937 = vmatprep.mubr.f32.mxu1 %v253_v40 }
 0x125   :  { %v2794_v48 = vpop.f32.mrf.mxu0  ;;  %643 = vmatmul.mubr.f32.gmra.mxu0 %v134_v41  ;;  %v696_v49 = vpop.f32.mrf.mxu1 }
 0x126   :  { %647 = vmatprep.mubr.f32.mxu0 %v137_v44 }
 0x127   :  { %v406_v52 = vpop.f32.mrf.mxu0  ;;  %v2799_v54 = vpop.f32.mrf.mxu1  ;;  %938 = vmatmul.mubr.f32.gmra.mxu1 %v252_v47 }
 0x129   :  { %v2801_v55 = vpop.f32.mrf.mxu0  ;;  %648 = vmatmul.mubr.f32.gmra.mxu0 %v136_v50  ;;  %v701_v56 = vpop.f32.mrf.mxu1 }
 0x12b   :  { %v411_v57 = vpop.f32.mrf.mxu0  ;;  %v2803_v58 = vpop.f32.mrf.mxu1 }
 0x12d   :  { %v2805_v60 = vpop.f32.mrf.mxu0  ;;  %v706_v62 = vpop.f32.mrf.mxu1 }
 0x12f   :  { %v416_v63 = vpop.f32.mrf.mxu0  ;;  %v2807_v0 = vpop.f32.mrf.mxu1 }
 0x131   :  { %v2809_v1 = vpop.f32.mrf.mxu0  ;;  %v711_v2 = vpop.f32.mrf.mxu1 }
 0x133   :  { %v421_v4 = vpop.f32.mrf.mxu0  ;;  %v2811_v6 = vpop.f32.mrf.mxu1 }
 0x135   :  { %v2813_v7 = vpop.f32.mrf.mxu0  ;;  %v716_v8 = vpop.f32.mrf.mxu1 }
 0x137   :  { %v426_v9 = vpop.f32.mrf.mxu0  ;;  %v2815_v10 = vpop.f32.mrf.mxu1 }
 0x139   :  { %v2817_v12 = vpop.f32.mrf.mxu0  ;;  %v721_v14 = vpop.f32.mrf.mxu1 }
 0x13b   :  { %v431_v15 = vpop.f32.mrf.mxu0  ;;  %v2819_v16 = vpop.f32.mrf.mxu1 }
 0x13d   :  { %v2821_v17 = vpop.f32.mrf.mxu0  ;;  %v726_v18 = vpop.f32.mrf.mxu1 }
 0x13f   :  { %v436_v20 = vpop.f32.mrf.mxu0  ;;  %v2823_v22 = vpop.f32.mrf.mxu1 }
 0x141   :  { %v2825_v23 = vpop.f32.mrf.mxu0  ;;  %v731_v24 = vpop.f32.mrf.mxu1 }
 0x143   :  { %v441_v25 = vpop.f32.mrf.mxu0  ;;  %v2827_v26 = vpop.f32.mrf.mxu1 }
 0x145   :  { %v2829_v28 = vpop.f32.mrf.mxu0  ;;  %v736_v30 = vpop.f32.mrf.mxu1 }
 0x147   :  { %v446_v31 = vpop.f32.mrf.mxu0  ;;  %v2831_v32 = vpop.f32.mrf.mxu1 }
 0x149   :  { %v2833_v33 = vpop.f32.mrf.mxu0  ;;  %v741_v34 = vpop.f32.mrf.mxu1 }
 0x14b   :  { %v451_v36 = vpop.f32.mrf.mxu0  ;;  %v2835_v39 = vpop.f32.mrf.mxu1 }
 0x14c   :  { %4947 = vst [vmem:[#allocation2_spill] sm:$0xff] %v2835_v39 }
 0x14d   :  { %v2837_v40 = vpop.f32.mrf.mxu0  ;;  %v746_v41 = vpop.f32.mrf.mxu1 }
 0x14f   :  { %v456_v42 = vpop.f32.mrf.mxu0  ;;  %v2839_v44 = vpop.f32.mrf.mxu1 }
 0x150   :  { %4948 = vst [vmem:[#allocation3_spill] sm:$0xff] %v2839_v44 }
 0x151   :  { %v2841_v47 = vpop.f32.mrf.mxu0  ;;  %v751_v49 = vpop.f32.mrf.mxu1 }
 0x153   :  { %v461_v50 = vpop.f32.mrf.mxu0  ;;  %v2843_v52 = vpop.f32.mrf.mxu1 }
 0x154   :  { %4949 = vst [vmem:[#allocation4_spill] sm:$0xff] %v2843_v52 }
 0x155   :  { %v2845_v56 = vpop.f32.mrf.mxu0  ;;  %v756_v57 = vpop.f32.mrf.mxu1 }
 0x157   :  { %v466_v62 = vpop.f32.mrf.mxu0  ;;  %v2847_v63 = vpop.f32.mrf.mxu1 }
 0x158   :  { %4950 = vst [vmem:[#allocation5_spill] sm:$0xff] %v2847_v63 }
 0x159   :  { %v2849_v2 = vpop.f32.mrf.mxu0  ;;  %v761_v4 = vpop.f32.mrf.mxu1 }
 0x15b   :  { %v471_v8 = vpop.f32.mrf.mxu0  ;;  %v2851_v9 = vpop.f32.mrf.mxu1 }
 0x15c   :  { %4951 = vst [vmem:[#allocation6_spill] sm:$0xff] %v2851_v9 }
 0x15d   :  { %v2853_v14 = vpop.f32.mrf.mxu0  ;;  %v766_v15 = vpop.f32.mrf.mxu1 }
 0x15f   :  { %v476_v18 = vpop.f32.mrf.mxu0  ;;  %v2855_v20 = vpop.f32.mrf.mxu1 }
 0x160   :  { %4952 = vst [vmem:[#allocation7_spill] sm:$0xff] %v2855_v20 }
 0x161   :  { %v2857_v24 = vpop.f32.mrf.mxu0  ;;  %v771_v25 = vpop.f32.mrf.mxu1 }
 0x162   :  { %v2876_v25 = vld [vmem:[%s4866_s2] ss:$0 sm:$0xff] }
 0x163   :  { %v481_v30 = vpop.f32.mrf.mxu0  ;;  %v2859_v31 = vpop.f32.mrf.mxu1  ;;  %v395_v52 = vadd.f32 %v2876_v25, %v2762_v29 }
 0x164   :  { %4953 = vst [vmem:[#allocation8_spill] sm:$0xff] %v2859_v31  ;;  %v365_v30 = vadd.f32 %v2876_v25, %v2666_v45 }
 0x165   :  { %v2861_v34 = vpop.f32.mrf.mxu0  ;;  %v776_v36 = vpop.f32.mrf.mxu1 }
 0x167   :  { %v486_v41 = vpop.f32.mrf.mxu0  ;;  %v2863_v42 = vpop.f32.mrf.mxu1 }
 0x168   :  { %4954 = vst [vmem:[#allocation9_spill] sm:$0xff] %v2863_v42 }
 0x169   :  { %v2865_v49 = vpop.f32.mrf.mxu0  ;;  %v781_v50 = vpop.f32.mrf.mxu1 }
 0x16a   :  { %v360_v50 = vadd.f32 %v2876_v25, %v2650_v38  ;;  %v380_v38 = vadd.f32 %v2876_v25, %v2714_v5 }
 0x16b   :  { %v491_v57 = vpop.f32.mrf.mxu0  ;;  %v2867_v62 = vpop.f32.mrf.mxu1 }
 0x16c   :  { %4955 = vst [vmem:[#allocation10_spill] sm:$0xff] %v2867_v62  ;;  %v370_v57 = vadd.f32 %v2876_v25, %v2682_v53  ;;  %v375_v62 = vadd.f32 %v2876_v25, %v2698_v61  ;;  %v2894_v31 = vmax.f32 %v360_v50, 0.0  ;;  %v385_v61 = vadd.f32 %v2876_v25, %v2730_v13 }
 0x16d   :  { %v2869_v4 = vpop.f32.mrf.mxu0  ;;  %v786_v8 = vpop.f32.mrf.mxu1 }
 0x16e   :  { %4959 = vst [vmem:[#allocation14_spill] sm:$0xff] %v2894_v31  ;;  %v2924_v63 = vmax.f32 %v385_v61, 0.0 }
 0x16f   :  { %v496_v15 = vpop.f32.mrf.mxu0  ;;  %v2871_v18 = vpop.f32.mrf.mxu1 }
 0x170   :  { %4956 = vst [vmem:[#allocation11_spill] sm:$0xff] %v2871_v18  ;;  %v2888_v18 = vmax.f32 %v365_v30, 0.0  ;;  %4965 = vst [vmem:[#allocation20_spill] sm:$0xff] %v2924_v63 }
 0x171   :  { %v2880_v36 = vpop.f32.mrf.mxu0  ;;  %v791_v41 = vpop.f32.mrf.mxu1 }
 0x172   :  { %4958 = vst [vmem:[#allocation13_spill] sm:$0xff] %v2888_v18  ;;  %v2896_v41 = vmax.f32 %v370_v57, 0.0  ;;  %v1184_v30 = vmul.f32 %v2888_v18, %v2888_v18  ;;  %v1183_v57 = vmul.f32 %v2894_v31, %v2894_v31  ;;  %v1060_v13 = vadd.f32 %v2888_v18, %v2894_v31 }
 0x173   :  { %v501_v8 = vpop.f32.mrf.mxu0  ;;  %v2886_v15 = vpop.f32.mrf.mxu1  ;;  %v2942_v31 = vmax.f32 %v395_v52, 0.0 }
 0x174   :  { %4957 = vst [vmem:[#allocation12_spill] sm:$0xff] %v2886_v15  ;;  %4960 = vst [vmem:[#allocation15_spill] sm:$0xff] %v2896_v41  ;;  %v2904_v8 = vmax.f32 %v375_v62, 0.0  ;;  %v1185_v5 = vmul.f32 %v2896_v41, %v2896_v41  ;;  %v1300_v9 = vadd.f32 %v1184_v30, %v1183_v57  ;;  %v400_v30 = vadd.f32 %v2876_v25, %v2778_v37 }
 0x175   :  { %v2892_v42 = vpop.f32.mrf.mxu0  ;;  %v796_v45 = vpop.f32.mrf.mxu1  ;;  %4967 = vst [vmem:[#allocation22_spill] sm:$0xff] %v2942_v31 }
 0x176   :  { %4962 = vst [vmem:[#allocation17_spill] sm:$0xff] %v2904_v8  ;;  %v390_v45 = vadd.f32 %v2876_v25, %v2746_v21  ;;  %v1061_v21 = vadd.f32 %v1060_v13, %v2896_v41  ;;  %v2951_v41 = vmax.f32 %v400_v30, 0.0 }
 0x177   :  { %v506_v20 = vpop.f32.mrf.mxu0  ;;  %v2900_v53 = vpop.f32.mrf.mxu1 }
 0x178   :  { %4961 = vst [vmem:[#allocation16_spill] sm:$0xff] %v2900_v53  ;;  %v2914_v20 = vmax.f32 %v380_v38, 0.0  ;;  %v2933_v39 = vmax.f32 %v390_v45, 0.0  ;;  %v1062_v18 = vadd.f32 %v1061_v21, %v2904_v8  ;;  %4968 = vst [vmem:[#allocation23_spill] sm:$0xff] %v2951_v41 }
 0x179   :  { %v2908_v15 = vpop.f32.mrf.mxu0  ;;  %v801_v50 = vpop.f32.mrf.mxu1 }
 0x17a   :  { %4963 = vst [vmem:[#allocation18_spill] sm:$0xff] %v2914_v20  ;;  %v1186_v50 = vmul.f32 %v2904_v8, %v2904_v8  ;;  %4966 = vst [vmem:[#allocation21_spill] sm:$0xff] %v2933_v39  ;;  %v1063_v13 = vadd.f32 %v1062_v18, %v2914_v20  ;;  %v415_v18 = vadd.f32 %v2876_v25, %v2805_v60 }
 0x17b   :  { %v511_v53 = vpop.f32.mrf.mxu0  ;;  %v2918_v62 = vpop.f32.mrf.mxu1 }
 0x17c   :  { %4964 = vst [vmem:[#allocation19_spill] sm:$0xff] %v2918_v62  ;;  %v1301_v53 = vadd.f32 %v1300_v9, %v1185_v5  ;;  %v1187_v62 = vmul.f32 %v2914_v20, %v2914_v20  ;;  %v405_v9 = vadd.f32 %v2876_v25, %v2794_v48 }
 0x17d   :  { %v2928_v38 = vpop.f32.mrf.mxu0  ;;  %v806_v44 = vpop.f32.mrf.mxu1 }
 0x17e   :  { %v1302_v29 = vadd.f32 %v1301_v53, %v1186_v50  ;;  %v1188_v44 = vmul.f32 %v2924_v63, %v2924_v63  ;;  %v410_v50 = vadd.f32 %v2876_v25, %v2801_v55  ;;  %v1064_v53 = vadd.f32 %v1063_v13, %v2924_v63 }
 0x17f   :  { %v516_v57 = vpop.f32.mrf.mxu0  ;;  %v2937_v61 = vpop.f32.mrf.mxu1  ;;  %v2960_v8 = vmax.f32 %v405_v9, 0.0  ;;  %v2978_v63 = vmax.f32 %v415_v18, 0.0 }
 0x180   :  { %v1303_v37 = vadd.f32 %v1302_v29, %v1187_v62  ;;  %v1189_v57 = vmul.f32 %v2933_v39, %v2933_v39  ;;  %v1065_v29 = vadd.f32 %v1064_v53, %v2933_v39  ;;  %v2969_v20 = vmax.f32 %v410_v50, 0.0 }
 0x181   :  { %v2946_v5 = vpop.f32.mrf.mxu0  ;;  %v811_v45 = vpop.f32.mrf.mxu1  ;;  %4969 = vst [vmem:[#allocation24_spill] sm:$0xff] %v2960_v8  ;;  %4971 = vst [vmem:[#allocation26_spill] sm:$0xff] %v2978_v63 }
 0x182   :  { %v1304_v48 = vadd.f32 %v1303_v37, %v1188_v44  ;;  %v1190_v45 = vmul.f32 %v2942_v31, %v2942_v31  ;;  %4970 = vst [vmem:[#allocation25_spill] sm:$0xff] %v2969_v20  ;;  %v420_v44 = vadd.f32 %v2876_v25, %v2809_v1  ;;  %v1066_v37 = vadd.f32 %v1065_v29, %v2942_v31 }
 0x183   :  { %v521_v21 = vpop.f32.mrf.mxu0  ;;  %v2955_v52 = vpop.f32.mrf.mxu1 }
 0x184   :  { %v1305_v55 = vadd.f32 %v1304_v48, %v1189_v57  ;;  %v1191_v21 = vmul.f32 %v2951_v41, %v2951_v41  ;;  %v425_v57 = vadd.f32 %v2876_v25, %v2813_v7  ;;  %v1067_v48 = vadd.f32 %v1066_v37, %v2951_v41 }
 0x185   :  { %v2964_v62 = vpop.f32.mrf.mxu0  ;;  %v816_v30 = vpop.f32.mrf.mxu1  ;;  %v2987_v39 = vmax.f32 %v420_v44, 0.0 }
 0x186   :  { %v1306_v60 = vadd.f32 %v1305_v55, %v1190_v45  ;;  %v1192_v30 = vmul.f32 %v2960_v8, %v2960_v8  ;;  %v430_v45 = vadd.f32 %v2876_v25, %v2817_v12  ;;  %v1068_v55 = vadd.f32 %v1067_v48, %v2960_v8 }
 0x187   :  { %v526_v13 = vpop.f32.mrf.mxu0  ;;  %v2973_v9 = vpop.f32.mrf.mxu1  ;;  %4972 = vst [vmem:[#allocation27_spill] sm:$0xff] %v2987_v39  ;;  %v2996_v31 = vmax.f32 %v425_v57, 0.0 }
 0x188   :  { %v1307_v1 = vadd.f32 %v1306_v60, %v1191_v21  ;;  %v1193_v13 = vmul.f32 %v2969_v20, %v2969_v20  ;;  %v435_v21 = vadd.f32 %v2876_v25, %v2821_v17  ;;  %v1069_v60 = vadd.f32 %v1068_v55, %v2969_v20 }
 0x189   :  { %v2982_v53 = vpop.f32.mrf.mxu0  ;;  %v821_v50 = vpop.f32.mrf.mxu1  ;;  %4973 = vst [vmem:[#allocation28_spill] sm:$0xff] %v2996_v31  ;;  %v3005_v41 = vmax.f32 %v430_v45, 0.0 }
 0x18a   :  { %v1308_v7 = vadd.f32 %v1307_v1, %v1192_v30  ;;  %v1194_v50 = vmul.f32 %v2978_v63, %v2978_v63  ;;  %v440_v30 = vadd.f32 %v2876_v25, %v2825_v23  ;;  %v1070_v1 = vadd.f32 %v1069_v60, %v2978_v63 }
 0x18b   :  { %v531_v29 = vpop.f32.mrf.mxu0  ;;  %v2991_v18 = vpop.f32.mrf.mxu1  ;;  %4974 = vst [vmem:[#allocation29_spill] sm:$0xff] %v3005_v41  ;;  %v3014_v8 = vmax.f32 %v435_v21, 0.0 }
 0x18c   :  { %v1309_v12 = vadd.f32 %v1308_v7, %v1193_v13  ;;  %v1195_v29 = vmul.f32 %v2987_v39, %v2987_v39  ;;  %v445_v13 = vadd.f32 %v2876_v25, %v2829_v28  ;;  %v1071_v7 = vadd.f32 %v1070_v1, %v2987_v39 }
 0x18d   :  { %v3000_v37 = vpop.f32.mrf.mxu0  ;;  %v826_v44 = vpop.f32.mrf.mxu1  ;;  %4975 = vst [vmem:[#allocation30_spill] sm:$0xff] %v3014_v8  ;;  %v3023_v20 = vmax.f32 %v440_v30, 0.0 }
 0x18e   :  { %v1310_v17 = vadd.f32 %v1309_v12, %v1194_v50  ;;  %v1196_v44 = vmul.f32 %v2996_v31, %v2996_v31  ;;  %v450_v50 = vadd.f32 %v2876_v25, %v2833_v33  ;;  %v1072_v12 = vadd.f32 %v1071_v7, %v2996_v31 }
 0x18f   :  { %v536_v48 = vpop.f32.mrf.mxu0  ;;  %v3009_v57 = vpop.f32.mrf.mxu1  ;;  %4976 = vst [vmem:[#allocation31_spill] sm:$0xff] %v3023_v20  ;;  %v3032_v63 = vmax.f32 %v445_v13, 0.0 }
 0x190   :  { %v1311_v23 = vadd.f32 %v1310_v17, %v1195_v29  ;;  %v1197_v48 = vmul.f32 %v3005_v41, %v3005_v41  ;;  %v455_v29 = vadd.f32 %v2876_v25, %v2837_v40  ;;  %v1073_v17 = vadd.f32 %v1072_v12, %v3005_v41 }
 0x191   :  { %v3018_v55 = vpop.f32.mrf.mxu0  ;;  %v831_v45 = vpop.f32.mrf.mxu1  ;;  %4977 = vst [vmem:[#allocation32_spill] sm:$0xff] %v3032_v63  ;;  %v3041_v39 = vmax.f32 %v450_v50, 0.0 }
 0x192   :  { %v1312_v28 = vadd.f32 %v1311_v23, %v1196_v44  ;;  %v1198_v45 = vmul.f32 %v3014_v8, %v3014_v8  ;;  %v460_v44 = vadd.f32 %v2876_v25, %v2841_v47  ;;  %v1074_v23 = vadd.f32 %v1073_v17, %v3014_v8 }
 0x193   :  { %v541_v60 = vpop.f32.mrf.mxu0  ;;  %v3027_v21 = vpop.f32.mrf.mxu1  ;;  %4978 = vst [vmem:[#allocation33_spill] sm:$0xff] %v3041_v39  ;;  %v3050_v31 = vmax.f32 %v455_v29, 0.0 }
 0x194   :  { %v1313_v33 = vadd.f32 %v1312_v28, %v1197_v48  ;;  %v1199_v60 = vmul.f32 %v3023_v20, %v3023_v20  ;;  %v465_v48 = vadd.f32 %v2876_v25, %v2845_v56  ;;  %v1075_v28 = vadd.f32 %v1074_v23, %v3023_v20 }
 0x195   :  { %v3036_v1 = vpop.f32.mrf.mxu0  ;;  %v836_v30 = vpop.f32.mrf.mxu1  ;;  %4979 = vst [vmem:[#allocation34_spill] sm:$0xff] %v3050_v31  ;;  %v3059_v41 = vmax.f32 %v460_v44, 0.0 }
 0x196   :  { %v1314_v40 = vadd.f32 %v1313_v33, %v1198_v45  ;;  %v1200_v30 = vmul.f32 %v3032_v63, %v3032_v63  ;;  %v470_v45 = vadd.f32 %v2876_v25, %v2849_v2  ;;  %v1076_v33 = vadd.f32 %v1075_v28, %v3032_v63 }
 0x197   :  { %v546_v7 = vpop.f32.mrf.mxu0  ;;  %v3045_v13 = vpop.f32.mrf.mxu1  ;;  %4980 = vst [vmem:[#allocation35_spill] sm:$0xff] %v3059_v41  ;;  %v3068_v8 = vmax.f32 %v465_v48, 0.0 }
 0x198   :  { %v1315_v47 = vadd.f32 %v1314_v40, %v1199_v60  ;;  %v1201_v7 = vmul.f32 %v3041_v39, %v3041_v39  ;;  %v475_v60 = vadd.f32 %v2876_v25, %v2853_v14  ;;  %v1077_v40 = vadd.f32 %v1076_v33, %v3041_v39 }
 0x199   :  { %v3054_v12 = vpop.f32.mrf.mxu0  ;;  %v841_v50 = vpop.f32.mrf.mxu1  ;;  %4981 = vst [vmem:[#allocation36_spill] sm:$0xff] %v3068_v8  ;;  %v3077_v20 = vmax.f32 %v470_v45, 0.0 }
 0x19a   :  { %v1316_v56 = vadd.f32 %v1315_v47, %v1200_v30  ;;  %v1202_v50 = vmul.f32 %v3050_v31, %v3050_v31  ;;  %v480_v30 = vadd.f32 %v2876_v25, %v2857_v24  ;;  %v1078_v47 = vadd.f32 %v1077_v40, %v3050_v31 }
 0x19b   :  { %v551_v17 = vpop.f32.mrf.mxu0  ;;  %v3063_v29 = vpop.f32.mrf.mxu1  ;;  %4982 = vst [vmem:[#allocation37_spill] sm:$0xff] %v3077_v20  ;;  %v3086_v63 = vmax.f32 %v475_v60, 0.0 }
 0x19c   :  { %v1317_v2 = vadd.f32 %v1316_v56, %v1201_v7  ;;  %v1203_v17 = vmul.f32 %v3059_v41, %v3059_v41  ;;  %v485_v7 = vadd.f32 %v2876_v25, %v2861_v34  ;;  %v1079_v56 = vadd.f32 %v1078_v47, %v3059_v41 }
 0x19d   :  { %v3072_v23 = vpop.f32.mrf.mxu0  ;;  %v846_v44 = vpop.f32.mrf.mxu1  ;;  %4983 = vst [vmem:[#allocation38_spill] sm:$0xff] %v3086_v63  ;;  %v3095_v39 = vmax.f32 %v480_v30, 0.0 }
 0x19e   :  { %v1318_v14 = vadd.f32 %v1317_v2, %v1202_v50  ;;  %v1204_v44 = vmul.f32 %v3068_v8, %v3068_v8  ;;  %v490_v50 = vadd.f32 %v2876_v25, %v2865_v49  ;;  %v1080_v2 = vadd.f32 %v1079_v56, %v3068_v8 }
 0x19f   :  { %v556_v28 = vpop.f32.mrf.mxu0  ;;  %v3081_v48 = vpop.f32.mrf.mxu1  ;;  %4984 = vst [vmem:[#allocation39_spill] sm:$0xff] %v3095_v39  ;;  %v3104_v31 = vmax.f32 %v485_v7, 0.0 }
 0x1a0   :  { %v1319_v24 = vadd.f32 %v1318_v14, %v1203_v17  ;;  %v1205_v28 = vmul.f32 %v3077_v20, %v3077_v20  ;;  %v495_v17 = vadd.f32 %v2876_v25, %v2869_v4  ;;  %v1081_v14 = vadd.f32 %v1080_v2, %v3077_v20 }
 0x1a1   :  { %v3090_v33 = vpop.f32.mrf.mxu0  ;;  %v851_v45 = vpop.f32.mrf.mxu1  ;;  %4985 = vst [vmem:[#allocation40_spill] sm:$0xff] %v3104_v31  ;;  %v3113_v41 = vmax.f32 %v490_v50, 0.0 }
 0x1a2   :  { %v1320_v34 = vadd.f32 %v1319_v24, %v1204_v44  ;;  %v1206_v45 = vmul.f32 %v3086_v63, %v3086_v63  ;;  %v500_v44 = vadd.f32 %v2876_v25, %v2880_v36  ;;  %v1082_v24 = vadd.f32 %v1081_v14, %v3086_v63 }
 0x1a3   :  { %v561_v40 = vpop.f32.mrf.mxu0  ;;  %v3099_v60 = vpop.f32.mrf.mxu1  ;;  %4986 = vst [vmem:[#allocation41_spill] sm:$0xff] %v3113_v41  ;;  %v3122_v8 = vmax.f32 %v495_v17, 0.0 }
 0x1a4   :  { %v1321_v49 = vadd.f32 %v1320_v34, %v1205_v28  ;;  %v1207_v40 = vmul.f32 %v3095_v39, %v3095_v39  ;;  %v505_v28 = vadd.f32 %v2876_v25, %v2892_v42  ;;  %v1083_v34 = vadd.f32 %v1082_v24, %v3095_v39 }
 0x1a5   :  { %v3108_v47 = vpop.f32.mrf.mxu0  ;;  %v856_v30 = vpop.f32.mrf.mxu1  ;;  %4987 = vst [vmem:[#allocation42_spill] sm:$0xff] %v3122_v8  ;;  %v3131_v20 = vmax.f32 %v500_v44, 0.0 }
 0x1a6   :  { %v1322_v4 = vadd.f32 %v1321_v49, %v1206_v45  ;;  %v1208_v30 = vmul.f32 %v3104_v31, %v3104_v31  ;;  %v510_v45 = vadd.f32 %v2876_v25, %v2908_v15  ;;  %v1084_v49 = vadd.f32 %v1083_v34, %v3104_v31 }
 0x1a7   :  { %v566_v56 = vpop.f32.mrf.mxu0  ;;  %v3117_v7 = vpop.f32.mrf.mxu1  ;;  %4988 = vst [vmem:[#allocation43_spill] sm:$0xff] %v3131_v20  ;;  %v3140_v63 = vmax.f32 %v505_v28, 0.0 }
 0x1a8   :  { %v1323_v36 = vadd.f32 %v1322_v4, %v1207_v40  ;;  %v1209_v56 = vmul.f32 %v3113_v41, %v3113_v41  ;;  %v515_v40 = vadd.f32 %v2876_v25, %v2928_v38  ;;  %v1085_v4 = vadd.f32 %v1084_v49, %v3113_v41 }
 0x1a9   :  { %v3126_v2 = vpop.f32.mrf.mxu0  ;;  %v861_v50 = vpop.f32.mrf.mxu1  ;;  %4989 = vst [vmem:[#allocation44_spill] sm:$0xff] %v3140_v63  ;;  %v3149_v39 = vmax.f32 %v510_v45, 0.0 }
 0x1aa   :  { %v1324_v42 = vadd.f32 %v1323_v36, %v1208_v30  ;;  %v1210_v50 = vmul.f32 %v3122_v8, %v3122_v8  ;;  %v520_v30 = vadd.f32 %v2876_v25, %v2946_v5  ;;  %v1086_v36 = vadd.f32 %v1085_v4, %v3122_v8 }
 0x1ab   :  { %v571_v14 = vpop.f32.mrf.mxu0  ;;  %v3135_v17 = vpop.f32.mrf.mxu1  ;;  %4990 = vst [vmem:[#allocation45_spill] sm:$0xff] %v3149_v39  ;;  %v3158_v31 = vmax.f32 %v515_v40, 0.0 }
 0x1ac   :  { %v1325_v15 = vadd.f32 %v1324_v42, %v1209_v56  ;;  %v1211_v14 = vmul.f32 %v3131_v20, %v3131_v20  ;;  %v525_v56 = vadd.f32 %v2876_v25, %v2964_v62  ;;  %v1087_v42 = vadd.f32 %v1086_v36, %v3131_v20 }
 0x1ad   :  { %v3144_v24 = vpop.f32.mrf.mxu0  ;;  %v866_v44 = vpop.f32.mrf.mxu1  ;;  %4991 = vst [vmem:[#allocation46_spill] sm:$0xff] %v3158_v31  ;;  %v3167_v41 = vmax.f32 %v520_v30, 0.0 }
 0x1ae   :  { %v1326_v38 = vadd.f32 %v1325_v15, %v1210_v50  ;;  %v1212_v44 = vmul.f32 %v3140_v63, %v3140_v63  ;;  %v530_v50 = vadd.f32 %v2876_v25, %v2982_v53  ;;  %v1088_v15 = vadd.f32 %v1087_v42, %v3140_v63 }
 0x1af   :  { %v576_v34 = vpop.f32.mrf.mxu0  ;;  %v3153_v28 = vpop.f32.mrf.mxu1  ;;  %4992 = vst [vmem:[#allocation47_spill] sm:$0xff] %v3167_v41  ;;  %v3176_v8 = vmax.f32 %v525_v56, 0.0 }
 0x1b0   :  { %v1327_v5 = vadd.f32 %v1326_v38, %v1211_v14  ;;  %v1213_v34 = vmul.f32 %v3149_v39, %v3149_v39  ;;  %v535_v14 = vadd.f32 %v2876_v25, %v3000_v37  ;;  %v1089_v38 = vadd.f32 %v1088_v15, %v3149_v39 }
 0x1b1   :  { %v3162_v49 = vpop.f32.mrf.mxu0  ;;  %v871_v45 = vpop.f32.mrf.mxu1  ;;  %4993 = vst [vmem:[#allocation48_spill] sm:$0xff] %v3176_v8  ;;  %v3185_v20 = vmax.f32 %v530_v50, 0.0 }
 0x1b2   :  { %v1328_v62 = vadd.f32 %v1327_v5, %v1212_v44  ;;  %v1214_v45 = vmul.f32 %v3158_v31, %v3158_v31  ;;  %v540_v44 = vadd.f32 %v2876_v25, %v3018_v55  ;;  %v1090_v5 = vadd.f32 %v1089_v38, %v3158_v31 }
 0x1b3   :  { %v581_v4 = vpop.f32.mrf.mxu0  ;;  %v3171_v40 = vpop.f32.mrf.mxu1  ;;  %4994 = vst [vmem:[#allocation49_spill] sm:$0xff] %v3185_v20  ;;  %v3194_v63 = vmax.f32 %v535_v14, 0.0  ;;  %v1217_v55 = vmul.f32 %v3185_v20, %v3185_v20 }
 0x1b4   :  { %v1329_v53 = vadd.f32 %v1328_v62, %v1213_v34  ;;  %v1215_v4 = vmul.f32 %v3167_v41, %v3167_v41  ;;  %v545_v34 = vadd.f32 %v2876_v25, %v3036_v1  ;;  %v1091_v62 = vadd.f32 %v1090_v5, %v3167_v41 }
 0x1b5   :  { %v3180_v36 = vpop.f32.mrf.mxu0  ;;  %v876_v30 = vpop.f32.mrf.mxu1  ;;  %4995 = vst [vmem:[#allocation50_spill] sm:$0xff] %v3194_v63  ;;  %v1218_v1 = vmul.f32 %v3194_v63, %v3194_v63 }
 0x1b6   :  { %v1330_v37 = vadd.f32 %v1329_v53, %v1214_v45  ;;  %v1216_v30 = vmul.f32 %v3176_v8, %v3176_v8  ;;  %v550_v45 = vadd.f32 %v2876_v25, %v3054_v12  ;;  %v1092_v14 = vadd.f32 %v1091_v62, %v3176_v8 }
 0x1b7   :  { %v586_v42 = vpop.f32.mrf.mxu0  ;;  %v3189_v56 = vpop.f32.mrf.mxu1 }
 0x1b8   :  { %v1331_v39 = vadd.f32 %v1330_v37, %v1215_v4  ;;  %v3201_v42 = vmax.f32 %v540_v44, 0.0  ;;  %v555_v4 = vadd.f32 %v2876_v25, %v3072_v23  ;;  %v1093_v37 = vadd.f32 %v1092_v14, %v3185_v20 }
 0x1b9   :  { %v589_v15 = vpop.f32.mrf.mxu0  ;;  %v881_v50 = vpop.f32.mrf.mxu1 }
 0x1ba   :  { %4996 = vst [vmem:[#allocation51_spill] sm:$0xff] %v3201_v42  ;;  %v1332_v31 = vadd.f32 %v1331_v39, %v1216_v30  ;;  %v3210_v50 = vmax.f32 %v545_v34, 0.0  ;;  %v1219_v12 = vmul.f32 %v3201_v42, %v3201_v42  ;;  %v560_v39 = vadd.f32 %v2876_v25, %v3090_v33 }
 0x1bb   :  { %v591_v38 = vpop.f32.mrf.mxu0  ;;  %v3205_v53 = vpop.f32.mrf.mxu1  ;;  %v1094_v34 = vadd.f32 %v1093_v37, %v3194_v63 }
 0x1bc   :  { %4997 = vst [vmem:[#allocation52_spill] sm:$0xff] %v3210_v50  ;;  %v1333_v41 = vadd.f32 %v1332_v31, %v1217_v55  ;;  %v3217_v38 = vmax.f32 %v550_v45, 0.0  ;;  %v1220_v23 = vmul.f32 %v3210_v50, %v3210_v50  ;;  %v565_v31 = vadd.f32 %v2876_v25, %v3108_v47 }
 0x1bd   :  { %v594_v5 = vpop.f32.mrf.mxu0  ;;  %v886_v44 = vpop.f32.mrf.mxu1  ;;  %v1095_v14 = vadd.f32 %v1094_v34, %v3201_v42 }
 0x1be   :  { %4998 = vst [vmem:[#allocation53_spill] sm:$0xff] %v3217_v38  ;;  %v1334_v8 = vadd.f32 %v1333_v41, %v1218_v1  ;;  %v3226_v44 = vmax.f32 %v555_v4, 0.0  ;;  %v1221_v33 = vmul.f32 %v3217_v38, %v3217_v38  ;;  %v570_v41 = vadd.f32 %v2876_v25, %v3126_v2 }
 0x1bf   :  { %v596_v30 = vpop.f32.mrf.mxu0  ;;  %v3221_v62 = vpop.f32.mrf.mxu1  ;;  %v1096_v4 = vadd.f32 %v1095_v14, %v3210_v50 }
 0x1c0   :  { %4999 = vst [vmem:[#allocation54_spill] sm:$0xff] %v3226_v44  ;;  %v1335_v20 = vadd.f32 %v1334_v8, %v1219_v12  ;;  %v3233_v30 = vmax.f32 %v560_v39, 0.0  ;;  %v1222_v47 = vmul.f32 %v3226_v44, %v3226_v44  ;;  %v575_v8 = vadd.f32 %v2876_v25, %v3144_v24 }
 0x1c1   :  { %v599_v55 = vpop.f32.mrf.mxu0  ;;  %v891_v45 = vpop.f32.mrf.mxu1  ;;  %v1097_v34 = vadd.f32 %v1096_v4, %v3217_v38 }
 0x1c2   :  { %5000 = vst [vmem:[#allocation55_spill] sm:$0xff] %v3233_v30  ;;  %v1336_v63 = vadd.f32 %v1335_v20, %v1220_v23  ;;  %v3242_v45 = vmax.f32 %v565_v31, 0.0  ;;  %v1223_v2 = vmul.f32 %v3233_v30, %v3233_v30  ;;  %v580_v20 = vadd.f32 %v2876_v25, %v3162_v49 }
 0x1c3   :  { %v601_v1 = vpop.f32.mrf.mxu0  ;;  %v3237_v37 = vpop.f32.mrf.mxu1  ;;  %v1098_v31 = vadd.f32 %v1097_v34, %v3226_v44 }
 0x1c4   :  { %5001 = vst [vmem:[#allocation56_spill] sm:$0xff] %v3242_v45  ;;  %v1337_v42 = vadd.f32 %v1336_v63, %v1221_v33  ;;  %v3249_v1 = vmax.f32 %v570_v41, 0.0  ;;  %v1224_v24 = vmul.f32 %v3242_v45, %v3242_v45  ;;  %v585_v63 = vadd.f32 %v2876_v25, %v3180_v36 }
 0x1c5   :  { %v604_v12 = vpop.f32.mrf.mxu0  ;;  %v896_v39 = vpop.f32.mrf.mxu1  ;;  %v1099_v4 = vadd.f32 %v1098_v31, %v3233_v30 }
 0x1c6   :  { %5002 = vst [vmem:[#allocation57_spill] sm:$0xff] %v3249_v1  ;;  %v1338_v50 = vadd.f32 %v1337_v42, %v1222_v47  ;;  %v3258_v39 = vmax.f32 %v575_v8, 0.0  ;;  %v1225_v49 = vmul.f32 %v3249_v1, %v3249_v1  ;;  %v590_v42 = vadd.f32 %v2876_v25, %v589_v15 }
 0x1c7   :  { %v606_v23 = vpop.f32.mrf.mxu0  ;;  %v3253_v14 = vpop.f32.mrf.mxu1  ;;  %v1100_v8 = vadd.f32 %v1099_v4, %v3242_v45  ;;  %v600_v4 = vadd.f32 %v2876_v25, %v599_v55 }
 0x1c8   :  { %5003 = vst [vmem:[#allocation58_spill] sm:$0xff] %v3258_v39  ;;  %v1339_v38 = vadd.f32 %v1338_v50, %v1223_v2  ;;  %v3265_v23 = vmax.f32 %v580_v20, 0.0  ;;  %v1226_v36 = vmul.f32 %v3258_v39, %v3258_v39  ;;  %v595_v50 = vadd.f32 %v2876_v25, %v594_v5 }
 0x1c9   :  { %v609_v33 = vpop.f32.mrf.mxu0  ;;  %v901_v41 = vpop.f32.mrf.mxu1  ;;  %v1101_v20 = vadd.f32 %v1100_v8, %v3249_v1 }
 0x1ca   :  { %5004 = vst [vmem:[#allocation59_spill] sm:$0xff] %v3265_v23  ;;  %v1340_v44 = vadd.f32 %v1339_v38, %v1224_v24  ;;  %v3273_v41 = vmax.f32 %v585_v63, 0.0  ;;  %v1227_v15 = vmul.f32 %v3265_v23, %v3265_v23 }
 0x1cb   :  { %v611_v47 = vpop.f32.mrf.mxu0  ;;  %v3268_v34 = vpop.f32.mrf.mxu1  ;;  %v1102_v63 = vadd.f32 %v1101_v20, %v3258_v39  ;;  %v610_v20 = vadd.f32 %v2876_v25, %v609_v33 }
 0x1cc   :  { %5005 = vst [vmem:[#allocation60_spill] sm:$0xff] %v3273_v41  ;;  %v1341_v30 = vadd.f32 %v1340_v44, %v1225_v49  ;;  %v3279_v47 = vmax.f32 %v590_v42, 0.0  ;;  %v1228_v5 = vmul.f32 %v3273_v41, %v3273_v41  ;;  %v605_v44 = vadd.f32 %v2876_v25, %v604_v12 }
 0x1cd   :  { %v614_v2 = vpop.f32.mrf.mxu0  ;;  %v906_v31 = vpop.f32.mrf.mxu1  ;;  %v1103_v42 = vadd.f32 %v1102_v63, %v3265_v23 }
 0x1ce   :  { %5006 = vst [vmem:[#allocation61_spill] sm:$0xff] %v3279_v47  ;;  %v1342_v45 = vadd.f32 %v1341_v30, %v1226_v36  ;;  %v3287_v31 = vmax.f32 %v595_v50, 0.0  ;;  %v1229_v55 = vmul.f32 %v3279_v47, %v3279_v47 }
 0x1cf   :  { %v616_v38 = vpop.f32.mrf.mxu0  ;;  %v3282_v24 = vpop.f32.mrf.mxu1  ;;  %v1104_v50 = vadd.f32 %v1103_v42, %v3273_v41 }
 0x1d0   :  { %5007 = vst [vmem:[#allocation62_spill] sm:$0xff] %v3287_v31  ;;  %v1343_v1 = vadd.f32 %v1342_v45, %v1227_v15  ;;  %v3293_v38 = vmax.f32 %v600_v4, 0.0  ;;  %v1230_v12 = vmul.f32 %v3287_v31, %v3287_v31  ;;  %v615_v45 = vadd.f32 %v2876_v25, %v614_v2 }
 0x1d1   :  { %v619_v49 = vpop.f32.mrf.mxu0  ;;  %v911_v8 = vpop.f32.mrf.mxu1  ;;  %v1105_v4 = vadd.f32 %v1104_v50, %v3279_v47 }
 0x1d2   :  { %5008 = vst [vmem:[#allocation63_spill] sm:$0xff] %v3293_v38  ;;  %v1344_v39 = vadd.f32 %v1343_v1, %v1228_v5  ;;  %v3301_v8 = vmax.f32 %v605_v44, 0.0  ;;  %v1231_v33 = vmul.f32 %v3293_v38, %v3293_v38  ;;  %v620_v5 = vadd.f32 %v2876_v25, %v619_v49 }
 0x1d3   :  { %v621_v30 = vpop.f32.mrf.mxu0  ;;  %v3296_v36 = vpop.f32.mrf.mxu1  ;;  %v1106_v1 = vadd.f32 %v1105_v4, %v3287_v31 }
 0x1d4   :  { %5009 = vst [vmem:[#allocation64_spill] sm:$0xff] %v3296_v36  ;;  %v1345_v23 = vadd.f32 %v1344_v39, %v1229_v55  ;;  %v3307_v30 = vmax.f32 %v610_v20, 0.0  ;;  %v1232_v2 = vmul.f32 %v3301_v8, %v3301_v8  ;;  %v3324_v49 = vmax.f32 %v620_v5, 0.0 }
 0x1d5   :  { %v624_v15 = vpop.f32.mrf.mxu0  ;;  %v916_v63 = vpop.f32.mrf.mxu1  ;;  %v1107_v55 = vadd.f32 %v1106_v1, %v3293_v38 }
 0x1d6   :  { %v1346_v44 = vadd.f32 %v1345_v23, %v1230_v12  ;;  %v3315_v63 = vmax.f32 %v615_v45, 0.0  ;;  %v625_v20 = vadd.f32 %v2876_v25, %v624_v15  ;;  %5012 = vst [vmem:[#allocation67_spill] sm:$0xff] %v3324_v49 }
 0x1d7   :  { %v626_v36 = vpop.f32.mrf.mxu0  ;;  %v3309_v42 = vpop.f32.mrf.mxu1  ;;  %v1108_v23 = vadd.f32 %v1107_v55, %v3301_v8 }
 0x1d8   :  { %5010 = vst [vmem:[#allocation65_spill] sm:$0xff] %v3315_v63  ;;  %v1347_v47 = vadd.f32 %v1346_v44, %v1231_v33  ;;  %v1233_v36 = vmul.f32 %v3307_v30, %v3307_v30  ;;  %v3330_v33 = vmax.f32 %v625_v20, 0.0 }
 0x1d9   :  { %v629_v50 = vpop.f32.mrf.mxu0  ;;  %v921_v39 = vpop.f32.mrf.mxu1  ;;  %v1109_v15 = vadd.f32 %v1108_v23, %v3307_v30 }
 0x1da   :  { %v630_v12 = vadd.f32 %v2876_v25, %v629_v50  ;;  %v1348_v45 = vadd.f32 %v1347_v47, %v1232_v2  ;;  %v1234_v39 = vmul.f32 %v3315_v63, %v3315_v63  ;;  %5013 = vst [vmem:[#allocation68_spill] sm:$0xff] %v3330_v33  ;;  %v1235_v47 = vmul.f32 %v3324_v49, %v3324_v49 }
 0x1db   :  { %v631_v41 = vpop.f32.mrf.mxu0  ;;  %v3321_v4 = vpop.f32.mrf.mxu1  ;;  %v1110_v5 = vadd.f32 %v1109_v15, %v3315_v63  ;;  %v1236_v20 = vmul.f32 %v3330_v33, %v3330_v33 }
 0x1dc   :  { %5011 = vst [vmem:[#allocation66_spill] sm:$0xff] %v3321_v4  ;;  %v1349_v44 = vadd.f32 %v1348_v45, %v1233_v36  ;;  %v3338_v2 = vmax.f32 %v630_v12, 0.0 }
 0x1dd   :  { %v634_v1 = vpop.f32.mrf.mxu0  ;;  %v926_v38 = vpop.f32.mrf.mxu1  ;;  %v1111_v23 = vadd.f32 %v1110_v5, %v3324_v49 }
 0x1de   :  { %v635_v41 = vadd.f32 %v2876_v25, %v634_v1  ;;  %5014 = vst [vmem:[#allocation69_spill] sm:$0xff] %v3338_v2  ;;  %v1350_v50 = vadd.f32 %v1349_v44, %v1234_v39  ;;  %v1237_v12 = vmul.f32 %v3338_v2, %v3338_v2 }
 0x1df   :  { %v636_v31 = vpop.f32.mrf.mxu0  ;;  %v3333_v4 = vpop.f32.mrf.mxu1  ;;  %v1112_v63 = vadd.f32 %v1111_v23, %v3330_v33 }
 0x1e0   :  { %v3343_v1 = vmax.f32 %v635_v41, 0.0  ;;  %v1351_v15 = vadd.f32 %v1350_v50, %v1235_v47  ;;  %v655_v47 = vadd.f32 %v2876_v25, %v2661_v43 }
 0x1e1   :  { %v639_v55 = vpop.f32.mrf.mxu0  ;;  %v931_v38 = vpop.f32.mrf.mxu1  ;;  %v1113_v49 = vadd.f32 %v1112_v63, %v3338_v2  ;;  %v660_v63 = vadd.f32 %v2876_v25, %v2677_v51 }
 0x1e2   :  { %5015 = vst [vmem:[#allocation70_spill] sm:$0xff] %v3343_v1  ;;  %v640_v31 = vadd.f32 %v2876_v25, %v639_v55  ;;  %v1352_v38 = vadd.f32 %v1351_v15, %v1236_v20  ;;  %v1238_v41 = vmul.f32 %v3343_v1, %v3343_v1 }
 0x1e3   :  { %v641_v36 = vpop.f32.mrf.mxu0  ;;  %v3346_v45 = vpop.f32.mrf.mxu1 }
 0x1e4   :  { %v3351_v39 = vmax.f32 %v640_v31, 0.0  ;;  %v1353_v36 = vadd.f32 %v1352_v38, %v1237_v12  ;;  %v1114_v31 = vadd.f32 %v1113_v49, %v3343_v1  ;;  %v3372_v38 = vmax.f32 %v655_v47, 0.0 }
 0x1e5   :  { %v644_v44 = vpop.f32.mrf.mxu0  ;;  %v936_v5 = vpop.f32.mrf.mxu1 }
 0x1e6   :  { %v645_v55 = vadd.f32 %v2876_v25, %v644_v44  ;;  %v1239_v5 = vmul.f32 %v3351_v39, %v3351_v39  ;;  %v1354_v44 = vadd.f32 %v1353_v36, %v1238_v41  ;;  %v1115_v33 = vadd.f32 %v1114_v31, %v3351_v39 }
 0x1e7   :  { %v646_v50 = vpop.f32.mrf.mxu0  ;;  %v3359_v23 = vpop.f32.mrf.mxu1  ;;  %v3381_v41 = vmax.f32 %v660_v63, 0.0 }
 0x1e8   :  { %v3364_v20 = vmax.f32 %v645_v55, 0.0  ;;  %v665_v55 = vadd.f32 %v2876_v25, %v2693_v59  ;;  %v1355_v50 = vadd.f32 %v1354_v44, %v1239_v5  ;;  %v1242_v59 = vmul.f32 %v3372_v38, %v3372_v38 }
 0x1e9   :  { %v649_v15 = vpop.f32.mrf.mxu0  ;;  %v941_v2 = vpop.f32.mrf.mxu1  ;;  %v1243_v63 = vmul.f32 %v3381_v41, %v3381_v41 }
 0x1ea   :  { %v1240_v43 = vmul.f32 %v3364_v20, %v3364_v20  ;;  %v650_v12 = vadd.f32 %v2876_v25, %v649_v15  ;;  %v1116_v1 = vadd.f32 %v1115_v33, %v3364_v20  ;;  %v670_v2 = vadd.f32 %v2876_v25, %v2709_v3 }
 0x1eb   :  { %v651_v49 = vpop.f32.mrf.mxu0  ;;  %v675_v15 = vadd.f32 %v2876_v25, %v2725_v11  ;;  %v3390_v33 = vmax.f32 %v665_v55, 0.0  ;;  %v685_v55 = vadd.f32 %v2876_v25, %v2757_v27  ;;  %v695_v27 = vadd.f32 %v2876_v25, %v2789_v46 }
 0x1ec   :  { %v3377_v51 = vmax.f32 %v650_v12, 0.0  ;;  %v1356_v36 = vadd.f32 %v1355_v50, %v1240_v43  ;;  %v3393_v3 = vmax.f32 %v670_v2, 0.0 }
 0x1ed   :  { %v3400_v11 = vmax.f32 %v675_v15, 0.0  ;;  %v1244_v49 = vmul.f32 %v3390_v33, %v3390_v33 }
 0x1ee   :  { %v1117_v31 = vadd.f32 %v1116_v1, %v3377_v51  ;;  %v1241_v47 = vmul.f32 %v3377_v51, %v3377_v51  ;;  %v680_v1 = vadd.f32 %v2876_v25, %v2741_v19  ;;  %v690_v19 = vadd.f32 %v2876_v25, %v2773_v35 }
 0x1f0   :  { %v1118_v5 = vadd.f32 %v1117_v31, %v3372_v38  ;;  %v1357_v44 = vadd.f32 %v1356_v36, %v1241_v47  ;;  %v1245_v36 = vmul.f32 %v3393_v3, %v3393_v3  ;;  %v3409_v31 = vmax.f32 %v680_v1, 0.0 }
 0x1f1   :  { %v700_v1 = vadd.f32 %v2876_v25, %v2799_v54 }
 0x1f2   :  { %v1119_v43 = vadd.f32 %v1118_v5, %v3381_v41  ;;  %v1358_v12 = vadd.f32 %v1357_v44, %v1242_v59  ;;  %v1246_v59 = vmul.f32 %v3400_v11, %v3400_v11  ;;  %v3416_v5 = vmax.f32 %v685_v55, 0.0 }
 0x1f3   :  { %v1247_v35 = vmul.f32 %v3409_v31, %v3409_v31  ;;  %v705_v55 = vadd.f32 %v2876_v25, %v2803_v58  ;;  %v3435_v54 = vmax.f32 %v700_v1, 0.0 }
 0x1f4   :  { %v1120_v50 = vadd.f32 %v1119_v43, %v3390_v33  ;;  %v1359_v2 = vadd.f32 %v1358_v12, %v1243_v63  ;;  %v3425_v43 = vmax.f32 %v690_v19, 0.0  ;;  %v1248_v46 = vmul.f32 %v3416_v5, %v3416_v5 }
 0x1f5   :  { %v3442_v58 = vmax.f32 %v705_v55, 0.0 }
 0x1f6   :  { %v1121_v47 = vadd.f32 %v1120_v50, %v3393_v3  ;;  %v1360_v15 = vadd.f32 %v1359_v2, %v1244_v49  ;;  %v3432_v50 = vmax.f32 %v695_v27, 0.0  ;;  %v1249_v19 = vmul.f32 %v3425_v43, %v3425_v43 }
 0x1f8   :  { %v1122_v44 = vadd.f32 %v1121_v47, %v3400_v11  ;;  %v1361_v63 = vadd.f32 %v1360_v15, %v1245_v36  ;;  %v710_v47 = vadd.f32 %v2876_v25, %v2807_v0  ;;  %v1250_v27 = vmul.f32 %v3432_v50, %v3432_v50 }
 0x1f9   :  { %v720_v0 = vadd.f32 %v2876_v25, %v2815_v10 }
 0x1fa   :  { %v1123_v12 = vadd.f32 %v1122_v44, %v3409_v31  ;;  %v1362_v49 = vadd.f32 %v1361_v63, %v1246_v59  ;;  %v715_v44 = vadd.f32 %v2876_v25, %v2811_v6  ;;  %v725_v6 = vadd.f32 %v2876_v25, %v2819_v16 }
 0x1fc   :  { %v1124_v2 = vadd.f32 %v1123_v12, %v3416_v5  ;;  %v1363_v36 = vadd.f32 %v1362_v49, %v1247_v35  ;;  %v1251_v35 = vmul.f32 %v3435_v54, %v3435_v54  ;;  %v3451_v12 = vmax.f32 %v710_v47, 0.0 }
 0x1fd   :  { %v730_v47 = vadd.f32 %v2876_v25, %v2823_v22 }
 0x1fe   :  { %v1125_v15 = vadd.f32 %v1124_v2, %v3425_v43  ;;  %v1364_v59 = vadd.f32 %v1363_v36, %v1248_v46  ;;  %v1252_v46 = vmul.f32 %v3442_v58, %v3442_v58  ;;  %v3458_v2 = vmax.f32 %v715_v44, 0.0 }
 0x1ff   :  { %v1253_v10 = vmul.f32 %v3451_v12, %v3451_v12  ;;  %v735_v44 = vadd.f32 %v2876_v25, %v2827_v26  ;;  %v3477_v22 = vmax.f32 %v730_v47, 0.0 }
 0x200   :  { %v1126_v63 = vadd.f32 %v1125_v15, %v3432_v50  ;;  %v1365_v1 = vadd.f32 %v1364_v59, %v1249_v19  ;;  %5016 = vst [vmem:[#allocation71_spill] sm:$0xff] %v3458_v2  ;;  %v3467_v15 = vmax.f32 %v720_v0, 0.0  ;;  %v1254_v16 = vmul.f32 %v3458_v2, %v3458_v2 }
 0x201   :  { %5019 = vst [vmem:[#allocation74_spill] sm:$0xff] %v3477_v22  ;;  %v3484_v26 = vmax.f32 %v735_v44, 0.0 }
 0x202   :  { %v1127_v49 = vadd.f32 %v1126_v63, %v3435_v54  ;;  %v1366_v55 = vadd.f32 %v1365_v1, %v1250_v27  ;;  %5017 = vst [vmem:[#allocation72_spill] sm:$0xff] %v3467_v15  ;;  %v3474_v63 = vmax.f32 %v725_v6, 0.0  ;;  %v1255_v0 = vmul.f32 %v3467_v15, %v3467_v15 }
 0x203   :  { %5020 = vst [vmem:[#allocation75_spill] sm:$0xff] %v3484_v26 }
 0x204   :  { %v1128_v36 = vadd.f32 %v1127_v49, %v3442_v58  ;;  %v1367_v19 = vadd.f32 %v1366_v55, %v1251_v35  ;;  %5018 = vst [vmem:[#allocation73_spill] sm:$0xff] %v3474_v63  ;;  %v740_v49 = vadd.f32 %v2876_v25, %v2831_v32  ;;  %v1256_v6 = vmul.f32 %v3474_v63, %v3474_v63  ;;  %v5023_v32 = vld [vmem:[#allocation3_spill] sm:$0xff] }
 0x206   :  { %v1129_v59 = vadd.f32 %v1128_v36, %v3451_v12  ;;  %v1368_v27 = vadd.f32 %v1367_v19, %v1252_v46  ;;  %v5021_v36 = vld [vmem:[#allocation2_spill] sm:$0xff] }
 0x207   :  { %v745_v19 = vadd.f32 %v2876_v25, %v5021_v36  ;;  %v5025_v36 = vld [vmem:[#allocation4_spill] sm:$0xff] }
 0x208   :  { %v1130_v1 = vadd.f32 %v1129_v59, %v3458_v2  ;;  %v1369_v35 = vadd.f32 %v1368_v27, %v1253_v10  ;;  %v1257_v59 = vmul.f32 %v3477_v22, %v3477_v22  ;;  %v3493_v27 = vmax.f32 %v740_v49, 0.0 }
 0x20a   :  { %v1131_v55 = vadd.f32 %v1130_v1, %v3467_v15  ;;  %v1370_v46 = vadd.f32 %v1369_v35, %v1254_v16  ;;  %5022 = vst [vmem:[#allocation2_spill] sm:$0xff] %v3493_v27  ;;  %v750_v1 = vadd.f32 %v2876_v25, %v5023_v32  ;;  %v1258_v35 = vmul.f32 %v3484_v26, %v3484_v26 }
 0x20b   :  { %v3500_v15 = vmax.f32 %v745_v19, 0.0  ;;  %v1259_v32 = vmul.f32 %v3493_v27, %v3493_v27  ;;  %v3515_v19 = vld [vmem:[%s4866_s2] ss:$0 sm:$0xff] }
 0x20c   :  { %v1371_v10 = vadd.f32 %v1370_v46, %v1255_v0  ;;  %v1132_v47 = vadd.f32 %v1131_v55, %v3474_v63  ;;  %v755_v0 = vadd.f32 %v2876_v25, %v5025_v36  ;;  %v5026_v63 = vld [vmem:[#allocation5_spill] sm:$0xff]  ;;  %v3509_v2 = vmax.f32 %v750_v1, 0.0  ;;  %v5031_v36 = vld [vmem:[#allocation7_spill] sm:$0xff] }
 0x20d   :  { %5024 = vst [vmem:[#allocation3_spill] sm:$0xff] %v3500_v15  ;;  %v760_v49 = vadd.f32 %v2876_v25, %v5026_v63 }
 0x20e   :  { %v1133_v44 = vadd.f32 %v1132_v47, %v3477_v22  ;;  %v1372_v16 = vadd.f32 %v1371_v10, %v1256_v6  ;;  %5027 = vst [vmem:[#allocation4_spill] sm:$0xff] %v3509_v2  ;;  %v5028_v47 = vld [vmem:[#allocation6_spill] sm:$0xff]  ;;  %v3521_v25 = vmax.f32 %v755_v0, 0.0 }
 0x210   :  { %v1134_v55 = vadd.f32 %v1133_v44, %v3484_v26  ;;  %v1373_v46 = vadd.f32 %v1372_v16, %v1257_v59  ;;  %v765_v44 = vadd.f32 %v3515_v19, %v5028_v47  ;;  %v1260_v59 = vmul.f32 %v3500_v15, %v3500_v15  ;;  %5029 = vst [vmem:[#allocation5_spill] sm:$0xff] %v3521_v25  ;;  %v5032_v26 = vld [vmem:[#allocation8_spill] sm:$0xff] }
 0x211   :  { %v3524_v16 = vmax.f32 %v760_v49, 0.0  ;;  %v1262_v0 = vmul.f32 %v3521_v25, %v3521_v25 }
 0x212   :  { %v1135_v6 = vadd.f32 %v1134_v55, %v3493_v27  ;;  %v1374_v10 = vadd.f32 %v1373_v46, %v1258_v35  ;;  %v1261_v35 = vmul.f32 %v3509_v2, %v3509_v2  ;;  %v770_v55 = vadd.f32 %v3515_v19, %v5031_v36  ;;  %v5034_v36 = vld [vmem:[#allocation9_spill] sm:$0xff] }
 0x213   :  { %5030 = vst [vmem:[#allocation6_spill] sm:$0xff] %v3524_v16  ;;  %v3531_v47 = vmax.f32 %v765_v44, 0.0 }
 0x214   :  { %v1136_v63 = vadd.f32 %v1135_v6, %v3500_v15  ;;  %v1375_v1 = vadd.f32 %v1374_v10, %v1259_v32  ;;  %v775_v6 = vadd.f32 %v3515_v19, %v5032_v26  ;;  %v1263_v10 = vmul.f32 %v3524_v16, %v3524_v16  ;;  %v5036_v26 = vld [vmem:[#allocation10_spill] sm:$0xff] }
 0x215   :  { %v3540_v15 = vmax.f32 %v770_v55, 0.0 }
 0x216   :  { %v1137_v46 = vadd.f32 %v1136_v63, %v3509_v2  ;;  %v1376_v27 = vadd.f32 %v1375_v1, %v1260_v59  ;;  %v780_v63 = vadd.f32 %v3515_v19, %v5034_v36  ;;  %v1264_v1 = vmul.f32 %v3531_v47, %v3531_v47 }
 0x217   :  { %5033 = vst [vmem:[#allocation7_spill] sm:$0xff] %v3540_v15  ;;  %v3547_v2 = vmax.f32 %v775_v6, 0.0  ;;  %v1265_v36 = vmul.f32 %v3540_v15, %v3540_v15 }
 0x218   :  { %v1138_v49 = vadd.f32 %v1137_v46, %v3521_v25  ;;  %v1377_v32 = vadd.f32 %v1376_v27, %v1261_v35  ;;  %v785_v46 = vadd.f32 %v3515_v19, %v5036_v26  ;;  %v5037_v25 = vld [vmem:[#allocation11_spill] sm:$0xff]  ;;  %v3556_v22 = vmax.f32 %v780_v63, 0.0 }
 0x219   :  { %5035 = vst [vmem:[#allocation8_spill] sm:$0xff] %v3547_v2  ;;  %v790_v55 = vadd.f32 %v3515_v19, %v5037_v25  ;;  %v1266_v26 = vmul.f32 %v3547_v2, %v3547_v2 }
 0x21a   :  { %v1139_v44 = vadd.f32 %v1138_v49, %v3524_v16  ;;  %v1378_v59 = vadd.f32 %v1377_v32, %v1262_v0  ;;  %v5038_v32 = vld [vmem:[#allocation12_spill] sm:$0xff]  ;;  %v3563_v16 = vmax.f32 %v785_v46, 0.0  ;;  %v1267_v63 = vmul.f32 %v3556_v22, %v3556_v22 }
 0x21b   :  { %v795_v6 = vadd.f32 %v3515_v19, %v5038_v32  ;;  %v3566_v25 = vmax.f32 %v790_v55, 0.0 }
 0x21c   :  { %v1140_v27 = vadd.f32 %v1139_v44, %v3531_v47  ;;  %v1379_v35 = vadd.f32 %v1378_v59, %v1263_v10  ;;  %v5039_v59 = vld [vmem:[#allocation16_spill] sm:$0xff]  ;;  %v1268_v46 = vmul.f32 %v3563_v16, %v3563_v16 }
 0x21d   :  { %v3573_v32 = vmax.f32 %v795_v6, 0.0  ;;  %v810_v6 = vadd.f32 %v3515_v19, %v2937_v61 }
 0x21e   :  { %v1141_v0 = vadd.f32 %v1140_v27, %v3540_v15  ;;  %v1380_v49 = vadd.f32 %v1379_v35, %v1264_v1  ;;  %v800_v27 = vadd.f32 %v3515_v19, %v5039_v59 }
 0x220   :  { %v1142_v10 = vadd.f32 %v1141_v0, %v3547_v2  ;;  %v1381_v44 = vadd.f32 %v1380_v49, %v1265_v36  ;;  %v5040_v36 = vld [vmem:[#allocation19_spill] sm:$0xff]  ;;  %v1269_v49 = vmul.f32 %v3566_v25, %v3566_v25  ;;  %v3582_v2 = vmax.f32 %v800_v27, 0.0 }
 0x221   :  { %v805_v55 = vadd.f32 %v3515_v19, %v5040_v36  ;;  %v820_v27 = vadd.f32 %v3515_v19, %v2973_v9  ;;  %v825_v36 = vadd.f32 %v3515_v19, %v2991_v18 }
 0x222   :  { %v1143_v1 = vadd.f32 %v1142_v10, %v3556_v22  ;;  %v1382_v35 = vadd.f32 %v1381_v44, %v1266_v26  ;;  %v1270_v26 = vmul.f32 %v3573_v32, %v3573_v32 }
 0x223   :  { %v3608_v9 = vmax.f32 %v820_v27, 0.0  ;;  %v3615_v18 = vmax.f32 %v825_v36, 0.0  ;;  %v835_v27 = vadd.f32 %v3515_v19, %v3027_v21  ;;  %v845_v21 = vadd.f32 %v3515_v19, %v3063_v29 }
 0x224   :  { %v1144_v15 = vadd.f32 %v1143_v1, %v3563_v16  ;;  %v1383_v0 = vadd.f32 %v1382_v35, %v1267_v63  ;;  %v3590_v1 = vmax.f32 %v805_v55, 0.0  ;;  %v815_v35 = vadd.f32 %v3515_v19, %v2955_v52 }
 0x225   :  { %v1276_v36 = vmul.f32 %v3615_v18, %v3615_v18 }
 0x226   :  { %v1145_v59 = vadd.f32 %v1144_v15, %v3566_v25  ;;  %v1384_v10 = vadd.f32 %v1383_v0, %v1268_v46  ;;  %v1271_v46 = vmul.f32 %v3582_v2, %v3582_v2  ;;  %v3599_v0 = vmax.f32 %v810_v6, 0.0 }
 0x227   :  { %v1272_v52 = vmul.f32 %v3590_v1, %v3590_v1 }
 0x228   :  { %v1146_v44 = vadd.f32 %v1145_v59, %v3573_v32  ;;  %v1385_v63 = vadd.f32 %v1384_v10, %v1269_v49  ;;  %v3606_v59 = vmax.f32 %v815_v35, 0.0  ;;  %v1273_v6 = vmul.f32 %v3599_v0, %v3599_v0 }
 0x22a   :  { %v1147_v15 = vadd.f32 %v1146_v44, %v3582_v2  ;;  %v1386_v61 = vadd.f32 %v1385_v63, %v1270_v26  ;;  %v830_v26 = vadd.f32 %v3515_v19, %v3009_v57  ;;  %v1274_v35 = vmul.f32 %v3606_v59, %v3606_v59 }
 0x22b   :  { %v840_v57 = vadd.f32 %v3515_v19, %v3045_v13 }
 0x22c   :  { %v1387_v49 = vadd.f32 %v1386_v61, %v1271_v46  ;;  %v1148_v55 = vadd.f32 %v1147_v15, %v3590_v1  ;;  %v1275_v46 = vmul.f32 %v3608_v9, %v3608_v9 }
 0x22e   :  { %v1388_v10 = vadd.f32 %v1387_v49, %v1272_v52  ;;  %v1149_v44 = vadd.f32 %v1148_v55, %v3599_v0  ;;  %v3625_v55 = vmax.f32 %v830_v26, 0.0 }
 0x230   :  { %v1389_v63 = vadd.f32 %v1388_v10, %v1273_v6  ;;  %v1150_v15 = vadd.f32 %v1149_v44, %v3606_v59  ;;  %v3632_v44 = vmax.f32 %v835_v27, 0.0  ;;  %v850_v6 = vadd.f32 %v3515_v19, %v3081_v48 }
 0x231   :  { %v1277_v13 = vmul.f32 %v3625_v55, %v3625_v55 }
 0x232   :  { %v1390_v61 = vadd.f32 %v1389_v63, %v1274_v35  ;;  %v1151_v49 = vadd.f32 %v1150_v15, %v3608_v9  ;;  %v3641_v15 = vmax.f32 %v840_v57, 0.0  ;;  %v855_v35 = vadd.f32 %v3515_v19, %v3099_v60 }
 0x233   :  { %v1278_v29 = vmul.f32 %v3632_v44, %v3632_v44  ;;  %v3650_v48 = vmax.f32 %v850_v6, 0.0  ;;  %v865_v6 = vadd.f32 %v3515_v19, %v3135_v17  ;;  %v875_v17 = vadd.f32 %v3515_v19, %v3171_v40 }
 0x234   :  { %v1391_v52 = vadd.f32 %v1390_v61, %v1275_v46  ;;  %v1152_v10 = vadd.f32 %v1151_v49, %v3615_v18  ;;  %v3648_v61 = vmax.f32 %v845_v21, 0.0  ;;  %v1279_v57 = vmul.f32 %v3641_v15, %v3641_v15 }
 0x235   :  { %v3657_v60 = vmax.f32 %v855_v35, 0.0 }
 0x236   :  { %v1392_v63 = vadd.f32 %v1391_v52, %v1276_v36  ;;  %v1153_v26 = vadd.f32 %v1152_v10, %v3625_v55  ;;  %v860_v52 = vadd.f32 %v3515_v19, %v3117_v7  ;;  %v1280_v21 = vmul.f32 %v3648_v61, %v3648_v61 }
 0x237   :  { %v870_v7 = vadd.f32 %v3515_v19, %v3153_v28  ;;  %v1282_v35 = vmul.f32 %v3657_v60, %v3657_v60 }
 0x238   :  { %v1393_v46 = vadd.f32 %v1392_v63, %v1277_v13  ;;  %v1154_v27 = vadd.f32 %v1153_v26, %v3632_v44  ;;  %v1281_v26 = vmul.f32 %v3650_v48, %v3650_v48 }
 0x23a   :  { %v1394_v49 = vadd.f32 %v1393_v46, %v1278_v29  ;;  %v1155_v36 = vadd.f32 %v1154_v27, %v3641_v15  ;;  %v3667_v27 = vmax.f32 %v860_v52, 0.0 }
 0x23c   :  { %v1395_v10 = vadd.f32 %v1394_v49, %v1279_v57  ;;  %v1156_v63 = vadd.f32 %v1155_v36, %v3648_v61  ;;  %v3674_v36 = vmax.f32 %v865_v6, 0.0  ;;  %v880_v57 = vadd.f32 %v3515_v19, %v3189_v56 }
 0x23d   :  { %v1283_v28 = vmul.f32 %v3667_v27, %v3667_v27 }
 0x23e   :  { %v1396_v13 = vadd.f32 %v1395_v10, %v1280_v21  ;;  %v1157_v46 = vadd.f32 %v1156_v63, %v3650_v48  ;;  %v3683_v63 = vmax.f32 %v870_v7, 0.0  ;;  %v885_v21 = vadd.f32 %v3515_v19, %v3205_v53 }
 0x23f   :  { %v1284_v40 = vmul.f32 %v3674_v36, %v3674_v36  ;;  %v3692_v56 = vmax.f32 %v880_v57, 0.0  ;;  %v895_v57 = vadd.f32 %v3515_v19, %v3237_v37  ;;  %v905_v37 = vadd.f32 %v3515_v19, %v3268_v34 }
 0x240   :  { %v1397_v29 = vadd.f32 %v1396_v13, %v1281_v26  ;;  %v1158_v49 = vadd.f32 %v1157_v46, %v3657_v60  ;;  %v3690_v13 = vmax.f32 %v875_v17, 0.0  ;;  %v1285_v7 = vmul.f32 %v3683_v63, %v3683_v63 }
 0x241   :  { %v3699_v53 = vmax.f32 %v885_v21, 0.0 }
 0x242   :  { %v1398_v10 = vadd.f32 %v1397_v29, %v1282_v35  ;;  %v1159_v52 = vadd.f32 %v1158_v49, %v3667_v27  ;;  %v890_v29 = vadd.f32 %v3515_v19, %v3221_v62  ;;  %v1286_v17 = vmul.f32 %v3690_v13, %v3690_v13 }
 0x243   :  { %v900_v62 = vadd.f32 %v3515_v19, %v3253_v14  ;;  %v1288_v21 = vmul.f32 %v3699_v53, %v3699_v53 }
 0x244   :  { %v1399_v26 = vadd.f32 %v1398_v10, %v1283_v28  ;;  %v1160_v6 = vadd.f32 %v1159_v52, %v3674_v36  ;;  %v1287_v52 = vmul.f32 %v3692_v56, %v3692_v56 }
 0x246   :  { %v1400_v46 = vadd.f32 %v1399_v26, %v1284_v40  ;;  %v1161_v35 = vadd.f32 %v1160_v6, %v3683_v63  ;;  %v3709_v6 = vmax.f32 %v890_v29, 0.0 }
 0x248   :  { %v1401_v49 = vadd.f32 %v1400_v46, %v1285_v7  ;;  %v1162_v10 = vadd.f32 %v1161_v35, %v3690_v13  ;;  %5041 = vst [vmem:[#allocation9_spill] sm:$0xff] %v3709_v6  ;;  %v3716_v35 = vmax.f32 %v895_v57, 0.0  ;;  %v910_v7 = vadd.f32 %v3515_v19, %v3282_v24 }
 0x249   :  { %v1289_v14 = vmul.f32 %v3709_v6, %v3709_v6 }
 0x24a   :  { %v1402_v28 = vadd.f32 %v1401_v49, %v1286_v17  ;;  %v1163_v26 = vadd.f32 %v1162_v10, %v3692_v56  ;;  %5042 = vst [vmem:[#allocation10_spill] sm:$0xff] %v3716_v35  ;;  %v3725_v10 = vmax.f32 %v900_v62, 0.0  ;;  %v5044_v17 = vld [vmem:[#allocation64_spill] sm:$0xff]  ;;  %v1290_v34 = vmul.f32 %v3716_v35, %v3716_v35 }
 0x24b   :  { %v3734_v24 = vmax.f32 %v910_v7, 0.0 }
 0x24c   :  { %v1403_v40 = vadd.f32 %v1402_v28, %v1287_v52  ;;  %v1164_v46 = vadd.f32 %v1163_v26, %v3699_v53  ;;  %5043 = vst [vmem:[#allocation11_spill] sm:$0xff] %v3725_v10  ;;  %v915_v52 = vadd.f32 %v3515_v19, %v5044_v17  ;;  %v3732_v26 = vmax.f32 %v905_v37, 0.0 }
 0x24d   :  { %5046 = vst [vmem:[#allocation16_spill] sm:$0xff] %v3734_v24  ;;  %v1291_v62 = vmul.f32 %v3725_v10, %v3725_v10 }
 0x24e   :  { %v1404_v49 = vadd.f32 %v1403_v40, %v1288_v21  ;;  %v1165_v29 = vadd.f32 %v1164_v46, %v3709_v6  ;;  %5045 = vst [vmem:[#allocation12_spill] sm:$0xff] %v3732_v26  ;;  %v920_v46 = vadd.f32 %v3515_v19, %v3309_v42  ;;  %v3741_v17 = vmax.f32 %v915_v52, 0.0 }
 0x24f   :  { %v1292_v7 = vmul.f32 %v3732_v26, %v3732_v26  ;;  %v930_v42 = vadd.f32 %v3515_v19, %v3333_v4 }
 0x250   :  { %v1405_v28 = vadd.f32 %v1404_v49, %v1289_v14  ;;  %v1166_v57 = vadd.f32 %v1165_v29, %v3716_v35  ;;  %5047 = vst [vmem:[#allocation19_spill] sm:$0xff] %v3741_v17  ;;  %v5048_v49 = vld [vmem:[#allocation66_spill] sm:$0xff]  ;;  %v1294_v52 = vmul.f32 %v3741_v17, %v3741_v17 }
 0x251   :  { %v925_v29 = vadd.f32 %v3515_v19, %v5048_v49  ;;  %v935_v49 = vadd.f32 %v3515_v19, %v3346_v45 }
 0x252   :  { %v1406_v21 = vadd.f32 %v1405_v28, %v1290_v34  ;;  %v1167_v40 = vadd.f32 %v1166_v57, %v3725_v10  ;;  %v1293_v28 = vmul.f32 %v3734_v24, %v3734_v24  ;;  %v3751_v10 = vmax.f32 %v920_v46, 0.0 }
 0x254   :  { %v1407_v14 = vadd.f32 %v1406_v21, %v1291_v62  ;;  %v1168_v37 = vadd.f32 %v1167_v40, %v3732_v26  ;;  %5049 = vst [vmem:[#allocation64_spill] sm:$0xff] %v3751_v10  ;;  %v3757_v21 = vmax.f32 %v925_v29, 0.0  ;;  %v1295_v4 = vmul.f32 %v3751_v10, %v3751_v10 }
 0x256   :  { %v1408_v57 = vadd.f32 %v1407_v14, %v1292_v7  ;;  %v1169_v34 = vadd.f32 %v1168_v37, %v3734_v24  ;;  %5050 = vst [vmem:[#allocation66_spill] sm:$0xff] %v3757_v21  ;;  %v940_v14 = vadd.f32 %v3515_v19, %v3359_v23  ;;  %v3767_v7 = vmax.f32 %v930_v42, 0.0 }
 0x257   :  { %v1296_v29 = vmul.f32 %v3757_v21, %v3757_v21 }
 0x258   :  { %v1409_v40 = vadd.f32 %v1408_v57, %v1293_v28  ;;  %v1170_v62 = vadd.f32 %v1169_v34, %v3741_v17  ;;  %5051 = vst [vmem:[#allocation76_spill] sm:$0xff] %v3767_v7  ;;  %v3772_v34 = vmax.f32 %v935_v49, 0.0  ;;  %v3774_v45 = vmax.f32 %v940_v14, 0.0 }
 0x259   :  { %v1297_v19 = vmul.f32 %v3767_v7, %v3767_v7 }
 0x25a   :  { %v1410_v37 = vadd.f32 %v1409_v40, %v1294_v52  ;;  %v1171_v46 = vadd.f32 %v1170_v62, %v3751_v10  ;;  %5052 = vst [vmem:[#allocation77_spill] sm:$0xff] %v3772_v34  ;;  %v1298_v40 = vmul.f32 %v3772_v34, %v3772_v34  ;;  %v1299_v62 = vmul.f32 %v3774_v45, %v3774_v45 }
 0x25c   :  { %v1411_v28 = vadd.f32 %v1410_v37, %v1295_v4  ;;  %v1172_v57 = vadd.f32 %v1171_v46, %v3757_v21 }
 0x25e   :  { %v1412_v17 = vadd.f32 %v1411_v28, %v1296_v29  ;;  %v1173_v23 = vadd.f32 %v1172_v57, %v3767_v7 }
 0x260   :  { %v1413_v52 = vadd.f32 %v1412_v17, %v1297_v19  ;;  %v1174_v42 = vadd.f32 %v1173_v23, %v3772_v34 }
 0x262   :  { %v1414_v37 = vadd.f32 %v1413_v52, %v1298_v40  ;;  %v1175_v49 = vadd.f32 %v1174_v42, %v3774_v45  ;;  %v1433_v42 = vlaneseq }
 0x264   :  { %v1176_v14 = vrot.slane %v1175_v49, 4  ;;  %v1415_v46 = vadd.f32 %v1414_v37, %v1299_v62  ;;  %v3785_v40 = vshrl.u32 %v1433_v42, 7  ;;  %v1425_v62 = vld [vmem:[%s4867_s3] sm:$0x1] }
 0x266   :  { %v1177_v4 = vadd.f32 %v1176_v14, %v1175_v49  ;;  %v1416_v29 = vrot.slane %v1415_v46, 4  ;;  %v4946_v37 = vsub.s32 0, %v3785_v40  ;;  %v5054_v14 = vld [vmem:[#allocation13_spill] sm:$0xff] }
 0x268   :  { %v1178_v28 = vrot.slane %v1177_v4, 2  ;;  %v1417_v57 = vadd.f32 %v1416_v29, %v1415_v46 }
 0x26a   :  { %v1179_v21 = vadd.f32 %v1178_v28, %v1177_v4  ;;  %v1418_v7 = vrot.slane %v1417_v57, 2  ;;  %v5055_v4 = vld [vmem:[#allocation15_spill] sm:$0xff] }
 0x26c   :  { %v1180_v17 = vrot.slane %v1179_v21, 1  ;;  %v1419_v19 = vadd.f32 %v1418_v7, %v1417_v57  ;;  %v5057_v57 = vld [vmem:[#allocation18_spill] sm:$0xff] }
 0x26e   :  { %v1181_v23 = vadd.f32 %v1180_v17, %v1179_v21  ;;  %v1420_v10 = vrot.slane %v1419_v19, 1 }
 0x270   :  { %v1182_v24 = vmul.f32 0.0010683761, %v1181_v23  ;;  %v1421_v34 = vadd.f32 %v1420_v10, %v1419_v19  ;;  %v3794_v10 = vld [vmem:[%s4868_s4] sm:$0x1]  ;;  %v5058_v19 = vld [vmem:[#allocation20_spill] sm:$0xff] }
 0x272   :  { %v1422_v26 = vmul.f32 0.0010683761, %v1421_v34  ;;  %v1423_v35 = vmul.f32 %v1182_v24, %v1182_v24 }
 0x274   :  { %v1424_v6 = vsub.f32 %v1422_v26, %v1423_v35  ;;  %v5053_v26 = vld [vmem:[#allocation14_spill] sm:$0xff]  ;;  %v5069_v35 = vld [vmem:[#allocation27_spill] sm:$0xff] }
 0x276   :  { %v1426_v52 = vadd.f32 1e-05, %v1424_v6 }
 0x278   :  { %1865 = vrsqrt.f32 %v1426_v52  ;;  %v5059_v52 = vld [vmem:[#allocation21_spill] sm:$0xff] }
 0x285   :  { %v1866_v49 = vpop.eup %1865 }
 0x286   :  { %v1428_v7 = vmul.f32 %v1866_v49, %v1425_v62  ;;  %v5060_v62 = vld [vmem:[#allocation22_spill] sm:$0xff] }
 0x288   :  { %v3796_v21 = vmul.f32 %v1428_v7, %v1182_v24  ;;  %v3800_v6 = vrot.slane %v1428_v7, %v4946_v37  ;;  %v5056_v24 = vld [vmem:[#allocation17_spill] sm:$0xff]  ;;  %v5061_v7 = vld [vmem:[#allocation23_spill] sm:$0xff]  ;;  %v5071_v37 = vld [vmem:[#allocation28_spill] sm:$0xff] }
 0x28a   :  { %v3806_v34 = vmul.f32 %v3800_v6, %v5053_v26  ;;  %v3810_v46 = vmul.f32 %v3800_v6, %v5054_v14  ;;  %v3814_v29 = vmul.f32 %v3800_v6, %v5055_v4  ;;  %v3818_v28 = vmul.f32 %v3800_v6, %v5056_v24  ;;  %v5063_v14 = vld [vmem:[#allocation24_spill] sm:$0xff]  ;;  %v5065_v24 = vld [vmem:[#allocation25_spill] sm:$0xff] }
 0x28b   :  { %v3822_v17 = vmul.f32 %v3800_v6, %v5057_v57  ;;  %v3826_v23 = vmul.f32 %v3800_v6, %v5058_v19  ;;  %v3830_v42 = vmul.f32 %v3800_v6, %v5059_v52  ;;  %v3834_v49 = vmul.f32 %v3800_v6, %v5060_v62  ;;  %v5067_v19 = vld [vmem:[#allocation26_spill] sm:$0xff] }
 0x28c   :  { %v3838_v26 = vmul.f32 %v3800_v6, %v5061_v7  ;;  %v3842_v4 = vmul.f32 %v3800_v6, %v5063_v14  ;;  %v3846_v57 = vmul.f32 %v3800_v6, %v5065_v24  ;;  %v3850_v52 = vmul.f32 %v3800_v6, %v5067_v19 }
 0x28d   :  { %v3854_v62 = vmul.f32 %v3800_v6, %v5069_v35  ;;  %v3858_v7 = vmul.f32 %v3800_v6, %v5071_v37 }
 0x28e   :  { %5062 = vst [vmem:[#allocation14_spill] sm:$0xff] %v3838_v26  ;;  %5064 = vst [vmem:[#allocation13_spill] sm:$0xff] %v3842_v4  ;;  %v5073_v26 = vld [vmem:[#allocation29_spill] sm:$0xff]  ;;  %v5075_v4 = vld [vmem:[#allocation30_spill] sm:$0xff] }
 0x28f   :  { %5066 = vst [vmem:[#allocation15_spill] sm:$0xff] %v3846_v57  ;;  %5068 = vst [vmem:[#allocation17_spill] sm:$0xff] %v3850_v52  ;;  %v3862_v14 = vmul.f32 %v3800_v6, %v5073_v26  ;;  %v3866_v24 = vmul.f32 %v3800_v6, %v5075_v4  ;;  %v5077_v57 = vld [vmem:[#allocation31_spill] sm:$0xff]  ;;  %v5079_v52 = vld [vmem:[#allocation32_spill] sm:$0xff] }
 0x290   :  { %5070 = vst [vmem:[#allocation18_spill] sm:$0xff] %v3854_v62  ;;  %5072 = vst [vmem:[#allocation20_spill] sm:$0xff] %v3858_v7  ;;  %v3870_v19 = vmul.f32 %v3800_v6, %v5077_v57  ;;  %v3874_v35 = vmul.f32 %v3800_v6, %v5079_v52  ;;  %v5081_v62 = vld [vmem:[#allocation33_spill] sm:$0xff]  ;;  %v5083_v7 = vld [vmem:[#allocation34_spill] sm:$0xff] }
 0x291   :  { %5074 = vst [vmem:[#allocation21_spill] sm:$0xff] %v3862_v14  ;;  %5076 = vst [vmem:[#allocation22_spill] sm:$0xff] %v3866_v24  ;;  %v3878_v37 = vmul.f32 %v3800_v6, %v5081_v62  ;;  %v3882_v26 = vmul.f32 %v3800_v6, %v5083_v7  ;;  %v5085_v14 = vld [vmem:[#allocation35_spill] sm:$0xff]  ;;  %v5087_v24 = vld [vmem:[#allocation36_spill] sm:$0xff] }
 0x292   :  { %5078 = vst [vmem:[#allocation23_spill] sm:$0xff] %v3870_v19  ;;  %5080 = vst [vmem:[#allocation24_spill] sm:$0xff] %v3874_v35  ;;  %v3886_v4 = vmul.f32 %v3800_v6, %v5085_v14  ;;  %v3890_v57 = vmul.f32 %v3800_v6, %v5087_v24  ;;  %v5089_v19 = vld [vmem:[#allocation37_spill] sm:$0xff]  ;;  %v5091_v35 = vld [vmem:[#allocation38_spill] sm:$0xff] }
 0x293   :  { %5082 = vst [vmem:[#allocation25_spill] sm:$0xff] %v3878_v37  ;;  %5084 = vst [vmem:[#allocation26_spill] sm:$0xff] %v3882_v26  ;;  %v3894_v52 = vmul.f32 %v3800_v6, %v5089_v19  ;;  %v3898_v62 = vmul.f32 %v3800_v6, %v5091_v35  ;;  %v5093_v37 = vld [vmem:[#allocation39_spill] sm:$0xff]  ;;  %v5095_v26 = vld [vmem:[#allocation40_spill] sm:$0xff] }
 0x294   :  { %5086 = vst [vmem:[#allocation27_spill] sm:$0xff] %v3886_v4  ;;  %5088 = vst [vmem:[#allocation28_spill] sm:$0xff] %v3890_v57  ;;  %v3902_v7 = vmul.f32 %v3800_v6, %v5093_v37  ;;  %v3906_v14 = vmul.f32 %v3800_v6, %v5095_v26  ;;  %v5097_v4 = vld [vmem:[#allocation41_spill] sm:$0xff]  ;;  %v5099_v57 = vld [vmem:[#allocation42_spill] sm:$0xff] }
 0x295   :  { %5090 = vst [vmem:[#allocation29_spill] sm:$0xff] %v3894_v52  ;;  %5092 = vst [vmem:[#allocation30_spill] sm:$0xff] %v3898_v62  ;;  %v3910_v24 = vmul.f32 %v3800_v6, %v5097_v4  ;;  %v3914_v19 = vmul.f32 %v3800_v6, %v5099_v57  ;;  %v5101_v52 = vld [vmem:[#allocation43_spill] sm:$0xff]  ;;  %v5103_v62 = vld [vmem:[#allocation44_spill] sm:$0xff] }
 0x296   :  { %5094 = vst [vmem:[#allocation31_spill] sm:$0xff] %v3902_v7  ;;  %5096 = vst [vmem:[#allocation32_spill] sm:$0xff] %v3906_v14  ;;  %v3918_v35 = vmul.f32 %v3800_v6, %v5101_v52  ;;  %v3922_v37 = vmul.f32 %v3800_v6, %v5103_v62  ;;  %v5105_v7 = vld [vmem:[#allocation45_spill] sm:$0xff]  ;;  %v5107_v14 = vld [vmem:[#allocation46_spill] sm:$0xff] }
 0x297   :  { %5098 = vst [vmem:[#allocation33_spill] sm:$0xff] %v3910_v24  ;;  %5100 = vst [vmem:[#allocation34_spill] sm:$0xff] %v3914_v19  ;;  %v3926_v26 = vmul.f32 %v3800_v6, %v5105_v7  ;;  %v3930_v4 = vmul.f32 %v3800_v6, %v5107_v14  ;;  %v5109_v24 = vld [vmem:[#allocation47_spill] sm:$0xff]  ;;  %v5111_v19 = vld [vmem:[#allocation48_spill] sm:$0xff] }
 0x298   :  { %5102 = vst [vmem:[#allocation35_spill] sm:$0xff] %v3918_v35  ;;  %5104 = vst [vmem:[#allocation36_spill] sm:$0xff] %v3922_v37  ;;  %v3934_v57 = vmul.f32 %v3800_v6, %v5109_v24  ;;  %v3938_v52 = vmul.f32 %v3800_v6, %v5111_v19  ;;  %v5113_v35 = vld [vmem:[#allocation49_spill] sm:$0xff]  ;;  %v5115_v37 = vld [vmem:[#allocation50_spill] sm:$0xff] }
 0x299   :  { %5106 = vst [vmem:[#allocation37_spill] sm:$0xff] %v3926_v26  ;;  %5108 = vst [vmem:[#allocation38_spill] sm:$0xff] %v3930_v4  ;;  %v3942_v62 = vmul.f32 %v3800_v6, %v5113_v35  ;;  %v3946_v7 = vmul.f32 %v3800_v6, %v5115_v37  ;;  %v5117_v26 = vld [vmem:[#allocation51_spill] sm:$0xff]  ;;  %v5119_v4 = vld [vmem:[#allocation52_spill] sm:$0xff] }
 0x29a   :  { %5110 = vst [vmem:[#allocation39_spill] sm:$0xff] %v3934_v57  ;;  %5112 = vst [vmem:[#allocation40_spill] sm:$0xff] %v3938_v52  ;;  %v3950_v14 = vmul.f32 %v3800_v6, %v5117_v26  ;;  %v3954_v24 = vmul.f32 %v3800_v6, %v5119_v4  ;;  %v5121_v57 = vld [vmem:[#allocation53_spill] sm:$0xff]  ;;  %v5123_v52 = vld [vmem:[#allocation54_spill] sm:$0xff] }
 0x29b   :  { %5114 = vst [vmem:[#allocation41_spill] sm:$0xff] %v3942_v62  ;;  %5116 = vst [vmem:[#allocation42_spill] sm:$0xff] %v3946_v7  ;;  %v3958_v19 = vmul.f32 %v3800_v6, %v5121_v57  ;;  %v3962_v35 = vmul.f32 %v3800_v6, %v5123_v52  ;;  %v5125_v62 = vld [vmem:[#allocation55_spill] sm:$0xff]  ;;  %v5127_v7 = vld [vmem:[#allocation56_spill] sm:$0xff] }
 0x29c   :  { %5118 = vst [vmem:[#allocation43_spill] sm:$0xff] %v3950_v14  ;;  %5120 = vst [vmem:[#allocation44_spill] sm:$0xff] %v3954_v24  ;;  %v3966_v37 = vmul.f32 %v3800_v6, %v5125_v62  ;;  %v3970_v26 = vmul.f32 %v3800_v6, %v5127_v7  ;;  %v5129_v14 = vld [vmem:[#allocation57_spill] sm:$0xff]  ;;  %v5131_v24 = vld [vmem:[#allocation58_spill] sm:$0xff] }
 0x29d   :  { %5122 = vst [vmem:[#allocation45_spill] sm:$0xff] %v3958_v19  ;;  %5124 = vst [vmem:[#allocation46_spill] sm:$0xff] %v3962_v35  ;;  %v3974_v4 = vmul.f32 %v3800_v6, %v5129_v14  ;;  %v3978_v57 = vmul.f32 %v3800_v6, %v5131_v24  ;;  %v5132_v19 = vld [vmem:[#allocation59_spill] sm:$0xff]  ;;  %v5133_v35 = vld [vmem:[#allocation60_spill] sm:$0xff] }
 0x29e   :  { %5126 = vst [vmem:[#allocation47_spill] sm:$0xff] %v3966_v37  ;;  %5128 = vst [vmem:[#allocation48_spill] sm:$0xff] %v3970_v26  ;;  %v3982_v52 = vmul.f32 %v3800_v6, %v5132_v19  ;;  %v3986_v62 = vmul.f32 %v3800_v6, %v5133_v35  ;;  %v5135_v37 = vld [vmem:[#allocation61_spill] sm:$0xff]  ;;  %v5137_v26 = vld [vmem:[#allocation62_spill] sm:$0xff]  ;;  %v4002_v19 = vmul.f32 %v3800_v6, %v3301_v8 }
 0x29f   :  { %5130 = vst [vmem:[#allocation49_spill] sm:$0xff] %v3974_v4  ;;  %v3990_v7 = vmul.f32 %v3800_v6, %v5135_v37  ;;  %v3994_v14 = vmul.f32 %v3800_v6, %v5137_v26  ;;  %v5139_v4 = vld [vmem:[#allocation63_spill] sm:$0xff]  ;;  %v4006_v35 = vmul.f32 %v3800_v6, %v3307_v30 }
 0x2a0   :  { %5134 = vst [vmem:[#allocation50_spill] sm:$0xff] %v3986_v62  ;;  %v3998_v24 = vmul.f32 %v3800_v6, %v5139_v4  ;;  %5141 = vst [vmem:[#allocation54_spill] sm:$0xff] %v4002_v19  ;;  %v5142_v62 = vld [vmem:[#allocation65_spill] sm:$0xff]  ;;  %v5146_v19 = vld [vmem:[#allocation70_spill] sm:$0xff] }
 0x2a1   :  { %5136 = vst [vmem:[#allocation51_spill] sm:$0xff] %v3990_v7  ;;  %5138 = vst [vmem:[#allocation52_spill] sm:$0xff] %v3994_v14  ;;  %v4010_v37 = vmul.f32 %v3800_v6, %v5142_v62  ;;  %v5143_v7 = vld [vmem:[#allocation67_spill] sm:$0xff]  ;;  %v5144_v14 = vld [vmem:[#allocation68_spill] sm:$0xff]  ;;  %v4026_v30 = vmul.f32 %v3800_v6, %v5146_v19  ;;  %v4030_v62 = vmul.f32 %v3800_v6, %v3351_v39 }
 0x2a2   :  { %5140 = vst [vmem:[#allocation53_spill] sm:$0xff] %v3998_v24  ;;  %v4014_v26 = vmul.f32 %v3800_v6, %v5143_v7  ;;  %v4018_v4 = vmul.f32 %v3800_v6, %v5144_v14  ;;  %v5145_v24 = vld [vmem:[#allocation69_spill] sm:$0xff]  ;;  %v4034_v7 = vmul.f32 %v3800_v6, %v3364_v20  ;;  %v4038_v14 = vmul.f32 %v3800_v6, %v3377_v51 }
 0x2a3   :  { %v4022_v8 = vmul.f32 %v3800_v6, %v5145_v24  ;;  %v4042_v24 = vmul.f32 %v3800_v6, %v3372_v38  ;;  %v4046_v19 = vmul.f32 %v3800_v6, %v3381_v41  ;;  %v4050_v39 = vmul.f32 %v3800_v6, %v3390_v33 }
 0x2a4   :  { %v4054_v20 = vmul.f32 %v3800_v6, %v3393_v3  ;;  %v4058_v51 = vmul.f32 %v3800_v6, %v3400_v11  ;;  %v4062_v38 = vmul.f32 %v3800_v6, %v3409_v31  ;;  %v4066_v41 = vmul.f32 %v3800_v6, %v3416_v5 }
 0x2a5   :  { %v4070_v33 = vmul.f32 %v3800_v6, %v3425_v43  ;;  %v4074_v3 = vmul.f32 %v3800_v6, %v3432_v50  ;;  %v4078_v11 = vmul.f32 %v3800_v6, %v3435_v54  ;;  %v4082_v31 = vmul.f32 %v3800_v6, %v3442_v58 }
 0x2a6   :  { %5147 = vst [vmem:[#allocation55_spill] sm:$0xff] %v4066_v41  ;;  %v4086_v5 = vmul.f32 %v3800_v6, %v3451_v12  ;;  %v5153_v41 = vld [vmem:[#allocation71_spill] sm:$0xff] }
 0x2a7   :  { %5148 = vst [vmem:[#allocation56_spill] sm:$0xff] %v4070_v33  ;;  %5149 = vst [vmem:[#allocation57_spill] sm:$0xff] %v4074_v3  ;;  %v4090_v43 = vmul.f32 %v3800_v6, %v5153_v41  ;;  %v5155_v33 = vld [vmem:[#allocation72_spill] sm:$0xff]  ;;  %v5157_v3 = vld [vmem:[#allocation73_spill] sm:$0xff] }
 0x2a8   :  { %5150 = vst [vmem:[#allocation58_spill] sm:$0xff] %v4078_v11  ;;  %5151 = vst [vmem:[#allocation59_spill] sm:$0xff] %v4082_v31  ;;  %v4094_v50 = vmul.f32 %v3800_v6, %v5155_v33  ;;  %v4098_v54 = vmul.f32 %v3800_v6, %v5157_v3  ;;  %v5159_v11 = vld [vmem:[#allocation74_spill] sm:$0xff]  ;;  %v5161_v31 = vld [vmem:[#allocation75_spill] sm:$0xff] }
 0x2a9   :  { %5152 = vst [vmem:[#allocation60_spill] sm:$0xff] %v4086_v5  ;;  %5154 = vst [vmem:[#allocation61_spill] sm:$0xff] %v4090_v43  ;;  %v4102_v58 = vmul.f32 %v3800_v6, %v5159_v11  ;;  %v4106_v12 = vmul.f32 %v3800_v6, %v5161_v31  ;;  %v5162_v5 = vld [vmem:[#allocation2_spill] sm:$0xff]  ;;  %v5164_v43 = vld [vmem:[#allocation3_spill] sm:$0xff] }
 0x2aa   :  { %5156 = vst [vmem:[#allocation62_spill] sm:$0xff] %v4094_v50  ;;  %5158 = vst [vmem:[#allocation63_spill] sm:$0xff] %v4098_v54  ;;  %v4110_v41 = vmul.f32 %v3800_v6, %v5162_v5  ;;  %v4114_v33 = vmul.f32 %v3800_v6, %v5164_v43  ;;  %v5166_v50 = vld [vmem:[#allocation4_spill] sm:$0xff]  ;;  %v5167_v54 = vld [vmem:[#allocation5_spill] sm:$0xff]  ;;  %v4130_v5 = vmul.f32 %v3800_v6, %v3531_v47 }
 0x2ab   :  { %5160 = vst [vmem:[#allocation65_spill] sm:$0xff] %v4102_v58  ;;  %v4118_v3 = vmul.f32 %v3800_v6, %v5166_v50  ;;  %v4122_v11 = vmul.f32 %v3800_v6, %v5167_v54  ;;  %v5168_v58 = vld [vmem:[#allocation6_spill] sm:$0xff]  ;;  %v4142_v54 = vmul.f32 %v3800_v6, %v3556_v22  ;;  %v4150_v47 = vmul.f32 %v3800_v6, %v3566_v25 }
 0x2ac   :  { %5163 = vst [vmem:[#allocation67_spill] sm:$0xff] %v4110_v41  ;;  %5165 = vst [vmem:[#allocation68_spill] sm:$0xff] %v4114_v33  ;;  %v4126_v31 = vmul.f32 %v3800_v6, %v5168_v58  ;;  %v5169_v41 = vld [vmem:[#allocation7_spill] sm:$0xff]  ;;  %v5170_v33 = vld [vmem:[#allocation8_spill] sm:$0xff]  ;;  %v4146_v58 = vmul.f32 %v3800_v6, %v3563_v16  ;;  %v4162_v22 = vmul.f32 %v3800_v6, %v3590_v1 }
 0x2ad   :  { %v4134_v43 = vmul.f32 %v3800_v6, %v5169_v41  ;;  %v4138_v50 = vmul.f32 %v3800_v6, %v5170_v33  ;;  %v4154_v41 = vmul.f32 %v3800_v6, %v3573_v32  ;;  %v4158_v33 = vmul.f32 %v3800_v6, %v3582_v2 }
 0x2ae   :  { %v4166_v16 = vmul.f32 %v3800_v6, %v3599_v0  ;;  %v4170_v25 = vmul.f32 %v3800_v6, %v3606_v59  ;;  %v4174_v32 = vmul.f32 %v3800_v6, %v3608_v9  ;;  %v4178_v2 = vmul.f32 %v3800_v6, %v3615_v18 }
 0x2af   :  { %v4182_v1 = vmul.f32 %v3800_v6, %v3625_v55  ;;  %v4186_v0 = vmul.f32 %v3800_v6, %v3632_v44  ;;  %v4190_v59 = vmul.f32 %v3800_v6, %v3641_v15  ;;  %v4194_v9 = vmul.f32 %v3800_v6, %v3648_v61 }
 0x2b0   :  { %v4198_v18 = vmul.f32 %v3800_v6, %v3650_v48  ;;  %v4202_v55 = vmul.f32 %v3800_v6, %v3657_v60  ;;  %v4206_v44 = vmul.f32 %v3800_v6, %v3667_v27  ;;  %v4210_v15 = vmul.f32 %v3800_v6, %v3674_v36 }
 0x2b1   :  { %v4214_v61 = vmul.f32 %v3800_v6, %v3683_v63  ;;  %v4218_v48 = vmul.f32 %v3800_v6, %v3690_v13  ;;  %v4222_v60 = vmul.f32 %v3800_v6, %v3692_v56  ;;  %v4226_v27 = vmul.f32 %v3800_v6, %v3699_v53 }
 0x2b2   :  { %5171 = vst [vmem:[#allocation69_spill] sm:$0xff] %v4206_v44  ;;  %5172 = vst [vmem:[#allocation70_spill] sm:$0xff] %v4210_v15  ;;  %v5177_v44 = vld [vmem:[#allocation9_spill] sm:$0xff]  ;;  %v5179_v15 = vld [vmem:[#allocation10_spill] sm:$0xff] }
 0x2b3   :  { %5173 = vst [vmem:[#allocation71_spill] sm:$0xff] %v4214_v61  ;;  %5174 = vst [vmem:[#allocation72_spill] sm:$0xff] %v4218_v48  ;;  %v4230_v36 = vmul.f32 %v3800_v6, %v5177_v44  ;;  %v4234_v63 = vmul.f32 %v3800_v6, %v5179_v15  ;;  %v5181_v61 = vld [vmem:[#allocation11_spill] sm:$0xff]  ;;  %v5183_v48 = vld [vmem:[#allocation12_spill] sm:$0xff] }
 0x2b4   :  { %5175 = vst [vmem:[#allocation73_spill] sm:$0xff] %v4222_v60  ;;  %5176 = vst [vmem:[#allocation74_spill] sm:$0xff] %v4226_v27  ;;  %v4238_v13 = vmul.f32 %v3800_v6, %v5181_v61  ;;  %v4242_v56 = vmul.f32 %v3800_v6, %v5183_v48  ;;  %v5185_v60 = vld [vmem:[#allocation16_spill] sm:$0xff]  ;;  %v5187_v27 = vld [vmem:[#allocation19_spill] sm:$0xff]  ;;  %v5191_v61 = vsub.f32 %v3794_v10, %v3796_v21 }
 0x2b5   :  { %5178 = vst [vmem:[#allocation75_spill] sm:$0xff] %v4230_v36  ;;  %5180 = vst [vmem:[#allocation2_spill] sm:$0xff] %v4234_v63  ;;  %v4246_v53 = vmul.f32 %v3800_v6, %v5185_v60  ;;  %v4250_v44 = vmul.f32 %v3800_v6, %v5187_v27  ;;  %v5189_v36 = vld [vmem:[#allocation64_spill] sm:$0xff]  ;;  %v5190_v63 = vsub.s32 0, %v3785_v40  ;;  %v5192_v48 = vld [vmem:[#allocation66_spill] sm:$0xff]  ;;  %v4277_v40 = vmul.f32 %v3800_v6, %v3774_v45 }
 0x2b6   :  { %5182 = vst [vmem:[#allocation3_spill] sm:$0xff] %v4238_v13  ;;  %5184 = vst [vmem:[#allocation4_spill] sm:$0xff] %v4242_v56  ;;  %v4254_v15 = vmul.f32 %v3800_v6, %v5189_v36  ;;  %v4265_v56 = vmul.f32 %v3800_v6, %v5192_v48  ;;  %v5193_v60 = vld [vmem:[#allocation76_spill] sm:$0xff]  ;;  %v5194_v27 = vld [vmem:[#allocation77_spill] sm:$0xff] }
 0x2b7   :  { %5186 = vst [vmem:[#allocation5_spill] sm:$0xff] %v4246_v53  ;;  %5188 = vst [vmem:[#allocation6_spill] sm:$0xff] %v4250_v44  ;;  %v4261_v13 = vrot.slane %v5191_v61, %v5190_v63  ;;  %v4269_v53 = vmul.f32 %v3800_v6, %v5193_v60  ;;  %v4273_v44 = vmul.f32 %v3800_v6, %v5194_v27  ;;  %v5197_v60 = vld [vmem:[#allocation13_spill] sm:$0xff]  ;;  %v5198_v27 = vld [vmem:[#allocation15_spill] sm:$0xff] }
 0x2b8   :  { %5195 = vst [vmem:[#allocation7_spill] sm:$0xff] %v4277_v40  ;;  %v5199_v40 = vld [vmem:[#allocation17_spill] sm:$0xff] }
 0x2b9   :  { %v1561_v10 = vadd.f32 %v4261_v13, %v3806_v34  ;;  %v1562_v21 = vadd.f32 %v4261_v13, %v3810_v46  ;;  %v1563_v36 = vadd.f32 %v4261_v13, %v3814_v29  ;;  %v1564_v63 = vadd.f32 %v4261_v13, %v3818_v28  ;;  %v5196_v34 = vld [vmem:[#allocation14_spill] sm:$0xff] }
 0x2ba   :  { %v1565_v61 = vadd.f32 %v4261_v13, %v3822_v17  ;;  %v1566_v48 = vadd.f32 %v4261_v13, %v3826_v23  ;;  %v1567_v45 = vadd.f32 %v4261_v13, %v3830_v42  ;;  %v1568_v6 = vadd.f32 %v4261_v13, %v3834_v49  ;;  %v5200_v23 = vld [vmem:[#allocation18_spill] sm:$0xff]  ;;  %v5201_v49 = vld [vmem:[#allocation20_spill] sm:$0xff] }
 0x2bb   :  { %v1569_v46 = vadd.f32 %v4261_v13, %v5196_v34  ;;  %v1570_v29 = vadd.f32 %v4261_v13, %v5197_v60  ;;  %v1571_v28 = vadd.f32 %v4261_v13, %v5198_v27  ;;  %v1572_v17 = vadd.f32 %v4261_v13, %v5199_v40  ;;  %1678 = vst [vmem:[%s4869_s5] sm:$0xff] %v1561_v10  ;;  %v5202_v34 = vld [vmem:[#allocation21_spill] sm:$0xff]  ;;  %v5203_v60 = vld [vmem:[#allocation22_spill] sm:$0xff]  ;;  %v5205_v27 = vld [vmem:[#allocation24_spill] sm:$0xff] }
 0x2bc   :  { %1679 = vst [vmem:[%s4869_s5 + $0x8] sm:$0xff] %v1562_v21  ;;  %1680 = vst [vmem:[%s4869_s5 + $0x10] sm:$0xff] %v1563_v36  ;;  %v1573_v42 = vadd.f32 %v4261_v13, %v5200_v23  ;;  %v1574_v40 = vadd.f32 %v4261_v13, %v5201_v49  ;;  %v1575_v10 = vadd.f32 %v4261_v13, %v5202_v34  ;;  %v5204_v36 = vld [vmem:[#allocation23_spill] sm:$0xff]  ;;  %v5206_v49 = vld [vmem:[#allocation25_spill] sm:$0xff] }
 0x2bd   :  { %1681 = vst [vmem:[%s4869_s5 + $0x18] sm:$0xff] %v1564_v63  ;;  %v1576_v21 = vadd.f32 %v4261_v13, %v5203_v60  ;;  %1682 = vst [vmem:[%s4869_s5 + $0x20] sm:$0xff] %v1565_v61  ;;  %v1577_v63 = vadd.f32 %v4261_v13, %v5204_v36  ;;  %v1578_v23 = vadd.f32 %v4261_v13, %v5205_v27  ;;  %v5207_v34 = vld [vmem:[#allocation26_spill] sm:$0xff]  ;;  %v5209_v60 = vld [vmem:[#allocation28_spill] sm:$0xff] }
 0x2be   :  { %1683 = vst [vmem:[%s4869_s5 + $0x28] sm:$0xff] %v1566_v48  ;;  %1684 = vst [vmem:[%s4869_s5 + $0x30] sm:$0xff] %v1567_v45  ;;  %v1579_v61 = vadd.f32 %v4261_v13, %v5206_v49  ;;  %v1580_v48 = vadd.f32 %v4261_v13, %v5207_v34  ;;  %v5208_v45 = vld [vmem:[#allocation27_spill] sm:$0xff]  ;;  %v1582_v36 = vadd.f32 %v4261_v13, %v5209_v60  ;;  %v5210_v27 = vld [vmem:[#allocation29_spill] sm:$0xff] }
 0x2bf   :  { %1685 = vst [vmem:[%s4869_s5 + $0x38] sm:$0xff] %v1568_v6  ;;  %1686 = vst [vmem:[%s4869_s5 + $0x40] sm:$0xff] %v1569_v46  ;;  %v1581_v6 = vadd.f32 %v4261_v13, %v5208_v45  ;;  %v1583_v46 = vadd.f32 %v4261_v13, %v5210_v27  ;;  %v5211_v49 = vld [vmem:[#allocation30_spill] sm:$0xff]  ;;  %v5213_v34 = vld [vmem:[#allocation32_spill] sm:$0xff] }
 0x2c0   :  { %1687 = vst [vmem:[%s4869_s5 + $0x48] sm:$0xff] %v1570_v29  ;;  %1688 = vst [vmem:[%s4869_s5 + $0x50] sm:$0xff] %v1571_v28  ;;  %v1584_v29 = vadd.f32 %v4261_v13, %v5211_v49  ;;  %v5212_v28 = vld [vmem:[#allocation31_spill] sm:$0xff]  ;;  %v1586_v45 = vadd.f32 %v4261_v13, %v5213_v34  ;;  %v5214_v60 = vld [vmem:[#allocation33_spill] sm:$0xff] }
 0x2c1   :  { %1689 = vst [vmem:[%s4869_s5 + $0x58] sm:$0xff] %v1572_v17  ;;  %1690 = vst [vmem:[%s4869_s5 + $0x60] sm:$0xff] %v1573_v42  ;;  %v1585_v17 = vadd.f32 %v4261_v13, %v5212_v28  ;;  %v1587_v42 = vadd.f32 %v4261_v13, %v5214_v60  ;;  %v5215_v27 = vld [vmem:[#allocation34_spill] sm:$0xff]  ;;  %v5217_v49 = vld [vmem:[#allocation36_spill] sm:$0xff] }
 0x2c2   :  { %1691 = vst [vmem:[%s4869_s5 + $0x68] sm:$0xff] %v1574_v40  ;;  %1692 = vst [vmem:[%s4869_s5 + $0x70] sm:$0xff] %v1575_v10  ;;  %v1588_v40 = vadd.f32 %v4261_v13, %v5215_v27  ;;  %v5216_v10 = vld [vmem:[#allocation35_spill] sm:$0xff]  ;;  %v1590_v28 = vadd.f32 %v4261_v13, %v5217_v49  ;;  %v5218_v34 = vld [vmem:[#allocation37_spill] sm:$0xff] }
 0x2c3   :  { %1693 = vst [vmem:[%s4869_s5 + $0x78] sm:$0xff] %v1576_v21  ;;  %1694 = vst [vmem:[%s4869_s5 + $0x80] sm:$0xff] %v1577_v63  ;;  %v1589_v21 = vadd.f32 %v4261_v13, %v5216_v10  ;;  %v1591_v63 = vadd.f32 %v4261_v13, %v5218_v34  ;;  %v5219_v60 = vld [vmem:[#allocation38_spill] sm:$0xff]  ;;  %v5221_v27 = vld [vmem:[#allocation40_spill] sm:$0xff] }
 0x2c4   :  { %1695 = vst [vmem:[%s4869_s5 + $0x88] sm:$0xff] %v1578_v23  ;;  %1696 = vst [vmem:[%s4869_s5 + $0x90] sm:$0xff] %v1579_v61  ;;  %v1592_v23 = vadd.f32 %v4261_v13, %v5219_v60  ;;  %v5220_v61 = vld [vmem:[#allocation39_spill] sm:$0xff]  ;;  %v1594_v10 = vadd.f32 %v4261_v13, %v5221_v27  ;;  %v5222_v49 = vld [vmem:[#allocation41_spill] sm:$0xff] }
 0x2c5   :  { %1697 = vst [vmem:[%s4869_s5 + $0x98] sm:$0xff] %v1580_v48  ;;  %1698 = vst [vmem:[%s4869_s5 + $0xa0] sm:$0xff] %v1581_v6  ;;  %v1593_v48 = vadd.f32 %v4261_v13, %v5220_v61  ;;  %v1595_v6 = vadd.f32 %v4261_v13, %v5222_v49  ;;  %v5223_v34 = vld [vmem:[#allocation42_spill] sm:$0xff]  ;;  %v5225_v60 = vld [vmem:[#allocation44_spill] sm:$0xff] }
 0x2c6   :  { %1699 = vst [vmem:[%s4869_s5 + $0xa8] sm:$0xff] %v1582_v36  ;;  %1700 = vst [vmem:[%s4869_s5 + $0xb0] sm:$0xff] %v1583_v46  ;;  %v1596_v36 = vadd.f32 %v4261_v13, %v5223_v34  ;;  %v5224_v46 = vld [vmem:[#allocation43_spill] sm:$0xff]  ;;  %v1598_v61 = vadd.f32 %v4261_v13, %v5225_v60  ;;  %v5226_v27 = vld [vmem:[#allocation45_spill] sm:$0xff] }
 0x2c7   :  { %1701 = vst [vmem:[%s4869_s5 + $0xb8] sm:$0xff] %v1584_v29  ;;  %1702 = vst [vmem:[%s4869_s5 + $0xc0] sm:$0xff] %v1585_v17  ;;  %v1597_v29 = vadd.f32 %v4261_v13, %v5224_v46  ;;  %v1599_v17 = vadd.f32 %v4261_v13, %v5226_v27  ;;  %v5227_v49 = vld [vmem:[#allocation46_spill] sm:$0xff]  ;;  %v5229_v34 = vld [vmem:[#allocation48_spill] sm:$0xff] }
 0x2c8   :  { %1703 = vst [vmem:[%s4869_s5 + $0xc8] sm:$0xff] %v1586_v45  ;;  %1704 = vst [vmem:[%s4869_s5 + $0xd0] sm:$0xff] %v1587_v42  ;;  %v1600_v45 = vadd.f32 %v4261_v13, %v5227_v49  ;;  %v5228_v42 = vld [vmem:[#allocation47_spill] sm:$0xff]  ;;  %v1602_v46 = vadd.f32 %v4261_v13, %v5229_v34  ;;  %v5230_v60 = vld [vmem:[#allocation49_spill] sm:$0xff] }
 0x2c9   :  { %1705 = vst [vmem:[%s4869_s5 + $0xd8] sm:$0xff] %v1588_v40  ;;  %1706 = vst [vmem:[%s4869_s5 + $0xe0] sm:$0xff] %v1589_v21  ;;  %v1601_v40 = vadd.f32 %v4261_v13, %v5228_v42  ;;  %v1603_v21 = vadd.f32 %v4261_v13, %v5230_v60  ;;  %v5232_v27 = vld [vmem:[#allocation51_spill] sm:$0xff]  ;;  %v5233_v49 = vld [vmem:[#allocation52_spill] sm:$0xff] }
 0x2ca   :  { %1707 = vst [vmem:[%s4869_s5 + $0xe8] sm:$0xff] %v1590_v28  ;;  %1708 = vst [vmem:[%s4869_s5 + $0xf0] sm:$0xff] %v1591_v63  ;;  %v1604_v28 = vadd.f32 %v4261_v13, %v3978_v57  ;;  %v1605_v63 = vadd.f32 %v4261_v13, %v3982_v52  ;;  %v5231_v57 = vld [vmem:[#allocation50_spill] sm:$0xff]  ;;  %v5234_v52 = vld [vmem:[#allocation53_spill] sm:$0xff] }
 0x2cb   :  { %1709 = vst [vmem:[%s4869_s5 + $0xf8] sm:$0xff] %v1592_v23  ;;  %1710 = vst [vmem:[%s4869_s5 + $0x100] sm:$0xff] %v1593_v48  ;;  %v1606_v23 = vadd.f32 %v4261_v13, %v5231_v57  ;;  %v1607_v48 = vadd.f32 %v4261_v13, %v5232_v27  ;;  %v5238_v34 = vld [vmem:[#allocation57_spill] sm:$0xff] }
 0x2cc   :  { %1711 = vst [vmem:[%s4869_s5 + $0x108] sm:$0xff] %v1594_v10  ;;  %1712 = vst [vmem:[%s4869_s5 + $0x110] sm:$0xff] %v1595_v6  ;;  %v1608_v10 = vadd.f32 %v4261_v13, %v5233_v49  ;;  %v1609_v6 = vadd.f32 %v4261_v13, %v5234_v52 }
 0x2cd   :  { %1713 = vst [vmem:[%s4869_s5 + $0x118] sm:$0xff] %v1596_v36  ;;  %1714 = vst [vmem:[%s4869_s5 + $0x120] sm:$0xff] %v1597_v29  ;;  %v5235_v36 = vld [vmem:[#allocation54_spill] sm:$0xff]  ;;  %v1611_v29 = vadd.f32 %v4261_v13, %v4006_v35  ;;  %v1613_v35 = vadd.f32 %v4261_v13, %v4014_v26  ;;  %v1617_v26 = vadd.f32 %v4261_v13, %v4030_v62 }
 0x2ce   :  { %1715 = vst [vmem:[%s4869_s5 + $0x128] sm:$0xff] %v1598_v61  ;;  %1716 = vst [vmem:[%s4869_s5 + $0x130] sm:$0xff] %v1599_v17  ;;  %v1610_v42 = vadd.f32 %v4261_v13, %v5235_v36  ;;  %v1612_v61 = vadd.f32 %v4261_v13, %v4010_v37  ;;  %v1614_v37 = vadd.f32 %v4261_v13, %v4018_v4 }
 0x2cf   :  { %1717 = vst [vmem:[%s4869_s5 + $0x138] sm:$0xff] %v1600_v45  ;;  %1718 = vst [vmem:[%s4869_s5 + $0x140] sm:$0xff] %v1601_v40  ;;  %v1615_v17 = vadd.f32 %v4261_v13, %v4022_v8  ;;  %v1616_v45 = vadd.f32 %v4261_v13, %v4026_v30  ;;  %v1618_v4 = vadd.f32 %v4261_v13, %v4034_v7 }
 0x2d0   :  { %1719 = vst [vmem:[%s4869_s5 + $0x148] sm:$0xff] %v1602_v46  ;;  %1720 = vst [vmem:[%s4869_s5 + $0x150] sm:$0xff] %v1603_v21  ;;  %v1619_v8 = vadd.f32 %v4261_v13, %v4038_v14  ;;  %v1620_v30 = vadd.f32 %v4261_v13, %v4042_v24  ;;  %v1621_v62 = vadd.f32 %v4261_v13, %v4046_v19  ;;  %v5240_v21 = vld [vmem:[#allocation59_spill] sm:$0xff] }
 0x2d1   :  { %1721 = vst [vmem:[%s4869_s5 + $0x158] sm:$0xff] %v1604_v28  ;;  %1722 = vst [vmem:[%s4869_s5 + $0x160] sm:$0xff] %v1605_v63  ;;  %v1622_v7 = vadd.f32 %v4261_v13, %v4050_v39  ;;  %v1623_v14 = vadd.f32 %v4261_v13, %v4054_v20  ;;  %v1624_v24 = vadd.f32 %v4261_v13, %v4058_v51  ;;  %v5236_v39 = vld [vmem:[#allocation55_spill] sm:$0xff]  ;;  %v5237_v51 = vld [vmem:[#allocation56_spill] sm:$0xff] }
 0x2d2   :  { %1723 = vst [vmem:[%s4869_s5 + $0x168] sm:$0xff] %v1606_v23  ;;  %1724 = vst [vmem:[%s4869_s5 + $0x170] sm:$0xff] %v1607_v48  ;;  %v1625_v19 = vadd.f32 %v4261_v13, %v4062_v38  ;;  %v1626_v20 = vadd.f32 %v4261_v13, %v5236_v39  ;;  %v1627_v40 = vadd.f32 %v4261_v13, %v5237_v51  ;;  %v5239_v38 = vld [vmem:[#allocation58_spill] sm:$0xff]  ;;  %v5241_v63 = vld [vmem:[#allocation60_spill] sm:$0xff] }
 0x2d3   :  { %1725 = vst [vmem:[%s4869_s5 + $0x178] sm:$0xff] %v1608_v10  ;;  %1726 = vst [vmem:[%s4869_s5 + $0x180] sm:$0xff] %v1609_v6  ;;  %v1628_v46 = vadd.f32 %v4261_v13, %v5238_v34  ;;  %v1629_v60 = vadd.f32 %v4261_v13, %v5239_v38  ;;  %v1630_v28 = vadd.f32 %v4261_v13, %v5240_v21  ;;  %v5242_v23 = vld [vmem:[#allocation61_spill] sm:$0xff]  ;;  %v5243_v48 = vld [vmem:[#allocation62_spill] sm:$0xff] }
 0x2d4   :  { %1727 = vst [vmem:[%s4869_s5 + $0x188] sm:$0xff] %v1610_v42  ;;  %1728 = vst [vmem:[%s4869_s5 + $0x190] sm:$0xff] %v1611_v29  ;;  %v1631_v57 = vadd.f32 %v4261_v13, %v5241_v63  ;;  %v1632_v27 = vadd.f32 %v4261_v13, %v5242_v23  ;;  %v1633_v49 = vadd.f32 %v4261_v13, %v5243_v48  ;;  %v5244_v10 = vld [vmem:[#allocation63_spill] sm:$0xff]  ;;  %v5245_v6 = vld [vmem:[#allocation65_spill] sm:$0xff] }
 0x2d5   :  { %1729 = vst [vmem:[%s4869_s5 + $0x198] sm:$0xff] %v1612_v61  ;;  %1730 = vst [vmem:[%s4869_s5 + $0x1a0] sm:$0xff] %v1613_v35  ;;  %v1634_v52 = vadd.f32 %v4261_v13, %v5244_v10  ;;  %v1635_v36 = vadd.f32 %v4261_v13, %v5245_v6  ;;  %v1636_v42 = vadd.f32 %v4261_v13, %v4106_v12  ;;  %v5246_v29 = vld [vmem:[#allocation67_spill] sm:$0xff]  ;;  %v5247_v12 = vld [vmem:[#allocation68_spill] sm:$0xff] }
 0x2d6   :  { %1731 = vst [vmem:[%s4869_s5 + $0x1a8] sm:$0xff] %v1614_v37  ;;  %1732 = vst [vmem:[%s4869_s5 + $0x1b0] sm:$0xff] %v1615_v17  ;;  %v1637_v61 = vadd.f32 %v4261_v13, %v5246_v29  ;;  %v1638_v35 = vadd.f32 %v4261_v13, %v5247_v12  ;;  %v1639_v37 = vadd.f32 %v4261_v13, %v4118_v3  ;;  %v5254_v39 = vld [vmem:[#allocation75_spill] sm:$0xff]  ;;  %v5255_v51 = vld [vmem:[#allocation2_spill] sm:$0xff] }
 0x2d7   :  { %1733 = vst [vmem:[%s4869_s5 + $0x1b8] sm:$0xff] %v1616_v45  ;;  %1734 = vst [vmem:[%s4869_s5 + $0x1c0] sm:$0xff] %v1617_v26  ;;  %v1640_v17 = vadd.f32 %v4261_v13, %v4122_v11  ;;  %v1641_v3 = vadd.f32 %v4261_v13, %v4126_v31  ;;  %v1642_v11 = vadd.f32 %v4261_v13, %v4130_v5  ;;  %v5256_v34 = vld [vmem:[#allocation3_spill] sm:$0xff]  ;;  %v5257_v38 = vld [vmem:[#allocation4_spill] sm:$0xff] }
 0x2d8   :  { %1735 = vst [vmem:[%s4869_s5 + $0x1c8] sm:$0xff] %v1618_v4  ;;  %1736 = vst [vmem:[%s4869_s5 + $0x1d0] sm:$0xff] %v1619_v8  ;;  %v1643_v45 = vadd.f32 %v4261_v13, %v4134_v43  ;;  %v1644_v26 = vadd.f32 %v4261_v13, %v4138_v50  ;;  %v1645_v31 = vadd.f32 %v4261_v13, %v4142_v54  ;;  %v5250_v4 = vld [vmem:[#allocation71_spill] sm:$0xff]  ;;  %v5258_v21 = vld [vmem:[#allocation5_spill] sm:$0xff] }
 0x2d9   :  { %1737 = vst [vmem:[%s4869_s5 + $0x1d8] sm:$0xff] %v1620_v30  ;;  %1738 = vst [vmem:[%s4869_s5 + $0x1e0] sm:$0xff] %v1621_v62  ;;  %v1646_v5 = vadd.f32 %v4261_v13, %v4146_v58  ;;  %v1647_v43 = vadd.f32 %v4261_v13, %v4150_v47  ;;  %v1648_v50 = vadd.f32 %v4261_v13, %v4154_v41  ;;  %v5251_v30 = vld [vmem:[#allocation72_spill] sm:$0xff]  ;;  %v5259_v63 = vld [vmem:[#allocation6_spill] sm:$0xff] }
 0x2da   :  { %1739 = vst [vmem:[%s4869_s5 + $0x1e8] sm:$0xff] %v1622_v7  ;;  %1740 = vst [vmem:[%s4869_s5 + $0x1f0] sm:$0xff] %v1623_v14  ;;  %v1649_v54 = vadd.f32 %v4261_v13, %v4158_v33  ;;  %v1650_v58 = vadd.f32 %v4261_v13, %v4162_v22  ;;  %v1651_v47 = vadd.f32 %v4261_v13, %v4166_v16  ;;  %v5252_v7 = vld [vmem:[#allocation73_spill] sm:$0xff] }
 0x2db   :  { %1741 = vst [vmem:[%s4869_s5 + $0x1f8] sm:$0xff] %v1624_v24  ;;  %1742 = vst [vmem:[%s4869_s5 + $0x200] sm:$0xff] %v1625_v19  ;;  %v1652_v41 = vadd.f32 %v4261_v13, %v4170_v25  ;;  %v1653_v33 = vadd.f32 %v4261_v13, %v4174_v32  ;;  %v1654_v22 = vadd.f32 %v4261_v13, %v4178_v2  ;;  %v5253_v24 = vld [vmem:[#allocation74_spill] sm:$0xff] }
 0x2dc   :  { %1743 = vst [vmem:[%s4869_s5 + $0x208] sm:$0xff] %v1626_v20  ;;  %1744 = vst [vmem:[%s4869_s5 + $0x210] sm:$0xff] %v1627_v40  ;;  %v1655_v16 = vadd.f32 %v4261_v13, %v4182_v1  ;;  %v1656_v25 = vadd.f32 %v4261_v13, %v4186_v0  ;;  %v1657_v32 = vadd.f32 %v4261_v13, %v4190_v59  ;;  %v5248_v59 = vld [vmem:[#allocation69_spill] sm:$0xff] }
 0x2dd   :  { %1745 = vst [vmem:[%s4869_s5 + $0x218] sm:$0xff] %v1628_v46  ;;  %1746 = vst [vmem:[%s4869_s5 + $0x220] sm:$0xff] %v1629_v60  ;;  %v1658_v2 = vadd.f32 %v4261_v13, %v4194_v9  ;;  %v1659_v1 = vadd.f32 %v4261_v13, %v4198_v18  ;;  %v1660_v0 = vadd.f32 %v4261_v13, %v4202_v55  ;;  %v5249_v18 = vld [vmem:[#allocation70_spill] sm:$0xff] }
 0x2de   :  { %1747 = vst [vmem:[%s4869_s5 + $0x228] sm:$0xff] %v1630_v28  ;;  %1748 = vst [vmem:[%s4869_s5 + $0x230] sm:$0xff] %v1631_v57  ;;  %v1661_v9 = vadd.f32 %v4261_v13, %v5248_v59  ;;  %v1662_v55 = vadd.f32 %v4261_v13, %v5249_v18  ;;  %v1663_v8 = vadd.f32 %v4261_v13, %v5250_v4 }
 0x2df   :  { %1749 = vst [vmem:[%s4869_s5 + $0x238] sm:$0xff] %v1632_v27  ;;  %1750 = vst [vmem:[%s4869_s5 + $0x240] sm:$0xff] %v1633_v49  ;;  %v1664_v62 = vadd.f32 %v4261_v13, %v5251_v30  ;;  %v1665_v14 = vadd.f32 %v4261_v13, %v5252_v7  ;;  %v1666_v19 = vadd.f32 %v4261_v13, %v5253_v24 }
 0x2e0   :  { %1751 = vst [vmem:[%s4869_s5 + $0x248] sm:$0xff] %v1634_v52  ;;  %1752 = vst [vmem:[%s4869_s5 + $0x250] sm:$0xff] %v1635_v36  ;;  %v1667_v20 = vadd.f32 %v4261_v13, %v5254_v39  ;;  %v1668_v40 = vadd.f32 %v4261_v13, %v5255_v51  ;;  %v1669_v46 = vadd.f32 %v4261_v13, %v5256_v34 }
 0x2e1   :  { %1753 = vst [vmem:[%s4869_s5 + $0x258] sm:$0xff] %v1636_v42  ;;  %1754 = vst [vmem:[%s4869_s5 + $0x260] sm:$0xff] %v1637_v61  ;;  %v1670_v60 = vadd.f32 %v4261_v13, %v5257_v38  ;;  %v1671_v28 = vadd.f32 %v4261_v13, %v5258_v21  ;;  %v1672_v57 = vadd.f32 %v4261_v13, %v5259_v63 }
 0x2e2   :  { %1755 = vst [vmem:[%s4869_s5 + $0x268] sm:$0xff] %v1638_v35  ;;  %1756 = vst [vmem:[%s4869_s5 + $0x270] sm:$0xff] %v1639_v37  ;;  %v1673_v23 = vadd.f32 %v4261_v13, %v4254_v15  ;;  %v1674_v27 = vadd.f32 %v4261_v13, %v4265_v56  ;;  %v1675_v48 = vadd.f32 %v4261_v13, %v4269_v53  ;;  %v5260_v56 = vld [vmem:[#allocation7_spill] sm:$0xff] }
 0x2e3   :  { %1757 = vst [vmem:[%s4869_s5 + $0x278] sm:$0xff] %v1640_v17  ;;  %1758 = vst [vmem:[%s4869_s5 + $0x280] sm:$0xff] %v1641_v3  ;;  %v1676_v49 = vadd.f32 %v4261_v13, %v4273_v44  ;;  %v1677_v53 = vadd.f32 %v4261_v13, %v5260_v56 }
 0x2e4   :  { %1759 = vst [vmem:[%s4869_s5 + $0x288] sm:$0xff] %v1642_v11  ;;  %1760 = vst [vmem:[%s4869_s5 + $0x290] sm:$0xff] %v1643_v45 }
 0x2e5   :  { %1761 = vst [vmem:[%s4869_s5 + $0x298] sm:$0xff] %v1644_v26  ;;  %1762 = vst [vmem:[%s4869_s5 + $0x2a0] sm:$0xff] %v1645_v31 }
 0x2e6   :  { %1763 = vst [vmem:[%s4869_s5 + $0x2a8] sm:$0xff] %v1646_v5  ;;  %1764 = vst [vmem:[%s4869_s5 + $0x2b0] sm:$0xff] %v1647_v43 }
 0x2e7   :  { %1765 = vst [vmem:[%s4869_s5 + $0x2b8] sm:$0xff] %v1648_v50  ;;  %1766 = vst [vmem:[%s4869_s5 + $0x2c0] sm:$0xff] %v1649_v54 }
 0x2e8   :  { %1767 = vst [vmem:[%s4869_s5 + $0x2c8] sm:$0xff] %v1650_v58  ;;  %1768 = vst [vmem:[%s4869_s5 + $0x2d0] sm:$0xff] %v1651_v47 }
 0x2e9   :  { %1769 = vst [vmem:[%s4869_s5 + $0x2d8] sm:$0xff] %v1652_v41  ;;  %1770 = vst [vmem:[%s4869_s5 + $0x2e0] sm:$0xff] %v1653_v33 }
 0x2ea   :  { %1771 = vst [vmem:[%s4869_s5 + $0x2e8] sm:$0xff] %v1654_v22  ;;  %1772 = vst [vmem:[%s4869_s5 + $0x2f0] sm:$0xff] %v1655_v16 }
 0x2eb   :  { %1773 = vst [vmem:[%s4869_s5 + $0x2f8] sm:$0xff] %v1656_v25  ;;  %1774 = vst [vmem:[%s4869_s5 + $0x300] sm:$0xff] %v1657_v32 }
 0x2ec   :  { %1775 = vst [vmem:[%s4869_s5 + $0x308] sm:$0xff] %v1658_v2  ;;  %1776 = vst [vmem:[%s4869_s5 + $0x310] sm:$0xff] %v1659_v1 }
 0x2ed   :  { %1777 = vst [vmem:[%s4869_s5 + $0x318] sm:$0xff] %v1660_v0  ;;  %1778 = vst [vmem:[%s4869_s5 + $0x320] sm:$0xff] %v1661_v9 }
 0x2ee   :  { %1779 = vst [vmem:[%s4869_s5 + $0x328] sm:$0xff] %v1662_v55  ;;  %1780 = vst [vmem:[%s4869_s5 + $0x330] sm:$0xff] %v1663_v8 }
 0x2ef   :  { %1781 = vst [vmem:[%s4869_s5 + $0x338] sm:$0xff] %v1664_v62  ;;  %1782 = vst [vmem:[%s4869_s5 + $0x340] sm:$0xff] %v1665_v14 }
 0x2f0   :  { %1783 = vst [vmem:[%s4869_s5 + $0x348] sm:$0xff] %v1666_v19  ;;  %1784 = vst [vmem:[%s4869_s5 + $0x350] sm:$0xff] %v1667_v20 }
 0x2f1   :  { %1785 = vst [vmem:[%s4869_s5 + $0x358] sm:$0xff] %v1668_v40  ;;  %1786 = vst [vmem:[%s4869_s5 + $0x360] sm:$0xff] %v1669_v46 }
 0x2f2   :  { %1787 = vst [vmem:[%s4869_s5 + $0x368] sm:$0xff] %v1670_v60  ;;  %1788 = vst [vmem:[%s4869_s5 + $0x370] sm:$0xff] %v1671_v28 }
 0x2f3   :  { %1789 = vst [vmem:[%s4869_s5 + $0x378] sm:$0xff] %v1672_v57  ;;  %1790 = vst [vmem:[%s4869_s5 + $0x380] sm:$0xff] %v1673_v23 }
 0x2f4   :  { %1791 = vst [vmem:[%s4869_s5 + $0x388] sm:$0xff] %v1674_v27  ;;  %1792 = vst [vmem:[%s4869_s5 + $0x390] sm:$0xff] %v1675_v48 }
 0x2f5   :  { %1793 = vst [vmem:[%s4869_s5 + $0x398] sm:$0xff] %v1676_v49  ;;  %1794 = vst [vmem:[%s4869_s5 + $0x3a0] sm:$0xff] %v1677_v53 }

// kernel: forward.5
= control target key start
LH: loop header
LB: loop body
LE: loop exit
PB: predicated region body
PF: predicated region fallthrough
CT: control target
= control target key end

     0   :  { %v2738_v0 = vmov 0.0   ;;  %vm2541_vm0 = vcmask 1041408   ;;  %s5813_s1 = inlined_call_operand.vmem [shape: f32[2048,128], index: 1, kind: input, shape index: {}]   ;;  %s5814_s0 = inlined_call_operand.vmem [shape: f32[234,2048], index: 0, kind: input, shape index: {}]   ;;  %s5815_s2 = inlined_call_operand.vmem [shape: f32[1,128], index: 2, kind: input, shape index: {}]   ;;  %s5816_s3 = inlined_call_operand.vmem [shape: f32[1,128], index: 3, kind: input, shape index: {}]   ;;  %s5817_s4 = inlined_call_operand.vmem [shape: f32[1,128], index: 4, kind: input, shape index: {}]   ;;  %s5818_s5 = inlined_call_operand.vmem [shape: f32[234,128], index: 5, kind: output, shape index: {}]  }
   0x1   :  { %763 = vmatprep.subr.mxu0 %v2738_v0  ;;  %v515_v1 = vld [vmem:[%s5813_s1 + $0x78] sm:$0xff]  ;;  %978 = vmatprep.subr.mxu1 %v2738_v0  ;;  %v514_v3 = vld [vmem:[%s5813_s1 + $0x70] sm:$0xff]  ;;  %v513_v5 = vld [vmem:[%s5813_s1 + $0x68] sm:$0xff] }
   0x2   :  { %v547_v2 = vld [vmem:[%s5813_s1 + $0x178] sm:$0xff]  ;;  %764 = vmatpush1.msra.mxu0 %v515_v1  ;;  %v546_v4 = vld [vmem:[%s5813_s1 + $0x170] sm:$0xff]  ;;  %v545_v6 = vld [vmem:[%s5813_s1 + $0x168] sm:$0xff] }
   0x3   :  { %979 = vmatpush1.msra.mxu1 %v547_v2  ;;  %765 = vmatprep.subr.mxu0 %v2738_v0  ;;  %v512_v7 = vld [vmem:[%s5813_s1 + $0x60] sm:$0xff]  ;;  %v511_v9 = vld [vmem:[%s5813_s1 + $0x58] sm:$0xff]  ;;  %v510_v11 = vld [vmem:[%s5813_s1 + $0x50] sm:$0xff] }
   0x4   :  { %980 = vmatprep.subr.mxu1 %v2738_v0  ;;  %766 = vmatpush1.msra.mxu0 %v514_v3  ;;  %v544_v8 = vld [vmem:[%s5813_s1 + $0x160] sm:$0xff]  ;;  %v543_v10 = vld [vmem:[%s5813_s1 + $0x158] sm:$0xff]  ;;  %v542_v12 = vld [vmem:[%s5813_s1 + $0x150] sm:$0xff] }
   0x5   :  { %981 = vmatpush1.msra.mxu1 %v546_v4  ;;  %767 = vmatprep.subr.mxu0 %v2738_v0  ;;  %v509_v13 = vld [vmem:[%s5813_s1 + $0x48] sm:$0xff]  ;;  %v508_v15 = vld [vmem:[%s5813_s1 + $0x40] sm:$0xff]  ;;  %v507_v17 = vld [vmem:[%s5813_s1 + $0x38] sm:$0xff] }
   0x6   :  { %982 = vmatprep.subr.mxu1 %v2738_v0  ;;  %768 = vmatpush1.msra.mxu0 %v513_v5  ;;  %v541_v14 = vld [vmem:[%s5813_s1 + $0x148] sm:$0xff]  ;;  %v540_v16 = vld [vmem:[%s5813_s1 + $0x140] sm:$0xff]  ;;  %v539_v18 = vld [vmem:[%s5813_s1 + $0x138] sm:$0xff] }
   0x7   :  { %983 = vmatpush1.msra.mxu1 %v545_v6  ;;  %769 = vmatprep.subr.mxu0 %v2738_v0  ;;  %v506_v19 = vld [vmem:[%s5813_s1 + $0x30] sm:$0xff]  ;;  %v505_v21 = vld [vmem:[%s5813_s1 + $0x28] sm:$0xff]  ;;  %v504_v23 = vld [vmem:[%s5813_s1 + $0x20] sm:$0xff] }
   0x8   :  { %984 = vmatprep.subr.mxu1 %v2738_v0  ;;  %770 = vmatpush1.msra.mxu0 %v512_v7  ;;  %v538_v20 = vld [vmem:[%s5813_s1 + $0x130] sm:$0xff]  ;;  %v537_v22 = vld [vmem:[%s5813_s1 + $0x128] sm:$0xff]  ;;  %v536_v24 = vld [vmem:[%s5813_s1 + $0x120] sm:$0xff] }
   0x9   :  { %985 = vmatpush1.msra.mxu1 %v544_v8  ;;  %771 = vmatprep.subr.mxu0 %v2738_v0  ;;  %v503_v25 = vld [vmem:[%s5813_s1 + $0x18] sm:$0xff]  ;;  %v502_v27 = vld [vmem:[%s5813_s1 + $0x10] sm:$0xff]  ;;  %v501_v29 = vld [vmem:[%s5813_s1 + $0x8] sm:$0xff] }
   0xa   :  { %986 = vmatprep.subr.mxu1 %v2738_v0  ;;  %772 = vmatpush1.msra.mxu0 %v511_v9  ;;  %v535_v26 = vld [vmem:[%s5813_s1 + $0x118] sm:$0xff]  ;;  %v534_v28 = vld [vmem:[%s5813_s1 + $0x110] sm:$0xff]  ;;  %v533_v30 = vld [vmem:[%s5813_s1 + $0x108] sm:$0xff] }
   0xb   :  { %987 = vmatpush1.msra.mxu1 %v543_v10  ;;  %773 = vmatprep.subr.mxu0 %v2738_v0  ;;  %v500_v31 = vld [vmem:[%s5813_s1] sm:$0xff]  ;;  %v531_v33 = vld [vmem:[%s5813_s1 + $0xf8] sm:$0xff]  ;;  %v530_v35 = vld [vmem:[%s5813_s1 + $0xf0] sm:$0xff] }
   0xc   :  { %988 = vmatprep.subr.mxu1 %v2738_v0  ;;  %774 = vmatpush1.msra.mxu0 %v510_v11  ;;  %v532_v32 = vld [vmem:[%s5813_s1 + $0x100] sm:$0xff]  ;;  %v563_v34 = vld [vmem:[%s5813_s1 + $0x1f8] sm:$0xff]  ;;  %v562_v36 = vld [vmem:[%s5813_s1 + $0x1f0] sm:$0xff] }
   0xd   :  { %989 = vmatpush1.msra.mxu1 %v542_v12  ;;  %775 = vmatprep.subr.mxu0 %v2738_v0  ;;  %v529_v37 = vld [vmem:[%s5813_s1 + $0xe8] sm:$0xff]  ;;  %v528_v39 = vld [vmem:[%s5813_s1 + $0xe0] sm:$0xff]  ;;  %v527_v41 = vld [vmem:[%s5813_s1 + $0xd8] sm:$0xff] }
   0xe   :  { %990 = vmatprep.subr.mxu1 %v2738_v0  ;;  %776 = vmatpush1.msra.mxu0 %v509_v13  ;;  %v561_v38 = vld [vmem:[%s5813_s1 + $0x1e8] sm:$0xff]  ;;  %v560_v40 = vld [vmem:[%s5813_s1 + $0x1e0] sm:$0xff]  ;;  %v559_v42 = vld [vmem:[%s5813_s1 + $0x1d8] sm:$0xff] }
   0xf   :  { %991 = vmatpush1.msra.mxu1 %v541_v14  ;;  %777 = vmatprep.subr.mxu0 %v2738_v0  ;;  %v526_v43 = vld [vmem:[%s5813_s1 + $0xd0] sm:$0xff]  ;;  %v525_v45 = vld [vmem:[%s5813_s1 + $0xc8] sm:$0xff]  ;;  %v524_v47 = vld [vmem:[%s5813_s1 + $0xc0] sm:$0xff] }
  0x10   :  { %992 = vmatprep.subr.mxu1 %v2738_v0  ;;  %778 = vmatpush1.msra.mxu0 %v508_v15  ;;  %v558_v44 = vld [vmem:[%s5813_s1 + $0x1d0] sm:$0xff]  ;;  %v557_v46 = vld [vmem:[%s5813_s1 + $0x1c8] sm:$0xff]  ;;  %v556_v48 = vld [vmem:[%s5813_s1 + $0x1c0] sm:$0xff] }
  0x11   :  { %993 = vmatpush1.msra.mxu1 %v540_v16  ;;  %779 = vmatprep.subr.mxu0 %v2738_v0  ;;  %v523_v49 = vld [vmem:[%s5813_s1 + $0xb8] sm:$0xff]  ;;  %v522_v51 = vld [vmem:[%s5813_s1 + $0xb0] sm:$0xff]  ;;  %v521_v53 = vld [vmem:[%s5813_s1 + $0xa8] sm:$0xff] }
  0x12   :  { %994 = vmatprep.subr.mxu1 %v2738_v0  ;;  %780 = vmatpush1.msra.mxu0 %v507_v17  ;;  %v555_v50 = vld [vmem:[%s5813_s1 + $0x1b8] sm:$0xff]  ;;  %v554_v52 = vld [vmem:[%s5813_s1 + $0x1b0] sm:$0xff]  ;;  %v553_v54 = vld [vmem:[%s5813_s1 + $0x1a8] sm:$0xff] }
  0x13   :  { %995 = vmatpush1.msra.mxu1 %v539_v18  ;;  %781 = vmatprep.subr.mxu0 %v2738_v0  ;;  %v520_v55 = vld [vmem:[%s5813_s1 + $0xa0] sm:$0xff]  ;;  %v519_v57 = vld [vmem:[%s5813_s1 + $0x98] sm:$0xff]  ;;  %v518_v59 = vld [vmem:[%s5813_s1 + $0x90] sm:$0xff] }
  0x14   :  { %996 = vmatprep.subr.mxu1 %v2738_v0  ;;  %782 = vmatpush1.msra.mxu0 %v506_v19  ;;  %v552_v56 = vld [vmem:[%s5813_s1 + $0x1a0] sm:$0xff]  ;;  %v551_v58 = vld [vmem:[%s5813_s1 + $0x198] sm:$0xff]  ;;  %v550_v60 = vld [vmem:[%s5813_s1 + $0x190] sm:$0xff] }
  0x15   :  { %997 = vmatpush1.msra.mxu1 %v538_v20  ;;  %783 = vmatprep.subr.mxu0 %v2738_v0  ;;  %v517_v61 = vld [vmem:[%s5813_s1 + $0x88] sm:$0xff]  ;;  %v516_v1 = vld [vmem:[%s5813_s1 + $0x80] sm:$0xff]  ;;  %v23_v4 = vld [vmem:[%s5814_s0 + $0x18] sm:$0xff] }
  0x16   :  { %998 = vmatprep.subr.mxu1 %v2738_v0  ;;  %784 = vmatpush1.msra.mxu0 %v505_v21  ;;  %v549_v62 = vld [vmem:[%s5813_s1 + $0x188] sm:$0xff]  ;;  %v20_v2 = vld [vmem:[%s5814_s0] sm:$0xff]  ;;  %v22_v5 = vld [vmem:[%s5814_s0 + $0x10] sm:$0xff] }
  0x17   :  { %999 = vmatpush1.msra.mxu1 %v537_v22  ;;  %785 = vmatprep.subr.mxu0 %v2738_v0  ;;  %v21_v63 = vld [vmem:[%s5814_s0 + $0x8] sm:$0xff]  ;;  %v548_v3 = vld [vmem:[%s5813_s1 + $0x180] sm:$0xff]  ;;  %v579_v6 = vld [vmem:[%s5813_s1 + $0x278] sm:$0xff] }
  0x18   :  { %1000 = vmatprep.subr.mxu1 %v2738_v0  ;;  %786 = vmatpush1.msra.mxu0 %v504_v23  ;;  %v37_v7 = vld [vmem:[%s5814_s0 + $0x88] sm:$0xff]  ;;  %v611_v8 = vld [vmem:[%s5813_s1 + $0x378] sm:$0xff]  ;;  %v36_v9 = vld [vmem:[%s5814_s0 + $0x80] sm:$0xff] }
  0x19   :  { %1001 = vmatpush1.msra.mxu1 %v536_v24  ;;  %787 = vmatprep.subr.mxu0 %v2738_v0  ;;  %v39_v10 = vld [vmem:[%s5814_s0 + $0x98] sm:$0xff]  ;;  %v38_v11 = vld [vmem:[%s5814_s0 + $0x90] sm:$0xff]  ;;  %v53_v13 = vld [vmem:[%s5814_s0 + $0x108] sm:$0xff] }
  0x1a   :  { %1002 = vmatprep.subr.mxu1 %v2738_v0  ;;  %788 = vmatpush1.msra.mxu0 %v503_v25  ;;  %v578_v12 = vld [vmem:[%s5813_s1 + $0x270] sm:$0xff]  ;;  %v52_v15 = vld [vmem:[%s5814_s0 + $0x100] sm:$0xff]  ;;  %v55_v16 = vld [vmem:[%s5814_s0 + $0x118] sm:$0xff] }
  0x1b   :  { %1003 = vmatpush1.msra.mxu1 %v535_v26  ;;  %789 = vmatprep.subr.mxu0 %v2738_v0  ;;  %v610_v14 = vld [vmem:[%s5813_s1 + $0x370] sm:$0xff]  ;;  %v577_v18 = vld [vmem:[%s5813_s1 + $0x268] sm:$0xff]  ;;  %v68_v21 = vld [vmem:[%s5814_s0 + $0x180] sm:$0xff] }
  0x1c   :  { %1004 = vmatprep.subr.mxu1 %v2738_v0  ;;  %790 = vmatpush1.msra.mxu0 %v502_v27  ;;  %v54_v17 = vld [vmem:[%s5814_s0 + $0x110] sm:$0xff]  ;;  %v69_v19 = vld [vmem:[%s5814_s0 + $0x188] sm:$0xff]  ;;  %v71_v22 = vld [vmem:[%s5814_s0 + $0x198] sm:$0xff] }
  0x1d   :  { %1005 = vmatpush1.msra.mxu1 %v534_v28  ;;  %791 = vmatprep.subr.mxu0 %v2738_v0  ;;  %v609_v20 = vld [vmem:[%s5813_s1 + $0x368] sm:$0xff]  ;;  %v70_v23 = vld [vmem:[%s5814_s0 + $0x190] sm:$0xff]  ;;  %v576_v24 = vld [vmem:[%s5813_s1 + $0x260] sm:$0xff] }
  0x1e   :  { %1006 = vmatprep.subr.mxu1 %v2738_v0  ;;  %792 = vmatpush1.msra.mxu0 %v501_v29  ;;  %v85_v25 = vld [vmem:[%s5814_s0 + $0x208] sm:$0xff]  ;;  %v608_v26 = vld [vmem:[%s5813_s1 + $0x360] sm:$0xff]  ;;  %v87_v28 = vld [vmem:[%s5814_s0 + $0x218] sm:$0xff] }
  0x1f   :  { %1007 = vmatpush1.msra.mxu1 %v533_v30  ;;  %793 = vmatprep.subr.mxu0 %v2738_v0  ;;  %v84_v27 = vld [vmem:[%s5814_s0 + $0x200] sm:$0xff]  ;;  %v575_v29 = vld [vmem:[%s5813_s1 + $0x258] sm:$0xff]  ;;  %v86_v30 = vld [vmem:[%s5814_s0 + $0x210] sm:$0xff] }
  0x20   :  { %1008 = vmatprep.subr.mxu1 %v2738_v0  ;;  %794 = vmatpush1.msra.mxu0 %v500_v31  ;;  %v101_v31 = vld [vmem:[%s5814_s0 + $0x288] sm:$0xff] }
  0x21   :  { %1009 = vmatpush1.msra.mxu1 %v532_v32  ;;  %795 = vmatprep.subr.mxu0 %v2738_v0  ;;  %v607_v32 = vld [vmem:[%s5813_s1 + $0x358] sm:$0xff] }
  0x22   :  { %1010 = vmatprep.subr.mxu1 %v2738_v0  ;;  %796 = vmatpush2.msra.mxu0 %v531_v33  ;;  %v100_v33 = vld [vmem:[%s5814_s0 + $0x280] sm:$0xff] }
  0x23   :  { %1011 = vmatpush2.msra.mxu1 %v563_v34  ;;  %797 = vmatprep.subr.mxu0 %v2738_v0  ;;  %v103_v34 = vld [vmem:[%s5814_s0 + $0x298] sm:$0xff] }
  0x24   :  { %1012 = vmatprep.subr.mxu1 %v2738_v0  ;;  %798 = vmatpush2.msra.mxu0 %v530_v35  ;;  %v574_v35 = vld [vmem:[%s5813_s1 + $0x250] sm:$0xff] }
  0x25   :  { %1013 = vmatpush2.msra.mxu1 %v562_v36  ;;  %799 = vmatprep.subr.mxu0 %v2738_v0  ;;  %v102_v36 = vld [vmem:[%s5814_s0 + $0x290] sm:$0xff] }
  0x26   :  { %1014 = vmatprep.subr.mxu1 %v2738_v0  ;;  %800 = vmatpush2.msra.mxu0 %v529_v37  ;;  %v117_v37 = vld [vmem:[%s5814_s0 + $0x308] sm:$0xff] }
  0x27   :  { %1015 = vmatpush2.msra.mxu1 %v561_v38  ;;  %801 = vmatprep.subr.mxu0 %v2738_v0  ;;  %v606_v38 = vld [vmem:[%s5813_s1 + $0x350] sm:$0xff] }
  0x28   :  { %1016 = vmatprep.subr.mxu1 %v2738_v0  ;;  %802 = vmatpush2.msra.mxu0 %v528_v39  ;;  %v116_v39 = vld [vmem:[%s5814_s0 + $0x300] sm:$0xff] }
  0x29   :  { %1017 = vmatpush2.msra.mxu1 %v560_v40  ;;  %803 = vmatprep.subr.mxu0 %v2738_v0  ;;  %v119_v40 = vld [vmem:[%s5814_s0 + $0x318] sm:$0xff] }
  0x2a   :  { %1018 = vmatprep.subr.mxu1 %v2738_v0  ;;  %804 = vmatpush2.msra.mxu0 %v527_v41  ;;  %v573_v41 = vld [vmem:[%s5813_s1 + $0x248] sm:$0xff] }
  0x2b   :  { %1019 = vmatpush2.msra.mxu1 %v559_v42  ;;  %805 = vmatprep.subr.mxu0 %v2738_v0  ;;  %v118_v42 = vld [vmem:[%s5814_s0 + $0x310] sm:$0xff] }
  0x2c   :  { %1020 = vmatprep.subr.mxu1 %v2738_v0  ;;  %806 = vmatpush2.msra.mxu0 %v526_v43  ;;  %v133_v43 = vld [vmem:[%s5814_s0 + $0x388] sm:$0xff] }
  0x2d   :  { %1021 = vmatpush2.msra.mxu1 %v558_v44  ;;  %807 = vmatprep.subr.mxu0 %v2738_v0  ;;  %v605_v44 = vld [vmem:[%s5813_s1 + $0x348] sm:$0xff] }
  0x2e   :  { %1022 = vmatprep.subr.mxu1 %v2738_v0  ;;  %808 = vmatpush2.msra.mxu0 %v525_v45  ;;  %v132_v45 = vld [vmem:[%s5814_s0 + $0x380] sm:$0xff] }
  0x2f   :  { %1023 = vmatpush2.msra.mxu1 %v557_v46  ;;  %809 = vmatprep.subr.mxu0 %v2738_v0  ;;  %v135_v46 = vld [vmem:[%s5814_s0 + $0x398] sm:$0xff] }
  0x30   :  { %1024 = vmatprep.subr.mxu1 %v2738_v0  ;;  %810 = vmatpush2.msra.mxu0 %v524_v47  ;;  %v572_v47 = vld [vmem:[%s5813_s1 + $0x240] sm:$0xff] }
  0x31   :  { %1025 = vmatpush2.msra.mxu1 %v556_v48  ;;  %811 = vmatprep.subr.mxu0 %v2738_v0  ;;  %v134_v48 = vld [vmem:[%s5814_s0 + $0x390] sm:$0xff] }
  0x32   :  { %1026 = vmatprep.subr.mxu1 %v2738_v0  ;;  %812 = vmatpush2.msra.mxu0 %v523_v49  ;;  %v604_v49 = vld [vmem:[%s5813_s1 + $0x340] sm:$0xff] }
  0x33   :  { %1027 = vmatpush2.msra.mxu1 %v555_v50  ;;  %813 = vmatprep.subr.mxu0 %v2738_v0  ;;  %v149_v50 = vld [vmem:[%s5814_s0 + $0x408] sm:$0xff] }
  0x34   :  { %1028 = vmatprep.subr.mxu1 %v2738_v0  ;;  %814 = vmatpush2.msra.mxu0 %v522_v51  ;;  %v571_v51 = vld [vmem:[%s5813_s1 + $0x238] sm:$0xff] }
  0x35   :  { %1029 = vmatpush2.msra.mxu1 %v554_v52  ;;  %815 = vmatprep.subr.mxu0 %v2738_v0  ;;  %v151_v52 = vld [vmem:[%s5814_s0 + $0x418] sm:$0xff] }
  0x36   :  { %1030 = vmatprep.subr.mxu1 %v2738_v0  ;;  %816 = vmatpush2.msra.mxu0 %v521_v53  ;;  %v148_v53 = vld [vmem:[%s5814_s0 + $0x400] sm:$0xff] }
  0x37   :  { %1031 = vmatpush2.msra.mxu1 %v553_v54  ;;  %817 = vmatprep.subr.mxu0 %v2738_v0  ;;  %v150_v54 = vld [vmem:[%s5814_s0 + $0x410] sm:$0xff] }
  0x38   :  { %1032 = vmatprep.subr.mxu1 %v2738_v0  ;;  %818 = vmatpush2.msra.mxu0 %v520_v55  ;;  %v603_v55 = vld [vmem:[%s5813_s1 + $0x338] sm:$0xff] }
  0x39   :  { %1033 = vmatpush2.msra.mxu1 %v552_v56  ;;  %819 = vmatprep.subr.mxu0 %v2738_v0  ;;  %v165_v56 = vld [vmem:[%s5814_s0 + $0x488] sm:$0xff] }
  0x3a   :  { %1034 = vmatprep.subr.mxu1 %v2738_v0  ;;  %820 = vmatpush2.msra.mxu0 %v519_v57  ;;  %v570_v57 = vld [vmem:[%s5813_s1 + $0x230] sm:$0xff] }
  0x3b   :  { %1035 = vmatpush2.msra.mxu1 %v551_v58  ;;  %821 = vmatprep.subr.mxu0 %v2738_v0  ;;  %v167_v58 = vld [vmem:[%s5814_s0 + $0x498] sm:$0xff] }
  0x3c   :  { %1036 = vmatprep.subr.mxu1 %v2738_v0  ;;  %822 = vmatpush2.msra.mxu0 %v518_v59  ;;  %v164_v59 = vld [vmem:[%s5814_s0 + $0x480] sm:$0xff] }
  0x3d   :  { %1037 = vmatpush2.msra.mxu1 %v550_v60  ;;  %823 = vmatprep.subr.mxu0 %v2738_v0  ;;  %v166_v60 = vld [vmem:[%s5814_s0 + $0x490] sm:$0xff] }
  0x3e   :  { %1038 = vmatprep.subr.mxu1 %v2738_v0  ;;  %824 = vmatpush2.msra.mxu0 %v517_v61  ;;  %v602_v61 = vld [vmem:[%s5813_s1 + $0x330] sm:$0xff] }
  0x3f   :  { %1039 = vmatpush2.msra.mxu1 %v549_v62  ;;  %825 = vmatprep.subr.mxu0 %v2738_v0  ;;  %v181_v62 = vld [vmem:[%s5814_s0 + $0x508] sm:$0xff] }
  0x40   :  { %827 = vmatprep.mubr.f32.mxu0 %v21_v63  ;;  %826 = vmatpush2.msra.mxu0 %v516_v1  ;;  %v569_v63 = vld [vmem:[%s5813_s1 + $0x228] sm:$0xff]  ;;  %v183_v1 = vld [vmem:[%s5814_s0 + $0x518] sm:$0xff] }
  0x41   :  { %1040 = vmatprep.subr.mxu1 %v2738_v0  ;;  %828 = vmatmul.mubr.f32.vlgmr.msra.gmra.mxu0 %v20_v2  ;;  %v180_v2 = vld [vmem:[%s5814_s0 + $0x500] sm:$0xff] }
  0x42   :  { %1041 = vmatpush2.msra.mxu1 %v548_v3  ;;  %1042 = vmatprep.mubr.f32.mxu1 %v23_v4  ;;  %v182_v3 = vld [vmem:[%s5814_s0 + $0x510] sm:$0xff]  ;;  %v601_v4 = vld [vmem:[%s5813_s1 + $0x328] sm:$0xff] }
  0x43   :  { %1193 = vmatprep.subr.mxu0 %v2738_v0  ;;  %1043 = vmatmul.mubr.f32.vlgmr.msra.gmra.mxu1 %v22_v5  ;;  %v197_v5 = vld [vmem:[%s5814_s0 + $0x588] sm:$0xff] }
  0x44   :  { %1194 = vmatpush1.msra.mxu0 %v579_v6  ;;  %1408 = vmatprep.subr.mxu1 %v2738_v0  ;;  %v568_v6 = vld [vmem:[%s5813_s1 + $0x220] sm:$0xff] }
  0x45   :  { %832 = vmatprep.mubr.f32.mxu0 %v37_v7  ;;  %1409 = vmatpush1.msra.mxu1 %v611_v8  ;;  %v199_v7 = vld [vmem:[%s5814_s0 + $0x598] sm:$0xff]  ;;  %v196_v8 = vld [vmem:[%s5814_s0 + $0x580] sm:$0xff] }
  0x46   :  { %833 = vmatmul.mubr.f32.gmra.mxu0 %v36_v9  ;;  %1047 = vmatprep.mubr.f32.mxu1 %v39_v10  ;;  %v198_v9 = vld [vmem:[%s5814_s0 + $0x590] sm:$0xff]  ;;  %v600_v10 = vld [vmem:[%s5813_s1 + $0x320] sm:$0xff] }
  0x47   :  { %1195 = vmatprep.subr.mxu0 %v2738_v0  ;;  %1048 = vmatmul.mubr.f32.gmra.mxu1 %v38_v11  ;;  %v567_v11 = vld [vmem:[%s5813_s1 + $0x218] sm:$0xff] }
  0x48   :  { %1196 = vmatpush1.msra.mxu0 %v578_v12  ;;  %1410 = vmatprep.subr.mxu1 %v2738_v0  ;;  %v213_v12 = vld [vmem:[%s5814_s0 + $0x608] sm:$0xff] }
  0x49   :  { %837 = vmatprep.mubr.f32.mxu0 %v53_v13  ;;  %1411 = vmatpush1.msra.mxu1 %v610_v14  ;;  %v212_v13 = vld [vmem:[%s5814_s0 + $0x600] sm:$0xff]  ;;  %v215_v14 = vld [vmem:[%s5814_s0 + $0x618] sm:$0xff] }
  0x4a   :  { %838 = vmatmul.mubr.f32.gmra.mxu0 %v52_v15  ;;  %1052 = vmatprep.mubr.f32.mxu1 %v55_v16  ;;  %v599_v15 = vld [vmem:[%s5813_s1 + $0x318] sm:$0xff]  ;;  %v214_v16 = vld [vmem:[%s5814_s0 + $0x610] sm:$0xff] }
  0x4b   :  { %1197 = vmatprep.subr.mxu0 %v2738_v0  ;;  %1053 = vmatmul.mubr.f32.gmra.mxu1 %v54_v17  ;;  %v566_v17 = vld [vmem:[%s5813_s1 + $0x210] sm:$0xff] }
  0x4c   :  { %1198 = vmatpush1.msra.mxu0 %v577_v18  ;;  %1412 = vmatprep.subr.mxu1 %v2738_v0  ;;  %v229_v18 = vld [vmem:[%s5814_s0 + $0x688] sm:$0xff] }
  0x4d   :  { %842 = vmatprep.mubr.f32.mxu0 %v69_v19  ;;  %1413 = vmatpush1.msra.mxu1 %v609_v20  ;;  %v228_v19 = vld [vmem:[%s5814_s0 + $0x680] sm:$0xff]  ;;  %v231_v20 = vld [vmem:[%s5814_s0 + $0x698] sm:$0xff] }
  0x4e   :  { %843 = vmatmul.mubr.f32.gmra.mxu0 %v68_v21  ;;  %1057 = vmatprep.mubr.f32.mxu1 %v71_v22  ;;  %v598_v21 = vld [vmem:[%s5813_s1 + $0x310] sm:$0xff] }
  0x4f   :  { %1199 = vmatprep.subr.mxu0 %v2738_v0  ;;  %1058 = vmatmul.mubr.f32.gmra.mxu1 %v70_v23  ;;  %v230_v22 = vld [vmem:[%s5814_s0 + $0x690] sm:$0xff]  ;;  %v565_v23 = vld [vmem:[%s5813_s1 + $0x208] sm:$0xff] }
  0x50   :  { %1200 = vmatpush1.msra.mxu0 %v576_v24  ;;  %1414 = vmatprep.subr.mxu1 %v2738_v0  ;;  %v245_v24 = vld [vmem:[%s5814_s0 + $0x708] sm:$0xff] }
  0x51   :  { %847 = vmatprep.mubr.f32.mxu0 %v85_v25  ;;  %1201 = vmatprep.subr.mxu0 %v2738_v0  ;;  %v244_v25 = vld [vmem:[%s5814_s0 + $0x700] sm:$0xff] }
  0x52   :  { %1415 = vmatpush1.msra.mxu1 %v608_v26  ;;  %848 = vmatmul.mubr.f32.gmra.mxu0 %v84_v27  ;;  %v247_v26 = vld [vmem:[%s5814_s0 + $0x718] sm:$0xff]  ;;  %v597_v27 = vld [vmem:[%s5813_s1 + $0x308] sm:$0xff] }
  0x53   :  { %1062 = vmatprep.mubr.f32.mxu1 %v87_v28  ;;  %1202 = vmatpush1.msra.mxu0 %v575_v29  ;;  %v246_v28 = vld [vmem:[%s5814_s0 + $0x710] sm:$0xff]  ;;  %v564_v29 = vld [vmem:[%s5813_s1 + $0x200] sm:$0xff] }
  0x54   :  { %1063 = vmatmul.mubr.f32.gmra.mxu1 %v86_v30  ;;  %1416 = vmatprep.subr.mxu1 %v2738_v0  ;;  %v261_v30 = vld [vmem:[%s5814_s0 + $0x788] sm:$0xff] }
  0x55   :  { %852 = vmatprep.mubr.f32.mxu0 %v101_v31  ;;  %1417 = vmatpush1.msra.mxu1 %v607_v32  ;;  %v260_v31 = vld [vmem:[%s5814_s0 + $0x780] sm:$0xff]  ;;  %v263_v32 = vld [vmem:[%s5814_s0 + $0x798] sm:$0xff] }
  0x56   :  { %1203 = vmatprep.subr.mxu0 %v2738_v0  ;;  %853 = vmatmul.mubr.f32.gmra.mxu0 %v100_v33  ;;  %v596_v33 = vld [vmem:[%s5813_s1 + $0x300] sm:$0xff] }
  0x57   :  { %1067 = vmatprep.mubr.f32.mxu1 %v103_v34  ;;  %1204 = vmatpush1.msra.mxu0 %v574_v35  ;;  %v262_v34 = vld [vmem:[%s5814_s0 + $0x790] sm:$0xff]  ;;  %v595_v35 = vld [vmem:[%s5813_s1 + $0x2f8] sm:$0xff] }
  0x58   :  { %1068 = vmatmul.mubr.f32.gmra.mxu1 %v102_v36  ;;  %1418 = vmatprep.subr.mxu1 %v2738_v0  ;;  %v277_v36 = vld [vmem:[%s5814_s0 + $0x808] sm:$0xff] }
  0x59   :  { %857 = vmatprep.mubr.f32.mxu0 %v117_v37  ;;  %1419 = vmatpush1.msra.mxu1 %v606_v38  ;;  %v627_v37 = vld [vmem:[%s5813_s1 + $0x3f8] sm:$0xff]  ;;  %v276_v38 = vld [vmem:[%s5814_s0 + $0x800] sm:$0xff] }
  0x5a   :  { %1205 = vmatprep.subr.mxu0 %v2738_v0  ;;  %858 = vmatmul.mubr.f32.gmra.mxu0 %v116_v39  ;;  %v279_v39 = vld [vmem:[%s5814_s0 + $0x818] sm:$0xff] }
  0x5b   :  { %1072 = vmatprep.mubr.f32.mxu1 %v119_v40  ;;  %1206 = vmatpush1.msra.mxu0 %v573_v41  ;;  %v278_v40 = vld [vmem:[%s5814_s0 + $0x810] sm:$0xff] }
  0x5c   :  { %1073 = vmatmul.mubr.f32.gmra.mxu1 %v118_v42  ;;  %1420 = vmatprep.subr.mxu1 %v2738_v0  ;;  %v594_v41 = vld [vmem:[%s5813_s1 + $0x2f0] sm:$0xff]  ;;  %v293_v42 = vld [vmem:[%s5814_s0 + $0x888] sm:$0xff] }
  0x5d   :  { %862 = vmatprep.mubr.f32.mxu0 %v133_v43  ;;  %1421 = vmatpush1.msra.mxu1 %v605_v44  ;;  %v626_v43 = vld [vmem:[%s5813_s1 + $0x3f0] sm:$0xff]  ;;  %v292_v44 = vld [vmem:[%s5814_s0 + $0x880] sm:$0xff] }
  0x5e   :  { %1207 = vmatprep.subr.mxu0 %v2738_v0  ;;  %863 = vmatmul.mubr.f32.gmra.mxu0 %v132_v45  ;;  %v295_v45 = vld [vmem:[%s5814_s0 + $0x898] sm:$0xff] }
  0x5f   :  { %1077 = vmatprep.mubr.f32.mxu1 %v135_v46  ;;  %1208 = vmatpush1.msra.mxu0 %v572_v47  ;;  %v294_v46 = vld [vmem:[%s5814_s0 + $0x890] sm:$0xff]  ;;  %v593_v47 = vld [vmem:[%s5813_s1 + $0x2e8] sm:$0xff] }
  0x60   :  { %1078 = vmatmul.mubr.f32.gmra.mxu1 %v134_v48  ;;  %1422 = vmatprep.subr.mxu1 %v2738_v0  ;;  %v309_v48 = vld [vmem:[%s5814_s0 + $0x908] sm:$0xff] }
  0x61   :  { %1209 = vmatprep.subr.mxu0 %v2738_v0  ;;  %1423 = vmatpush1.msra.mxu1 %v604_v49  ;;  %v625_v49 = vld [vmem:[%s5813_s1 + $0x3e8] sm:$0xff] }
  0x62   :  { %867 = vmatprep.mubr.f32.mxu0 %v149_v50  ;;  %1210 = vmatpush1.msra.mxu0 %v571_v51  ;;  %v308_v50 = vld [vmem:[%s5814_s0 + $0x900] sm:$0xff]  ;;  %v311_v51 = vld [vmem:[%s5814_s0 + $0x918] sm:$0xff] }
  0x63   :  { %1082 = vmatprep.mubr.f32.mxu1 %v151_v52  ;;  %868 = vmatmul.mubr.f32.gmra.mxu0 %v148_v53  ;;  %v310_v52 = vld [vmem:[%s5814_s0 + $0x910] sm:$0xff]  ;;  %v592_v53 = vld [vmem:[%s5813_s1 + $0x2e0] sm:$0xff] }
  0x64   :  { %1424 = vmatprep.subr.mxu1 %v2738_v0  ;;  %1083 = vmatmul.mubr.f32.gmra.mxu1 %v150_v54  ;;  %v325_v54 = vld [vmem:[%s5814_s0 + $0x988] sm:$0xff] }
  0x65   :  { %1211 = vmatprep.subr.mxu0 %v2738_v0  ;;  %1425 = vmatpush1.msra.mxu1 %v603_v55  ;;  %v624_v55 = vld [vmem:[%s5813_s1 + $0x3e0] sm:$0xff] }
  0x66   :  { %872 = vmatprep.mubr.f32.mxu0 %v165_v56  ;;  %1212 = vmatpush1.msra.mxu0 %v570_v57  ;;  %v324_v56 = vld [vmem:[%s5814_s0 + $0x980] sm:$0xff]  ;;  %v327_v57 = vld [vmem:[%s5814_s0 + $0x998] sm:$0xff] }
  0x67   :  { %1087 = vmatprep.mubr.f32.mxu1 %v167_v58  ;;  %873 = vmatmul.mubr.f32.gmra.mxu0 %v164_v59  ;;  %v591_v58 = vld [vmem:[%s5813_s1 + $0x2d8] sm:$0xff]  ;;  %v326_v59 = vld [vmem:[%s5814_s0 + $0x990] sm:$0xff] }
  0x68   :  { %1426 = vmatprep.subr.mxu1 %v2738_v0  ;;  %1088 = vmatmul.mubr.f32.gmra.mxu1 %v166_v60  ;;  %v341_v60 = vld [vmem:[%s5814_s0 + $0xa08] sm:$0xff] }
  0x69   :  { %1213 = vmatprep.subr.mxu0 %v2738_v0  ;;  %1427 = vmatpush1.msra.mxu1 %v602_v61  ;;  %v623_v61 = vld [vmem:[%s5813_s1 + $0x3d8] sm:$0xff] }
  0x6a   :  { %877 = vmatprep.mubr.f32.mxu0 %v181_v62  ;;  %1214 = vmatpush1.msra.mxu0 %v569_v63  ;;  %v340_v62 = vld [vmem:[%s5814_s0 + $0xa00] sm:$0xff]  ;;  %v343_v63 = vld [vmem:[%s5814_s0 + $0xa18] sm:$0xff] }
  0x6b   :  { %1092 = vmatprep.mubr.f32.mxu1 %v183_v1  ;;  %878 = vmatmul.mubr.f32.gmra.mxu0 %v180_v2  ;;  %v590_v1 = vld [vmem:[%s5813_s1 + $0x2d0] sm:$0xff] }
  0x6c   :  { %1428 = vmatprep.subr.mxu1 %v2738_v0  ;;  %1093 = vmatmul.mubr.f32.gmra.mxu1 %v182_v3  ;;  %v342_v2 = vld [vmem:[%s5814_s0 + $0xa10] sm:$0xff]  ;;  %v357_v3 = vld [vmem:[%s5814_s0 + $0xa88] sm:$0xff] }
  0x6d   :  { %1215 = vmatprep.subr.mxu0 %v2738_v0  ;;  %1429 = vmatpush1.msra.mxu1 %v601_v4  ;;  %v622_v4 = vld [vmem:[%s5813_s1 + $0x3d0] sm:$0xff] }
  0x6e   :  { %882 = vmatprep.mubr.f32.mxu0 %v197_v5  ;;  %1216 = vmatpush1.msra.mxu0 %v568_v6  ;;  %v356_v5 = vld [vmem:[%s5814_s0 + $0xa80] sm:$0xff]  ;;  %v359_v6 = vld [vmem:[%s5814_s0 + $0xa98] sm:$0xff] }
  0x6f   :  { %1097 = vmatprep.mubr.f32.mxu1 %v199_v7  ;;  %883 = vmatmul.mubr.f32.gmra.mxu0 %v196_v8  ;;  %v589_v7 = vld [vmem:[%s5813_s1 + $0x2c8] sm:$0xff]  ;;  %v358_v8 = vld [vmem:[%s5814_s0 + $0xa90] sm:$0xff] }
  0x70   :  { %1430 = vmatprep.subr.mxu1 %v2738_v0  ;;  %1098 = vmatmul.mubr.f32.gmra.mxu1 %v198_v9  ;;  %v373_v9 = vld [vmem:[%s5814_s0 + $0xb08] sm:$0xff] }
  0x71   :  { %1217 = vmatprep.subr.mxu0 %v2738_v0  ;;  %1431 = vmatpush1.msra.mxu1 %v600_v10  ;;  %v621_v10 = vld [vmem:[%s5813_s1 + $0x3c8] sm:$0xff] }
  0x72   :  { %1218 = vmatpush1.msra.mxu0 %v567_v11  ;;  %887 = vmatprep.mubr.f32.mxu0 %v213_v12  ;;  %v372_v11 = vld [vmem:[%s5814_s0 + $0xb00] sm:$0xff]  ;;  %v375_v12 = vld [vmem:[%s5814_s0 + $0xb18] sm:$0xff] }
  0x73   :  { %1432 = vmatprep.subr.mxu1 %v2738_v0  ;;  %888 = vmatmul.mubr.f32.gmra.mxu0 %v212_v13  ;;  %v588_v13 = vld [vmem:[%s5813_s1 + $0x2c0] sm:$0xff] }
  0x74   :  { %1102 = vmatprep.mubr.f32.mxu1 %v215_v14  ;;  %1433 = vmatpush1.msra.mxu1 %v599_v15  ;;  %v374_v14 = vld [vmem:[%s5814_s0 + $0xb10] sm:$0xff]  ;;  %v620_v15 = vld [vmem:[%s5813_s1 + $0x3c0] sm:$0xff] }
  0x75   :  { %1219 = vmatprep.subr.mxu0 %v2738_v0  ;;  %1103 = vmatmul.mubr.f32.gmra.mxu1 %v214_v16  ;;  %v389_v16 = vld [vmem:[%s5814_s0 + $0xb88] sm:$0xff] }
  0x76   :  { %1220 = vmatpush1.msra.mxu0 %v566_v17  ;;  %892 = vmatprep.mubr.f32.mxu0 %v229_v18  ;;  %v587_v17 = vld [vmem:[%s5813_s1 + $0x2b8] sm:$0xff] }
  0x77   :  { %1434 = vmatprep.subr.mxu1 %v2738_v0  ;;  %893 = vmatmul.mubr.f32.gmra.mxu0 %v228_v19  ;;  %v391_v18 = vld [vmem:[%s5814_s0 + $0xb98] sm:$0xff]  ;;  %v388_v19 = vld [vmem:[%s5814_s0 + $0xb80] sm:$0xff] }
  0x78   :  { %1107 = vmatprep.mubr.f32.mxu1 %v231_v20  ;;  %1435 = vmatpush1.msra.mxu1 %v598_v21  ;;  %v390_v20 = vld [vmem:[%s5814_s0 + $0xb90] sm:$0xff]  ;;  %v619_v21 = vld [vmem:[%s5813_s1 + $0x3b8] sm:$0xff] }
  0x79   :  { %1221 = vmatprep.subr.mxu0 %v2738_v0  ;;  %1108 = vmatmul.mubr.f32.gmra.mxu1 %v230_v22  ;;  %v405_v22 = vld [vmem:[%s5814_s0 + $0xc08] sm:$0xff] }
  0x7a   :  { %1222 = vmatpush1.msra.mxu0 %v565_v23  ;;  %897 = vmatprep.mubr.f32.mxu0 %v245_v24  ;;  %v586_v23 = vld [vmem:[%s5813_s1 + $0x2b0] sm:$0xff]  ;;  %v407_v24 = vld [vmem:[%s5814_s0 + $0xc18] sm:$0xff] }
  0x7b   :  { %1436 = vmatprep.subr.mxu1 %v2738_v0  ;;  %898 = vmatmul.mubr.f32.gmra.mxu0 %v244_v25  ;;  %v404_v25 = vld [vmem:[%s5814_s0 + $0xc00] sm:$0xff] }
  0x7c   :  { %1112 = vmatprep.mubr.f32.mxu1 %v247_v26  ;;  %1437 = vmatpush1.msra.mxu1 %v597_v27  ;;  %v406_v26 = vld [vmem:[%s5814_s0 + $0xc10] sm:$0xff] }
  0x7d   :  { %1223 = vmatprep.subr.mxu0 %v2738_v0  ;;  %1113 = vmatmul.mubr.f32.gmra.mxu1 %v246_v28  ;;  %v618_v27 = vld [vmem:[%s5813_s1 + $0x3b0] sm:$0xff]  ;;  %v421_v28 = vld [vmem:[%s5814_s0 + $0xc88] sm:$0xff] }
  0x7e   :  { %1224 = vmatpush1.msra.mxu0 %v564_v29  ;;  %902 = vmatprep.mubr.f32.mxu0 %v261_v30  ;;  %v585_v29 = vld [vmem:[%s5813_s1 + $0x2a8] sm:$0xff]  ;;  %v423_v30 = vld [vmem:[%s5814_s0 + $0xc98] sm:$0xff] }
  0x7f   :  { %1438 = vmatprep.subr.mxu1 %v2738_v0  ;;  %903 = vmatmul.mubr.f32.gmra.mxu0 %v260_v31  ;;  %v420_v31 = vld [vmem:[%s5814_s0 + $0xc80] sm:$0xff] }
  0x80   :  { %1117 = vmatprep.mubr.f32.mxu1 %v263_v32  ;;  %1225 = vmatprep.subr.mxu0 %v2738_v0  ;;  %v422_v32 = vld [vmem:[%s5814_s0 + $0xc90] sm:$0xff] }
  0x81   :  { %1439 = vmatpush1.msra.mxu1 %v596_v33  ;;  %1226 = vmatpush2.msra.mxu0 %v595_v35  ;;  %v617_v33 = vld [vmem:[%s5813_s1 + $0x3a8] sm:$0xff]  ;;  %v584_v35 = vld [vmem:[%s5813_s1 + $0x2a0] sm:$0xff] }
  0x82   :  { %1118 = vmatmul.mubr.f32.gmra.mxu1 %v262_v34  ;;  %1440 = vmatprep.subr.mxu1 %v2738_v0  ;;  %v437_v34 = vld [vmem:[%s5814_s0 + $0xd08] sm:$0xff] }
  0x83   :  { %907 = vmatprep.mubr.f32.mxu0 %v277_v36  ;;  %1441 = vmatpush2.msra.mxu1 %v627_v37  ;;  %v439_v36 = vld [vmem:[%s5814_s0 + $0xd18] sm:$0xff]  ;;  %v436_v37 = vld [vmem:[%s5814_s0 + $0xd00] sm:$0xff] }
  0x84   :  { %908 = vmatmul.mubr.f32.gmra.mxu0 %v276_v38  ;;  %1122 = vmatprep.mubr.f32.mxu1 %v279_v39  ;;  %v438_v38 = vld [vmem:[%s5814_s0 + $0xd10] sm:$0xff]  ;;  %v616_v39 = vld [vmem:[%s5813_s1 + $0x3a0] sm:$0xff] }
  0x85   :  { %1227 = vmatprep.subr.mxu0 %v2738_v0  ;;  %1442 = vmatprep.subr.mxu1 %v2738_v0 }
  0x86   :  { %1123 = vmatmul.mubr.f32.gmra.mxu1 %v278_v40  ;;  %1228 = vmatpush2.msra.mxu0 %v594_v41  ;;  %v583_v40 = vld [vmem:[%s5813_s1 + $0x298] sm:$0xff]  ;;  %v453_v41 = vld [vmem:[%s5814_s0 + $0xd88] sm:$0xff] }
  0x87   :  { %912 = vmatprep.mubr.f32.mxu0 %v293_v42  ;;  %1443 = vmatpush2.msra.mxu1 %v626_v43  ;;  %v452_v42 = vld [vmem:[%s5814_s0 + $0xd80] sm:$0xff]  ;;  %v455_v43 = vld [vmem:[%s5814_s0 + $0xd98] sm:$0xff] }
  0x88   :  { %913 = vmatmul.mubr.f32.gmra.mxu0 %v292_v44  ;;  %1127 = vmatprep.mubr.f32.mxu1 %v295_v45  ;;  %v615_v44 = vld [vmem:[%s5813_s1 + $0x398] sm:$0xff]  ;;  %v454_v45 = vld [vmem:[%s5814_s0 + $0xd90] sm:$0xff] }
  0x89   :  { %1229 = vmatprep.subr.mxu0 %v2738_v0  ;;  %1444 = vmatprep.subr.mxu1 %v2738_v0 }
  0x8a   :  { %1128 = vmatmul.mubr.f32.gmra.mxu1 %v294_v46  ;;  %1230 = vmatpush2.msra.mxu0 %v593_v47  ;;  %v582_v46 = vld [vmem:[%s5813_s1 + $0x290] sm:$0xff]  ;;  %v469_v47 = vld [vmem:[%s5814_s0 + $0xe08] sm:$0xff] }
  0x8b   :  { %917 = vmatprep.mubr.f32.mxu0 %v309_v48  ;;  %1445 = vmatpush2.msra.mxu1 %v625_v49  ;;  %v468_v48 = vld [vmem:[%s5814_s0 + $0xe00] sm:$0xff]  ;;  %v471_v49 = vld [vmem:[%s5814_s0 + $0xe18] sm:$0xff] }
  0x8c   :  { %918 = vmatmul.mubr.f32.gmra.mxu0 %v308_v50  ;;  %1132 = vmatprep.mubr.f32.mxu1 %v311_v51  ;;  %v614_v50 = vld [vmem:[%s5813_s1 + $0x390] sm:$0xff] }
  0x8d   :  { %1231 = vmatprep.subr.mxu0 %v2738_v0  ;;  %1446 = vmatprep.subr.mxu1 %v2738_v0  ;;  %v470_v51 = vld [vmem:[%s5814_s0 + $0xe10] sm:$0xff] }
  0x8e   :  { %1133 = vmatmul.mubr.f32.gmra.mxu1 %v310_v52  ;;  %1232 = vmatpush2.msra.mxu0 %v592_v53  ;;  %v581_v52 = vld [vmem:[%s5813_s1 + $0x288] sm:$0xff] }
  0x8f   :  { %922 = vmatprep.mubr.f32.mxu0 %v325_v54  ;;  %1233 = vmatprep.subr.mxu0 %v2738_v0  ;;  %v485_v53 = vld [vmem:[%s5814_s0 + $0xe88] sm:$0x3]  ;;  %v484_v54 = vld [vmem:[%s5814_s0 + $0xe80] sm:$0x3] }
  0x90   :  { %1447 = vmatpush2.msra.mxu1 %v624_v55  ;;  %923 = vmatmul.mubr.f32.gmra.mxu0 %v324_v56  ;;  %v487_v55 = vld [vmem:[%s5814_s0 + $0xe98] sm:$0x3]  ;;  %v613_v56 = vld [vmem:[%s5813_s1 + $0x388] sm:$0xff] }
  0x91   :  { %1137 = vmatprep.mubr.f32.mxu1 %v327_v57  ;;  %1234 = vmatpush2.msra.mxu0 %v591_v58  ;;  %v486_v57 = vld [vmem:[%s5814_s0 + $0xe90] sm:$0x3]  ;;  %v580_v58 = vld [vmem:[%s5813_s1 + $0x280] sm:$0xff] }
  0x92   :  { %1138 = vmatmul.mubr.f32.gmra.mxu1 %v326_v59  ;;  %1448 = vmatprep.subr.mxu1 %v2738_v0  ;;  %v25_v59 = vld [vmem:[%s5814_s0 + $0x28] sm:$0xff] }
  0x93   :  { %927 = vmatprep.mubr.f32.mxu0 %v341_v60  ;;  %1449 = vmatpush2.msra.mxu1 %v623_v61  ;;  %v24_v60 = vld [vmem:[%s5814_s0 + $0x20] sm:$0xff] }
  0x94   :  { %1235 = vmatprep.subr.mxu0 %v2738_v0  ;;  %928 = vmatmul.mubr.f32.gmra.mxu0 %v340_v62  ;;  %v612_v61 = vld [vmem:[%s5813_s1 + $0x380] sm:$0xff]  ;;  %v27_v62 = vld [vmem:[%s5814_s0 + $0x38] sm:$0xff] }
  0x95   :  { %1142 = vmatprep.mubr.f32.mxu1 %v343_v63  ;;  %1236 = vmatpush2.msra.mxu0 %v590_v1  ;;  %v26_v63 = vld [vmem:[%s5814_s0 + $0x30] sm:$0xff]  ;;  %v643_v1 = vld [vmem:[%s5813_s1 + $0x478] sm:$0xff] }
  0x96   :  { %1143 = vmatmul.mubr.f32.gmra.mxu1 %v342_v2  ;;  %1450 = vmatprep.subr.mxu1 %v2738_v0  ;;  %v41_v2 = vld [vmem:[%s5814_s0 + $0xa8] sm:$0xff] }
  0x97   :  { %932 = vmatprep.mubr.f32.mxu0 %v357_v3  ;;  %1451 = vmatpush2.msra.mxu1 %v622_v4  ;;  %v675_v3 = vld [vmem:[%s5813_s1 + $0x578] sm:$0xff]  ;;  %v40_v4 = vld [vmem:[%s5814_s0 + $0xa0] sm:$0xff] }
  0x98   :  { %1237 = vmatprep.subr.mxu0 %v2738_v0  ;;  %933 = vmatmul.mubr.f32.gmra.mxu0 %v356_v5  ;;  %v43_v5 = vld [vmem:[%s5814_s0 + $0xb8] sm:$0xff] }
  0x99   :  { %1147 = vmatprep.mubr.f32.mxu1 %v359_v6  ;;  %1238 = vmatpush2.msra.mxu0 %v589_v7  ;;  %v42_v6 = vld [vmem:[%s5814_s0 + $0xb0] sm:$0xff] }
  0x9a   :  { %1148 = vmatmul.mubr.f32.gmra.mxu1 %v358_v8  ;;  %1452 = vmatprep.subr.mxu1 %v2738_v0  ;;  %v642_v7 = vld [vmem:[%s5813_s1 + $0x470] sm:$0xff]  ;;  %v57_v8 = vld [vmem:[%s5814_s0 + $0x128] sm:$0xff] }
  0x9b   :  { %937 = vmatprep.mubr.f32.mxu0 %v373_v9  ;;  %1453 = vmatpush2.msra.mxu1 %v621_v10  ;;  %v674_v9 = vld [vmem:[%s5813_s1 + $0x570] sm:$0xff]  ;;  %v56_v10 = vld [vmem:[%s5814_s0 + $0x120] sm:$0xff] }
  0x9c   :  { %1239 = vmatprep.subr.mxu0 %v2738_v0  ;;  %938 = vmatmul.mubr.f32.gmra.mxu0 %v372_v11  ;;  %v59_v11 = vld [vmem:[%s5814_s0 + $0x138] sm:$0xff] }
  0x9d   :  { %1152 = vmatprep.mubr.f32.mxu1 %v375_v12  ;;  %1240 = vmatpush2.msra.mxu0 %v588_v13  ;;  %v58_v12 = vld [vmem:[%s5814_s0 + $0x130] sm:$0xff]  ;;  %v641_v13 = vld [vmem:[%s5813_s1 + $0x468] sm:$0xff] }
  0x9e   :  { %1153 = vmatmul.mubr.f32.gmra.mxu1 %v374_v14  ;;  %1454 = vmatprep.subr.mxu1 %v2738_v0  ;;  %v73_v14 = vld [vmem:[%s5814_s0 + $0x1a8] sm:$0xff] }
  0x9f   :  { %1241 = vmatprep.subr.mxu0 %v2738_v0  ;;  %1455 = vmatpush2.msra.mxu1 %v620_v15  ;;  %v673_v15 = vld [vmem:[%s5813_s1 + $0x568] sm:$0xff] }
  0xa0   :  { %942 = vmatprep.mubr.f32.mxu0 %v389_v16  ;;  %1242 = vmatpush2.msra.mxu0 %v587_v17  ;;  %v72_v16 = vld [vmem:[%s5814_s0 + $0x1a0] sm:$0xff]  ;;  %v75_v17 = vld [vmem:[%s5814_s0 + $0x1b8] sm:$0xff] }
  0xa1   :  { %1157 = vmatprep.mubr.f32.mxu1 %v391_v18  ;;  %943 = vmatmul.mubr.f32.gmra.mxu0 %v388_v19  ;;  %v74_v18 = vld [vmem:[%s5814_s0 + $0x1b0] sm:$0xff]  ;;  %v640_v19 = vld [vmem:[%s5813_s1 + $0x460] sm:$0xff] }
  0xa2   :  { %1456 = vmatprep.subr.mxu1 %v2738_v0  ;;  %1158 = vmatmul.mubr.f32.gmra.mxu1 %v390_v20  ;;  %v89_v20 = vld [vmem:[%s5814_s0 + $0x228] sm:$0xff] }
  0xa3   :  { %1243 = vmatprep.subr.mxu0 %v2738_v0  ;;  %1457 = vmatpush2.msra.mxu1 %v619_v21  ;;  %v672_v21 = vld [vmem:[%s5813_s1 + $0x560] sm:$0xff] }
  0xa4   :  { %947 = vmatprep.mubr.f32.mxu0 %v405_v22  ;;  %1244 = vmatpush2.msra.mxu0 %v586_v23  ;;  %v88_v22 = vld [vmem:[%s5814_s0 + $0x220] sm:$0xff]  ;;  %v91_v23 = vld [vmem:[%s5814_s0 + $0x238] sm:$0xff] }
  0xa5   :  { %1162 = vmatprep.mubr.f32.mxu1 %v407_v24  ;;  %948 = vmatmul.mubr.f32.gmra.mxu0 %v404_v25  ;;  %v639_v24 = vld [vmem:[%s5813_s1 + $0x458] sm:$0xff]  ;;  %v90_v25 = vld [vmem:[%s5814_s0 + $0x230] sm:$0xff] }
  0xa6   :  { %1458 = vmatprep.subr.mxu1 %v2738_v0  ;;  %1163 = vmatmul.mubr.f32.gmra.mxu1 %v406_v26  ;;  %v105_v26 = vld [vmem:[%s5814_s0 + $0x2a8] sm:$0xff] }
  0xa7   :  { %1245 = vmatprep.subr.mxu0 %v2738_v0  ;;  %1459 = vmatpush2.msra.mxu1 %v618_v27  ;;  %v671_v27 = vld [vmem:[%s5813_s1 + $0x558] sm:$0xff] }
  0xa8   :  { %952 = vmatprep.mubr.f32.mxu0 %v421_v28  ;;  %1246 = vmatpush2.msra.mxu0 %v585_v29  ;;  %v104_v28 = vld [vmem:[%s5814_s0 + $0x2a0] sm:$0xff]  ;;  %v107_v29 = vld [vmem:[%s5814_s0 + $0x2b8] sm:$0xff] }
  0xa9   :  { %1167 = vmatprep.mubr.f32.mxu1 %v423_v30  ;;  %953 = vmatmul.mubr.f32.gmra.mxu0 %v420_v31  ;;  %v638_v30 = vld [vmem:[%s5813_s1 + $0x450] sm:$0xff] }
  0xaa   :  { %1460 = vmatprep.subr.mxu1 %v2738_v0  ;;  %1168 = vmatmul.mubr.f32.gmra.mxu1 %v422_v32  ;;  %v106_v31 = vld [vmem:[%s5814_s0 + $0x2b0] sm:$0xff]  ;;  %v121_v32 = vld [vmem:[%s5814_s0 + $0x328] sm:$0xff] }
  0xab   :  { %1247 = vmatprep.subr.mxu0 %v2738_v0  ;;  %1461 = vmatpush2.msra.mxu1 %v617_v33  ;;  %v670_v33 = vld [vmem:[%s5813_s1 + $0x550] sm:$0xff] }
  0xac   :  { %957 = vmatprep.mubr.f32.mxu0 %v437_v34  ;;  %1248 = vmatpush2.msra.mxu0 %v584_v35  ;;  %v120_v34 = vld [vmem:[%s5814_s0 + $0x320] sm:$0xff]  ;;  %v123_v35 = vld [vmem:[%s5814_s0 + $0x338] sm:$0xff] }
  0xad   :  { %1172 = vmatprep.mubr.f32.mxu1 %v439_v36  ;;  %958 = vmatmul.mubr.f32.gmra.mxu0 %v436_v37  ;;  %v637_v36 = vld [vmem:[%s5813_s1 + $0x448] sm:$0xff]  ;;  %v122_v37 = vld [vmem:[%s5814_s0 + $0x330] sm:$0xff] }
  0xae   :  { %1462 = vmatprep.subr.mxu1 %v2738_v0  ;;  %1173 = vmatmul.mubr.f32.gmra.mxu1 %v438_v38  ;;  %v137_v38 = vld [vmem:[%s5814_s0 + $0x3a8] sm:$0xff] }
  0xaf   :  { %1249 = vmatprep.subr.mxu0 %v2738_v0  ;;  %1463 = vmatpush2.msra.mxu1 %v616_v39  ;;  %v669_v39 = vld [vmem:[%s5813_s1 + $0x548] sm:$0xff] }
  0xb0   :  { %1250 = vmatpush2.msra.mxu0 %v583_v40  ;;  %962 = vmatprep.mubr.f32.mxu0 %v453_v41  ;;  %v136_v40 = vld [vmem:[%s5814_s0 + $0x3a0] sm:$0xff]  ;;  %v139_v41 = vld [vmem:[%s5814_s0 + $0x3b8] sm:$0xff] }
  0xb1   :  { %1464 = vmatprep.subr.mxu1 %v2738_v0  ;;  %963 = vmatmul.mubr.f32.gmra.mxu0 %v452_v42  ;;  %v636_v42 = vld [vmem:[%s5813_s1 + $0x440] sm:$0xff] }
  0xb2   :  { %1177 = vmatprep.mubr.f32.mxu1 %v455_v43  ;;  %1465 = vmatpush2.msra.mxu1 %v615_v44  ;;  %v138_v43 = vld [vmem:[%s5814_s0 + $0x3b0] sm:$0xff]  ;;  %v668_v44 = vld [vmem:[%s5813_s1 + $0x540] sm:$0xff] }
  0xb3   :  { %1251 = vmatprep.subr.mxu0 %v2738_v0  ;;  %1178 = vmatmul.mubr.f32.gmra.mxu1 %v454_v45  ;;  %v153_v45 = vld [vmem:[%s5814_s0 + $0x428] sm:$0xff] }
  0xb4   :  { %1252 = vmatpush2.msra.mxu0 %v582_v46  ;;  %967 = vmatprep.mubr.f32.mxu0 %v469_v47  ;;  %v635_v46 = vld [vmem:[%s5813_s1 + $0x438] sm:$0xff] }
  0xb5   :  { %1466 = vmatprep.subr.mxu1 %v2738_v0  ;;  %968 = vmatmul.mubr.f32.gmra.mxu0 %v468_v48  ;;  %v155_v47 = vld [vmem:[%s5814_s0 + $0x438] sm:$0xff]  ;;  %v152_v48 = vld [vmem:[%s5814_s0 + $0x420] sm:$0xff] }
  0xb6   :  { %1182 = vmatprep.mubr.f32.mxu1 %v471_v49  ;;  %1467 = vmatpush2.msra.mxu1 %v614_v50  ;;  %v154_v49 = vld [vmem:[%s5814_s0 + $0x430] sm:$0xff]  ;;  %v667_v50 = vld [vmem:[%s5813_s1 + $0x538] sm:$0xff] }
  0xb7   :  { %1253 = vmatprep.subr.mxu0 %v2738_v0  ;;  %1183 = vmatmul.mubr.f32.gmra.mxu1 %v470_v51  ;;  %v169_v51 = vld [vmem:[%s5814_s0 + $0x4a8] sm:$0xff] }
  0xb8   :  { %1254 = vmatpush2.msra.mxu0 %v581_v52  ;;  %972 = vmatprep.mubr.f32.mxu0 %v485_v53  ;;  %v634_v52 = vld [vmem:[%s5813_s1 + $0x430] sm:$0xff]  ;;  %v171_v53 = vld [vmem:[%s5814_s0 + $0x4b8] sm:$0xff] }
  0xb9   :  { %1468 = vmatprep.subr.mxu1 %v2738_v0  ;;  %973 = vmatmul.mubr.f32.gmra.mxu0 %v484_v54  ;;  %v168_v54 = vld [vmem:[%s5814_s0 + $0x4a0] sm:$0xff] }
  0xba   :  { %1187 = vmatprep.mubr.f32.mxu1 %v487_v55  ;;  %1469 = vmatpush2.msra.mxu1 %v613_v56  ;;  %v170_v55 = vld [vmem:[%s5814_s0 + $0x4b0] sm:$0xff] }
  0xbb   :  { %1255 = vmatprep.subr.mxu0 %v2738_v0  ;;  %1188 = vmatmul.mubr.f32.gmra.mxu1 %v486_v57  ;;  %v666_v56 = vld [vmem:[%s5813_s1 + $0x530] sm:$0xff]  ;;  %v185_v57 = vld [vmem:[%s5814_s0 + $0x528] sm:$0xff] }
  0xbc   :  { %1256 = vmatpush2.msra.mxu0 %v580_v58  ;;  %1257 = vmatprep.mubr.f32.mxu0 %v25_v59  ;;  %v633_v58 = vld [vmem:[%s5813_s1 + $0x428] sm:$0xff]  ;;  %v187_v59 = vld [vmem:[%s5814_s0 + $0x538] sm:$0xff] }
  0xbd   :  { %1470 = vmatprep.subr.mxu1 %v2738_v0  ;;  %1258 = vmatmul.mubr.f32.vlgmr.msra.gmra.mxu0 %v24_v60  ;;  %v184_v60 = vld [vmem:[%s5814_s0 + $0x520] sm:$0xff] }
  0xbe   :  { %1471 = vmatpush2.msra.mxu1 %v612_v61  ;;  %1472 = vmatprep.mubr.f32.mxu1 %v27_v62  ;;  %v186_v61 = vld [vmem:[%s5814_s0 + $0x530] sm:$0xff]  ;;  %v665_v62 = vld [vmem:[%s5813_s1 + $0x528] sm:$0xff] }
  0xbf   :  { %1623 = vmatprep.subr.mxu0 %v2738_v0  ;;  %1473 = vmatmul.mubr.f32.vlgmr.msra.gmra.mxu1 %v26_v63  ;;  %v201_v63 = vld [vmem:[%s5814_s0 + $0x5a8] sm:$0xff] }
  0xc0   :  { %1624 = vmatpush1.msra.mxu0 %v643_v1  ;;  %1838 = vmatprep.subr.mxu1 %v2738_v0  ;;  %v632_v1 = vld [vmem:[%s5813_s1 + $0x420] sm:$0xff] }
  0xc1   :  { %1262 = vmatprep.mubr.f32.mxu0 %v41_v2  ;;  %1839 = vmatpush1.msra.mxu1 %v675_v3  ;;  %v203_v2 = vld [vmem:[%s5814_s0 + $0x5b8] sm:$0xff]  ;;  %v200_v3 = vld [vmem:[%s5814_s0 + $0x5a0] sm:$0xff] }
  0xc2   :  { %1263 = vmatmul.mubr.f32.gmra.mxu0 %v40_v4  ;;  %1477 = vmatprep.mubr.f32.mxu1 %v43_v5  ;;  %v202_v4 = vld [vmem:[%s5814_s0 + $0x5b0] sm:$0xff]  ;;  %v664_v5 = vld [vmem:[%s5813_s1 + $0x520] sm:$0xff] }
  0xc3   :  { %1625 = vmatprep.subr.mxu0 %v2738_v0  ;;  %1478 = vmatmul.mubr.f32.gmra.mxu1 %v42_v6  ;;  %v631_v6 = vld [vmem:[%s5813_s1 + $0x418] sm:$0xff] }
  0xc4   :  { %1626 = vmatpush1.msra.mxu0 %v642_v7  ;;  %1840 = vmatprep.subr.mxu1 %v2738_v0  ;;  %v217_v7 = vld [vmem:[%s5814_s0 + $0x628] sm:$0xff] }
  0xc5   :  { %1267 = vmatprep.mubr.f32.mxu0 %v57_v8  ;;  %1841 = vmatpush1.msra.mxu1 %v674_v9  ;;  %v216_v8 = vld [vmem:[%s5814_s0 + $0x620] sm:$0xff]  ;;  %v219_v9 = vld [vmem:[%s5814_s0 + $0x638] sm:$0xff] }
  0xc6   :  { %1268 = vmatmul.mubr.f32.gmra.mxu0 %v56_v10  ;;  %1482 = vmatprep.mubr.f32.mxu1 %v59_v11  ;;  %v663_v10 = vld [vmem:[%s5813_s1 + $0x518] sm:$0xff]  ;;  %v218_v11 = vld [vmem:[%s5814_s0 + $0x630] sm:$0xff] }
  0xc7   :  { %1627 = vmatprep.subr.mxu0 %v2738_v0  ;;  %1483 = vmatmul.mubr.f32.gmra.mxu1 %v58_v12  ;;  %v630_v12 = vld [vmem:[%s5813_s1 + $0x410] sm:$0xff] }
  0xc8   :  { %1628 = vmatpush1.msra.mxu0 %v641_v13  ;;  %1842 = vmatprep.subr.mxu1 %v2738_v0  ;;  %v233_v13 = vld [vmem:[%s5814_s0 + $0x6a8] sm:$0xff] }
  0xc9   :  { %1272 = vmatprep.mubr.f32.mxu0 %v73_v14  ;;  %1843 = vmatpush1.msra.mxu1 %v673_v15  ;;  %v232_v14 = vld [vmem:[%s5814_s0 + $0x6a0] sm:$0xff]  ;;  %v235_v15 = vld [vmem:[%s5814_s0 + $0x6b8] sm:$0xff] }
  0xca   :  { %1273 = vmatmul.mubr.f32.gmra.mxu0 %v72_v16  ;;  %1487 = vmatprep.mubr.f32.mxu1 %v75_v17  ;;  %v662_v16 = vld [vmem:[%s5813_s1 + $0x510] sm:$0xff] }
  0xcb   :  { %1629 = vmatprep.subr.mxu0 %v2738_v0  ;;  %1488 = vmatmul.mubr.f32.gmra.mxu1 %v74_v18  ;;  %v234_v17 = vld [vmem:[%s5814_s0 + $0x6b0] sm:$0xff]  ;;  %v629_v18 = vld [vmem:[%s5813_s1 + $0x408] sm:$0xff] }
  0xcc   :  { %1630 = vmatpush1.msra.mxu0 %v640_v19  ;;  %1844 = vmatprep.subr.mxu1 %v2738_v0  ;;  %v249_v19 = vld [vmem:[%s5814_s0 + $0x728] sm:$0xff] }
  0xcd   :  { %1277 = vmatprep.mubr.f32.mxu0 %v89_v20  ;;  %1631 = vmatprep.subr.mxu0 %v2738_v0  ;;  %v248_v20 = vld [vmem:[%s5814_s0 + $0x720] sm:$0xff] }
  0xce   :  { %1845 = vmatpush1.msra.mxu1 %v672_v21  ;;  %1278 = vmatmul.mubr.f32.gmra.mxu0 %v88_v22  ;;  %v251_v21 = vld [vmem:[%s5814_s0 + $0x738] sm:$0xff]  ;;  %v661_v22 = vld [vmem:[%s5813_s1 + $0x508] sm:$0xff] }
  0xcf   :  { %1492 = vmatprep.mubr.f32.mxu1 %v91_v23  ;;  %1632 = vmatpush1.msra.mxu0 %v639_v24  ;;  %v250_v23 = vld [vmem:[%s5814_s0 + $0x730] sm:$0xff]  ;;  %v628_v24 = vld [vmem:[%s5813_s1 + $0x400] sm:$0xff] }
  0xd0   :  { %1493 = vmatmul.mubr.f32.gmra.mxu1 %v90_v25  ;;  %1846 = vmatprep.subr.mxu1 %v2738_v0  ;;  %v265_v25 = vld [vmem:[%s5814_s0 + $0x7a8] sm:$0xff] }
  0xd1   :  { %1282 = vmatprep.mubr.f32.mxu0 %v105_v26  ;;  %1847 = vmatpush1.msra.mxu1 %v671_v27  ;;  %v264_v26 = vld [vmem:[%s5814_s0 + $0x7a0] sm:$0xff]  ;;  %v267_v27 = vld [vmem:[%s5814_s0 + $0x7b8] sm:$0xff] }
  0xd2   :  { %1633 = vmatprep.subr.mxu0 %v2738_v0  ;;  %1283 = vmatmul.mubr.f32.gmra.mxu0 %v104_v28  ;;  %v660_v28 = vld [vmem:[%s5813_s1 + $0x500] sm:$0xff] }
  0xd3   :  { %1497 = vmatprep.mubr.f32.mxu1 %v107_v29  ;;  %1634 = vmatpush1.msra.mxu0 %v638_v30  ;;  %v266_v29 = vld [vmem:[%s5814_s0 + $0x7b0] sm:$0xff]  ;;  %v659_v30 = vld [vmem:[%s5813_s1 + $0x4f8] sm:$0xff] }
  0xd4   :  { %1498 = vmatmul.mubr.f32.gmra.mxu1 %v106_v31  ;;  %1848 = vmatprep.subr.mxu1 %v2738_v0  ;;  %v281_v31 = vld [vmem:[%s5814_s0 + $0x828] sm:$0xff] }
  0xd5   :  { %1287 = vmatprep.mubr.f32.mxu0 %v121_v32  ;;  %1849 = vmatpush1.msra.mxu1 %v670_v33  ;;  %v691_v32 = vld [vmem:[%s5813_s1 + $0x5f8] sm:$0xff]  ;;  %v280_v33 = vld [vmem:[%s5814_s0 + $0x820] sm:$0xff] }
  0xd6   :  { %1635 = vmatprep.subr.mxu0 %v2738_v0  ;;  %1288 = vmatmul.mubr.f32.gmra.mxu0 %v120_v34  ;;  %v283_v34 = vld [vmem:[%s5814_s0 + $0x838] sm:$0xff] }
  0xd7   :  { %1502 = vmatprep.mubr.f32.mxu1 %v123_v35  ;;  %1636 = vmatpush1.msra.mxu0 %v637_v36  ;;  %v282_v35 = vld [vmem:[%s5814_s0 + $0x830] sm:$0xff] }
  0xd8   :  { %1503 = vmatmul.mubr.f32.gmra.mxu1 %v122_v37  ;;  %1850 = vmatprep.subr.mxu1 %v2738_v0  ;;  %v658_v36 = vld [vmem:[%s5813_s1 + $0x4f0] sm:$0xff]  ;;  %v297_v37 = vld [vmem:[%s5814_s0 + $0x8a8] sm:$0xff] }
  0xd9   :  { %1292 = vmatprep.mubr.f32.mxu0 %v137_v38  ;;  %1851 = vmatpush1.msra.mxu1 %v669_v39  ;;  %v3990_v38 = vld [vmem:[%s5815_s2] ss:$0 sm:$0xff]  ;;  %v690_v39 = vld [vmem:[%s5813_s1 + $0x5f0] sm:$0xff] }
  0xda   :  { %1637 = vmatprep.subr.mxu0 %v2738_v0  ;;  %1293 = vmatmul.mubr.f32.gmra.mxu0 %v136_v40  ;;  %v296_v40 = vld [vmem:[%s5814_s0 + $0x8a0] sm:$0xff] }
  0xdb   :  { %1507 = vmatprep.mubr.f32.mxu1 %v139_v41  ;;  %1638 = vmatpush1.msra.mxu0 %v636_v42  ;;  %v299_v41 = vld [vmem:[%s5814_s0 + $0x8b8] sm:$0xff] }
  0xdc   :  { %1508 = vmatmul.mubr.f32.gmra.mxu1 %v138_v43  ;;  %1852 = vmatprep.subr.mxu1 %v2738_v0  ;;  %v298_v43 = vld [vmem:[%s5814_s0 + $0x8b0] sm:$0xff] }
  0xdd   :  { %1639 = vmatprep.subr.mxu0 %v2738_v0  ;;  %1853 = vmatpush1.msra.mxu1 %v668_v44  ;;  %v657_v44 = vld [vmem:[%s5813_s1 + $0x4e8] sm:$0xff] }
  0xde   :  { %1297 = vmatprep.mubr.f32.mxu0 %v153_v45  ;;  %1640 = vmatpush1.msra.mxu0 %v635_v46  ;;  %v313_v46 = vld [vmem:[%s5814_s0 + $0x928] sm:$0xff] }
  0xdf   :  { %1512 = vmatprep.mubr.f32.mxu1 %v155_v47  ;;  %1298 = vmatmul.mubr.f32.gmra.mxu0 %v152_v48 }
  0xe0   :  { %1854 = vmatprep.subr.mxu1 %v2738_v0  ;;  %1513 = vmatmul.mubr.f32.gmra.mxu1 %v154_v49  ;;  %v689_v49 = vld [vmem:[%s5813_s1 + $0x5e8] sm:$0xff] }
  0xe1   :  { %1641 = vmatprep.subr.mxu0 %v2738_v0  ;;  %1855 = vmatpush1.msra.mxu1 %v667_v50  ;;  %v312_v50 = vld [vmem:[%s5814_s0 + $0x920] sm:$0xff] }
  0xe2   :  { %1302 = vmatprep.mubr.f32.mxu0 %v169_v51  ;;  %1642 = vmatpush1.msra.mxu0 %v634_v52  ;;  %v315_v52 = vld [vmem:[%s5814_s0 + $0x938] sm:$0xff] }
  0xe3   :  { %1517 = vmatprep.mubr.f32.mxu1 %v171_v53  ;;  %1303 = vmatmul.mubr.f32.gmra.mxu0 %v168_v54 }
  0xe4   :  { %1856 = vmatprep.subr.mxu1 %v2738_v0  ;;  %1518 = vmatmul.mubr.f32.gmra.mxu1 %v170_v55  ;;  %v314_v55 = vld [vmem:[%s5814_s0 + $0x930] sm:$0xff] }
  0xe5   :  { %1643 = vmatprep.subr.mxu0 %v2738_v0  ;;  %1857 = vmatpush1.msra.mxu1 %v666_v56  ;;  %v656_v56 = vld [vmem:[%s5813_s1 + $0x4e0] sm:$0xff] }
  0xe6   :  { %1307 = vmatprep.mubr.f32.mxu0 %v185_v57  ;;  %1644 = vmatpush1.msra.mxu0 %v633_v58  ;;  %v329_v58 = vld [vmem:[%s5814_s0 + $0x9a8] sm:$0xff] }
  0xe7   :  { %1522 = vmatprep.mubr.f32.mxu1 %v187_v59  ;;  %1308 = vmatmul.mubr.f32.gmra.mxu0 %v184_v60 }
  0xe8   :  { %1858 = vmatprep.subr.mxu1 %v2738_v0  ;;  %1523 = vmatmul.mubr.f32.gmra.mxu1 %v186_v61  ;;  %v688_v61 = vld [vmem:[%s5813_s1 + $0x5e0] sm:$0xff] }
  0xe9   :  { %1645 = vmatprep.subr.mxu0 %v2738_v0  ;;  %1859 = vmatpush1.msra.mxu1 %v665_v62 }
  0xea   :  { %1312 = vmatprep.mubr.f32.mxu0 %v201_v63  ;;  %1646 = vmatpush1.msra.mxu0 %v632_v1  ;;  %v328_v63 = vld [vmem:[%s5814_s0 + $0x9a0] sm:$0xff]  ;;  %v331_v1 = vld [vmem:[%s5814_s0 + $0x9b8] sm:$0xff] }
  0xeb   :  { %1527 = vmatprep.mubr.f32.mxu1 %v203_v2  ;;  %1313 = vmatmul.mubr.f32.gmra.mxu0 %v200_v3 }
  0xec   :  { %1860 = vmatprep.subr.mxu1 %v2738_v0  ;;  %1528 = vmatmul.mubr.f32.gmra.mxu1 %v202_v4  ;;  %v655_v4 = vld [vmem:[%s5813_s1 + $0x4d8] sm:$0xff] }
  0xed   :  { %1647 = vmatprep.subr.mxu0 %v2738_v0  ;;  %1861 = vmatpush1.msra.mxu1 %v664_v5  ;;  %v330_v5 = vld [vmem:[%s5814_s0 + $0x9b0] sm:$0xff] }
  0xee   :  { %1648 = vmatpush1.msra.mxu0 %v631_v6  ;;  %1317 = vmatprep.mubr.f32.mxu0 %v217_v7  ;;  %v345_v7 = vld [vmem:[%s5814_s0 + $0xa28] sm:$0xff] }
  0xef   :  { %1862 = vmatprep.subr.mxu1 %v2738_v0  ;;  %1318 = vmatmul.mubr.f32.gmra.mxu0 %v216_v8 }
  0xf0   :  { %1532 = vmatprep.mubr.f32.mxu1 %v219_v9  ;;  %1863 = vmatpush1.msra.mxu1 %v663_v10  ;;  %v687_v10 = vld [vmem:[%s5813_s1 + $0x5d8] sm:$0xff] }
  0xf1   :  { %1649 = vmatprep.subr.mxu0 %v2738_v0  ;;  %1533 = vmatmul.mubr.f32.gmra.mxu1 %v218_v11 }
  0xf2   :  { %1650 = vmatpush1.msra.mxu0 %v630_v12  ;;  %1322 = vmatprep.mubr.f32.mxu0 %v233_v13  ;;  %v344_v12 = vld [vmem:[%s5814_s0 + $0xa20] sm:$0xff]  ;;  %v347_v13 = vld [vmem:[%s5814_s0 + $0xa38] sm:$0xff] }
  0xf3   :  { %1864 = vmatprep.subr.mxu1 %v2738_v0  ;;  %1323 = vmatmul.mubr.f32.gmra.mxu0 %v232_v14 }
  0xf4   :  { %1537 = vmatprep.mubr.f32.mxu1 %v235_v15  ;;  %1865 = vmatpush1.msra.mxu1 %v662_v16  ;;  %v654_v16 = vld [vmem:[%s5813_s1 + $0x4d0] sm:$0xff] }
  0xf5   :  { %1651 = vmatprep.subr.mxu0 %v2738_v0  ;;  %1538 = vmatmul.mubr.f32.gmra.mxu1 %v234_v17  ;;  %v346_v17 = vld [vmem:[%s5814_s0 + $0xa30] sm:$0xff] }
  0xf6   :  { %1652 = vmatpush1.msra.mxu0 %v629_v18  ;;  %1327 = vmatprep.mubr.f32.mxu0 %v249_v19  ;;  %v361_v19 = vld [vmem:[%s5814_s0 + $0xaa8] sm:$0xff] }
  0xf7   :  { %1866 = vmatprep.subr.mxu1 %v2738_v0  ;;  %1328 = vmatmul.mubr.f32.gmra.mxu0 %v248_v20 }
  0xf8   :  { %1542 = vmatprep.mubr.f32.mxu1 %v251_v21  ;;  %1867 = vmatpush1.msra.mxu1 %v661_v22  ;;  %v686_v22 = vld [vmem:[%s5813_s1 + $0x5d0] sm:$0xff] }
  0xf9   :  { %1653 = vmatprep.subr.mxu0 %v2738_v0  ;;  %1543 = vmatmul.mubr.f32.gmra.mxu1 %v250_v23 }
  0xfa   :  { %1654 = vmatpush1.msra.mxu0 %v628_v24  ;;  %1332 = vmatprep.mubr.f32.mxu0 %v265_v25  ;;  %v360_v24 = vld [vmem:[%s5814_s0 + $0xaa0] sm:$0xff]  ;;  %v363_v25 = vld [vmem:[%s5814_s0 + $0xab8] sm:$0xff] }
  0xfb   :  { %1868 = vmatprep.subr.mxu1 %v2738_v0  ;;  %1333 = vmatmul.mubr.f32.gmra.mxu0 %v264_v26 }
  0xfc   :  { %1547 = vmatprep.mubr.f32.mxu1 %v267_v27  ;;  %1655 = vmatprep.subr.mxu0 %v2738_v0  ;;  %v653_v27 = vld [vmem:[%s5813_s1 + $0x4c8] sm:$0xff] }
  0xfd   :  { %1869 = vmatpush1.msra.mxu1 %v660_v28  ;;  %1656 = vmatpush2.msra.mxu0 %v659_v30  ;;  %v362_v28 = vld [vmem:[%s5814_s0 + $0xab0] sm:$0xff]  ;;  %v377_v30 = vld [vmem:[%s5814_s0 + $0xb28] sm:$0xff] }
  0xfe   :  { %1548 = vmatmul.mubr.f32.gmra.mxu1 %v266_v29  ;;  %1870 = vmatprep.subr.mxu1 %v2738_v0 }
  0xff   :  { %1337 = vmatprep.mubr.f32.mxu0 %v281_v31  ;;  %1871 = vmatpush2.msra.mxu1 %v691_v32 }
 0x100   :  { %1338 = vmatmul.mubr.f32.gmra.mxu0 %v280_v33  ;;  %1552 = vmatprep.mubr.f32.mxu1 %v283_v34  ;;  %v685_v33 = vld [vmem:[%s5813_s1 + $0x5c8] sm:$0xff] }
 0x101   :  { %1657 = vmatprep.subr.mxu0 %v2738_v0  ;;  %v829_v42 = vpop.f32.mrf.mxu0  ;;  %1872 = vmatprep.subr.mxu1 %v2738_v0 }
 0x102   :  { %1553 = vmatmul.mubr.f32.gmra.mxu1 %v282_v35  ;;  %1658 = vmatpush2.msra.mxu0 %v658_v36  ;;  %v830_v45 = vadd.f32 %v3990_v38, %v829_v42  ;;  %v376_v35 = vld [vmem:[%s5814_s0 + $0xb20] sm:$0xff]  ;;  %v379_v36 = vld [vmem:[%s5814_s0 + $0xb38] sm:$0xff] }
 0x103   :  { %1342 = vmatprep.mubr.f32.mxu0 %v297_v37  ;;  %1873 = vmatpush2.msra.mxu1 %v690_v39  ;;  %v1044_v47 = vpop.f32.mrf.mxu1  ;;  %v831_v48 = vpop.f32.mrf.mxu0 }
 0x104   :  { %1343 = vmatmul.mubr.f32.gmra.mxu0 %v296_v40  ;;  %1557 = vmatprep.mubr.f32.mxu1 %v299_v41  ;;  %v4020_v51 = vadd.f32 %v1044_v47, %v830_v45  ;;  %v652_v40 = vld [vmem:[%s5813_s1 + $0x4c0] sm:$0xff]  ;;  %v378_v41 = vld [vmem:[%s5814_s0 + $0xb30] sm:$0xff]  ;;  %v651_v48 = vld [vmem:[%s5813_s1 + $0x4b8] sm:$0xff] }
 0x105   :  { %1659 = vmatprep.subr.mxu0 %v2738_v0  ;;  %v1046_v53 = vpop.f32.mrf.mxu1  ;;  %1874 = vmatprep.subr.mxu1 %v2738_v0  ;;  %v684_v45 = vld [vmem:[%s5813_s1 + $0x5c0] sm:$0xff] }
 0x106   :  { %1558 = vmatmul.mubr.f32.gmra.mxu1 %v298_v43  ;;  %1660 = vmatpush2.msra.mxu0 %v657_v44  ;;  %v834_v54 = vpop.f32.mrf.mxu0  ;;  %v392_v53 = vld [vmem:[%s5814_s0 + $0xba0] sm:$0xff] }
 0x107   :  { %1347 = vmatprep.mubr.f32.mxu0 %v313_v46  ;;  %v835_v57 = vadd.f32 %v3990_v38, %v834_v54  ;;  %1875 = vmatpush2.msra.mxu1 %v689_v49  ;;  %v1049_v59 = vpop.f32.mrf.mxu1  ;;  %v393_v46 = vld [vmem:[%s5814_s0 + $0xba8] sm:$0xff]  ;;  %v395_v49 = vld [vmem:[%s5814_s0 + $0xbb8] sm:$0xff] }
 0x108   :  { %1348 = vmatmul.mubr.f32.gmra.mxu0 %v312_v50  ;;  %v836_v60 = vpop.f32.mrf.mxu0  ;;  %1562 = vmatprep.mubr.f32.mxu1 %v315_v52 }
 0x109   :  { %1661 = vmatprep.subr.mxu0 %v2738_v0  ;;  %v4040_v62 = vadd.f32 %v1049_v59, %v835_v57  ;;  %v1051_v2 = vpop.f32.mrf.mxu1  ;;  %1876 = vmatprep.subr.mxu1 %v2738_v0  ;;  %v409_v59 = vld [vmem:[%s5814_s0 + $0xc28] sm:$0xff] }
 0x10a   :  { %1563 = vmatmul.mubr.f32.gmra.mxu1 %v314_v55  ;;  %1662 = vmatpush2.msra.mxu0 %v656_v56  ;;  %v839_v3 = vpop.f32.mrf.mxu0  ;;  %v394_v55 = vld [vmem:[%s5814_s0 + $0xbb0] sm:$0xff] }
 0x10b   :  { %1352 = vmatprep.mubr.f32.mxu0 %v329_v58  ;;  %v840_v6 = vadd.f32 %v3990_v38, %v839_v3  ;;  %1663 = vmatprep.subr.mxu0 %v2738_v0  ;;  %v1054_v8 = vpop.f32.mrf.mxu1  ;;  %v683_v58 = vld [vmem:[%s5813_s1 + $0x5b8] sm:$0xff]  ;;  %v408_v3 = vld [vmem:[%s5814_s0 + $0xc20] sm:$0xff] }
 0x10c   :  { %1877 = vmatpush2.msra.mxu1 %v688_v61  ;;  %v841_v9 = vpop.f32.mrf.mxu0  ;;  %1353 = vmatmul.mubr.f32.gmra.mxu0 %v328_v63  ;;  %v650_v61 = vld [vmem:[%s5813_s1 + $0x4b0] sm:$0xff]  ;;  %v411_v63 = vld [vmem:[%s5814_s0 + $0xc38] sm:$0xff] }
 0x10d   :  { %1567 = vmatprep.mubr.f32.mxu1 %v331_v1  ;;  %v4063_v11 = vadd.f32 %v1054_v8, %v840_v6  ;;  %1664 = vmatpush2.msra.mxu0 %v655_v4  ;;  %v1056_v14 = vpop.f32.mrf.mxu1  ;;  %v682_v8 = vld [vmem:[%s5813_s1 + $0x5b0] sm:$0xff]  ;;  %v425_v9 = vld [vmem:[%s5814_s0 + $0xca8] sm:$0xff] }
 0x10e   :  { %1568 = vmatmul.mubr.f32.gmra.mxu1 %v330_v5  ;;  %v844_v15 = vpop.f32.mrf.mxu0  ;;  %1878 = vmatprep.subr.mxu1 %v2738_v0  ;;  %v410_v5 = vld [vmem:[%s5814_s0 + $0xc30] sm:$0xff] }
 0x10f   :  { %1357 = vmatprep.mubr.f32.mxu0 %v345_v7  ;;  %v845_v18 = vadd.f32 %v3990_v38, %v844_v15  ;;  %1879 = vmatpush2.msra.mxu1 %v687_v10  ;;  %v1059_v20 = vpop.f32.mrf.mxu1 }
 0x110   :  { %1665 = vmatprep.subr.mxu0 %v2738_v0  ;;  %v846_v21 = vpop.f32.mrf.mxu0  ;;  %1358 = vmatmul.mubr.f32.gmra.mxu0 %v344_v12  ;;  %v649_v12 = vld [vmem:[%s5813_s1 + $0x4a8] sm:$0xff] }
 0x111   :  { %1572 = vmatprep.mubr.f32.mxu1 %v347_v13  ;;  %v4086_v23 = vadd.f32 %v1059_v20, %v845_v18  ;;  %1666 = vmatpush2.msra.mxu0 %v654_v16  ;;  %v1061_v26 = vpop.f32.mrf.mxu1  ;;  %v427_v13 = vld [vmem:[%s5814_s0 + $0xcb8] sm:$0xff]  ;;  %v424_v16 = vld [vmem:[%s5814_s0 + $0xca0] sm:$0xff]  ;;  %v441_v20 = vld [vmem:[%s5814_s0 + $0xd28] sm:$0xff] }
 0x112   :  { %1573 = vmatmul.mubr.f32.gmra.mxu1 %v346_v17  ;;  %1880 = vmatprep.subr.mxu1 %v2738_v0  ;;  %v849_v29 = vpop.f32.mrf.mxu0  ;;  %v426_v17 = vld [vmem:[%s5814_s0 + $0xcb0] sm:$0xff] }
 0x113   :  { %1362 = vmatprep.mubr.f32.mxu0 %v361_v19  ;;  %1881 = vmatpush2.msra.mxu1 %v686_v22  ;;  %v850_v31 = vadd.f32 %v3990_v38, %v849_v29  ;;  %v681_v19 = vld [vmem:[%s5813_s1 + $0x5a8] sm:$0xff] }
 0x114   :  { %1667 = vmatprep.subr.mxu0 %v2738_v0  ;;  %v1064_v32 = vpop.f32.mrf.mxu1  ;;  %1363 = vmatmul.mubr.f32.gmra.mxu0 %v360_v24  ;;  %v851_v34 = vpop.f32.mrf.mxu0  ;;  %v648_v24 = vld [vmem:[%s5813_s1 + $0x4a0] sm:$0xff] }
 0x115   :  { %1577 = vmatprep.mubr.f32.mxu1 %v363_v25  ;;  %1668 = vmatpush2.msra.mxu0 %v653_v27  ;;  %v4115_v37 = vadd.f32 %v1064_v32, %v850_v31  ;;  %v443_v25 = vld [vmem:[%s5814_s0 + $0xd38] sm:$0xff]  ;;  %v440_v27 = vld [vmem:[%s5814_s0 + $0xd20] sm:$0xff] }
 0x116   :  { %1578 = vmatmul.mubr.f32.gmra.mxu1 %v362_v28  ;;  %v1066_v39 = vpop.f32.mrf.mxu1  ;;  %1882 = vmatprep.subr.mxu1 %v2738_v0  ;;  %v854_v42 = vpop.f32.mrf.mxu0  ;;  %v680_v32 = vld [vmem:[%s5813_s1 + $0x5a0] sm:$0xff] }
 0x117   :  { %1367 = vmatprep.mubr.f32.mxu0 %v377_v30  ;;  %1883 = vmatpush2.msra.mxu1 %v685_v33  ;;  %v855_v43 = vadd.f32 %v3990_v38, %v854_v42  ;;  %v442_v30 = vld [vmem:[%s5814_s0 + $0xd30] sm:$0xff]  ;;  %v647_v33 = vld [vmem:[%s5813_s1 + $0x498] sm:$0xff] }
 0x118   :  { %1669 = vmatprep.subr.mxu0 %v2738_v0  ;;  %v1069_v44 = vpop.f32.mrf.mxu1  ;;  %1368 = vmatmul.mubr.f32.gmra.mxu0 %v376_v35  ;;  %v856_v47 = vpop.f32.mrf.mxu0 }
 0x119   :  { %1582 = vmatprep.mubr.f32.mxu1 %v379_v36  ;;  %1670 = vmatpush2.msra.mxu0 %v652_v40  ;;  %v4138_v50 = vadd.f32 %v1069_v44, %v855_v43  ;;  %v457_v36 = vld [vmem:[%s5814_s0 + $0xda8] sm:$0xff]  ;;  %v456_v40 = vld [vmem:[%s5814_s0 + $0xda0] sm:$0xff]  ;;  %v679_v44 = vld [vmem:[%s5813_s1 + $0x598] sm:$0xff] }
 0x11a   :  { %1583 = vmatmul.mubr.f32.gmra.mxu1 %v378_v41  ;;  %v1071_v52 = vpop.f32.mrf.mxu1  ;;  %1884 = vmatprep.subr.mxu1 %v2738_v0  ;;  %v859_v54 = vpop.f32.mrf.mxu0  ;;  %v459_v41 = vld [vmem:[%s5814_s0 + $0xdb8] sm:$0xff]  ;;  %v646_v47 = vld [vmem:[%s5813_s1 + $0x490] sm:$0xff] }
 0x11b   :  { %1671 = vmatprep.subr.mxu0 %v2738_v0  ;;  %1885 = vmatpush2.msra.mxu1 %v684_v45  ;;  %v860_v56 = vadd.f32 %v3990_v38, %v859_v54  ;;  %v473_v52 = vld [vmem:[%s5814_s0 + $0xe28] sm:$0xff]  ;;  %v472_v54 = vld [vmem:[%s5814_s0 + $0xe20] sm:$0xff] }
 0x11c   :  { %1372 = vmatprep.mubr.f32.mxu0 %v393_v46  ;;  %v1074_v57 = vpop.f32.mrf.mxu1  ;;  %1672 = vmatpush2.msra.mxu0 %v651_v48  ;;  %v861_v60 = vpop.f32.mrf.mxu0  ;;  %v458_v46 = vld [vmem:[%s5814_s0 + $0xdb0] sm:$0xff] }
 0x11d   :  { %1587 = vmatprep.mubr.f32.mxu1 %v395_v49  ;;  %1373 = vmatmul.mubr.f32.gmra.mxu0 %v392_v53  ;;  %v4162_v1 = vadd.f32 %v1074_v57, %v860_v56  ;;  %v474_v60 = vld [vmem:[%s5814_s0 + $0xe30] sm:$0xff] }
 0x11e   :  { %1886 = vmatprep.subr.mxu1 %v2738_v0  ;;  %v1076_v2 = vpop.f32.mrf.mxu1  ;;  %1588 = vmatmul.mubr.f32.gmra.mxu1 %v394_v55  ;;  %v864_v4 = vpop.f32.mrf.mxu0  ;;  %v475_v55 = vld [vmem:[%s5814_s0 + $0xe38] sm:$0xff] }
 0x11f   :  { %1673 = vmatprep.subr.mxu0 %v2738_v0  ;;  %1887 = vmatpush2.msra.mxu1 %v683_v58  ;;  %v865_v6 = vadd.f32 %v3990_v38, %v864_v4  ;;  %v678_v58 = vld [vmem:[%s5813_s1 + $0x590] sm:$0xff] }
 0x120   :  { %1377 = vmatprep.mubr.f32.mxu0 %v409_v59  ;;  %v1079_v7 = vpop.f32.mrf.mxu1  ;;  %1674 = vmatpush2.msra.mxu0 %v650_v61  ;;  %v866_v10 = vpop.f32.mrf.mxu0  ;;  %v645_v61 = vld [vmem:[%s5813_s1 + $0x488] sm:$0xff] }
 0x121   :  { %1592 = vmatprep.mubr.f32.mxu1 %v411_v63  ;;  %1378 = vmatmul.mubr.f32.gmra.mxu0 %v408_v3  ;;  %v4185_v14 = vadd.f32 %v1079_v7, %v865_v6  ;;  %v489_v3 = vld [vmem:[%s5814_s0 + $0xea8] sm:$0x3]  ;;  %v491_v6 = vld [vmem:[%s5814_s0 + $0xeb8] sm:$0x3] }
 0x122   :  { %1888 = vmatprep.subr.mxu1 %v2738_v0  ;;  %v1081_v15 = vpop.f32.mrf.mxu1  ;;  %1593 = vmatmul.mubr.f32.gmra.mxu1 %v410_v5  ;;  %v488_v5 = vld [vmem:[%s5814_s0 + $0xea0] sm:$0x3] }
 0x123   :  { %1675 = vmatprep.subr.mxu0 %v2738_v0  ;;  %1889 = vmatpush2.msra.mxu1 %v682_v8  ;;  %v869_v18 = vpop.f32.mrf.mxu0 }
 0x124   :  { %1382 = vmatprep.mubr.f32.mxu0 %v425_v9  ;;  %1676 = vmatpush2.msra.mxu0 %v649_v12  ;;  %v870_v21 = vadd.f32 %v3990_v38, %v869_v18  ;;  %v1084_v22 = vpop.f32.mrf.mxu1  ;;  %v677_v9 = vld [vmem:[%s5813_s1 + $0x588] sm:$0xff]  ;;  %v490_v12 = vld [vmem:[%s5814_s0 + $0xeb0] sm:$0x3] }
 0x125   :  { %1597 = vmatprep.mubr.f32.mxu1 %v427_v13  ;;  %1383 = vmatmul.mubr.f32.gmra.mxu0 %v424_v16  ;;  %v871_v26 = vpop.f32.mrf.mxu0  ;;  %v644_v13 = vld [vmem:[%s5813_s1 + $0x480] sm:$0xff]  ;;  %v29_v16 = vld [vmem:[%s5814_s0 + $0x48] sm:$0xff] }
 0x126   :  { %1890 = vmatprep.subr.mxu1 %v2738_v0  ;;  %1598 = vmatmul.mubr.f32.gmra.mxu1 %v426_v17  ;;  %v4212_v28 = vadd.f32 %v1084_v22, %v870_v21  ;;  %v1086_v29 = vpop.f32.mrf.mxu1  ;;  %v31_v22 = vld [vmem:[%s5814_s0 + $0x58] sm:$0xff]  ;;  %v30_v26 = vld [vmem:[%s5814_s0 + $0x50] sm:$0xff] }
 0x127   :  { %1677 = vmatprep.subr.mxu0 %v2738_v0  ;;  %1891 = vmatpush2.msra.mxu1 %v681_v19  ;;  %v874_v31 = vpop.f32.mrf.mxu0  ;;  %v28_v19 = vld [vmem:[%s5814_s0 + $0x40] sm:$0xff] }
 0x128   :  { %1387 = vmatprep.mubr.f32.mxu0 %v441_v20  ;;  %1678 = vmatpush2.msra.mxu0 %v648_v24  ;;  %v875_v34 = vadd.f32 %v3990_v38, %v874_v31  ;;  %v1089_v35 = vpop.f32.mrf.mxu1  ;;  %v676_v20 = vld [vmem:[%s5813_s1 + $0x580] sm:$0xff] }
 0x129   :  { %1602 = vmatprep.mubr.f32.mxu1 %v443_v25  ;;  %1388 = vmatmul.mubr.f32.gmra.mxu0 %v440_v27  ;;  %v876_v39 = vpop.f32.mrf.mxu0  ;;  %v707_v27 = vld [vmem:[%s5813_s1 + $0x678] sm:$0xff] }
 0x12a   :  { %1892 = vmatprep.subr.mxu1 %v2738_v0  ;;  %1603 = vmatmul.mubr.f32.gmra.mxu1 %v442_v30  ;;  %v4235_v42 = vadd.f32 %v1089_v35, %v875_v34  ;;  %v1091_v43 = vpop.f32.mrf.mxu1  ;;  %v45_v30 = vld [vmem:[%s5814_s0 + $0xc8] sm:$0xff]  ;;  %v44_v34 = vld [vmem:[%s5814_s0 + $0xc0] sm:$0xff] }
 0x12b   :  { %1679 = vmatprep.subr.mxu0 %v2738_v0  ;;  %1893 = vmatpush2.msra.mxu1 %v680_v32  ;;  %v879_v45 = vpop.f32.mrf.mxu0  ;;  %v706_v43 = vld [vmem:[%s5813_s1 + $0x670] sm:$0xff] }
 0x12c   :  { %1680 = vmatpush2.msra.mxu0 %v647_v33  ;;  %1392 = vmatprep.mubr.f32.mxu0 %v457_v36  ;;  %v880_v48 = vadd.f32 %v3990_v38, %v879_v45  ;;  %v1094_v49 = vpop.f32.mrf.mxu1  ;;  %v739_v33 = vld [vmem:[%s5813_s1 + $0x778] sm:$0xff]  ;;  %v61_v45 = vld [vmem:[%s5814_s0 + $0x148] sm:$0xff] }
 0x12d   :  { %1894 = vmatprep.subr.mxu1 %v2738_v0  ;;  %1393 = vmatmul.mubr.f32.gmra.mxu0 %v456_v40  ;;  %v881_v53 = vpop.f32.mrf.mxu0  ;;  %v47_v36 = vld [vmem:[%s5814_s0 + $0xd8] sm:$0xff] }
 0x12e   :  { %1607 = vmatprep.mubr.f32.mxu1 %v459_v41  ;;  %1895 = vmatpush2.msra.mxu1 %v679_v44  ;;  %v4258_v56 = vadd.f32 %v1094_v49, %v880_v48  ;;  %v1096_v57 = vpop.f32.mrf.mxu1  ;;  %v46_v41 = vld [vmem:[%s5814_s0 + $0xd0] sm:$0xff]  ;;  %v60_v49 = vld [vmem:[%s5814_s0 + $0x140] sm:$0xff]  ;;  %v63_v53 = vld [vmem:[%s5814_s0 + $0x158] sm:$0xff] }
 0x12f   :  { %1681 = vmatprep.subr.mxu0 %v2738_v0  ;;  %1608 = vmatmul.mubr.f32.gmra.mxu1 %v458_v46  ;;  %v884_v59 = vpop.f32.mrf.mxu0  ;;  %v738_v48 = vld [vmem:[%s5813_s1 + $0x770] sm:$0xff] }
 0x130   :  { %1682 = vmatpush2.msra.mxu0 %v646_v47  ;;  %1397 = vmatprep.mubr.f32.mxu0 %v473_v52  ;;  %v885_v63 = vadd.f32 %v3990_v38, %v884_v59  ;;  %v1099_v2 = vpop.f32.mrf.mxu1  ;;  %v62_v57 = vld [vmem:[%s5814_s0 + $0x150] sm:$0xff] }
 0x131   :  { %1896 = vmatprep.subr.mxu1 %v2738_v0  ;;  %1398 = vmatmul.mubr.f32.gmra.mxu0 %v472_v54  ;;  %v886_v4 = vpop.f32.mrf.mxu0 }
 0x132   :  { %1612 = vmatprep.mubr.f32.mxu1 %v475_v55  ;;  %1897 = vmatpush2.msra.mxu1 %v678_v58  ;;  %v4281_v7 = vadd.f32 %v1099_v2, %v885_v63  ;;  %v1101_v8 = vpop.f32.mrf.mxu1  ;;  %v705_v58 = vld [vmem:[%s5813_s1 + $0x668] sm:$0xff] }
 0x133   :  { %1683 = vmatprep.subr.mxu0 %v2738_v0  ;;  %1613 = vmatmul.mubr.f32.gmra.mxu1 %v474_v60  ;;  %v889_v10 = vpop.f32.mrf.mxu0  ;;  %v77_v60 = vld [vmem:[%s5814_s0 + $0x1c8] sm:$0xff] }
 0x134   :  { %1684 = vmatpush2.msra.mxu0 %v645_v61  ;;  %1402 = vmatprep.mubr.f32.mxu0 %v489_v3  ;;  %v890_v15 = vadd.f32 %v3990_v38, %v889_v10  ;;  %v737_v2 = vld [vmem:[%s5813_s1 + $0x768] sm:$0xff]  ;;  %v76_v3 = vld [vmem:[%s5814_s0 + $0x1c0] sm:$0xff] }
 0x135   :  { %1898 = vmatprep.subr.mxu1 %v2738_v0  ;;  %1403 = vmatmul.mubr.f32.gmra.mxu0 %v488_v5  ;;  %v1104_v17 = vpop.f32.mrf.mxu1  ;;  %v891_v18 = vpop.f32.mrf.mxu0  ;;  %v79_v5 = vld [vmem:[%s5814_s0 + $0x1d8] sm:$0xff]  ;;  %v704_v10 = vld [vmem:[%s5813_s1 + $0x660] sm:$0xff] }
 0x136   :  { %1617 = vmatprep.mubr.f32.mxu1 %v491_v6  ;;  %1899 = vmatpush2.msra.mxu1 %v677_v9  ;;  %v4304_v21 = vadd.f32 %v1104_v17, %v890_v15  ;;  %v78_v9 = vld [vmem:[%s5814_s0 + $0x1d0] sm:$0xff]  ;;  %v736_v17 = vld [vmem:[%s5813_s1 + $0x760] sm:$0xff] }
 0x137   :  { %1685 = vmatprep.subr.mxu0 %v2738_v0  ;;  %1618 = vmatmul.mubr.f32.gmra.mxu1 %v490_v12  ;;  %v1106_v24 = vpop.f32.mrf.mxu1  ;;  %v894_v25 = vpop.f32.mrf.mxu0 }
 0x138   :  { %1686 = vmatpush2.msra.mxu0 %v644_v13  ;;  %1687 = vmatprep.mubr.f32.mxu0 %v29_v16  ;;  %v895_v29 = vadd.f32 %v3990_v38, %v894_v25  ;;  %v93_v13 = vld [vmem:[%s5814_s0 + $0x248] sm:$0xff]  ;;  %v703_v25 = vld [vmem:[%s5813_s1 + $0x658] sm:$0xff] }
 0x139   :  { %1900 = vmatprep.subr.mxu1 %v2738_v0  ;;  %1688 = vmatmul.mubr.f32.vlgmr.msra.gmra.mxu0 %v28_v19  ;;  %v1109_v31 = vpop.f32.mrf.mxu1  ;;  %v896_v32 = vpop.f32.mrf.mxu0  ;;  %v92_v19 = vld [vmem:[%s5814_s0 + $0x240] sm:$0xff] }
 0x13a   :  { %1901 = vmatpush2.msra.mxu1 %v676_v20  ;;  %1902 = vmatprep.mubr.f32.mxu1 %v31_v22  ;;  %v4327_v35 = vadd.f32 %v1109_v31, %v895_v29  ;;  %v95_v20 = vld [vmem:[%s5814_s0 + $0x258] sm:$0xff]  ;;  %v109_v29 = vld [vmem:[%s5814_s0 + $0x2c8] sm:$0xff] }
 0x13b   :  { %2053 = vmatprep.subr.mxu0 %v2738_v0  ;;  %1903 = vmatmul.mubr.f32.vlgmr.msra.gmra.mxu1 %v30_v26  ;;  %v1111_v39 = vpop.f32.mrf.mxu1  ;;  %v899_v40 = vpop.f32.mrf.mxu0  ;;  %v94_v26 = vld [vmem:[%s5814_s0 + $0x250] sm:$0xff]  ;;  %v735_v32 = vld [vmem:[%s5813_s1 + $0x758] sm:$0xff] }
 0x13c   :  { %2054 = vmatpush1.msra.mxu0 %v707_v27  ;;  %2268 = vmatprep.subr.mxu1 %v2738_v0  ;;  %v900_v44 = vadd.f32 %v3990_v38, %v899_v40 }
 0x13d   :  { %1692 = vmatprep.mubr.f32.mxu0 %v45_v30  ;;  %2269 = vmatpush1.msra.mxu1 %v739_v33  ;;  %v1114_v46 = vpop.f32.mrf.mxu1  ;;  %v901_v47 = vpop.f32.mrf.mxu0 }
 0x13e   :  { %1693 = vmatmul.mubr.f32.gmra.mxu0 %v44_v34  ;;  %1907 = vmatprep.mubr.f32.mxu1 %v47_v36  ;;  %v4350_v52 = vadd.f32 %v1114_v46, %v900_v44  ;;  %v108_v34 = vld [vmem:[%s5814_s0 + $0x2c0] sm:$0xff]  ;;  %v111_v36 = vld [vmem:[%s5814_s0 + $0x2d8] sm:$0xff] }
 0x13f   :  { %2055 = vmatprep.subr.mxu0 %v2738_v0  ;;  %1908 = vmatmul.mubr.f32.gmra.mxu1 %v46_v41  ;;  %v1116_v54 = vpop.f32.mrf.mxu1  ;;  %v904_v55 = vpop.f32.mrf.mxu0  ;;  %v702_v41 = vld [vmem:[%s5813_s1 + $0x650] sm:$0xff] }
 0x140   :  { %2056 = vmatpush1.msra.mxu0 %v706_v43  ;;  %2270 = vmatprep.subr.mxu1 %v2738_v0  ;;  %v905_v59 = vadd.f32 %v3990_v38, %v904_v55  ;;  %v110_v43 = vld [vmem:[%s5814_s0 + $0x2d0] sm:$0xff]  ;;  %v127_v54 = vld [vmem:[%s5814_s0 + $0x358] sm:$0xff] }
 0x141   :  { %1697 = vmatprep.mubr.f32.mxu0 %v61_v45  ;;  %2271 = vmatpush1.msra.mxu1 %v738_v48  ;;  %v906_v63 = vpop.f32.mrf.mxu0  ;;  %v125_v45 = vld [vmem:[%s5814_s0 + $0x348] sm:$0xff]  ;;  %v734_v48 = vld [vmem:[%s5813_s1 + $0x750] sm:$0xff] }
 0x142   :  { %1698 = vmatmul.mubr.f32.gmra.mxu0 %v60_v49  ;;  %v1119_v61 = vpop.f32.mrf.mxu1  ;;  %1912 = vmatprep.mubr.f32.mxu1 %v63_v53  ;;  %v124_v53 = vld [vmem:[%s5814_s0 + $0x340] sm:$0xff] }
 0x143   :  { %2057 = vmatprep.subr.mxu0 %v2738_v0  ;;  %v4373_v4 = vadd.f32 %v1119_v61, %v905_v59  ;;  %1913 = vmatmul.mubr.f32.gmra.mxu1 %v62_v57  ;;  %v701_v57 = vld [vmem:[%s5813_s1 + $0x648] sm:$0xff] }
 0x144   :  { %2058 = vmatpush1.msra.mxu0 %v705_v58  ;;  %v1121_v6 = vpop.f32.mrf.mxu1  ;;  %v909_v8 = vpop.f32.mrf.mxu0  ;;  %2272 = vmatprep.subr.mxu1 %v2738_v0  ;;  %v126_v58 = vld [vmem:[%s5814_s0 + $0x350] sm:$0xff] }
 0x145   :  { %1702 = vmatprep.mubr.f32.mxu0 %v77_v60  ;;  %v910_v12 = vadd.f32 %v3990_v38, %v909_v8  ;;  %2273 = vmatpush1.msra.mxu1 %v737_v2  ;;  %v141_v60 = vld [vmem:[%s5814_s0 + $0x3c8] sm:$0xff]  ;;  %v143_v6 = vld [vmem:[%s5814_s0 + $0x3d8] sm:$0xff] }
 0x146   :  { %1703 = vmatmul.mubr.f32.gmra.mxu0 %v76_v3  ;;  %v1124_v15 = vpop.f32.mrf.mxu1  ;;  %v911_v16 = vpop.f32.mrf.mxu0  ;;  %1917 = vmatprep.mubr.f32.mxu1 %v79_v5  ;;  %v733_v2 = vld [vmem:[%s5813_s1 + $0x748] sm:$0xff]  ;;  %v140_v5 = vld [vmem:[%s5814_s0 + $0x3c0] sm:$0xff] }
 0x147   :  { %2059 = vmatprep.subr.mxu0 %v2738_v0  ;;  %v4393_v18 = vadd.f32 %v1124_v15, %v910_v12  ;;  %1918 = vmatmul.mubr.f32.gmra.mxu1 %v78_v9  ;;  %v142_v12 = vld [vmem:[%s5814_s0 + $0x3d0] sm:$0xff] }
 0x148   :  { %2060 = vmatpush1.msra.mxu0 %v704_v10  ;;  %v1126_v22 = vpop.f32.mrf.mxu1  ;;  %v914_v24 = vpop.f32.mrf.mxu0  ;;  %2274 = vmatprep.subr.mxu1 %v2738_v0  ;;  %v700_v10 = vld [vmem:[%s5813_s1 + $0x640] sm:$0xff] }
 0x149   :  { %1707 = vmatprep.mubr.f32.mxu0 %v93_v13  ;;  %v915_v27 = vadd.f32 %v3990_v38, %v914_v24  ;;  %2061 = vmatprep.subr.mxu0 %v2738_v0  ;;  %v699_v22 = vld [vmem:[%s5813_s1 + $0x638] sm:$0xff] }
 0x14a   :  { %2275 = vmatpush1.msra.mxu1 %v736_v17  ;;  %v1129_v30 = vpop.f32.mrf.mxu1  ;;  %v916_v31 = vpop.f32.mrf.mxu0  ;;  %1708 = vmatmul.mubr.f32.gmra.mxu0 %v92_v19  ;;  %v732_v17 = vld [vmem:[%s5813_s1 + $0x740] sm:$0xff]  ;;  %v157_v19 = vld [vmem:[%s5814_s0 + $0x448] sm:$0xff]  ;;  %v159_v24 = vld [vmem:[%s5814_s0 + $0x458] sm:$0xff] }
 0x14b   :  { %1922 = vmatprep.mubr.f32.mxu1 %v95_v20  ;;  %v4416_v33 = vadd.f32 %v1129_v30, %v915_v27  ;;  %2062 = vmatpush1.msra.mxu0 %v703_v25  ;;  %v156_v27 = vld [vmem:[%s5814_s0 + $0x440] sm:$0xff]  ;;  %v158_v30 = vld [vmem:[%s5814_s0 + $0x450] sm:$0xff] }
 0x14c   :  { %1923 = vmatmul.mubr.f32.gmra.mxu1 %v94_v26  ;;  %v1131_v39 = vpop.f32.mrf.mxu1  ;;  %v919_v40 = vpop.f32.mrf.mxu0  ;;  %2276 = vmatprep.subr.mxu1 %v2738_v0 }
 0x14d   :  { %1712 = vmatprep.mubr.f32.mxu0 %v109_v29  ;;  %v920_v44 = vadd.f32 %v3990_v38, %v919_v40  ;;  %2277 = vmatpush1.msra.mxu1 %v735_v32  ;;  %v698_v40 = vld [vmem:[%s5813_s1 + $0x630] sm:$0xff] }
 0x14e   :  { %2063 = vmatprep.subr.mxu0 %v2738_v0  ;;  %v1134_v46 = vpop.f32.mrf.mxu1  ;;  %v921_v47 = vpop.f32.mrf.mxu0  ;;  %1713 = vmatmul.mubr.f32.gmra.mxu0 %v108_v34  ;;  %v731_v34 = vld [vmem:[%s5813_s1 + $0x738] sm:$0xff] }
 0x14f   :  { %1927 = vmatprep.mubr.f32.mxu1 %v111_v36  ;;  %v4439_v49 = vadd.f32 %v1134_v46, %v920_v44  ;;  %2064 = vmatpush1.msra.mxu0 %v702_v41  ;;  %v173_v36 = vld [vmem:[%s5814_s0 + $0x4c8] sm:$0xff]  ;;  %v175_v41 = vld [vmem:[%s5814_s0 + $0x4d8] sm:$0xff]  ;;  %v174_v47 = vld [vmem:[%s5814_s0 + $0x4d0] sm:$0xff] }
 0x150   :  { %1928 = vmatmul.mubr.f32.gmra.mxu1 %v110_v43  ;;  %v1136_v55 = vpop.f32.mrf.mxu1  ;;  %2278 = vmatprep.subr.mxu1 %v2738_v0  ;;  %v924_v59 = vpop.f32.mrf.mxu0 }
 0x151   :  { %1717 = vmatprep.mubr.f32.mxu0 %v125_v45  ;;  %2279 = vmatpush1.msra.mxu1 %v734_v48  ;;  %v925_v61 = vadd.f32 %v3990_v38, %v924_v59  ;;  %v172_v45 = vld [vmem:[%s5814_s0 + $0x4c0] sm:$0xff]  ;;  %v189_v55 = vld [vmem:[%s5814_s0 + $0x548] sm:$0xff]  ;;  %v191_v59 = vld [vmem:[%s5814_s0 + $0x558] sm:$0xff] }
 0x152   :  { %2065 = vmatprep.subr.mxu0 %v2738_v0  ;;  %v1139_v63 = vpop.f32.mrf.mxu1  ;;  %1718 = vmatmul.mubr.f32.gmra.mxu0 %v124_v53  ;;  %v926_v3 = vpop.f32.mrf.mxu0 }
 0x153   :  { %1932 = vmatprep.mubr.f32.mxu1 %v127_v54  ;;  %2066 = vmatpush1.msra.mxu0 %v701_v57  ;;  %v4468_v8 = vadd.f32 %v1139_v63, %v925_v61  ;;  %v730_v54 = vld [vmem:[%s5813_s1 + $0x730] sm:$0xff]  ;;  %v188_v63 = vld [vmem:[%s5814_s0 + $0x540] sm:$0xff] }
 0x154   :  { %1933 = vmatmul.mubr.f32.gmra.mxu1 %v126_v58  ;;  %v1141_v9 = vpop.f32.mrf.mxu1  ;;  %2280 = vmatprep.subr.mxu1 %v2738_v0  ;;  %v929_v13 = vpop.f32.mrf.mxu0  ;;  %v697_v58 = vld [vmem:[%s5813_s1 + $0x628] sm:$0xff] }
 0x155   :  { %1722 = vmatprep.mubr.f32.mxu0 %v141_v60  ;;  %2281 = vmatpush1.msra.mxu1 %v733_v2  ;;  %v930_v15 = vadd.f32 %v3990_v38, %v929_v13  ;;  %v190_v2 = vld [vmem:[%s5814_s0 + $0x550] sm:$0xff]  ;;  %v207_v13 = vld [vmem:[%s5814_s0 + $0x5d8] sm:$0xff] }
 0x156   :  { %2067 = vmatprep.subr.mxu0 %v2738_v0  ;;  %v1144_v16 = vpop.f32.mrf.mxu1  ;;  %1723 = vmatmul.mubr.f32.gmra.mxu0 %v140_v5  ;;  %v931_v20 = vpop.f32.mrf.mxu0  ;;  %v729_v5 = vld [vmem:[%s5813_s1 + $0x728] sm:$0xff] }
 0x157   :  { %1937 = vmatprep.mubr.f32.mxu1 %v143_v6  ;;  %2068 = vmatpush1.msra.mxu0 %v700_v10  ;;  %v4491_v25 = vadd.f32 %v1144_v16, %v930_v15  ;;  %v205_v6 = vld [vmem:[%s5814_s0 + $0x5c8] sm:$0xff]  ;;  %v204_v16 = vld [vmem:[%s5814_s0 + $0x5c0] sm:$0xff]  ;;  %v206_v20 = vld [vmem:[%s5814_s0 + $0x5d0] sm:$0xff] }
 0x158   :  { %1938 = vmatmul.mubr.f32.gmra.mxu1 %v142_v12  ;;  %v1146_v26 = vpop.f32.mrf.mxu1  ;;  %2282 = vmatprep.subr.mxu1 %v2738_v0  ;;  %v934_v29 = vpop.f32.mrf.mxu0  ;;  %v696_v12 = vld [vmem:[%s5813_s1 + $0x620] sm:$0xff] }
 0x159   :  { %2069 = vmatprep.subr.mxu0 %v2738_v0  ;;  %2283 = vmatpush1.msra.mxu1 %v732_v17  ;;  %v935_v31 = vadd.f32 %v3990_v38, %v934_v29  ;;  %v695_v26 = vld [vmem:[%s5813_s1 + $0x618] sm:$0xff] }
 0x15a   :  { %1727 = vmatprep.mubr.f32.mxu0 %v157_v19  ;;  %v1149_v32 = vpop.f32.mrf.mxu1  ;;  %2070 = vmatpush1.msra.mxu0 %v699_v22  ;;  %v936_v39 = vpop.f32.mrf.mxu0 }
 0x15b   :  { %1942 = vmatprep.mubr.f32.mxu1 %v159_v24  ;;  %1728 = vmatmul.mubr.f32.gmra.mxu0 %v156_v27  ;;  %v4515_v43 = vadd.f32 %v1149_v32, %v935_v31  ;;  %v728_v24 = vld [vmem:[%s5813_s1 + $0x720] sm:$0xff]  ;;  %v727_v39 = vld [vmem:[%s5813_s1 + $0x718] sm:$0xff] }
 0x15c   :  { %2284 = vmatprep.subr.mxu1 %v2738_v0  ;;  %v1151_v44 = vpop.f32.mrf.mxu1  ;;  %1943 = vmatmul.mubr.f32.gmra.mxu1 %v158_v30  ;;  %v939_v46 = vpop.f32.mrf.mxu0  ;;  %v221_v30 = vld [vmem:[%s5814_s0 + $0x648] sm:$0xff]  ;;  %v220_v32 = vld [vmem:[%s5814_s0 + $0x640] sm:$0xff] }
 0x15d   :  { %2071 = vmatprep.subr.mxu0 %v2738_v0  ;;  %2285 = vmatpush1.msra.mxu1 %v731_v34  ;;  %v940_v48 = vadd.f32 %v3990_v38, %v939_v46  ;;  %v694_v44 = vld [vmem:[%s5813_s1 + $0x610] sm:$0xff] }
 0x15e   :  { %1732 = vmatprep.mubr.f32.mxu0 %v173_v36  ;;  %v1154_v53 = vpop.f32.mrf.mxu1  ;;  %2072 = vmatpush1.msra.mxu0 %v698_v40  ;;  %v941_v57 = vpop.f32.mrf.mxu0 }
 0x15f   :  { %1947 = vmatprep.mubr.f32.mxu1 %v175_v41  ;;  %1733 = vmatmul.mubr.f32.gmra.mxu0 %v172_v45  ;;  %v4538_v60 = vadd.f32 %v1154_v53, %v940_v48  ;;  %v222_v41 = vld [vmem:[%s5814_s0 + $0x650] sm:$0xff]  ;;  %v4603_v45 = vld [vmem:[%s5815_s2] ss:$0 sm:$0xff]  ;;  %v237_v48 = vld [vmem:[%s5814_s0 + $0x6c8] sm:$0xff] }
 0x160   :  { %2286 = vmatprep.subr.mxu1 %v2738_v0  ;;  %v1156_v61 = vpop.f32.mrf.mxu1  ;;  %1948 = vmatmul.mubr.f32.gmra.mxu1 %v174_v47 }
 0x161   :  { %2073 = vmatprep.subr.mxu0 %v2738_v0  ;;  %2287 = vmatpush1.msra.mxu1 %v730_v54  ;;  %v944_v3 = vpop.f32.mrf.mxu0  ;;  %v236_v54 = vld [vmem:[%s5814_s0 + $0x6c0] sm:$0xff] }
 0x162   :  { %1737 = vmatprep.mubr.f32.mxu0 %v189_v55  ;;  %2074 = vmatpush1.msra.mxu0 %v697_v58  ;;  %v945_v9 = vadd.f32 %v3990_v38, %v944_v3  ;;  %v1159_v10 = vpop.f32.mrf.mxu1  ;;  %v239_v55 = vld [vmem:[%s5814_s0 + $0x6d8] sm:$0xff] }
 0x163   :  { %1952 = vmatprep.mubr.f32.mxu1 %v191_v59  ;;  %1738 = vmatmul.mubr.f32.gmra.mxu0 %v188_v63  ;;  %v946_v15 = vpop.f32.mrf.mxu0  ;;  %v726_v59 = vld [vmem:[%s5813_s1 + $0x710] sm:$0xff] }
 0x164   :  { %2288 = vmatprep.subr.mxu1 %v2738_v0  ;;  %1953 = vmatmul.mubr.f32.gmra.mxu1 %v190_v2  ;;  %v4565_v17 = vadd.f32 %v1159_v10, %v945_v9  ;;  %v1161_v19 = vpop.f32.mrf.mxu1  ;;  %v238_v63 = vld [vmem:[%s5814_s0 + $0x6d0] sm:$0xff]  ;;  %v693_v2 = vld [vmem:[%s5813_s1 + $0x608] sm:$0xff]  ;;  %v252_v10 = vld [vmem:[%s5814_s0 + $0x740] sm:$0xff] }
 0x165   :  { %2075 = vmatprep.subr.mxu0 %v2738_v0  ;;  %2289 = vmatpush1.msra.mxu1 %v729_v5  ;;  %v949_v22 = vpop.f32.mrf.mxu0 }
 0x166   :  { %1742 = vmatprep.mubr.f32.mxu0 %v205_v6  ;;  %2076 = vmatpush1.msra.mxu0 %v696_v12  ;;  %v950_v27 = vadd.f32 %v3990_v38, %v949_v22  ;;  %v1164_v29 = vpop.f32.mrf.mxu1  ;;  %v223_v38 = vld [vmem:[%s5814_s0 + $0x658] sm:$0xff]  ;;  %v253_v6 = vld [vmem:[%s5814_s0 + $0x748] sm:$0xff]  ;;  %v692_v22 = vld [vmem:[%s5813_s1 + $0x600] sm:$0xff] }
 0x167   :  { %1957 = vmatprep.mubr.f32.mxu1 %v207_v13  ;;  %1743 = vmatmul.mubr.f32.gmra.mxu0 %v204_v16  ;;  %v951_v31 = vpop.f32.mrf.mxu0  ;;  %v255_v12 = vld [vmem:[%s5814_s0 + $0x758] sm:$0xff]  ;;  %v725_v16 = vld [vmem:[%s5813_s1 + $0x708] sm:$0xff] }
 0x168   :  { %2290 = vmatprep.subr.mxu1 %v2738_v0  ;;  %1958 = vmatmul.mubr.f32.gmra.mxu1 %v206_v20  ;;  %v4588_v34 = vadd.f32 %v1164_v29, %v950_v27  ;;  %v1166_v36 = vpop.f32.mrf.mxu1  ;;  %v254_v20 = vld [vmem:[%s5814_s0 + $0x750] sm:$0xff]  ;;  %v271_v31 = vld [vmem:[%s5814_s0 + $0x7d8] sm:$0xff] }
 0x169   :  { %2077 = vmatprep.subr.mxu0 %v2738_v0  ;;  %2291 = vmatpush1.msra.mxu1 %v728_v24  ;;  %v954_v40 = vpop.f32.mrf.mxu0 }
 0x16a   :  { %2078 = vmatpush1.msra.mxu0 %v695_v26  ;;  %1747 = vmatprep.mubr.f32.mxu0 %v221_v30  ;;  %v955_v46 = vadd.f32 %v4603_v45, %v954_v40  ;;  %v1169_v47 = vpop.f32.mrf.mxu1  ;;  %v269_v26 = vld [vmem:[%s5814_s0 + $0x7c8] sm:$0xff]  ;;  %v268_v30 = vld [vmem:[%s5814_s0 + $0x7c0] sm:$0xff]  ;;  %v270_v40 = vld [vmem:[%s5814_s0 + $0x7d0] sm:$0xff] }
 0x16b   :  { %2292 = vmatprep.subr.mxu1 %v2738_v0  ;;  %1748 = vmatmul.mubr.f32.gmra.mxu0 %v220_v32  ;;  %v956_v53 = vpop.f32.mrf.mxu0 }
 0x16c   :  { %1962 = vmatprep.mubr.f32.mxu1 %v223_v38  ;;  %2293 = vmatpush1.msra.mxu1 %v727_v39  ;;  %v4616_v57 = vadd.f32 %v1169_v47, %v955_v46  ;;  %v1171_v58 = vpop.f32.mrf.mxu1  ;;  %v724_v38 = vld [vmem:[%s5813_s1 + $0x700] sm:$0xff]  ;;  %v285_v46 = vld [vmem:[%s5814_s0 + $0x848] sm:$0xff]  ;;  %v755_v53 = vld [vmem:[%s5813_s1 + $0x7f8] sm:$0xff] }
 0x16d   :  { %2079 = vmatprep.subr.mxu0 %v2738_v0  ;;  %1963 = vmatmul.mubr.f32.gmra.mxu1 %v222_v41  ;;  %v959_v61 = vpop.f32.mrf.mxu0  ;;  %v723_v41 = vld [vmem:[%s5813_s1 + $0x6f8] sm:$0xff] }
 0x16e   :  { %2080 = vmatpush1.msra.mxu0 %v694_v44  ;;  %1752 = vmatprep.mubr.f32.mxu0 %v237_v48  ;;  %v960_v3 = vadd.f32 %v4603_v45, %v959_v61  ;;  %v1174_v5 = vpop.f32.mrf.mxu1  ;;  %v287_v58 = vld [vmem:[%s5814_s0 + $0x858] sm:$0xff] }
 0x16f   :  { %2294 = vmatprep.subr.mxu1 %v2738_v0  ;;  %1753 = vmatmul.mubr.f32.gmra.mxu0 %v236_v54  ;;  %v961_v9 = vpop.f32.mrf.mxu0  ;;  %v284_v54 = vld [vmem:[%s5814_s0 + $0x840] sm:$0xff] }
 0x170   :  { %1967 = vmatprep.mubr.f32.mxu1 %v239_v55  ;;  %2295 = vmatpush1.msra.mxu1 %v726_v59  ;;  %v4639_v13 = vadd.f32 %v1174_v5, %v960_v3  ;;  %v1176_v15 = vpop.f32.mrf.mxu1  ;;  %v301_v5 = vld [vmem:[%s5814_s0 + $0x8c8] sm:$0xff] }
 0x171   :  { %2081 = vmatprep.subr.mxu0 %v2738_v0  ;;  %1968 = vmatmul.mubr.f32.gmra.mxu1 %v238_v63  ;;  %v964_v19 = vpop.f32.mrf.mxu0  ;;  %v286_v63 = vld [vmem:[%s5814_s0 + $0x850] sm:$0xff]  ;;  %v303_v15 = vld [vmem:[%s5814_s0 + $0x8d8] sm:$0xff] }
 0x172   :  { %2082 = vmatpush1.msra.mxu0 %v693_v2  ;;  %1757 = vmatprep.mubr.f32.mxu0 %v253_v6  ;;  %v965_v24 = vadd.f32 %v4603_v45, %v964_v19  ;;  %v722_v2 = vld [vmem:[%s5813_s1 + $0x6f0] sm:$0xff] }
 0x173   :  { %2296 = vmatprep.subr.mxu1 %v2738_v0  ;;  %1758 = vmatmul.mubr.f32.gmra.mxu0 %v252_v10  ;;  %v1179_v27 = vpop.f32.mrf.mxu1  ;;  %v966_v29 = vpop.f32.mrf.mxu0  ;;  %v754_v10 = vld [vmem:[%s5813_s1 + $0x7f0] sm:$0xff] }
 0x174   :  { %1972 = vmatprep.mubr.f32.mxu1 %v255_v12  ;;  %2297 = vmatpush1.msra.mxu1 %v725_v16  ;;  %v4662_v32 = vadd.f32 %v1179_v27, %v965_v24  ;;  %v300_v12 = vld [vmem:[%s5814_s0 + $0x8c0] sm:$0xff] }
 0x175   :  { %2083 = vmatprep.subr.mxu0 %v2738_v0  ;;  %1973 = vmatmul.mubr.f32.gmra.mxu1 %v254_v20  ;;  %v1181_v36 = vpop.f32.mrf.mxu1  ;;  %v969_v39 = vpop.f32.mrf.mxu0  ;;  %v302_v20 = vld [vmem:[%s5814_s0 + $0x8d0] sm:$0xff] }
 0x176   :  { %2084 = vmatpush1.msra.mxu0 %v692_v22  ;;  %1762 = vmatprep.mubr.f32.mxu0 %v269_v26  ;;  %v970_v44 = vadd.f32 %v4603_v45, %v969_v39  ;;  %v721_v22 = vld [vmem:[%s5813_s1 + $0x6e8] sm:$0xff] }
 0x177   :  { %2298 = vmatprep.subr.mxu1 %v2738_v0  ;;  %1763 = vmatmul.mubr.f32.gmra.mxu0 %v268_v30  ;;  %v1184_v47 = vpop.f32.mrf.mxu1  ;;  %v971_v48 = vpop.f32.mrf.mxu0  ;;  %v317_v26 = vld [vmem:[%s5814_s0 + $0x948] sm:$0xff] }
 0x178   :  { %1977 = vmatprep.mubr.f32.mxu1 %v271_v31  ;;  %2085 = vmatprep.subr.mxu0 %v2738_v0  ;;  %v4685_v55 = vadd.f32 %v1184_v47, %v970_v44  ;;  %v753_v30 = vld [vmem:[%s5813_s1 + $0x7e8] sm:$0xff]  ;;  %v316_v31 = vld [vmem:[%s5814_s0 + $0x940] sm:$0xff] }
 0x179   :  { %2299 = vmatpush1.msra.mxu1 %v724_v38  ;;  %2086 = vmatpush2.msra.mxu0 %v723_v41  ;;  %v1186_v59 = vpop.f32.mrf.mxu1  ;;  %v974_v61 = vpop.f32.mrf.mxu0  ;;  %v319_v38 = vld [vmem:[%s5814_s0 + $0x958] sm:$0xff]  ;;  %v720_v41 = vld [vmem:[%s5813_s1 + $0x6e0] sm:$0xff] }
 0x17a   :  { %1978 = vmatmul.mubr.f32.gmra.mxu1 %v270_v40  ;;  %2300 = vmatprep.subr.mxu1 %v2738_v0  ;;  %v975_v3 = vadd.f32 %v4603_v45, %v974_v61  ;;  %v318_v40 = vld [vmem:[%s5814_s0 + $0x950] sm:$0xff] }
 0x17b   :  { %1767 = vmatprep.mubr.f32.mxu0 %v285_v46  ;;  %2301 = vmatpush2.msra.mxu1 %v755_v53  ;;  %v1189_v6 = vpop.f32.mrf.mxu1  ;;  %v976_v9 = vpop.f32.mrf.mxu0  ;;  %v333_v46 = vld [vmem:[%s5814_s0 + $0x9c8] sm:$0xff]  ;;  %v752_v53 = vld [vmem:[%s5813_s1 + $0x7e0] sm:$0xff] }
 0x17c   :  { %1768 = vmatmul.mubr.f32.gmra.mxu0 %v284_v54  ;;  %1982 = vmatprep.mubr.f32.mxu1 %v287_v58  ;;  %v4708_v45 = vadd.f32 %v1189_v6, %v975_v3  ;;  %v335_v58 = vld [vmem:[%s5814_s0 + $0x9d8] sm:$0xff] }
 0x17d   :  { %2087 = vmatprep.subr.mxu0 %v2738_v0  ;;  %v1191_v16 = vpop.f32.mrf.mxu1  ;;  %v1259_v19 = vpop.f32.mrf.mxu0  ;;  %2302 = vmatprep.subr.mxu1 %v2738_v0 }
 0x17e   :  { %1983 = vmatmul.mubr.f32.gmra.mxu1 %v286_v63  ;;  %2088 = vmatpush2.msra.mxu0 %v722_v2  ;;  %v1260_v24 = vadd.f32 %v1259_v19, %v4020_v51  ;;  %v719_v63 = vld [vmem:[%s5813_s1 + $0x6d8] sm:$0xff]  ;;  %v334_v2 = vld [vmem:[%s5814_s0 + $0x9d0] sm:$0xff] }
 0x17f   :  { %1772 = vmatprep.mubr.f32.mxu0 %v301_v5  ;;  %2303 = vmatpush2.msra.mxu1 %v754_v10  ;;  %v1474_v27 = vpop.f32.mrf.mxu1  ;;  %v1261_v29 = vpop.f32.mrf.mxu0  ;;  %v349_v5 = vld [vmem:[%s5814_s0 + $0xa48] sm:$0xff]  ;;  %v751_v10 = vld [vmem:[%s5813_s1 + $0x7d8] sm:$0xff] }
 0x180   :  { %1773 = vmatmul.mubr.f32.gmra.mxu0 %v300_v12  ;;  %1987 = vmatprep.mubr.f32.mxu1 %v303_v15  ;;  %v4731_v51 = vadd.f32 %v1474_v27, %v1260_v24  ;;  %v351_v15 = vld [vmem:[%s5814_s0 + $0xa58] sm:$0xff] }
 0x181   :  { %2089 = vmatprep.subr.mxu0 %v2738_v0  ;;  %v1476_v36 = vpop.f32.mrf.mxu1  ;;  %2304 = vmatprep.subr.mxu1 %v2738_v0 }
 0x182   :  { %1988 = vmatmul.mubr.f32.gmra.mxu1 %v302_v20  ;;  %2090 = vmatpush2.msra.mxu0 %v721_v22  ;;  %v1264_v39 = vpop.f32.mrf.mxu0  ;;  %v718_v20 = vld [vmem:[%s5813_s1 + $0x6d0] sm:$0xff] }
 0x183   :  { %1777 = vmatprep.mubr.f32.mxu0 %v317_v26  ;;  %v1265_v44 = vadd.f32 %v1264_v39, %v4040_v62  ;;  %2305 = vmatpush2.msra.mxu1 %v753_v30  ;;  %v1479_v47 = vpop.f32.mrf.mxu1  ;;  %v332_v62 = vld [vmem:[%s5814_s0 + $0x9c0] sm:$0xff]  ;;  %v350_v22 = vld [vmem:[%s5814_s0 + $0xa50] sm:$0xff]  ;;  %v365_v26 = vld [vmem:[%s5814_s0 + $0xac8] sm:$0xff] }
 0x184   :  { %1778 = vmatmul.mubr.f32.gmra.mxu0 %v316_v31  ;;  %v1266_v48 = vpop.f32.mrf.mxu0  ;;  %1992 = vmatprep.mubr.f32.mxu1 %v319_v38  ;;  %v750_v30 = vld [vmem:[%s5813_s1 + $0x7d0] sm:$0xff]  ;;  %v367_v38 = vld [vmem:[%s5814_s0 + $0xad8] sm:$0xff]  ;;  %v717_v39 = vld [vmem:[%s5813_s1 + $0x6c8] sm:$0xff] }
 0x185   :  { %2091 = vmatprep.subr.mxu0 %v2738_v0  ;;  %v4751_v54 = vadd.f32 %v1479_v47, %v1265_v44  ;;  %v1481_v59 = vpop.f32.mrf.mxu1  ;;  %2306 = vmatprep.subr.mxu1 %v2738_v0  ;;  %v381_v44 = vld [vmem:[%s5814_s0 + $0xb48] sm:$0xff] }
 0x186   :  { %1993 = vmatmul.mubr.f32.gmra.mxu1 %v318_v40  ;;  %2092 = vmatpush2.msra.mxu0 %v720_v41  ;;  %v1269_v61 = vpop.f32.mrf.mxu0  ;;  %v366_v40 = vld [vmem:[%s5814_s0 + $0xad0] sm:$0xff]  ;;  %v749_v48 = vld [vmem:[%s5813_s1 + $0x7c8] sm:$0xff] }
 0x187   :  { %1782 = vmatprep.mubr.f32.mxu0 %v333_v46  ;;  %v1270_v3 = vadd.f32 %v1269_v61, %v4063_v11  ;;  %2093 = vmatprep.subr.mxu0 %v2738_v0  ;;  %v1484_v6 = vpop.f32.mrf.mxu1  ;;  %v348_v11 = vld [vmem:[%s5814_s0 + $0xa40] sm:$0xff] }
 0x188   :  { %2307 = vmatpush2.msra.mxu1 %v752_v53  ;;  %v1271_v9 = vpop.f32.mrf.mxu0  ;;  %1783 = vmatmul.mubr.f32.gmra.mxu0 %v332_v62  ;;  %v380_v62 = vld [vmem:[%s5814_s0 + $0xb40] sm:$0xff] }
 0x189   :  { %1997 = vmatprep.mubr.f32.mxu1 %v335_v58  ;;  %v4774_v12 = vadd.f32 %v1484_v6, %v1270_v3  ;;  %2094 = vmatpush2.msra.mxu0 %v719_v63  ;;  %v1486_v16 = vpop.f32.mrf.mxu1  ;;  %v383_v58 = vld [vmem:[%s5814_s0 + $0xb58] sm:$0xff]  ;;  %v716_v61 = vld [vmem:[%s5813_s1 + $0x6c0] sm:$0xff]  ;;  %v382_v63 = vld [vmem:[%s5814_s0 + $0xb50] sm:$0xff] }
 0x18a   :  { %1998 = vmatmul.mubr.f32.gmra.mxu1 %v334_v2  ;;  %v1274_v19 = vpop.f32.mrf.mxu0  ;;  %2308 = vmatprep.subr.mxu1 %v2738_v0  ;;  %v748_v6 = vld [vmem:[%s5813_s1 + $0x7c0] sm:$0xff]  ;;  %v397_v9 = vld [vmem:[%s5814_s0 + $0xbc8] sm:$0xff] }
 0x18b   :  { %1787 = vmatprep.mubr.f32.mxu0 %v349_v5  ;;  %v1275_v24 = vadd.f32 %v1274_v19, %v4086_v23  ;;  %2309 = vmatpush2.msra.mxu1 %v751_v10  ;;  %v1489_v27 = vpop.f32.mrf.mxu1  ;;  %v364_v23 = vld [vmem:[%s5814_s0 + $0xac0] sm:$0xff] }
 0x18c   :  { %2095 = vmatprep.subr.mxu0 %v2738_v0  ;;  %v1276_v29 = vpop.f32.mrf.mxu0  ;;  %1788 = vmatmul.mubr.f32.gmra.mxu0 %v348_v11  ;;  %v715_v11 = vld [vmem:[%s5813_s1 + $0x6b8] sm:$0xff]  ;;  %v396_v19 = vld [vmem:[%s5814_s0 + $0xbc0] sm:$0xff] }
 0x18d   :  { %2002 = vmatprep.mubr.f32.mxu1 %v351_v15  ;;  %v4797_v31 = vadd.f32 %v1489_v27, %v1275_v24  ;;  %2096 = vmatpush2.msra.mxu0 %v718_v20  ;;  %v1491_v36 = vpop.f32.mrf.mxu1  ;;  %v747_v27 = vld [vmem:[%s5813_s1 + $0x7b8] sm:$0xff]  ;;  %v413_v29 = vld [vmem:[%s5814_s0 + $0xc48] sm:$0xff] }
 0x18e   :  { %2003 = vmatmul.mubr.f32.gmra.mxu1 %v350_v22  ;;  %2310 = vmatprep.subr.mxu1 %v2738_v0  ;;  %v1279_v41 = vpop.f32.mrf.mxu0  ;;  %v398_v22 = vld [vmem:[%s5814_s0 + $0xbd0] sm:$0xff] }
 0x18f   :  { %1792 = vmatprep.mubr.f32.mxu0 %v365_v26  ;;  %2311 = vmatpush2.msra.mxu1 %v750_v30  ;;  %v1280_v46 = vadd.f32 %v1279_v41, %v4115_v37  ;;  %v414_v41 = vld [vmem:[%s5814_s0 + $0xc50] sm:$0xff] }
 0x190   :  { %2097 = vmatprep.subr.mxu0 %v2738_v0  ;;  %v1494_v47 = vpop.f32.mrf.mxu1  ;;  %1793 = vmatmul.mubr.f32.gmra.mxu0 %v364_v23  ;;  %v1281_v53 = vpop.f32.mrf.mxu0  ;;  %v714_v23 = vld [vmem:[%s5813_s1 + $0x6b0] sm:$0xff] }
 0x191   :  { %2007 = vmatprep.mubr.f32.mxu1 %v367_v38  ;;  %2098 = vmatpush2.msra.mxu0 %v717_v39  ;;  %v4826_v59 = vadd.f32 %v1494_v47, %v1280_v46  ;;  %v412_v39 = vld [vmem:[%s5814_s0 + $0xc40] sm:$0xff]  ;;  %v746_v47 = vld [vmem:[%s5813_s1 + $0x7b0] sm:$0xff] }
 0x192   :  { %2008 = vmatmul.mubr.f32.gmra.mxu1 %v366_v40  ;;  %v1496_v37 = vpop.f32.mrf.mxu1  ;;  %2312 = vmatprep.subr.mxu1 %v2738_v0  ;;  %v1284_v2 = vpop.f32.mrf.mxu0 }
 0x193   :  { %1797 = vmatprep.mubr.f32.mxu0 %v381_v44  ;;  %2313 = vmatpush2.msra.mxu1 %v749_v48  ;;  %v1285_v3 = vadd.f32 %v1284_v2, %v4138_v50  ;;  %v399_v50 = vld [vmem:[%s5814_s0 + $0xbd8] sm:$0xff]  ;;  %v429_v48 = vld [vmem:[%s5814_s0 + $0xcc8] sm:$0xff] }
 0x194   :  { %2099 = vmatprep.subr.mxu0 %v2738_v0  ;;  %v1499_v5 = vpop.f32.mrf.mxu1  ;;  %1798 = vmatmul.mubr.f32.gmra.mxu0 %v380_v62  ;;  %v1286_v10 = vpop.f32.mrf.mxu0  ;;  %v713_v62 = vld [vmem:[%s5813_s1 + $0x6a8] sm:$0xff] }
 0x195   :  { %2012 = vmatprep.mubr.f32.mxu1 %v383_v58  ;;  %2100 = vmatpush2.msra.mxu0 %v716_v61  ;;  %v4849_v15 = vadd.f32 %v1499_v5, %v1285_v3  ;;  %v428_v61 = vld [vmem:[%s5814_s0 + $0xcc0] sm:$0xff]  ;;  %v745_v3 = vld [vmem:[%s5813_s1 + $0x7a8] sm:$0xff] }
 0x196   :  { %2013 = vmatmul.mubr.f32.gmra.mxu1 %v382_v63  ;;  %v1501_v16 = vpop.f32.mrf.mxu1  ;;  %2314 = vmatprep.subr.mxu1 %v2738_v0  ;;  %v1289_v20 = vpop.f32.mrf.mxu0  ;;  %v430_v63 = vld [vmem:[%s5814_s0 + $0xcd0] sm:$0xff]  ;;  %v445_v5 = vld [vmem:[%s5814_s0 + $0xd48] sm:$0xff]  ;;  %v712_v10 = vld [vmem:[%s5813_s1 + $0x6a0] sm:$0xff] }
 0x197   :  { %2101 = vmatprep.subr.mxu0 %v2738_v0  ;;  %2315 = vmatpush2.msra.mxu1 %v748_v6  ;;  %v1290_v24 = vadd.f32 %v1289_v20, %v4162_v1  ;;  %v415_v1 = vld [vmem:[%s5814_s0 + $0xc58] sm:$0xff]  ;;  %v446_v20 = vld [vmem:[%s5814_s0 + $0xd50] sm:$0xff] }
 0x198   :  { %1802 = vmatprep.mubr.f32.mxu0 %v397_v9  ;;  %v1504_v26 = vpop.f32.mrf.mxu1  ;;  %2102 = vmatpush2.msra.mxu0 %v715_v11  ;;  %v1291_v30 = vpop.f32.mrf.mxu0  ;;  %v447_v11 = vld [vmem:[%s5814_s0 + $0xd58] sm:$0xff] }
 0x199   :  { %2017 = vmatprep.mubr.f32.mxu1 %v399_v50  ;;  %1803 = vmatmul.mubr.f32.gmra.mxu0 %v396_v19  ;;  %v4873_v38 = vadd.f32 %v1504_v26, %v1290_v24  ;;  %v744_v24 = vld [vmem:[%s5813_s1 + $0x7a0] sm:$0xff]  ;;  %v711_v26 = vld [vmem:[%s5813_s1 + $0x698] sm:$0xff]  ;;  %v461_v30 = vld [vmem:[%s5814_s0 + $0xdc8] sm:$0xff] }
 0x19a   :  { %2316 = vmatprep.subr.mxu1 %v2738_v0  ;;  %v1506_v36 = vpop.f32.mrf.mxu1  ;;  %2018 = vmatmul.mubr.f32.gmra.mxu1 %v398_v22  ;;  %v1294_v40 = vpop.f32.mrf.mxu0 }
 0x19b   :  { %2103 = vmatprep.subr.mxu0 %v2738_v0  ;;  %2317 = vmatpush2.msra.mxu1 %v747_v27  ;;  %v1295_v44 = vadd.f32 %v1294_v40, %v4185_v14  ;;  %v431_v14 = vld [vmem:[%s5814_s0 + $0xcd8] sm:$0xff] }
 0x19c   :  { %1807 = vmatprep.mubr.f32.mxu0 %v413_v29  ;;  %v1509_v46 = vpop.f32.mrf.mxu1  ;;  %2104 = vmatpush2.msra.mxu0 %v714_v23  ;;  %v1296_v53 = vpop.f32.mrf.mxu0  ;;  %v743_v40 = vld [vmem:[%s5813_s1 + $0x798] sm:$0xff] }
 0x19d   :  { %2022 = vmatprep.mubr.f32.mxu1 %v415_v1  ;;  %1808 = vmatmul.mubr.f32.gmra.mxu0 %v412_v39  ;;  %v4896_v58 = vadd.f32 %v1509_v46, %v1295_v44  ;;  %v460_v1 = vld [vmem:[%s5814_s0 + $0xdc0] sm:$0xff]  ;;  %v462_v44 = vld [vmem:[%s5814_s0 + $0xdd0] sm:$0xff]  ;;  %v477_v53 = vld [vmem:[%s5814_s0 + $0xe48] sm:$0xff] }
 0x19e   :  { %2318 = vmatprep.subr.mxu1 %v2738_v0  ;;  %v1511_v37 = vpop.f32.mrf.mxu1  ;;  %2023 = vmatmul.mubr.f32.gmra.mxu1 %v414_v41  ;;  %v710_v46 = vld [vmem:[%s5813_s1 + $0x690] sm:$0xff] }
 0x19f   :  { %2105 = vmatprep.subr.mxu0 %v2738_v0  ;;  %2319 = vmatpush2.msra.mxu1 %v746_v47  ;;  %v1299_v2 = vpop.f32.mrf.mxu0  ;;  %v479_v37 = vld [vmem:[%s5814_s0 + $0xe58] sm:$0xff] }
 0x1a0   :  { %1812 = vmatprep.mubr.f32.mxu0 %v429_v48  ;;  %2106 = vmatpush2.msra.mxu0 %v713_v62  ;;  %v1300_v6 = vadd.f32 %v1299_v2, %v4212_v28  ;;  %v1514_v9 = vpop.f32.mrf.mxu1  ;;  %v444_v28 = vld [vmem:[%s5814_s0 + $0xd40] sm:$0xff] }
 0x1a1   :  { %2027 = vmatprep.mubr.f32.mxu1 %v431_v14  ;;  %1813 = vmatmul.mubr.f32.gmra.mxu0 %v428_v61  ;;  %v1301_v50 = vpop.f32.mrf.mxu0  ;;  %v476_v14 = vld [vmem:[%s5814_s0 + $0xe40] sm:$0xff] }
 0x1a2   :  { %2320 = vmatprep.subr.mxu1 %v2738_v0  ;;  %2028 = vmatmul.mubr.f32.gmra.mxu1 %v430_v63  ;;  %v4923_v16 = vadd.f32 %v1514_v9, %v1300_v6  ;;  %v1516_v19 = vpop.f32.mrf.mxu1  ;;  %v742_v63 = vld [vmem:[%s5813_s1 + $0x790] sm:$0xff]  ;;  %v492_v50 = vld [vmem:[%s5814_s0 + $0xec0] sm:$0x3] }
 0x1a3   :  { %2107 = vmatprep.subr.mxu0 %v2738_v0  ;;  %2321 = vmatpush2.msra.mxu1 %v745_v3  ;;  %v1304_v22 = vpop.f32.mrf.mxu0  ;;  %v478_v3 = vld [vmem:[%s5814_s0 + $0xe50] sm:$0xff] }
 0x1a4   :  { %1817 = vmatprep.mubr.f32.mxu0 %v445_v5  ;;  %2108 = vmatpush2.msra.mxu0 %v712_v10  ;;  %v1305_v27 = vadd.f32 %v1304_v22, %v4235_v42  ;;  %v1519_v29 = vpop.f32.mrf.mxu1  ;;  %v463_v42 = vld [vmem:[%s5814_s0 + $0xdd8] sm:$0xff]  ;;  %v709_v5 = vld [vmem:[%s5813_s1 + $0x688] sm:$0xff] }
 0x1a5   :  { %2032 = vmatprep.mubr.f32.mxu1 %v447_v11  ;;  %1818 = vmatmul.mubr.f32.gmra.mxu0 %v444_v28  ;;  %v1306_v23 = vpop.f32.mrf.mxu0  ;;  %v493_v10 = vld [vmem:[%s5814_s0 + $0xec8] sm:$0x3]  ;;  %v495_v28 = vld [vmem:[%s5814_s0 + $0xed8] sm:$0x3] }
 0x1a6   :  { %2322 = vmatprep.subr.mxu1 %v2738_v0  ;;  %2033 = vmatmul.mubr.f32.gmra.mxu1 %v446_v20  ;;  %v4946_v36 = vadd.f32 %v1519_v29, %v1305_v27  ;;  %v1521_v39 = vpop.f32.mrf.mxu1  ;;  %v741_v20 = vld [vmem:[%s5813_s1 + $0x788] sm:$0xff] }
 0x1a7   :  { %2109 = vmatprep.subr.mxu0 %v2738_v0  ;;  %2323 = vmatpush2.msra.mxu1 %v744_v24  ;;  %v1309_v41 = vpop.f32.mrf.mxu0  ;;  %v494_v24 = vld [vmem:[%s5814_s0 + $0xed0] sm:$0x3]  ;;  %v33_v29 = vld [vmem:[%s5814_s0 + $0x68] sm:$0xff]  ;;  %v35_v39 = vld [vmem:[%s5814_s0 + $0x78] sm:$0xff] }
 0x1a8   :  { %2110 = vmatpush2.msra.mxu0 %v711_v26  ;;  %1822 = vmatprep.mubr.f32.mxu0 %v461_v30  ;;  %v1310_v47 = vadd.f32 %v1309_v41, %v4258_v56  ;;  %v1524_v48 = vpop.f32.mrf.mxu1  ;;  %v708_v26 = vld [vmem:[%s5813_s1 + $0x680] sm:$0xff]  ;;  %v49_v41 = vld [vmem:[%s5814_s0 + $0xe8] sm:$0xff] }
 0x1a9   :  { %2324 = vmatprep.subr.mxu1 %v2738_v0  ;;  %1823 = vmatmul.mubr.f32.gmra.mxu0 %v460_v1  ;;  %v1311_v62 = vpop.f32.mrf.mxu0  ;;  %v32_v1 = vld [vmem:[%s5814_s0 + $0x60] sm:$0xff] }
 0x1aa   :  { %2037 = vmatprep.mubr.f32.mxu1 %v463_v42  ;;  %2325 = vmatpush2.msra.mxu1 %v743_v40  ;;  %v4969_v56 = vadd.f32 %v1524_v48, %v1310_v47  ;;  %v1526_v61 = vpop.f32.mrf.mxu1  ;;  %v740_v42 = vld [vmem:[%s5813_s1 + $0x780] sm:$0xff]  ;;  %v51_v48 = vld [vmem:[%s5814_s0 + $0xf8] sm:$0xff] }
 0x1ab   :  { %2111 = vmatprep.subr.mxu0 %v2738_v0  ;;  %2038 = vmatmul.mubr.f32.gmra.mxu1 %v462_v44  ;;  %v1314_v2 = vpop.f32.mrf.mxu0 }
 0x1ac   :  { %2112 = vmatpush2.msra.mxu0 %v710_v46  ;;  %1827 = vmatprep.mubr.f32.mxu0 %v477_v53  ;;  %v1315_v6 = vadd.f32 %v1314_v2, %v4281_v7  ;;  %v1529_v9 = vpop.f32.mrf.mxu1  ;;  %v34_v46 = vld [vmem:[%s5814_s0 + $0x70] sm:$0xff] }
 0x1ad   :  { %2326 = vmatprep.subr.mxu1 %v2738_v0  ;;  %1828 = vmatmul.mubr.f32.gmra.mxu0 %v476_v14  ;;  %v1316_v11 = vpop.f32.mrf.mxu0 }
 0x1ae   :  { %2042 = vmatprep.mubr.f32.mxu1 %v479_v37  ;;  %2327 = vmatpush2.msra.mxu1 %v742_v63  ;;  %v4992_v7 = vadd.f32 %v1529_v9, %v1315_v6  ;;  %v1531_v19 = vpop.f32.mrf.mxu1  ;;  %v50_v63 = vld [vmem:[%s5814_s0 + $0xf0] sm:$0xff]  ;;  %v64_v9 = vld [vmem:[%s5814_s0 + $0x160] sm:$0xff] }
 0x1af   :  { %2113 = vmatprep.subr.mxu0 %v2738_v0  ;;  %2043 = vmatmul.mubr.f32.gmra.mxu1 %v478_v3  ;;  %v1319_v22 = vpop.f32.mrf.mxu0  ;;  %v67_v3 = vld [vmem:[%s5814_s0 + $0x178] sm:$0xff] }
 0x1b0   :  { %2114 = vmatpush2.msra.mxu0 %v709_v5  ;;  %1832 = vmatprep.mubr.f32.mxu0 %v493_v10  ;;  %v1320_v27 = vadd.f32 %v1319_v22, %v4304_v21 }
 0x1b1   :  { %2328 = vmatprep.subr.mxu1 %v2738_v0  ;;  %1833 = vmatmul.mubr.f32.gmra.mxu0 %v492_v50  ;;  %v1534_v30 = vpop.f32.mrf.mxu1  ;;  %v1321_v23 = vpop.f32.mrf.mxu0 }
 0x1b2   :  { %2047 = vmatprep.mubr.f32.mxu1 %v495_v28  ;;  %2329 = vmatpush2.msra.mxu1 %v741_v20  ;;  %v5015_v21 = vadd.f32 %v1534_v30, %v1320_v27  ;;  %v66_v28 = vld [vmem:[%s5814_s0 + $0x170] sm:$0xff]  ;;  %v83_v20 = vld [vmem:[%s5814_s0 + $0x1f8] sm:$0xff] }
 0x1b3   :  { %2115 = vmatprep.subr.mxu0 %v2738_v0  ;;  %2048 = vmatmul.mubr.f32.gmra.mxu1 %v494_v24  ;;  %v1536_v40 = vpop.f32.mrf.mxu1  ;;  %v1324_v44 = vpop.f32.mrf.mxu0  ;;  %v82_v23 = vld [vmem:[%s5814_s0 + $0x1f0] sm:$0xff] }
 0x1b4   :  { %2116 = vmatpush2.msra.mxu0 %v708_v26  ;;  %2117 = vmatprep.mubr.f32.mxu0 %v33_v29  ;;  %v1325_v47 = vadd.f32 %v1324_v44, %v4327_v35  ;;  %v65_v35 = vld [vmem:[%s5814_s0 + $0x168] sm:$0xff]  ;;  %v80_v26 = vld [vmem:[%s5814_s0 + $0x1e0] sm:$0xff] }
 0x1b5   :  { %2330 = vmatprep.subr.mxu1 %v2738_v0  ;;  %2118 = vmatmul.mubr.f32.vlgmr.msra.gmra.mxu0 %v32_v1  ;;  %v1539_v53 = vpop.f32.mrf.mxu1  ;;  %v1326_v62 = vpop.f32.mrf.mxu0  ;;  %v48_v0 = vld [vmem:[%s5814_s0 + $0xe0] sm:$0xff] }
 0x1b6   :  { %2331 = vmatpush2.msra.mxu1 %v740_v42  ;;  %2332 = vmatprep.mubr.f32.mxu1 %v35_v39  ;;  %v5034_v14 = vadd.f32 %v1539_v53, %v1325_v47  ;;  %v99_v42 = vld [vmem:[%s5814_s0 + $0x278] sm:$0xff] }
 0x1b7   :  { %2122 = vmatprep.mubr.f32.mxu0 %v49_v41  ;;  %2333 = vmatmul.mubr.f32.vlgmr.msra.gmra.mxu1 %v34_v46  ;;  %v1541_v37 = vpop.f32.mrf.mxu1  ;;  %v1329_v61 = vpop.f32.mrf.mxu0  ;;  %v96_v41 = vld [vmem:[%s5814_s0 + $0x260] sm:$0xff]  ;;  %v115_v62 = vld [vmem:[%s5814_s0 + $0x2f8] sm:$0xff] }
 0x1b8   :  { %2337 = vmatprep.mubr.f32.mxu1 %v51_v48  ;;  %v1330_v2 = vadd.f32 %v1329_v61, %v4350_v52  ;;  %v81_v52 = vld [vmem:[%s5814_s0 + $0x1e8] sm:$0xff]  ;;  %v98_v48 = vld [vmem:[%s5814_s0 + $0x270] sm:$0xff] }
 0x1b9   :  { %2123 = vmatmul.mubr.f32.gmra.mxu0 %v48_v0  ;;  %v1544_v5 = vpop.f32.mrf.mxu1  ;;  %v1331_v6 = vpop.f32.mrf.mxu0 }
 0x1ba   :  { %2127 = vmatprep.mubr.f32.mxu0 %v65_v35  ;;  %v5049_v10 = vadd.f32 %v1544_v5, %v1330_v2  ;;  %v112_v35 = vld [vmem:[%s5814_s0 + $0x2e0] sm:$0xff]  ;;  %v131_v6 = vld [vmem:[%s5814_s0 + $0x378] sm:$0xff] }
 0x1bb   :  { %2338 = vmatmul.mubr.f32.gmra.mxu1 %v50_v63  ;;  %v1546_v11 = vpop.f32.mrf.mxu1  ;;  %v1334_v50 = vpop.f32.mrf.mxu0 }
 0x1bc   :  { %2342 = vmatprep.mubr.f32.mxu1 %v67_v3  ;;  %v1335_v19 = vadd.f32 %v1334_v50, %v4373_v4  ;;  %v97_v4 = vld [vmem:[%s5814_s0 + $0x268] sm:$0xff]  ;;  %v114_v3 = vld [vmem:[%s5814_s0 + $0x2f0] sm:$0xff] }
 0x1bd   :  { %2128 = vmatmul.mubr.f32.gmra.mxu0 %v64_v9  ;;  %v1336_v24 = vpop.f32.mrf.mxu0 }
 0x1be   :  { %v1549_v22 = vpop.f32.mrf.mxu1  ;;  %2132 = vmatprep.mubr.f32.mxu0 %v81_v52  ;;  %v128_v52 = vld [vmem:[%s5814_s0 + $0x360] sm:$0xff]  ;;  %v147_v24 = vld [vmem:[%s5814_s0 + $0x3f8] sm:$0xff] }
 0x1bf   :  { %v5064_v27 = vadd.f32 %v1549_v22, %v1335_v19  ;;  %2343 = vmatmul.mubr.f32.gmra.mxu1 %v66_v28  ;;  %v130_v19 = vld [vmem:[%s5814_s0 + $0x370] sm:$0xff] }
 0x1c0   :  { %v1551_v29 = vpop.f32.mrf.mxu1  ;;  %v1339_v30 = vpop.f32.mrf.mxu0  ;;  %2347 = vmatprep.mubr.f32.mxu1 %v83_v20 }
 0x1c1   :  { %v1340_v1 = vadd.f32 %v1339_v30, %v4393_v18  ;;  %2133 = vmatmul.mubr.f32.gmra.mxu0 %v80_v26  ;;  %v113_v18 = vld [vmem:[%s5814_s0 + $0x2e8] sm:$0xff]  ;;  %v144_v29 = vld [vmem:[%s5814_s0 + $0x3e0] sm:$0xff] }
 0x1c2   :  { %v1554_v39 = vpop.f32.mrf.mxu1  ;;  %v1341_v40 = vpop.f32.mrf.mxu0  ;;  %2137 = vmatprep.mubr.f32.mxu0 %v97_v4 }
 0x1c3   :  { %v5079_v44 = vadd.f32 %v1554_v39, %v1340_v1  ;;  %2348 = vmatmul.mubr.f32.gmra.mxu1 %v82_v23  ;;  %v161_v1 = vld [vmem:[%s5814_s0 + $0x468] sm:$0xff]  ;;  %v163_v40 = vld [vmem:[%s5814_s0 + $0x478] sm:$0xff] }
 0x1c4   :  { %v1556_v46 = vpop.f32.mrf.mxu1  ;;  %v1344_v47 = vpop.f32.mrf.mxu0  ;;  %2352 = vmatprep.mubr.f32.mxu1 %v99_v42 }
 0x1c5   :  { %v1345_v53 = vadd.f32 %v1344_v47, %v4416_v33  ;;  %2138 = vmatmul.mubr.f32.gmra.mxu0 %v96_v41  ;;  %v129_v33 = vld [vmem:[%s5814_s0 + $0x368] sm:$0xff]  ;;  %v160_v46 = vld [vmem:[%s5814_s0 + $0x460] sm:$0xff] }
 0x1c6   :  { %v1559_v0 = vpop.f32.mrf.mxu1  ;;  %v1346_v37 = vpop.f32.mrf.mxu0  ;;  %2142 = vmatprep.mubr.f32.mxu0 %v113_v18 }
 0x1c7   :  { %v5094_v61 = vadd.f32 %v1559_v0, %v1345_v53  ;;  %2353 = vmatmul.mubr.f32.gmra.mxu1 %v98_v48  ;;  %v177_v53 = vld [vmem:[%s5814_s0 + $0x4e8] sm:$0xff]  ;;  %v179_v37 = vld [vmem:[%s5814_s0 + $0x4f8] sm:$0xff] }
 0x1c8   :  { %v1561_v63 = vpop.f32.mrf.mxu1  ;;  %v1349_v2 = vpop.f32.mrf.mxu0  ;;  %2357 = vmatprep.mubr.f32.mxu1 %v115_v62 }
 0x1c9   :  { %v1350_v5 = vadd.f32 %v1349_v2, %v4439_v49  ;;  %2143 = vmatmul.mubr.f32.gmra.mxu0 %v112_v35  ;;  %v145_v49 = vld [vmem:[%s5814_s0 + $0x3e8] sm:$0xff]  ;;  %v176_v63 = vld [vmem:[%s5814_s0 + $0x4e0] sm:$0xff] }
 0x1ca   :  { %v1564_v9 = vpop.f32.mrf.mxu1  ;;  %v1351_v11 = vpop.f32.mrf.mxu0  ;;  %2147 = vmatprep.mubr.f32.mxu0 %v129_v33 }
 0x1cb   :  { %v5109_v50 = vadd.f32 %v1564_v9, %v1350_v5  ;;  %2358 = vmatmul.mubr.f32.gmra.mxu1 %v114_v3  ;;  %v193_v5 = vld [vmem:[%s5814_s0 + $0x568] sm:$0xff]  ;;  %v195_v11 = vld [vmem:[%s5814_s0 + $0x578] sm:$0xff] }
 0x1cc   :  { %v1566_v28 = vpop.f32.mrf.mxu1  ;;  %2362 = vmatprep.mubr.f32.mxu1 %v131_v6  ;;  %v1354_v20 = vpop.f32.mrf.mxu0 }
 0x1cd   :  { %2148 = vmatmul.mubr.f32.gmra.mxu0 %v128_v52  ;;  %v1355_v22 = vadd.f32 %v1354_v20, %v4468_v8  ;;  %v146_v8 = vld [vmem:[%s5814_s0 + $0x3f0] sm:$0xff]  ;;  %v192_v28 = vld [vmem:[%s5814_s0 + $0x560] sm:$0xff] }
 0x1ce   :  { %v1569_v26 = vpop.f32.mrf.mxu1  ;;  %2152 = vmatprep.mubr.f32.mxu0 %v145_v49  ;;  %v1356_v4 = vpop.f32.mrf.mxu0 }
 0x1cf   :  { %2363 = vmatmul.mubr.f32.gmra.mxu1 %v130_v19  ;;  %v5124_v30 = vadd.f32 %v1569_v26, %v1355_v22  ;;  %v209_v22 = vld [vmem:[%s5814_s0 + $0x5e8] sm:$0xff]  ;;  %v211_v26 = vld [vmem:[%s5814_s0 + $0x5f8] sm:$0xff]  ;;  %v208_v4 = vld [vmem:[%s5814_s0 + $0x5e0] sm:$0xff] }
 0x1d0   :  { %v1571_v23 = vpop.f32.mrf.mxu1  ;;  %2367 = vmatprep.mubr.f32.mxu1 %v147_v24  ;;  %v1359_v42 = vpop.f32.mrf.mxu0 }
 0x1d1   :  { %2153 = vmatmul.mubr.f32.gmra.mxu0 %v144_v29  ;;  %v1360_v39 = vadd.f32 %v1359_v42, %v4491_v25  ;;  %v162_v25 = vld [vmem:[%s5814_s0 + $0x470] sm:$0xff] }
 0x1d2   :  { %v1574_v41 = vpop.f32.mrf.mxu1  ;;  %2157 = vmatprep.mubr.f32.mxu0 %v161_v1  ;;  %v1361_v18 = vpop.f32.mrf.mxu0 }
 0x1d3   :  { %2368 = vmatmul.mubr.f32.gmra.mxu1 %v146_v8  ;;  %v5139_v47 = vadd.f32 %v1574_v41, %v1360_v39  ;;  %v225_v8 = vld [vmem:[%s5814_s0 + $0x668] sm:$0xff]  ;;  %v210_v39 = vld [vmem:[%s5814_s0 + $0x5f0] sm:$0xff]  ;;  %v227_v41 = vld [vmem:[%s5814_s0 + $0x678] sm:$0xff] }
 0x1d4   :  { %v1576_v48 = vpop.f32.mrf.mxu1  ;;  %2372 = vmatprep.mubr.f32.mxu1 %v163_v40  ;;  %v1364_v62 = vpop.f32.mrf.mxu0  ;;  %v224_v18 = vld [vmem:[%s5814_s0 + $0x660] sm:$0xff] }
 0x1d5   :  { %2158 = vmatmul.mubr.f32.gmra.mxu0 %v160_v46  ;;  %v1365_v0 = vadd.f32 %v1364_v62, %v4515_v43  ;;  %v178_v43 = vld [vmem:[%s5814_s0 + $0x4f0] sm:$0xff] }
 0x1d6   :  { %v1579_v35 = vpop.f32.mrf.mxu1  ;;  %2162 = vmatprep.mubr.f32.mxu0 %v177_v53  ;;  %v1366_v33 = vpop.f32.mrf.mxu0 }
 0x1d7   :  { %2373 = vmatmul.mubr.f32.gmra.mxu1 %v162_v25  ;;  %v5154_v2 = vadd.f32 %v1579_v35, %v1365_v0  ;;  %v241_v25 = vld [vmem:[%s5814_s0 + $0x6e8] sm:$0xff]  ;;  %v226_v0 = vld [vmem:[%s5814_s0 + $0x670] sm:$0xff]  ;;  %v243_v35 = vld [vmem:[%s5814_s0 + $0x6f8] sm:$0xff] }
 0x1d8   :  { %v1581_v3 = vpop.f32.mrf.mxu1  ;;  %2377 = vmatprep.mubr.f32.mxu1 %v179_v37  ;;  %v1369_v6 = vpop.f32.mrf.mxu0  ;;  %v240_v33 = vld [vmem:[%s5814_s0 + $0x6e0] sm:$0xff] }
 0x1d9   :  { %2163 = vmatmul.mubr.f32.gmra.mxu0 %v176_v63  ;;  %v1370_v9 = vadd.f32 %v1369_v6, %v4538_v60  ;;  %v194_v60 = vld [vmem:[%s5814_s0 + $0x570] sm:$0xff] }
 0x1da   :  { %v1584_v52 = vpop.f32.mrf.mxu1  ;;  %2167 = vmatprep.mubr.f32.mxu0 %v193_v5  ;;  %v1371_v49 = vpop.f32.mrf.mxu0 }
 0x1db   :  { %2378 = vmatmul.mubr.f32.gmra.mxu1 %v178_v43  ;;  %v5169_v19 = vadd.f32 %v1584_v52, %v1370_v9  ;;  %v257_v43 = vld [vmem:[%s5814_s0 + $0x768] sm:$0xff]  ;;  %v242_v9 = vld [vmem:[%s5814_s0 + $0x6f0] sm:$0xff]  ;;  %v259_v52 = vld [vmem:[%s5814_s0 + $0x778] sm:$0xff] }
 0x1dc   :  { %v1586_v20 = vpop.f32.mrf.mxu1  ;;  %2382 = vmatprep.mubr.f32.mxu1 %v195_v11  ;;  %v256_v49 = vld [vmem:[%s5814_s0 + $0x760] sm:$0xff] }
 0x1dd   :  { %2168 = vmatmul.mubr.f32.gmra.mxu0 %v192_v28  ;;  %v1374_v24 = vpop.f32.mrf.mxu0 }
 0x1de   :  { %2172 = vmatprep.mubr.f32.mxu0 %v209_v22  ;;  %v1375_v29 = vadd.f32 %v1374_v24, %v4565_v17  ;;  %v1589_v23 = vpop.f32.mrf.mxu1 }
 0x1df   :  { %2383 = vmatmul.mubr.f32.gmra.mxu1 %v194_v60  ;;  %v1376_v1 = vpop.f32.mrf.mxu0  ;;  %v273_v60 = vld [vmem:[%s5814_s0 + $0x7e8] sm:$0xff] }
 0x1e0   :  { %2387 = vmatprep.mubr.f32.mxu1 %v211_v26  ;;  %v5187_v42 = vadd.f32 %v1589_v23, %v1375_v29  ;;  %v1591_v40 = vpop.f32.mrf.mxu1  ;;  %v258_v26 = vld [vmem:[%s5814_s0 + $0x770] sm:$0xff]  ;;  %v272_v1 = vld [vmem:[%s5814_s0 + $0x7e0] sm:$0xff] }
 0x1e1   :  { %2173 = vmatmul.mubr.f32.gmra.mxu0 %v208_v4  ;;  %v1379_v17 = vpop.f32.mrf.mxu0  ;;  %v275_v4 = vld [vmem:[%s5814_s0 + $0x7f8] sm:$0xff]  ;;  %v289_v40 = vld [vmem:[%s5814_s0 + $0x868] sm:$0xff] }
 0x1e2   :  { %2177 = vmatprep.mubr.f32.mxu0 %v225_v8  ;;  %v1380_v46 = vadd.f32 %v1379_v17, %v4588_v34  ;;  %v1594_v48 = vpop.f32.mrf.mxu1 }
 0x1e3   :  { %2388 = vmatmul.mubr.f32.gmra.mxu1 %v210_v39  ;;  %v1381_v53 = vpop.f32.mrf.mxu0 }
 0x1e4   :  { %2392 = vmatprep.mubr.f32.mxu1 %v227_v41  ;;  %v5202_v62 = vadd.f32 %v1594_v48, %v1380_v46  ;;  %v1596_v37 = vpop.f32.mrf.mxu1  ;;  %v274_v41 = vld [vmem:[%s5814_s0 + $0x7f0] sm:$0xff]  ;;  %v288_v53 = vld [vmem:[%s5814_s0 + $0x860] sm:$0xff] }
 0x1e5   :  { %2178 = vmatmul.mubr.f32.gmra.mxu0 %v224_v18  ;;  %v1384_v34 = vpop.f32.mrf.mxu0  ;;  %v291_v18 = vld [vmem:[%s5814_s0 + $0x878] sm:$0xff]  ;;  %v305_v37 = vld [vmem:[%s5814_s0 + $0x8e8] sm:$0xff] }
 0x1e6   :  { %2182 = vmatprep.mubr.f32.mxu0 %v241_v25  ;;  %v1385_v63 = vadd.f32 %v1384_v34, %v4616_v57  ;;  %v1599_v3 = vpop.f32.mrf.mxu1 }
 0x1e7   :  { %2393 = vmatmul.mubr.f32.gmra.mxu1 %v226_v0  ;;  %v1386_v5 = vpop.f32.mrf.mxu0 }
 0x1e8   :  { %2397 = vmatprep.mubr.f32.mxu1 %v243_v35  ;;  %v5217_v6 = vadd.f32 %v1599_v3, %v1385_v63  ;;  %v1601_v11 = vpop.f32.mrf.mxu1  ;;  %v290_v35 = vld [vmem:[%s5814_s0 + $0x870] sm:$0xff]  ;;  %v304_v5 = vld [vmem:[%s5814_s0 + $0x8e0] sm:$0xff] }
 0x1e9   :  { %2183 = vmatmul.mubr.f32.gmra.mxu0 %v240_v33  ;;  %v1389_v57 = vpop.f32.mrf.mxu0  ;;  %v307_v33 = vld [vmem:[%s5814_s0 + $0x8f8] sm:$0xff]  ;;  %v321_v11 = vld [vmem:[%s5814_s0 + $0x968] sm:$0xff] }
 0x1ea   :  { %2187 = vmatprep.mubr.f32.mxu0 %v257_v43  ;;  %v1390_v28 = vadd.f32 %v1389_v57, %v4639_v13  ;;  %v1604_v20 = vpop.f32.mrf.mxu1 }
 0x1eb   :  { %2398 = vmatmul.mubr.f32.gmra.mxu1 %v242_v9  ;;  %v1391_v22 = vpop.f32.mrf.mxu0 }
 0x1ec   :  { %2402 = vmatprep.mubr.f32.mxu1 %v259_v52  ;;  %v5232_v24 = vadd.f32 %v1604_v20, %v1390_v28  ;;  %v1606_v29 = vpop.f32.mrf.mxu1  ;;  %v306_v52 = vld [vmem:[%s5814_s0 + $0x8f0] sm:$0xff]  ;;  %v320_v22 = vld [vmem:[%s5814_s0 + $0x960] sm:$0xff] }
 0x1ed   :  { %2188 = vmatmul.mubr.f32.gmra.mxu0 %v256_v49  ;;  %v1394_v13 = vpop.f32.mrf.mxu0  ;;  %v323_v49 = vld [vmem:[%s5814_s0 + $0x978] sm:$0xff]  ;;  %v337_v29 = vld [vmem:[%s5814_s0 + $0x9e8] sm:$0xff] }
 0x1ee   :  { %2192 = vmatprep.mubr.f32.mxu0 %v273_v60  ;;  %v1395_v23 = vadd.f32 %v1394_v13, %v4662_v32 }
 0x1ef   :  { %2403 = vmatmul.mubr.f32.gmra.mxu1 %v258_v26  ;;  %v1609_v8 = vpop.f32.mrf.mxu1  ;;  %v1396_v39 = vpop.f32.mrf.mxu0 }
 0x1f0   :  { %2407 = vmatprep.mubr.f32.mxu1 %v275_v4  ;;  %v5247_v17 = vadd.f32 %v1609_v8, %v1395_v23  ;;  %v322_v4 = vld [vmem:[%s5814_s0 + $0x970] sm:$0xff]  ;;  %v336_v39 = vld [vmem:[%s5814_s0 + $0x9e0] sm:$0xff] }
 0x1f1   :  { %2193 = vmatmul.mubr.f32.gmra.mxu0 %v272_v1  ;;  %v1611_v32 = vpop.f32.mrf.mxu1  ;;  %v1399_v46 = vpop.f32.mrf.mxu0  ;;  %v339_v1 = vld [vmem:[%s5814_s0 + $0x9f8] sm:$0xff] }
 0x1f2   :  { %2197 = vmatprep.mubr.f32.mxu0 %v289_v40  ;;  %v1400_v48 = vadd.f32 %v1399_v46, %v4685_v55  ;;  %v353_v32 = vld [vmem:[%s5814_s0 + $0xa68] sm:$0xff] }
 0x1f3   :  { %2408 = vmatmul.mubr.f32.gmra.mxu1 %v274_v41  ;;  %v1614_v25 = vpop.f32.mrf.mxu1  ;;  %v1401_v0 = vpop.f32.mrf.mxu0 }
 0x1f4   :  { %2412 = vmatprep.mubr.f32.mxu1 %v291_v18  ;;  %v5262_v34 = vadd.f32 %v1614_v25, %v1400_v48  ;;  %v338_v18 = vld [vmem:[%s5814_s0 + $0x9f0] sm:$0xff]  ;;  %v352_v0 = vld [vmem:[%s5814_s0 + $0xa60] sm:$0xff] }
 0x1f5   :  { %2198 = vmatmul.mubr.f32.gmra.mxu0 %v288_v53  ;;  %v1616_v55 = vpop.f32.mrf.mxu1  ;;  %v1404_v63 = vpop.f32.mrf.mxu0  ;;  %v355_v53 = vld [vmem:[%s5814_s0 + $0xa78] sm:$0xff] }
 0x1f6   :  { %2202 = vmatprep.mubr.f32.mxu0 %v305_v37  ;;  %v1405_v3 = vadd.f32 %v1404_v63, %v4708_v45  ;;  %v369_v55 = vld [vmem:[%s5814_s0 + $0xae8] sm:$0xff] }
 0x1f7   :  { %2413 = vmatmul.mubr.f32.gmra.mxu1 %v290_v35  ;;  %v1619_v43 = vpop.f32.mrf.mxu1  ;;  %v1406_v9 = vpop.f32.mrf.mxu0 }
 0x1f8   :  { %2417 = vmatprep.mubr.f32.mxu1 %v307_v33  ;;  %v5277_v57 = vadd.f32 %v1619_v43, %v1405_v3  ;;  %v354_v33 = vld [vmem:[%s5814_s0 + $0xa70] sm:$0xff]  ;;  %v368_v9 = vld [vmem:[%s5814_s0 + $0xae0] sm:$0xff] }
 0x1f9   :  { %2203 = vmatmul.mubr.f32.gmra.mxu0 %v304_v5  ;;  %v1621_v45 = vpop.f32.mrf.mxu1  ;;  %v1689_v28 = vpop.f32.mrf.mxu0  ;;  %v371_v5 = vld [vmem:[%s5814_s0 + $0xaf8] sm:$0xff] }
 0x1fa   :  { %2207 = vmatprep.mubr.f32.mxu0 %v321_v11  ;;  %v1690_v20 = vadd.f32 %v1689_v28, %v4731_v51  ;;  %v385_v45 = vld [vmem:[%s5814_s0 + $0xb68] sm:$0xff] }
 0x1fb   :  { %2418 = vmatmul.mubr.f32.gmra.mxu1 %v306_v52  ;;  %v1904_v60 = vpop.f32.mrf.mxu1  ;;  %v1691_v26 = vpop.f32.mrf.mxu0 }
 0x1fc   :  { %2422 = vmatprep.mubr.f32.mxu1 %v323_v49  ;;  %v5292_v13 = vadd.f32 %v1904_v60, %v1690_v20  ;;  %v370_v49 = vld [vmem:[%s5814_s0 + $0xaf0] sm:$0xff]  ;;  %v387_v20 = vld [vmem:[%s5814_s0 + $0xb78] sm:$0xff]  ;;  %v384_v60 = vld [vmem:[%s5814_s0 + $0xb60] sm:$0xff] }
 0x1fd   :  { %2208 = vmatmul.mubr.f32.gmra.mxu0 %v320_v22  ;;  %v1906_v51 = vpop.f32.mrf.mxu1 }
 0x1fe   :  { %v1694_v23 = vpop.f32.mrf.mxu0  ;;  %2212 = vmatprep.mubr.f32.mxu0 %v337_v29  ;;  %v386_v51 = vld [vmem:[%s5814_s0 + $0xb70] sm:$0xff] }
 0x1ff   :  { %v1695_v8 = vadd.f32 %v1694_v23, %v4751_v54  ;;  %2423 = vmatmul.mubr.f32.gmra.mxu1 %v322_v4  ;;  %v1909_v40 = vpop.f32.mrf.mxu1  ;;  %v401_v4 = vld [vmem:[%s5814_s0 + $0xbe8] sm:$0xff] }
 0x200   :  { %v1696_v41 = vpop.f32.mrf.mxu0  ;;  %2427 = vmatprep.mubr.f32.mxu1 %v339_v1 }
 0x201   :  { %v5307_v46 = vadd.f32 %v1909_v40, %v1695_v8  ;;  %2213 = vmatmul.mubr.f32.gmra.mxu0 %v336_v39  ;;  %v1911_v54 = vpop.f32.mrf.mxu1  ;;  %v403_v39 = vld [vmem:[%s5814_s0 + $0xbf8] sm:$0xff]  ;;  %v400_v40 = vld [vmem:[%s5814_s0 + $0xbe0] sm:$0xff] }
 0x202   :  { %v1699_v48 = vpop.f32.mrf.mxu0  ;;  %2217 = vmatprep.mubr.f32.mxu0 %v353_v32  ;;  %v402_v54 = vld [vmem:[%s5814_s0 + $0xbf0] sm:$0xff] }
 0x203   :  { %v1700_v25 = vadd.f32 %v1699_v48, %v4774_v12  ;;  %2428 = vmatmul.mubr.f32.gmra.mxu1 %v338_v18  ;;  %v1914_v37 = vpop.f32.mrf.mxu1  ;;  %v417_v18 = vld [vmem:[%s5814_s0 + $0xc68] sm:$0xff] }
 0x204   :  { %v1701_v35 = vpop.f32.mrf.mxu0  ;;  %2432 = vmatprep.mubr.f32.mxu1 %v355_v53 }
 0x205   :  { %v5322_v63 = vadd.f32 %v1914_v37, %v1700_v25  ;;  %2218 = vmatmul.mubr.f32.gmra.mxu0 %v352_v0  ;;  %v1916_v12 = vpop.f32.mrf.mxu1  ;;  %v419_v0 = vld [vmem:[%s5814_s0 + $0xc78] sm:$0xff]  ;;  %v416_v37 = vld [vmem:[%s5814_s0 + $0xc60] sm:$0xff] }
 0x206   :  { %v1704_v3 = vpop.f32.mrf.mxu0  ;;  %2222 = vmatprep.mubr.f32.mxu0 %v369_v55  ;;  %v418_v12 = vld [vmem:[%s5814_s0 + $0xc70] sm:$0xff] }
 0x207   :  { %v1705_v43 = vadd.f32 %v1704_v3, %v4797_v31  ;;  %2433 = vmatmul.mubr.f32.gmra.mxu1 %v354_v33  ;;  %v1919_v11 = vpop.f32.mrf.mxu1  ;;  %v433_v33 = vld [vmem:[%s5814_s0 + $0xce8] sm:$0xff] }
 0x208   :  { %v1706_v52 = vpop.f32.mrf.mxu0  ;;  %2437 = vmatprep.mubr.f32.mxu1 %v371_v5 }
 0x209   :  { %v5337_v28 = vadd.f32 %v1919_v11, %v1705_v43  ;;  %2223 = vmatmul.mubr.f32.gmra.mxu0 %v368_v9  ;;  %v1921_v31 = vpop.f32.mrf.mxu1  ;;  %v435_v9 = vld [vmem:[%s5814_s0 + $0xcf8] sm:$0xff]  ;;  %v432_v11 = vld [vmem:[%s5814_s0 + $0xce0] sm:$0xff] }
 0x20a   :  { %2227 = vmatprep.mubr.f32.mxu0 %v385_v45  ;;  %v1709_v22 = vpop.f32.mrf.mxu0  ;;  %v434_v31 = vld [vmem:[%s5814_s0 + $0xcf0] sm:$0xff] }
 0x20b   :  { %2438 = vmatmul.mubr.f32.gmra.mxu1 %v370_v49  ;;  %v1710_v26 = vadd.f32 %v1709_v22, %v4826_v59  ;;  %v449_v49 = vld [vmem:[%s5814_s0 + $0xd68] sm:$0xff] }
 0x20c   :  { %v1924_v29 = vpop.f32.mrf.mxu1  ;;  %2442 = vmatprep.mubr.f32.mxu1 %v387_v20  ;;  %v1711_v23 = vpop.f32.mrf.mxu0 }
 0x20d   :  { %2228 = vmatmul.mubr.f32.gmra.mxu0 %v384_v60  ;;  %v5355_v1 = vadd.f32 %v1924_v29, %v1710_v26  ;;  %v451_v26 = vld [vmem:[%s5814_s0 + $0xd78] sm:$0xff] }
 0x20e   :  { %v1926_v8 = vpop.f32.mrf.mxu1  ;;  %2232 = vmatprep.mubr.f32.mxu0 %v401_v4  ;;  %v1714_v59 = vpop.f32.mrf.mxu0  ;;  %v465_v4 = vld [vmem:[%s5814_s0 + $0xde8] sm:$0xff] }
 0x20f   :  { %2443 = vmatmul.mubr.f32.gmra.mxu1 %v386_v51  ;;  %v1715_v41 = vadd.f32 %v1714_v59, %v4849_v15  ;;  %v450_v8 = vld [vmem:[%s5814_s0 + $0xd70] sm:$0xff]  ;;  %v467_v59 = vld [vmem:[%s5814_s0 + $0xdf8] sm:$0xff] }
 0x210   :  { %v1929_v32 = vpop.f32.mrf.mxu1  ;;  %2447 = vmatprep.mubr.f32.mxu1 %v403_v39  ;;  %v1716_v48 = vpop.f32.mrf.mxu0 }
 0x211   :  { %2233 = vmatmul.mubr.f32.gmra.mxu0 %v400_v40  ;;  %v5370_v53 = vadd.f32 %v1929_v32, %v1715_v41 }
 0x212   :  { %v1931_v25 = vpop.f32.mrf.mxu1  ;;  %2237 = vmatprep.mubr.f32.mxu0 %v417_v18  ;;  %v1719_v15 = vpop.f32.mrf.mxu0  ;;  %v481_v18 = vld [vmem:[%s5814_s0 + $0xe68] sm:$0xff] }
 0x213   :  { %2448 = vmatmul.mubr.f32.gmra.mxu1 %v402_v54  ;;  %v1720_v35 = vadd.f32 %v1719_v15, %v4873_v38  ;;  %v466_v25 = vld [vmem:[%s5814_s0 + $0xdf0] sm:$0xff]  ;;  %v483_v15 = vld [vmem:[%s5814_s0 + $0xe78] sm:$0xff] }
 0x214   :  { %v1934_v55 = vpop.f32.mrf.mxu1  ;;  %2452 = vmatprep.mubr.f32.mxu1 %v419_v0  ;;  %v1721_v3 = vpop.f32.mrf.mxu0 }
 0x215   :  { %2238 = vmatmul.mubr.f32.gmra.mxu0 %v416_v37  ;;  %v5385_v5 = vadd.f32 %v1934_v55, %v1720_v35 }
 0x216   :  { %v1936_v43 = vpop.f32.mrf.mxu1  ;;  %2242 = vmatprep.mubr.f32.mxu0 %v433_v33  ;;  %v1724_v38 = vpop.f32.mrf.mxu0  ;;  %v497_v33 = vld [vmem:[%s5814_s0 + $0xee8] sm:$0x3] }
 0x217   :  { %2453 = vmatmul.mubr.f32.gmra.mxu1 %v418_v12  ;;  %v1725_v52 = vadd.f32 %v1724_v38, %v4896_v58  ;;  %v448_v58 = vld [vmem:[%s5814_s0 + $0xd60] sm:$0xff]  ;;  %v482_v43 = vld [vmem:[%s5814_s0 + $0xe70] sm:$0xff]  ;;  %v499_v38 = vld [vmem:[%s5814_s0 + $0xef8] sm:$0x3] }
 0x218   :  { %v1939_v45 = vpop.f32.mrf.mxu1  ;;  %2457 = vmatprep.mubr.f32.mxu1 %v435_v9  ;;  %v1726_v20 = vpop.f32.mrf.mxu0 }
 0x219   :  { %2243 = vmatmul.mubr.f32.gmra.mxu0 %v432_v11  ;;  %v5400_v22 = vadd.f32 %v1939_v45, %v1725_v52  ;;  %v498_v20 = vld [vmem:[%s5814_s0 + $0xef0] sm:$0x3] }
 0x21a   :  { %v1941_v60 = vpop.f32.mrf.mxu1  ;;  %2247 = vmatprep.mubr.f32.mxu0 %v449_v49 }
 0x21b   :  { %2458 = vmatmul.mubr.f32.gmra.mxu1 %v434_v31  ;;  %v1729_v29 = vpop.f32.mrf.mxu0 }
 0x21c   :  { %v1730_v51 = vadd.f32 %v1729_v29, %v4923_v16  ;;  %2462 = vmatprep.mubr.f32.mxu1 %v451_v26  ;;  %v1944_v23 = vpop.f32.mrf.mxu1  ;;  %v464_v16 = vld [vmem:[%s5814_s0 + $0xde0] sm:$0xff] }
 0x21d   :  { %2248 = vmatmul.mubr.f32.gmra.mxu0 %v448_v58  ;;  %v1731_v39 = vpop.f32.mrf.mxu0 }
 0x21e   :  { %v5418_v40 = vadd.f32 %v1944_v23, %v1730_v51  ;;  %v1946_v41 = vpop.f32.mrf.mxu1  ;;  %2252 = vmatprep.mubr.f32.mxu0 %v465_v4 }
 0x21f   :  { %2463 = vmatmul.mubr.f32.gmra.mxu1 %v450_v8  ;;  %v1734_v32 = vpop.f32.mrf.mxu0 }
 0x220   :  { %v1735_v54 = vadd.f32 %v1734_v32, %v4946_v36  ;;  %2467 = vmatprep.mubr.f32.mxu1 %v467_v59  ;;  %v1949_v48 = vpop.f32.mrf.mxu1  ;;  %v480_v36 = vld [vmem:[%s5814_s0 + $0xe60] sm:$0xff] }
 0x221   :  { %2253 = vmatmul.mubr.f32.gmra.mxu0 %v464_v16  ;;  %v1736_v0 = vpop.f32.mrf.mxu0 }
 0x222   :  { %v5433_v37 = vadd.f32 %v1949_v48, %v1735_v54  ;;  %v1951_v35 = vpop.f32.mrf.mxu1  ;;  %2257 = vmatprep.mubr.f32.mxu0 %v481_v18 }
 0x223   :  { %2468 = vmatmul.mubr.f32.gmra.mxu1 %v466_v25  ;;  %v1739_v55 = vpop.f32.mrf.mxu0 }
 0x224   :  { %v1740_v12 = vadd.f32 %v1739_v55, %v4969_v56  ;;  %2472 = vmatprep.mubr.f32.mxu1 %v483_v15  ;;  %v1954_v3 = vpop.f32.mrf.mxu1  ;;  %v496_v56 = vld [vmem:[%s5814_s0 + $0xee0] sm:$0x3] }
 0x225   :  { %2258 = vmatmul.mubr.f32.gmra.mxu0 %v480_v36  ;;  %v1741_v9 = vpop.f32.mrf.mxu0 }
 0x226   :  { %v5448_v11 = vadd.f32 %v1954_v3, %v1740_v12  ;;  %v1956_v52 = vpop.f32.mrf.mxu1  ;;  %2262 = vmatprep.mubr.f32.mxu0 %v497_v33 }
 0x227   :  { %2473 = vmatmul.mubr.f32.gmra.mxu1 %v482_v43  ;;  %v1744_v45 = vpop.f32.mrf.mxu0 }
 0x228   :  { %v1745_v49 = vadd.f32 %v1744_v45, %v4992_v7  ;;  %2477 = vmatprep.mubr.f32.mxu1 %v499_v38  ;;  %v1959_v31 = vpop.f32.mrf.mxu1 }
 0x229   :  { %2263 = vmatmul.mubr.f32.gmra.mxu0 %v496_v56  ;;  %v1746_v60 = vpop.f32.mrf.mxu0 }
 0x22a   :  { %v5457_v26 = vadd.f32 %v1959_v31, %v1745_v49  ;;  %v1961_v58 = vpop.f32.mrf.mxu1 }
 0x22b   :  { %2478 = vmatmul.mubr.f32.gmra.mxu1 %v498_v20  ;;  %v1749_v29 = vpop.f32.mrf.mxu0 }
 0x22c   :  { %v1750_v4 = vadd.f32 %v1749_v29, %v5015_v21 }
 0x22d   :  { %v1964_v51 = vpop.f32.mrf.mxu1  ;;  %v1751_v23 = vpop.f32.mrf.mxu0 }
 0x22e   :  { %v5460_v8 = vadd.f32 %v1964_v51, %v1750_v4 }
 0x22f   :  { %v1966_v7 = vpop.f32.mrf.mxu1  ;;  %v1754_v39 = vpop.f32.mrf.mxu0 }
 0x230   :  { %v1755_v59 = vadd.f32 %v1754_v39, %v5034_v14 }
 0x231   :  { %v1969_v41 = vpop.f32.mrf.mxu1  ;;  %v1756_v16 = vpop.f32.mrf.mxu0 }
 0x232   :  { %v5463_v32 = vadd.f32 %v1969_v41, %v1755_v59 }
 0x233   :  { %v1971_v18 = vpop.f32.mrf.mxu1  ;;  %v1759_v54 = vpop.f32.mrf.mxu0 }
 0x234   :  { %v1760_v48 = vadd.f32 %v1759_v54, %v5049_v10 }
 0x235   :  { %v1974_v25 = vpop.f32.mrf.mxu1  ;;  %v1761_v0 = vpop.f32.mrf.mxu0 }
 0x236   :  { %v5466_v15 = vadd.f32 %v1974_v25, %v1760_v48 }
 0x237   :  { %v1976_v21 = vpop.f32.mrf.mxu1  ;;  %v1764_v35 = vpop.f32.mrf.mxu0 }
 0x238   :  { %v1765_v36 = vadd.f32 %v1764_v35, %v5064_v27 }
 0x239   :  { %v1766_v33 = vpop.f32.mrf.mxu0 }
 0x23a   :  { %v1979_v55 = vpop.f32.mrf.mxu1 }
 0x23b   :  { %v5469_v12 = vadd.f32 %v1979_v55, %v1765_v36 }
 0x23c   :  { %v1981_v14 = vpop.f32.mrf.mxu1  ;;  %v1769_v3 = vpop.f32.mrf.mxu0 }
 0x23d   :  { %v1770_v43 = vadd.f32 %v1769_v3, %v5079_v44 }
 0x23e   :  { %v1984_v9 = vpop.f32.mrf.mxu1  ;;  %v1771_v38 = vpop.f32.mrf.mxu0 }
 0x23f   :  { %v5472_v52 = vadd.f32 %v1984_v9, %v1770_v43 }
 0x240   :  { %v1986_v10 = vpop.f32.mrf.mxu1  ;;  %v1774_v56 = vpop.f32.mrf.mxu0 }
 0x241   :  { %v1775_v45 = vadd.f32 %v1774_v56, %v5094_v61 }
 0x242   :  { %v1989_v49 = vpop.f32.mrf.mxu1  ;;  %v1776_v31 = vpop.f32.mrf.mxu0 }
 0x243   :  { %v5475_v20 = vadd.f32 %v1989_v49, %v1775_v45 }
 0x244   :  { %v1991_v27 = vpop.f32.mrf.mxu1  ;;  %v1779_v60 = vpop.f32.mrf.mxu0 }
 0x245   :  { %v1780_v58 = vadd.f32 %v1779_v60, %v5109_v50 }
 0x246   :  { %v1994_v29 = vpop.f32.mrf.mxu1  ;;  %v1781_v4 = vpop.f32.mrf.mxu0 }
 0x247   :  { %v5478_v51 = vadd.f32 %v1994_v29, %v1780_v58 }
 0x248   :  { %v1996_v44 = vpop.f32.mrf.mxu1  ;;  %v1784_v23 = vpop.f32.mrf.mxu0 }
 0x249   :  { %v1785_v7 = vadd.f32 %v1784_v23, %v5124_v30 }
 0x24a   :  { %v1999_v39 = vpop.f32.mrf.mxu1  ;;  %v1786_v59 = vpop.f32.mrf.mxu0 }
 0x24b   :  { %v5481_v41 = vadd.f32 %v1999_v39, %v1785_v7 }
 0x24c   :  { %v2001_v61 = vpop.f32.mrf.mxu1  ;;  %v1789_v16 = vpop.f32.mrf.mxu0 }
 0x24d   :  { %v1790_v18 = vadd.f32 %v1789_v16, %v5139_v47 }
 0x24e   :  { %v2004_v54 = vpop.f32.mrf.mxu1  ;;  %v1791_v48 = vpop.f32.mrf.mxu0 }
 0x24f   :  { %v5484_v25 = vadd.f32 %v2004_v54, %v1790_v18 }
 0x250   :  { %v2006_v50 = vpop.f32.mrf.mxu1  ;;  %v1794_v0 = vpop.f32.mrf.mxu0 }
 0x251   :  { %v1795_v21 = vadd.f32 %v1794_v0, %v5154_v2 }
 0x252   :  { %v2009_v35 = vpop.f32.mrf.mxu1  ;;  %v1796_v36 = vpop.f32.mrf.mxu0 }
 0x253   :  { %v5487_v55 = vadd.f32 %v2009_v35, %v1795_v21 }
 0x254   :  { %v2011_v30 = vpop.f32.mrf.mxu1  ;;  %v1799_v33 = vpop.f32.mrf.mxu0 }
 0x255   :  { %v1800_v14 = vadd.f32 %v1799_v33, %v5169_v19 }
 0x256   :  { %v2014_v3 = vpop.f32.mrf.mxu1  ;;  %v1801_v43 = vpop.f32.mrf.mxu0 }
 0x257   :  { %v5490_v9 = vadd.f32 %v2014_v3, %v1800_v14 }
 0x258   :  { %v2016_v47 = vpop.f32.mrf.mxu1 }
 0x259   :  { %v1804_v38 = vpop.f32.mrf.mxu0 }
 0x25a   :  { %v1805_v10 = vadd.f32 %v1804_v38, %v5187_v42  ;;  %v2019_v56 = vpop.f32.mrf.mxu1 }
 0x25b   :  { %v1806_v45 = vpop.f32.mrf.mxu0 }
 0x25c   :  { %v5493_v49 = vadd.f32 %v2019_v56, %v1805_v10  ;;  %v2021_v2 = vpop.f32.mrf.mxu1 }
 0x25d   :  { %v1809_v31 = vpop.f32.mrf.mxu0 }
 0x25e   :  { %v1810_v27 = vadd.f32 %v1809_v31, %v5202_v62  ;;  %v2024_v60 = vpop.f32.mrf.mxu1 }
 0x25f   :  { %v1811_v58 = vpop.f32.mrf.mxu0 }
 0x260   :  { %v5496_v29 = vadd.f32 %v2024_v60, %v1810_v27  ;;  %v2026_v19 = vpop.f32.mrf.mxu1 }
 0x261   :  { %v1814_v4 = vpop.f32.mrf.mxu0 }
 0x262   :  { %v1815_v44 = vadd.f32 %v1814_v4, %v5217_v6  ;;  %v2029_v23 = vpop.f32.mrf.mxu1 }
 0x263   :  { %v1816_v7 = vpop.f32.mrf.mxu0 }
 0x264   :  { %v5499_v39 = vadd.f32 %v2029_v23, %v1815_v44  ;;  %v2031_v42 = vpop.f32.mrf.mxu1 }
 0x265   :  { %v1819_v59 = vpop.f32.mrf.mxu0 }
 0x266   :  { %v1820_v61 = vadd.f32 %v1819_v59, %v5232_v24  ;;  %v2034_v16 = vpop.f32.mrf.mxu1 }
 0x267   :  { %v1821_v18 = vpop.f32.mrf.mxu0 }
 0x268   :  { %v5502_v54 = vadd.f32 %v2034_v16, %v1820_v61  ;;  %v2036_v62 = vpop.f32.mrf.mxu1 }
 0x269   :  { %v1824_v48 = vpop.f32.mrf.mxu0 }
 0x26a   :  { %v1825_v50 = vadd.f32 %v1824_v48, %v5247_v17 }
 0x26b   :  { %v2039_v0 = vpop.f32.mrf.mxu1  ;;  %v1826_v21 = vpop.f32.mrf.mxu0 }
 0x26c   :  { %v5505_v35 = vadd.f32 %v2039_v0, %v1825_v50 }
 0x26d   :  { %v2041_v6 = vpop.f32.mrf.mxu1  ;;  %v1829_v36 = vpop.f32.mrf.mxu0 }
 0x26e   :  { %v1830_v30 = vadd.f32 %v1829_v36, %v5262_v34 }
 0x26f   :  { %v2044_v33 = vpop.f32.mrf.mxu1  ;;  %v1831_v14 = vpop.f32.mrf.mxu0 }
 0x270   :  { %v5508_v3 = vadd.f32 %v2044_v33, %v1830_v30 }
 0x271   :  { %v2046_v24 = vpop.f32.mrf.mxu1  ;;  %v1834_v43 = vpop.f32.mrf.mxu0 }
 0x272   :  { %v1835_v47 = vadd.f32 %v1834_v43, %v5277_v57 }
 0x273   :  { %v2049_v38 = vpop.f32.mrf.mxu1  ;;  %v1836_v10 = vpop.f32.mrf.mxu0 }
 0x274   :  { %v5511_v56 = vadd.f32 %v2049_v38, %v1835_v47 }
 0x275   :  { %v2051_v17 = vpop.f32.mrf.mxu1  ;;  %v2119_v45 = vpop.f32.mrf.mxu0 }
 0x276   :  { %v2120_v2 = vadd.f32 %v2119_v45, %v5292_v13 }
 0x277   :  { %v2334_v31 = vpop.f32.mrf.mxu1  ;;  %v2121_v27 = vpop.f32.mrf.mxu0 }
 0x278   :  { %v2335_v60 = vadd.f32 %v2334_v31, %v2120_v2 }
 0x279   :  { %v2336_v34 = vpop.f32.mrf.mxu1  ;;  %v2124_v58 = vpop.f32.mrf.mxu0 }
 0x27a   :  { %v2125_v31 = vadd.f32 %v2124_v58, %v5307_v46 }
 0x27b   :  { %v2339_v19 = vpop.f32.mrf.mxu1  ;;  %v2126_v4 = vpop.f32.mrf.mxu0 }
 0x27d   :  { %v2341_v44 = vpop.f32.mrf.mxu1  ;;  %v2129_v23 = vpop.f32.mrf.mxu0 }
 0x27f   :  { %v2344_v7 = vpop.f32.mrf.mxu1  ;;  %v2131_v42 = vpop.f32.mrf.mxu0 }
 0x280   :  { %v2130_v42 = vadd.f32 %v2129_v23, %v5322_v63 }
 0x281   :  { %v2346_v57 = vpop.f32.mrf.mxu1  ;;  %v2134_v59 = vpop.f32.mrf.mxu0 }
 0x282   :  { %v2340_v57 = vadd.f32 %v2339_v19, %v2125_v31 }
 0x283   :  { %v2349_v61 = vpop.f32.mrf.mxu1  ;;  %v2136_v16 = vpop.f32.mrf.mxu0 }
 0x285   :  { %v2351_v18 = vpop.f32.mrf.mxu1  ;;  %v2139_v62 = vpop.f32.mrf.mxu0 }
 0x287   :  { %v2354_v48 = vpop.f32.mrf.mxu1  ;;  %v2141_v50 = vpop.f32.mrf.mxu0 }
 0x288   :  { %v2135_v50 = vadd.f32 %v2134_v59, %v5337_v28 }
 0x289   :  { %v2356_v13 = vpop.f32.mrf.mxu1  ;;  %v2144_v0 = vpop.f32.mrf.mxu0 }
 0x28a   :  { %v2350_v58 = vadd.f32 %v2349_v61, %v2135_v50 }
 0x28b   :  { %v2359_v21 = vpop.f32.mrf.mxu1  ;;  %v2146_v6 = vpop.f32.mrf.mxu0 }
 0x28d   :  { %v2361_v36 = vpop.f32.mrf.mxu1  ;;  %v2149_v30 = vpop.f32.mrf.mxu0 }
 0x28e   :  { %v2345_v36 = vadd.f32 %v2344_v7, %v2130_v42  ;;  %v2150_v28 = vadd.f32 %v2149_v30, %v5385_v5 }
 0x28f   :  { %v2364_v33 = vpop.f32.mrf.mxu1  ;;  %v2151_v14 = vpop.f32.mrf.mxu0 }
 0x290   :  { %v2140_v14 = vadd.f32 %v2139_v62, %v5355_v1  ;;  %v5523_v23 = vmax.f32 %v2345_v36, 0.0  ;;  %v5528_v62 = vmax.f32 %v2350_v58, 0.0  ;;  %v2365_v5 = vadd.f32 %v2364_v33, %v2150_v28 }
 0x291   :  { %v2366_v24 = vpop.f32.mrf.mxu1  ;;  %v2154_v43 = vpop.f32.mrf.mxu0 }
 0x292   :  { %v5518_v24 = vmax.f32 %v2340_v57, 0.0  ;;  %v2355_v31 = vadd.f32 %v2354_v48, %v2140_v14  ;;  %v2155_v61 = vadd.f32 %v2154_v43, %v5400_v22  ;;  %v2553_v48 = vmul.f32 %v5523_v23, %v5523_v23 }
 0x293   :  { %v2369_v47 = vpop.f32.mrf.mxu1  ;;  %v2156_v38 = vpop.f32.mrf.mxu0  ;;  %v2554_v22 = vmul.f32 %v5528_v62, %v5528_v62 }
 0x294   :  { %v2552_v7 = vmul.f32 %v5518_v24, %v5518_v24  ;;  %v2370_v50 = vadd.f32 %v2369_v47, %v2155_v61 }
 0x295   :  { %v2371_v10 = vpop.f32.mrf.mxu1  ;;  %v2159_v17 = vpop.f32.mrf.mxu0 }
 0x296   :  { %v2145_v10 = vadd.f32 %v2144_v0, %v5370_v53  ;;  %v2160_v30 = vadd.f32 %v2159_v17, %v5418_v40  ;;  %v5548_v17 = vmax.f32 %v2365_v5, 0.0 }
 0x297   :  { %v2374_v45 = vpop.f32.mrf.mxu1  ;;  %v2161_v2 = vpop.f32.mrf.mxu0 }
 0x298   :  { %v5521_v2 = vmax.f32 %v2335_v60, 0.0  ;;  %v2375_v58 = vadd.f32 %v2374_v45, %v2160_v30 }
 0x299   :  { %v2376_v27 = vpop.f32.mrf.mxu1  ;;  %v2164_v34 = vpop.f32.mrf.mxu0 }
 0x29a   :  { %v2360_v27 = vadd.f32 %v2359_v21, %v2145_v10  ;;  %v2551_v53 = vmul.f32 %v5521_v2, %v5521_v2  ;;  %v2513_v42 = vadd.f32 %v5518_v24, %v5521_v2 }
 0x29b   :  { %v2379_v4 = vpop.f32.mrf.mxu1  ;;  %v2166_v44 = vpop.f32.mrf.mxu0 }
 0x29c   :  { %v5535_v44 = vmax.f32 %v2355_v31, 0.0  ;;  %v2581_v57 = vadd.f32 %v2552_v7, %v2551_v53  ;;  %v5542_v43 = vmax.f32 %v2360_v27, 0.0  ;;  %v2514_v36 = vadd.f32 %v2513_v42, %v5523_v23 }
 0x29d   :  { %v2381_v16 = vpop.f32.mrf.mxu1  ;;  %v2169_v18 = vpop.f32.mrf.mxu0 }
 0x29e   :  { %v2555_v40 = vmul.f32 %v5535_v44, %v5535_v44  ;;  %v2515_v10 = vadd.f32 %v2514_v36, %v5528_v62 }
 0x29f   :  { %v2384_v13 = vpop.f32.mrf.mxu1  ;;  %v2171_v6 = vpop.f32.mrf.mxu0 }
 0x2a0   :  { %v2165_v6 = vadd.f32 %v2164_v34, %v5433_v37  ;;  %v2556_v37 = vmul.f32 %v5542_v43, %v5542_v43  ;;  %v5554_v34 = vmax.f32 %v2370_v50, 0.0  ;;  %v2516_v53 = vadd.f32 %v2515_v10, %v5535_v44 }
 0x2a1   :  { %v2386_v38 = vpop.f32.mrf.mxu1  ;;  %v2174_v46 = vpop.f32.mrf.mxu0 }
 0x2a2   :  { %v2582_v38 = vadd.f32 %v2581_v57, %v2553_v48  ;;  %v2380_v7 = vadd.f32 %v2379_v4, %v2165_v6  ;;  %v2517_v42 = vadd.f32 %v2516_v53, %v5542_v43 }
 0x2a3   :  { %v2389_v63 = vpop.f32.mrf.mxu1  ;;  %v2176_v19 = vpop.f32.mrf.mxu0 }
 0x2a4   :  { %v2170_v19 = vadd.f32 %v2169_v18, %v5448_v11  ;;  %v2583_v47 = vadd.f32 %v2582_v38, %v2554_v22  ;;  %v5560_v11 = vmax.f32 %v2375_v58, 0.0  ;;  %v2518_v6 = vadd.f32 %v2517_v42, %v5548_v17 }
 0x2a5   :  { %v2391_v1 = vpop.f32.mrf.mxu1  ;;  %v2179_v59 = vpop.f32.mrf.mxu0 }
 0x2a6   :  { %v2175_v1 = vadd.f32 %v2174_v46, %v5457_v26  ;;  %v2584_v45 = vadd.f32 %v2583_v47, %v2555_v40  ;;  %v2385_v18 = vadd.f32 %v2384_v13, %v2170_v19  ;;  %v2180_v48 = vadd.f32 %v2179_v59, %v5460_v8 }
 0x2a7   :  { %v2394_v60 = vpop.f32.mrf.mxu1  ;;  %v2181_v0 = vpop.f32.mrf.mxu0  ;;  %v2558_v26 = vmul.f32 %v5554_v34, %v5554_v34  ;;  %v5566_v46 = vmax.f32 %v2380_v7, 0.0  ;;  %v2559_v8 = vmul.f32 %v5560_v11, %v5560_v11  ;;  %v2519_v58 = vadd.f32 %v2518_v6, %v5554_v34 }
 0x2a8   :  { %v2557_v0 = vmul.f32 %v5548_v17, %v5548_v17  ;;  %v2585_v4 = vadd.f32 %v2584_v45, %v2556_v37  ;;  %v2390_v57 = vadd.f32 %v2389_v63, %v2175_v1  ;;  %v5572_v59 = vmax.f32 %v2385_v18, 0.0 }
 0x2a9   :  { %v2396_v21 = vpop.f32.mrf.mxu1  ;;  %v2184_v16 = vpop.f32.mrf.mxu0  ;;  %v2395_v36 = vadd.f32 %v2394_v60, %v2180_v48  ;;  %v2520_v37 = vadd.f32 %v2519_v58, %v5560_v11 }
 0x2aa   :  { %v2185_v21 = vadd.f32 %v2184_v16, %v5463_v32  ;;  %v2586_v13 = vadd.f32 %v2585_v4, %v2557_v0  ;;  %v2560_v32 = vmul.f32 %v5566_v46, %v5566_v46  ;;  %v5578_v16 = vmax.f32 %v2390_v57, 0.0 }
 0x2ab   :  { %v2399_v14 = vpop.f32.mrf.mxu1  ;;  %v2186_v33 = vpop.f32.mrf.mxu0  ;;  %v2521_v45 = vadd.f32 %v2520_v37, %v5566_v46 }
 0x2ac   :  { %v2587_v63 = vadd.f32 %v2586_v13, %v2558_v26  ;;  %v2400_v10 = vadd.f32 %v2399_v14, %v2185_v21 }
 0x2ad   :  { %v2401_v31 = vpop.f32.mrf.mxu1  ;;  %v2189_v28 = vpop.f32.mrf.mxu0  ;;  %v2522_v42 = vadd.f32 %v2521_v45, %v5572_v59 }
 0x2ae   :  { %v2190_v33 = vadd.f32 %v2189_v28, %v5466_v15  ;;  %v2588_v60 = vadd.f32 %v2587_v63, %v2559_v8  ;;  %v2561_v15 = vmul.f32 %v5572_v59, %v5572_v59  ;;  %v5584_v28 = vmax.f32 %v2395_v36, 0.0 }
 0x2af   :  { %v2404_v27 = vpop.f32.mrf.mxu1  ;;  %v2191_v61 = vpop.f32.mrf.mxu0  ;;  %v5590_v0 = vmax.f32 %v2400_v10, 0.0 }
 0x2b0   :  { %v2405_v7 = vadd.f32 %v2404_v27, %v2190_v33  ;;  %v2589_v14 = vadd.f32 %v2588_v60, %v2560_v32 }
 0x2b1   :  { %v2406_v5 = vpop.f32.mrf.mxu1  ;;  %v2194_v30 = vpop.f32.mrf.mxu0 }
 0x2b2   :  { %v2195_v19 = vadd.f32 %v2194_v30, %v5469_v12  ;;  %v2562_v12 = vmul.f32 %v5578_v16, %v5578_v16  ;;  %v2590_v27 = vadd.f32 %v2589_v14, %v2561_v15  ;;  %v5596_v4 = vmax.f32 %v2405_v7, 0.0 }
 0x2b3   :  { %v2409_v22 = vpop.f32.mrf.mxu1  ;;  %v2196_v50 = vpop.f32.mrf.mxu0 }
 0x2b4   :  { %v2410_v18 = vadd.f32 %v2409_v22, %v2195_v19  ;;  %v2523_v50 = vadd.f32 %v2522_v42, %v5578_v16  ;;  %v2591_v22 = vadd.f32 %v2590_v27, %v2562_v12  ;;  %v2565_v58 = vmul.f32 %v5596_v4, %v5596_v4 }
 0x2b5   :  { %v2411_v38 = vpop.f32.mrf.mxu1  ;;  %v2199_v40 = vpop.f32.mrf.mxu0 }
 0x2b6   :  { %v2200_v1 = vadd.f32 %v2199_v40, %v5472_v52  ;;  %v2563_v52 = vmul.f32 %v5584_v28, %v5584_v28  ;;  %v5602_v13 = vmax.f32 %v2410_v18, 0.0  ;;  %v2524_v38 = vadd.f32 %v2523_v50, %v5584_v28 }
 0x2b7   :  { %v2414_v31 = vpop.f32.mrf.mxu1  ;;  %v2201_v47 = vpop.f32.mrf.mxu0 }
 0x2b8   :  { %v2415_v26 = vadd.f32 %v2414_v31, %v2200_v1  ;;  %v2592_v40 = vadd.f32 %v2591_v22, %v2563_v52  ;;  %v2525_v19 = vadd.f32 %v2524_v38, %v5590_v0  ;;  %v2566_v37 = vmul.f32 %v5602_v13, %v5602_v13 }
 0x2b9   :  { %v2416_v61 = vpop.f32.mrf.mxu1  ;;  %v2204_v53 = vpop.f32.mrf.mxu0 }
 0x2ba   :  { %v2205_v48 = vadd.f32 %v2204_v53, %v5475_v20  ;;  %v2564_v20 = vmul.f32 %v5590_v0, %v5590_v0  ;;  %v5607_v63 = vmax.f32 %v2415_v26, 0.0  ;;  %v2526_v1 = vadd.f32 %v2525_v19, %v5596_v4 }
 0x2bb   :  { %v2419_v5 = vpop.f32.mrf.mxu1  ;;  %v2206_v30 = vpop.f32.mrf.mxu0 }
 0x2bc   :  { %v2420_v8 = vadd.f32 %v2419_v5, %v2205_v48  ;;  %v2593_v47 = vadd.f32 %v2592_v40, %v2564_v20  ;;  %v2567_v45 = vmul.f32 %v5607_v63, %v5607_v63 }
 0x2bd   :  { %v2421_v57 = vpop.f32.mrf.mxu1  ;;  %v2209_v21 = vpop.f32.mrf.mxu0 }
 0x2be   :  { %v2210_v6 = vadd.f32 %v2209_v21, %v5478_v51  ;;  %v5613_v60 = vmax.f32 %v2420_v8, 0.0  ;;  %v2594_v53 = vadd.f32 %v2593_v47, %v2565_v58 }
 0x2bf   :  { %v2424_v36 = vpop.f32.mrf.mxu1  ;;  %v2211_v33 = vpop.f32.mrf.mxu0 }
 0x2c0   :  { %v2425_v32 = vadd.f32 %v2424_v36, %v2210_v6  ;;  %v2595_v5 = vadd.f32 %v2594_v53, %v2566_v37  ;;  %v2568_v30 = vmul.f32 %v5613_v60, %v5613_v60 }
 0x2c1   :  { %v2426_v10 = vpop.f32.mrf.mxu1  ;;  %v2214_v51 = vpop.f32.mrf.mxu0 }
 0x2c2   :  { %v2215_v31 = vadd.f32 %v2214_v51, %v5481_v41  ;;  %v5618_v14 = vmax.f32 %v2425_v32, 0.0  ;;  %v2527_v41 = vadd.f32 %v2526_v1, %v5602_v13  ;;  %v2596_v21 = vadd.f32 %v2595_v5, %v2567_v45 }
 0x2c3   :  { %v2429_v15 = vpop.f32.mrf.mxu1  ;;  %v2216_v7 = vpop.f32.mrf.mxu0 }
 0x2c4   :  { %v2430_v61 = vadd.f32 %v2429_v15, %v2215_v31  ;;  %v2528_v52 = vadd.f32 %v2527_v41, %v5607_v63  ;;  %v2569_v50 = vmul.f32 %v5618_v14, %v5618_v14  ;;  %v2597_v36 = vadd.f32 %v2596_v21, %v2568_v30 }
 0x2c5   :  { %v2431_v12 = vpop.f32.mrf.mxu1  ;;  %v2219_v18 = vpop.f32.mrf.mxu0 }
 0x2c6   :  { %v2220_v48 = vadd.f32 %v2219_v18, %v5484_v25  ;;  %v5625_v26 = vmax.f32 %v2430_v61, 0.0  ;;  %v2529_v20 = vadd.f32 %v2528_v52, %v5613_v60  ;;  %v2598_v10 = vadd.f32 %v2597_v36, %v2569_v50 }
 0x2c7   :  { %v2434_v42 = vpop.f32.mrf.mxu1  ;;  %v2221_v27 = vpop.f32.mrf.mxu0 }
 0x2c8   :  { %v2435_v57 = vadd.f32 %v2434_v42, %v2220_v48  ;;  %v2530_v40 = vadd.f32 %v2529_v20, %v5618_v14  ;;  %v2570_v58 = vmul.f32 %v5625_v26, %v5625_v26 }
 0x2c9   :  { %v2436_v6 = vpop.f32.mrf.mxu1  ;;  %v2224_v22 = vpop.f32.mrf.mxu0 }
 0x2ca   :  { %v5630_v25 = vmax.f32 %v2435_v57, 0.0  ;;  %v2225_v8 = vadd.f32 %v2224_v22, %v5487_v55  ;;  %v2531_v31 = vadd.f32 %v2530_v40, %v5625_v26  ;;  %v2599_v1 = vadd.f32 %v2598_v10, %v2570_v58 }
 0x2cb   :  { %v2439_v33 = vpop.f32.mrf.mxu1  ;;  %v2226_v38 = vpop.f32.mrf.mxu0 }
 0x2cc   :  { %v2440_v32 = vadd.f32 %v2439_v33, %v2225_v8  ;;  %v2571_v47 = vmul.f32 %v5630_v25, %v5630_v25  ;;  %v2532_v61 = vadd.f32 %v2531_v31, %v5630_v25 }
 0x2cd   :  { %v2441_v51 = vpop.f32.mrf.mxu1  ;;  %v2229_v19 = vpop.f32.mrf.mxu0 }
 0x2ce   :  { %v5639_v37 = vmax.f32 %v2440_v32, 0.0  ;;  %v2230_v55 = vadd.f32 %v2229_v19, %v5490_v9  ;;  %v2600_v41 = vadd.f32 %v2599_v1, %v2571_v47 }
 0x2cf   :  { %v2444_v15 = vpop.f32.mrf.mxu1  ;;  %v2231_v7 = vpop.f32.mrf.mxu0 }
 0x2d0   :  { %v2572_v53 = vmul.f32 %v5639_v37, %v5639_v37  ;;  %v2445_v45 = vadd.f32 %v2444_v15, %v2230_v55  ;;  %v2533_v48 = vadd.f32 %v2532_v61, %v5639_v37 }
 0x2d1   :  { %v2446_v12 = vpop.f32.mrf.mxu1  ;;  %v2234_v18 = vpop.f32.mrf.mxu0 }
 0x2d2   :  { %v5646_v5 = vmax.f32 %v2445_v45, 0.0  ;;  %v2235_v30 = vadd.f32 %v2234_v18, %v5493_v49  ;;  %v2601_v27 = vadd.f32 %v2600_v41, %v2572_v53 }
 0x2d3   :  { %v2449_v42 = vpop.f32.mrf.mxu1  ;;  %v2236_v9 = vpop.f32.mrf.mxu0 }
 0x2d4   :  { %v2534_v52 = vadd.f32 %v2533_v48, %v5646_v5  ;;  %v2573_v57 = vmul.f32 %v5646_v5, %v5646_v5  ;;  %v2450_v21 = vadd.f32 %v2449_v42, %v2235_v30 }
 0x2d5   :  { %v2451_v50 = vpop.f32.mrf.mxu1  ;;  %v2239_v6 = vpop.f32.mrf.mxu0 }
 0x2d6   :  { %v2602_v22 = vadd.f32 %v2601_v27, %v2573_v57  ;;  %v5652_v20 = vmax.f32 %v2450_v21, 0.0  ;;  %v2240_v8 = vadd.f32 %v2239_v6, %v5496_v29 }
 0x2d7   :  { %v2454_v36 = vpop.f32.mrf.mxu1  ;;  %v2241_v33 = vpop.f32.mrf.mxu0 }
 0x2d8   :  { %v2535_v49 = vadd.f32 %v2534_v52, %v5652_v20  ;;  %v2574_v38 = vmul.f32 %v5652_v20, %v5652_v20  ;;  %v2455_v40 = vadd.f32 %v2454_v36, %v2240_v8 }
 0x2d9   :  { %v2456_v58 = vpop.f32.mrf.mxu1  ;;  %v2244_v32 = vpop.f32.mrf.mxu0 }
 0x2da   :  { %v2603_v10 = vadd.f32 %v2602_v22, %v2574_v38  ;;  %v5658_v51 = vmax.f32 %v2455_v40, 0.0  ;;  %v2245_v19 = vadd.f32 %v2244_v32, %v5499_v39 }
 0x2db   :  { %v2459_v31 = vpop.f32.mrf.mxu1  ;;  %v2246_v47 = vpop.f32.mrf.mxu0 }
 0x2dc   :  { %v2536_v55 = vadd.f32 %v2535_v49, %v5658_v51  ;;  %v2575_v29 = vmul.f32 %v5658_v51, %v5658_v51  ;;  %v2460_v15 = vadd.f32 %v2459_v31, %v2245_v19 }
 0x2dd   :  { %v2461_v7 = vpop.f32.mrf.mxu1  ;;  %v2249_v1 = vpop.f32.mrf.mxu0 }
 0x2de   :  { %v2604_v61 = vadd.f32 %v2603_v10, %v2575_v29  ;;  %v5664_v53 = vmax.f32 %v2460_v15, 0.0  ;;  %v2250_v45 = vadd.f32 %v2249_v1, %v5502_v54 }
 0x2df   :  { %v2464_v12 = vpop.f32.mrf.mxu1  ;;  %v2251_v18 = vpop.f32.mrf.mxu0 }
 0x2e0   :  { %v2537_v41 = vadd.f32 %v2536_v55, %v5664_v53  ;;  %v2576_v39 = vmul.f32 %v5664_v53, %v5664_v53  ;;  %v2465_v48 = vadd.f32 %v2464_v12, %v2250_v45 }
 0x2e1   :  { %v2466_v30 = vpop.f32.mrf.mxu1  ;;  %v2254_v42 = vpop.f32.mrf.mxu0 }
 0x2e2   :  { %v2605_v9 = vadd.f32 %v2604_v61, %v2576_v39  ;;  %v5670_v27 = vmax.f32 %v2465_v48, 0.0  ;;  %v2255_v52 = vadd.f32 %v2254_v42, %v5505_v35 }
 0x2e3   :  { %v2469_v57 = vpop.f32.mrf.mxu1  ;;  %v2256_v21 = vpop.f32.mrf.mxu0 }
 0x2e4   :  { %v2538_v50 = vadd.f32 %v2537_v41, %v5670_v27  ;;  %v2577_v54 = vmul.f32 %v5670_v27, %v5670_v27  ;;  %v2470_v6 = vadd.f32 %v2469_v57, %v2255_v52 }
 0x2e5   :  { %v2471_v22 = vpop.f32.mrf.mxu1  ;;  %v2259_v8 = vpop.f32.mrf.mxu0 }
 0x2e6   :  { %v2606_v36 = vadd.f32 %v2605_v9, %v2577_v54  ;;  %v5676_v33 = vmax.f32 %v2470_v6, 0.0  ;;  %v2260_v49 = vadd.f32 %v2259_v8, %v5508_v3 }
 0x2e7   :  { %v2474_v38 = vpop.f32.mrf.mxu1  ;;  %v2261_v40 = vpop.f32.mrf.mxu0 }
 0x2e8   :  { %v2539_v58 = vadd.f32 %v2538_v50, %v5676_v33  ;;  %v2578_v35 = vmul.f32 %v5676_v33, %v5676_v33  ;;  %v2475_v32 = vadd.f32 %v2474_v38, %v2260_v49 }
 0x2e9   :  { %v2476_v10 = vpop.f32.mrf.mxu1  ;;  %v2264_v19 = vpop.f32.mrf.mxu0 }
 0x2ea   :  { %v2607_v31 = vadd.f32 %v2606_v36, %v2578_v35  ;;  %v5682_v47 = vmax.f32 %v2475_v32, 0.0  ;;  %v2265_v55 = vadd.f32 %v2264_v19, %v5511_v56  ;;  %v2628_v32 = vlaneseq  ;;  %v2620_v19 = vld [vmem:[%s5816_s3] sm:$0x1] }
 0x2eb   :  { %v2479_v29 = vpop.f32.mrf.mxu1  ;;  %v2266_v15 = vpop.f32.mrf.mxu0 }
 0x2ec   :  { %v2540_v7 = vadd.f32 %v2539_v58, %v5682_v47  ;;  %v2579_v3 = vmul.f32 %v5682_v47, %v5682_v47  ;;  %v2480_v1 = vadd.f32 %v2479_v29, %v2265_v55  ;;  %v2629_v10 = vshrl.u32 %v2628_v32, 7  ;;  %v2624_v15 = vld [vmem:[%s5817_s4] sm:$0x1] }
 0x2ed   :  { %v2481_v61 = vpop.f32.mrf.mxu1 }
 0x2ee   :  { %v2608_v45 = vadd.f32 %v2607_v31, %v2579_v3  ;;  %v2512_v12 = vmax.f32 %v2480_v1, 0.0  ;;  %v2630_v31 = vsub.s32 0, %v2629_v10 }
 0x2f0   :  { %v2542_v18 = vsel %vm2541_vm0, %v2512_v12, 0.0  ;;  %v2580_v41 = vmul.f32 %v2512_v12, %v2512_v12 }
 0x2f1   :  { %v2543_v39 = vadd.f32 %v2542_v18, %v2540_v7 }
 0x2f2   :  { %v2609_v48 = vsel %vm2541_vm0, %v2580_v41, 0.0 }
 0x2f3   :  { %v2544_v30 = vrot.slane %v2543_v39, 4  ;;  %v2610_v42 = vadd.f32 %v2609_v48, %v2608_v45 }
 0x2f5   :  { %v2545_v9 = vadd.f32 %v2544_v30, %v2543_v39  ;;  %v2611_v56 = vrot.slane %v2610_v42, 4 }
 0x2f7   :  { %v2546_v52 = vrot.slane %v2545_v9, 2  ;;  %v2612_v57 = vadd.f32 %v2611_v56, %v2610_v42 }
 0x2f9   :  { %v2547_v21 = vadd.f32 %v2546_v52, %v2545_v9  ;;  %v2613_v50 = vrot.slane %v2612_v57, 2 }
 0x2fb   :  { %v2548_v54 = vrot.slane %v2547_v21, 1  ;;  %v2614_v6 = vadd.f32 %v2613_v50, %v2612_v57 }
 0x2fd   :  { %v2549_v22 = vadd.f32 %v2548_v54, %v2547_v21  ;;  %v2615_v8 = vrot.slane %v2614_v6, 1 }
 0x2ff   :  { %v2550_v36 = vmul.f32 0.0042735045, %v2549_v22  ;;  %v2616_v49 = vadd.f32 %v2615_v8, %v2614_v6 }
 0x301   :  { %v2617_v38 = vmul.f32 0.0042735045, %v2616_v49  ;;  %v2618_v40 = vmul.f32 %v2550_v36, %v2550_v36 }
 0x303   :  { %v2619_v58 = vsub.f32 %v2617_v38, %v2618_v40 }
 0x305   :  { %v2621_v35 = vadd.f32 1e-05, %v2619_v58 }
 0x307   :  { %2735 = vrsqrt.f32 %v2621_v35 }
 0x314   :  { %v2736_v55 = vpop.eup %2735 }
 0x315   :  { %v2623_v29 = vmul.f32 %v2736_v55, %v2620_v19 }
 0x317   :  { %v2625_v7 = vmul.f32 %v2623_v29, %v2550_v36  ;;  %v2631_v3 = vrot.slane %v2623_v29, %v2630_v31 }
 0x319   :  { %v2626_v1 = vsub.f32 %v2624_v15, %v2625_v7  ;;  %v2633_v61 = vmul.f32 %v2631_v3, %v5521_v2  ;;  %v2634_v45 = vmul.f32 %v2631_v3, %v5518_v24  ;;  %v2635_v18 = vmul.f32 %v2631_v3, %v5523_v23 }
 0x31a   :  { %v2636_v41 = vmul.f32 %v2631_v3, %v5528_v62  ;;  %v2637_v39 = vmul.f32 %v2631_v3, %v5535_v44  ;;  %v2638_v48 = vmul.f32 %v2631_v3, %v5542_v43  ;;  %v2639_v30 = vmul.f32 %v2631_v3, %v5548_v17 }
 0x31b   :  { %v2640_v42 = vmul.f32 %v2631_v3, %v5554_v34  ;;  %v2641_v9 = vmul.f32 %v2631_v3, %v5560_v11  ;;  %v2642_v56 = vmul.f32 %v2631_v3, %v5566_v46  ;;  %v2643_v2 = vmul.f32 %v2631_v3, %v5572_v59 }
 0x31c   :  { %v2644_v24 = vmul.f32 %v2631_v3, %v5578_v16  ;;  %v2645_v23 = vmul.f32 %v2631_v3, %v5584_v28  ;;  %v2646_v62 = vmul.f32 %v2631_v3, %v5590_v0  ;;  %v2647_v44 = vmul.f32 %v2631_v3, %v5596_v4 }
 0x31d   :  { %v2648_v43 = vmul.f32 %v2631_v3, %v5602_v13  ;;  %v2649_v17 = vmul.f32 %v2631_v3, %v5607_v63  ;;  %v2654_v34 = vmul.f32 %v2631_v3, %v5639_v37  ;;  %v2655_v11 = vmul.f32 %v2631_v3, %v5646_v5 }
 0x31e   :  { %v2656_v46 = vmul.f32 %v2631_v3, %v5652_v20  ;;  %v2657_v59 = vmul.f32 %v2631_v3, %v5658_v51  ;;  %v2658_v16 = vmul.f32 %v2631_v3, %v5664_v53  ;;  %v2659_v28 = vmul.f32 %v2631_v3, %v5670_v27 }
 0x31f   :  { %v2660_v0 = vmul.f32 %v2631_v3, %v5676_v33  ;;  %v2661_v4 = vmul.f32 %v2631_v3, %v5682_v47  ;;  %v2662_v52 = vmul.f32 %v2631_v3, %v2512_v12  ;;  %v2667_v13 = vrot.slane %v2626_v1, %v2630_v31 }
 0x320   :  { %v2650_v63 = vmul.f32 %v2631_v3, %v5613_v60  ;;  %v2651_v37 = vmul.f32 %v2631_v3, %v5618_v14  ;;  %v2652_v5 = vmul.f32 %v2631_v3, %v5625_v26  ;;  %v2653_v20 = vmul.f32 %v2631_v3, %v5630_v25 }
 0x321   :  { %v2669_v57 = vadd.f32 %v2667_v13, %v2633_v61  ;;  %v2670_v51 = vadd.f32 %v2667_v13, %v2634_v45  ;;  %v2671_v21 = vadd.f32 %v2667_v13, %v2635_v18  ;;  %v2672_v53 = vadd.f32 %v2667_v13, %v2636_v41 }
 0x322   :  { %v2673_v50 = vadd.f32 %v2667_v13, %v2637_v39  ;;  %v2674_v27 = vadd.f32 %v2667_v13, %v2638_v48  ;;  %v2675_v54 = vadd.f32 %v2667_v13, %v2639_v30  ;;  %v2676_v33 = vadd.f32 %v2667_v13, %v2640_v42 }
 0x323   :  { %v2677_v6 = vadd.f32 %v2667_v13, %v2641_v9  ;;  %v2678_v47 = vadd.f32 %v2667_v13, %v2642_v56  ;;  %v2679_v12 = vadd.f32 %v2667_v13, %v2643_v2  ;;  %v2680_v22 = vadd.f32 %v2667_v13, %v2644_v24  ;;  %2699 = vst [vmem:[%s5818_s5] sm:$0xff] %v2669_v57 }
 0x324   :  { %2700 = vst [vmem:[%s5818_s5 + $0x8] sm:$0xff] %v2670_v51  ;;  %2701 = vst [vmem:[%s5818_s5 + $0x10] sm:$0xff] %v2671_v21  ;;  %v2681_v60 = vadd.f32 %v2667_v13, %v2645_v23  ;;  %v2682_v14 = vadd.f32 %v2667_v13, %v2646_v62  ;;  %v2683_v26 = vadd.f32 %v2667_v13, %v2647_v44 }
 0x325   :  { %2702 = vst [vmem:[%s5818_s5 + $0x18] sm:$0xff] %v2672_v53  ;;  %v2684_v25 = vadd.f32 %v2667_v13, %v2648_v43  ;;  %2703 = vst [vmem:[%s5818_s5 + $0x20] sm:$0xff] %v2673_v50  ;;  %v2685_v8 = vadd.f32 %v2667_v13, %v2649_v17  ;;  %v2686_v36 = vadd.f32 %v2667_v13, %v2650_v63 }
 0x326   :  { %2704 = vst [vmem:[%s5818_s5 + $0x28] sm:$0xff] %v2674_v27  ;;  %2705 = vst [vmem:[%s5818_s5 + $0x30] sm:$0xff] %v2675_v54  ;;  %v2687_v49 = vadd.f32 %v2667_v13, %v2651_v37  ;;  %v2688_v38 = vadd.f32 %v2667_v13, %v2652_v5  ;;  %v2689_v40 = vadd.f32 %v2667_v13, %v2653_v20 }
 0x327   :  { %2706 = vst [vmem:[%s5818_s5 + $0x38] sm:$0xff] %v2676_v33  ;;  %2707 = vst [vmem:[%s5818_s5 + $0x40] sm:$0xff] %v2677_v6  ;;  %v2690_v58 = vadd.f32 %v2667_v13, %v2654_v34  ;;  %v2691_v35 = vadd.f32 %v2667_v13, %v2655_v11  ;;  %v2692_v32 = vadd.f32 %v2667_v13, %v2656_v46 }
 0x328   :  { %2708 = vst [vmem:[%s5818_s5 + $0x48] sm:$0xff] %v2678_v47  ;;  %2709 = vst [vmem:[%s5818_s5 + $0x50] sm:$0xff] %v2679_v12  ;;  %v2693_v10 = vadd.f32 %v2667_v13, %v2657_v59  ;;  %v2694_v19 = vadd.f32 %v2667_v13, %v2658_v16  ;;  %v2695_v31 = vadd.f32 %v2667_v13, %v2659_v28 }
 0x329   :  { %2710 = vst [vmem:[%s5818_s5 + $0x58] sm:$0xff] %v2680_v22  ;;  %2711 = vst [vmem:[%s5818_s5 + $0x60] sm:$0xff] %v2681_v60  ;;  %v2696_v55 = vadd.f32 %v2667_v13, %v2660_v0  ;;  %v2697_v29 = vadd.f32 %v2667_v13, %v2661_v4  ;;  %v2698_v15 = vadd.f32 %v2667_v13, %v2662_v52 }
 0x32a   :  { %2712 = vst [vmem:[%s5818_s5 + $0x68] sm:$0xff] %v2682_v14  ;;  %2713 = vst [vmem:[%s5818_s5 + $0x70] sm:$0xff] %v2683_v26 }
 0x32b   :  { %2714 = vst [vmem:[%s5818_s5 + $0x78] sm:$0xff] %v2684_v25  ;;  %2715 = vst [vmem:[%s5818_s5 + $0x80] sm:$0xff] %v2685_v8 }
 0x32c   :  { %2716 = vst [vmem:[%s5818_s5 + $0x88] sm:$0xff] %v2686_v36  ;;  %2717 = vst [vmem:[%s5818_s5 + $0x90] sm:$0xff] %v2687_v49 }
 0x32d   :  { %2718 = vst [vmem:[%s5818_s5 + $0x98] sm:$0xff] %v2688_v38  ;;  %2719 = vst [vmem:[%s5818_s5 + $0xa0] sm:$0xff] %v2689_v40 }
 0x32e   :  { %2720 = vst [vmem:[%s5818_s5 + $0xa8] sm:$0xff] %v2690_v58  ;;  %2721 = vst [vmem:[%s5818_s5 + $0xb0] sm:$0xff] %v2691_v35 }
 0x32f   :  { %2722 = vst [vmem:[%s5818_s5 + $0xb8] sm:$0xff] %v2692_v32  ;;  %2723 = vst [vmem:[%s5818_s5 + $0xc0] sm:$0xff] %v2693_v10 }
 0x330   :  { %2724 = vst [vmem:[%s5818_s5 + $0xc8] sm:$0xff] %v2694_v19  ;;  %2725 = vst [vmem:[%s5818_s5 + $0xd0] sm:$0xff] %v2695_v31 }
 0x331   :  { %2726 = vst [vmem:[%s5818_s5 + $0xd8] sm:$0xff] %v2696_v55  ;;  %2727 = vst [vmem:[%s5818_s5 + $0xe0] sm:$0xff] %v2697_v29 }
 0x332   :  { %2728 = vst [vmem:[%s5818_s5 + $0xe8] sm:$0x3] %v2698_v15 }

// kernel: forward.6
= control target key start
LH: loop header
LB: loop body
LE: loop exit
PB: predicated region body
PF: predicated region fallthrough
CT: control target
= control target key end

     0   :  { %vm1263_vm0 = vmmov 0   ;;  %vm818_vm1 = vcmask 1045504   ;;  %s2183_s1 = inlined_call_operand.vmem [shape: f32[1152,128], index: 1, kind: input, shape index: {}]   ;;  %s2184_s0 = inlined_call_operand.vmem [shape: f32[70,1152], index: 0, kind: input, shape index: {}]   ;;  %s2185_s2 = inlined_call_operand.vmem [shape: f32[1,128], index: 2, kind: input, shape index: {}]   ;;  %s2186_s3 = inlined_call_operand.vmem [shape: f32[1,128], index: 3, kind: input, shape index: {}]   ;;  %s2187_s4 = inlined_call_operand.vmem [shape: f32[1,128], index: 4, kind: input, shape index: {}]   ;;  %s2188_s5 = inlined_call_operand.vmem [shape: f32[70,128], index: 5, kind: output, shape index: {}]  }
   0x1   :  { %v132_v0 = vld [vmem:[%s2183_s1 + $0xf8] sm:$0xff]  ;;  %v131_v4 = vld [vmem:[%s2183_s1 + $0xf0] sm:$0xff]  ;;  %v130_v8 = vld [vmem:[%s2183_s1 + $0xe8] sm:$0xff] }
   0x2   :  { %v164_v1 = vld [vmem:[%s2183_s1 + $0x1f8] sm:$0xff]  ;;  %906 = vmatprep.subr.mxu0 %v132_v0  ;;  %v163_v5 = vld [vmem:[%s2183_s1 + $0x1f0] sm:$0xff]  ;;  %v162_v9 = vld [vmem:[%s2183_s1 + $0x1e8] sm:$0xff] }
   0x3   :  { %v116_v2 = vld [vmem:[%s2183_s1 + $0x78] sm:$0xff]  ;;  %965 = vmatprep.subr.mxu1 %v164_v1  ;;  %v115_v6 = vld [vmem:[%s2183_s1 + $0x70] sm:$0xff]  ;;  %v114_v10 = vld [vmem:[%s2183_s1 + $0x68] sm:$0xff] }
   0x4   :  { %v148_v3 = vld [vmem:[%s2183_s1 + $0x178] sm:$0xff]  ;;  %907 = vmatpush3.msra.mxu0 %v116_v2  ;;  %v147_v7 = vld [vmem:[%s2183_s1 + $0x170] sm:$0xff]  ;;  %v146_v11 = vld [vmem:[%s2183_s1 + $0x168] sm:$0xff] }
   0x5   :  { %966 = vmatpush3.msra.mxu1 %v148_v3  ;;  %908 = vmatprep.subr.mxu0 %v131_v4  ;;  %v129_v12 = vld [vmem:[%s2183_s1 + $0xe0] sm:$0xff]  ;;  %v128_v16 = vld [vmem:[%s2183_s1 + $0xd8] sm:$0xff]  ;;  %v127_v20 = vld [vmem:[%s2183_s1 + $0xd0] sm:$0xff] }
   0x6   :  { %967 = vmatprep.subr.mxu1 %v163_v5  ;;  %909 = vmatpush3.msra.mxu0 %v115_v6  ;;  %v161_v13 = vld [vmem:[%s2183_s1 + $0x1e0] sm:$0xff]  ;;  %v160_v17 = vld [vmem:[%s2183_s1 + $0x1d8] sm:$0xff]  ;;  %v159_v21 = vld [vmem:[%s2183_s1 + $0x1d0] sm:$0xff] }
   0x7   :  { %968 = vmatpush3.msra.mxu1 %v147_v7  ;;  %910 = vmatprep.subr.mxu0 %v130_v8  ;;  %v113_v14 = vld [vmem:[%s2183_s1 + $0x60] sm:$0xff]  ;;  %v112_v18 = vld [vmem:[%s2183_s1 + $0x58] sm:$0xff]  ;;  %v111_v22 = vld [vmem:[%s2183_s1 + $0x50] sm:$0xff] }
   0x8   :  { %969 = vmatprep.subr.mxu1 %v162_v9  ;;  %v145_v15 = vld [vmem:[%s2183_s1 + $0x160] sm:$0xff]  ;;  %911 = vmatpush3.msra.mxu0 %v114_v10  ;;  %v144_v19 = vld [vmem:[%s2183_s1 + $0x158] sm:$0xff]  ;;  %v143_v23 = vld [vmem:[%s2183_s1 + $0x150] sm:$0xff] }
   0x9   :  { %970 = vmatpush3.msra.mxu1 %v146_v11  ;;  %912 = vmatprep.subr.mxu0 %v129_v12  ;;  %v126_v24 = vld [vmem:[%s2183_s1 + $0xc8] sm:$0xff]  ;;  %v125_v28 = vld [vmem:[%s2183_s1 + $0xc0] sm:$0xff]  ;;  %v124_v32 = vld [vmem:[%s2183_s1 + $0xb8] sm:$0xff] }
   0xa   :  { %971 = vmatprep.subr.mxu1 %v161_v13  ;;  %913 = vmatpush3.msra.mxu0 %v113_v14  ;;  %v158_v25 = vld [vmem:[%s2183_s1 + $0x1c8] sm:$0xff]  ;;  %v157_v29 = vld [vmem:[%s2183_s1 + $0x1c0] sm:$0xff]  ;;  %v156_v33 = vld [vmem:[%s2183_s1 + $0x1b8] sm:$0xff] }
   0xb   :  { %972 = vmatpush3.msra.mxu1 %v145_v15  ;;  %914 = vmatprep.subr.mxu0 %v128_v16  ;;  %v110_v26 = vld [vmem:[%s2183_s1 + $0x48] sm:$0xff]  ;;  %v109_v30 = vld [vmem:[%s2183_s1 + $0x40] sm:$0xff]  ;;  %v108_v34 = vld [vmem:[%s2183_s1 + $0x38] sm:$0xff] }
   0xc   :  { %973 = vmatprep.subr.mxu1 %v160_v17  ;;  %915 = vmatpush3.msra.mxu0 %v112_v18  ;;  %v142_v27 = vld [vmem:[%s2183_s1 + $0x148] sm:$0xff]  ;;  %v141_v31 = vld [vmem:[%s2183_s1 + $0x140] sm:$0xff]  ;;  %v140_v35 = vld [vmem:[%s2183_s1 + $0x138] sm:$0xff] }
   0xd   :  { %974 = vmatpush3.msra.mxu1 %v144_v19  ;;  %916 = vmatprep.subr.mxu0 %v127_v20  ;;  %v123_v36 = vld [vmem:[%s2183_s1 + $0xb0] sm:$0xff]  ;;  %v122_v40 = vld [vmem:[%s2183_s1 + $0xa8] sm:$0xff]  ;;  %v121_v44 = vld [vmem:[%s2183_s1 + $0xa0] sm:$0xff] }
   0xe   :  { %975 = vmatprep.subr.mxu1 %v159_v21  ;;  %917 = vmatpush3.msra.mxu0 %v111_v22  ;;  %v155_v37 = vld [vmem:[%s2183_s1 + $0x1b0] sm:$0xff]  ;;  %v154_v41 = vld [vmem:[%s2183_s1 + $0x1a8] sm:$0xff]  ;;  %v153_v45 = vld [vmem:[%s2183_s1 + $0x1a0] sm:$0xff] }
   0xf   :  { %976 = vmatpush3.msra.mxu1 %v143_v23  ;;  %918 = vmatprep.subr.mxu0 %v126_v24  ;;  %v107_v38 = vld [vmem:[%s2183_s1 + $0x30] sm:$0xff]  ;;  %v106_v42 = vld [vmem:[%s2183_s1 + $0x28] sm:$0xff]  ;;  %v105_v46 = vld [vmem:[%s2183_s1 + $0x20] sm:$0xff] }
  0x10   :  { %977 = vmatprep.subr.mxu1 %v158_v25  ;;  %919 = vmatpush3.msra.mxu0 %v110_v26  ;;  %v139_v39 = vld [vmem:[%s2183_s1 + $0x130] sm:$0xff]  ;;  %v138_v43 = vld [vmem:[%s2183_s1 + $0x128] sm:$0xff]  ;;  %v137_v47 = vld [vmem:[%s2183_s1 + $0x120] sm:$0xff] }
  0x11   :  { %978 = vmatpush3.msra.mxu1 %v142_v27  ;;  %920 = vmatprep.subr.mxu0 %v125_v28  ;;  %v120_v48 = vld [vmem:[%s2183_s1 + $0x98] sm:$0xff]  ;;  %v119_v52 = vld [vmem:[%s2183_s1 + $0x90] sm:$0xff]  ;;  %v118_v56 = vld [vmem:[%s2183_s1 + $0x88] sm:$0xff] }
  0x12   :  { %979 = vmatprep.subr.mxu1 %v157_v29  ;;  %921 = vmatpush3.msra.mxu0 %v109_v30  ;;  %v152_v49 = vld [vmem:[%s2183_s1 + $0x198] sm:$0xff]  ;;  %v151_v53 = vld [vmem:[%s2183_s1 + $0x190] sm:$0xff]  ;;  %v150_v57 = vld [vmem:[%s2183_s1 + $0x188] sm:$0xff] }
  0x13   :  { %980 = vmatpush3.msra.mxu1 %v141_v31  ;;  %922 = vmatprep.subr.mxu0 %v124_v32  ;;  %v104_v50 = vld [vmem:[%s2183_s1 + $0x18] sm:$0xff]  ;;  %v103_v54 = vld [vmem:[%s2183_s1 + $0x10] sm:$0xff]  ;;  %v102_v58 = vld [vmem:[%s2183_s1 + $0x8] sm:$0xff] }
  0x14   :  { %981 = vmatprep.subr.mxu1 %v156_v33  ;;  %923 = vmatpush3.msra.mxu0 %v108_v34  ;;  %v136_v51 = vld [vmem:[%s2183_s1 + $0x118] sm:$0xff]  ;;  %v135_v55 = vld [vmem:[%s2183_s1 + $0x110] sm:$0xff]  ;;  %v134_v59 = vld [vmem:[%s2183_s1 + $0x108] sm:$0xff] }
  0x15   :  { %982 = vmatpush3.msra.mxu1 %v140_v35  ;;  %924 = vmatprep.subr.mxu0 %v123_v36  ;;  %v117_v60 = vld [vmem:[%s2183_s1 + $0x80] sm:$0xff]  ;;  %v21_v63 = vld [vmem:[%s2184_s0 + $0x8] sm:$0xff]  ;;  %v23_v1 = vld [vmem:[%s2184_s0 + $0x18] sm:$0xff] }
  0x16   :  { %983 = vmatprep.subr.mxu1 %v155_v37  ;;  %925 = vmatpush3.msra.mxu0 %v107_v38  ;;  %v149_v61 = vld [vmem:[%s2183_s1 + $0x180] sm:$0xff]  ;;  %v22_v3 = vld [vmem:[%s2184_s0 + $0x10] sm:$0xff]  ;;  %v196_v4 = vld [vmem:[%s2183_s1 + $0x2f8] sm:$0xff] }
  0x17   :  { %984 = vmatpush3.msra.mxu1 %v139_v39  ;;  %926 = vmatprep.subr.mxu0 %v122_v40  ;;  %v101_v62 = vld [vmem:[%s2183_s1] sm:$0xff]  ;;  %v30_v5 = vld [vmem:[%s2184_s0 + $0x50] sm:$0xff]  ;;  %v180_v6 = vld [vmem:[%s2183_s1 + $0x278] sm:$0xff] }
  0x18   :  { %985 = vmatprep.subr.mxu1 %v154_v41  ;;  %927 = vmatpush3.msra.mxu0 %v106_v42  ;;  %v133_v0 = vld [vmem:[%s2183_s1 + $0x100] sm:$0xff]  ;;  %v195_v8 = vld [vmem:[%s2183_s1 + $0x2f0] sm:$0xff]  ;;  %v228_v9 = vld [vmem:[%s2183_s1 + $0x3f8] sm:$0xff] }
  0x19   :  { %986 = vmatpush3.msra.mxu1 %v138_v43  ;;  %928 = vmatprep.subr.mxu0 %v121_v44  ;;  %v20_v2 = vld [vmem:[%s2184_s0] sm:$0xff]  ;;  %v29_v10 = vld [vmem:[%s2184_s0 + $0x48] sm:$0xff]  ;;  %v31_v11 = vld [vmem:[%s2184_s0 + $0x58] sm:$0xff] }
  0x1a   :  { %987 = vmatprep.subr.mxu1 %v153_v45  ;;  %929 = vmatpush3.msra.mxu0 %v105_v46  ;;  %v32_v7 = vld [vmem:[%s2184_s0 + $0x60] sm:$0xff]  ;;  %v179_v12 = vld [vmem:[%s2183_s1 + $0x270] sm:$0xff]  ;;  %v212_v13 = vld [vmem:[%s2183_s1 + $0x378] sm:$0xff] }
  0x1b   :  { %988 = vmatpush3.msra.mxu1 %v137_v47  ;;  %930 = vmatprep.subr.mxu0 %v120_v48  ;;  %v194_v14 = vld [vmem:[%s2183_s1 + $0x2e8] sm:$0xff]  ;;  %v227_v15 = vld [vmem:[%s2183_s1 + $0x3f0] sm:$0xff]  ;;  %v39_v17 = vld [vmem:[%s2184_s0 + $0x98] sm:$0xff] }
  0x1c   :  { %989 = vmatprep.subr.mxu1 %v152_v49  ;;  %931 = vmatpush3.msra.mxu0 %v104_v50  ;;  %v178_v16 = vld [vmem:[%s2183_s1 + $0x268] sm:$0xff]  ;;  %v193_v19 = vld [vmem:[%s2183_s1 + $0x2e0] sm:$0xff]  ;;  %v211_v20 = vld [vmem:[%s2183_s1 + $0x370] sm:$0xff] }
  0x1d   :  { %990 = vmatpush3.msra.mxu1 %v136_v51  ;;  %932 = vmatprep.subr.mxu0 %v119_v52  ;;  %v41_v18 = vld [vmem:[%s2184_s0 + $0xa8] sm:$0xff]  ;;  %v38_v21 = vld [vmem:[%s2184_s0 + $0x90] sm:$0xff]  ;;  %v40_v22 = vld [vmem:[%s2184_s0 + $0xa0] sm:$0xff] }
  0x1e   :  { %991 = vmatprep.subr.mxu1 %v151_v53  ;;  %933 = vmatpush3.msra.mxu0 %v103_v54  ;;  %v177_v23 = vld [vmem:[%s2183_s1 + $0x260] sm:$0xff]  ;;  %v226_v24 = vld [vmem:[%s2183_s1 + $0x3e8] sm:$0xff]  ;;  %v192_v25 = vld [vmem:[%s2183_s1 + $0x2d8] sm:$0xff] }
  0x1f   :  { %992 = vmatpush3.msra.mxu1 %v135_v55  ;;  %934 = vmatprep.subr.mxu0 %v118_v56  ;;  %v210_v26 = vld [vmem:[%s2183_s1 + $0x368] sm:$0xff]  ;;  %v176_v27 = vld [vmem:[%s2183_s1 + $0x258] sm:$0xff]  ;;  %v225_v28 = vld [vmem:[%s2183_s1 + $0x3e0] sm:$0xff] }
  0x20   :  { %993 = vmatprep.subr.mxu1 %v150_v57  ;;  %935 = vmatpush3.msra.mxu0 %v102_v58  ;;  %v48_v29 = vld [vmem:[%s2184_s0 + $0xe0] sm:$0xff]  ;;  %v50_v30 = vld [vmem:[%s2184_s0 + $0xf0] sm:$0xff]  ;;  %v47_v32 = vld [vmem:[%s2184_s0 + $0xd8] sm:$0xff] }
  0x21   :  { %994 = vmatpush3.msra.mxu1 %v134_v59  ;;  %936 = vmatprep.subr.mxu0 %v117_v60  ;;  %v209_v31 = vld [vmem:[%s2183_s1 + $0x360] sm:$0xff]  ;;  %v49_v33 = vld [vmem:[%s2184_s0 + $0xe8] sm:$0xff]  ;;  %v191_v34 = vld [vmem:[%s2183_s1 + $0x2d0] sm:$0xff] }
  0x22   :  { %995 = vmatprep.subr.mxu1 %v149_v61  ;;  %937 = vmatpush3.msra.mxu0 %v101_v62  ;;  %v224_v35 = vld [vmem:[%s2183_s1 + $0x3d8] sm:$0xff]  ;;  %v175_v36 = vld [vmem:[%s2183_s1 + $0x250] sm:$0xff]  ;;  %v190_v38 = vld [vmem:[%s2183_s1 + $0x2c8] sm:$0xff] }
  0x23   :  { %316 = vmatprep.mubr.f32.mxu0 %v21_v63  ;;  %996 = vmatpush3.msra.mxu1 %v133_v0  ;;  %v208_v37 = vld [vmem:[%s2183_s1 + $0x358] sm:$0xff]  ;;  %v223_v39 = vld [vmem:[%s2183_s1 + $0x3d0] sm:$0xff]  ;;  %v57_v40 = vld [vmem:[%s2184_s0 + $0x128] sm:$0xff] }
  0x24   :  { %426 = vmatprep.mubr.f32.mxu1 %v23_v1  ;;  %317 = vmatmul.mubr.f32.vlgmr.msra.gmra.mxu0 %v20_v2  ;;  %v59_v41 = vld [vmem:[%s2184_s0 + $0x138] sm:$0xff]  ;;  %v174_v42 = vld [vmem:[%s2183_s1 + $0x248] sm:$0xff]  ;;  %v207_v43 = vld [vmem:[%s2183_s1 + $0x350] sm:$0xff] }
  0x25   :  { %427 = vmatmul.mubr.f32.vlgmr.msra.gmra.mxu1 %v22_v3  ;;  %1024 = vmatprep.subr.mxu0 %v196_v4  ;;  %v56_v44 = vld [vmem:[%s2184_s0 + $0x120] sm:$0xff]  ;;  %v58_v45 = vld [vmem:[%s2184_s0 + $0x130] sm:$0xff]  ;;  %v222_v47 = vld [vmem:[%s2183_s1 + $0x3c8] sm:$0xff] }
  0x26   :  { %321 = vmatprep.mubr.f32.mxu0 %v30_v5  ;;  %1025 = vmatpush3.msra.mxu0 %v180_v6  ;;  %v189_v46 = vld [vmem:[%s2183_s1 + $0x2c0] sm:$0xff]  ;;  %v206_v49 = vld [vmem:[%s2183_s1 + $0x348] sm:$0xff]  ;;  %v188_v50 = vld [vmem:[%s2183_s1 + $0x2b8] sm:$0xff] }
  0x27   :  { %431 = vmatprep.mubr.f32.mxu1 %v32_v7  ;;  %1026 = vmatprep.subr.mxu0 %v195_v8  ;;  %v173_v48 = vld [vmem:[%s2183_s1 + $0x240] sm:$0xff]  ;;  %v66_v52 = vld [vmem:[%s2184_s0 + $0x170] sm:$0xff]  ;;  %v172_v54 = vld [vmem:[%s2183_s1 + $0x238] sm:$0xff] }
  0x28   :  { %1083 = vmatprep.subr.mxu1 %v228_v9  ;;  %322 = vmatmul.mubr.f32.gmra.mxu0 %v29_v10  ;;  %v221_v51 = vld [vmem:[%s2183_s1 + $0x3c0] sm:$0xff]  ;;  %v65_v56 = vld [vmem:[%s2184_s0 + $0x168] sm:$0xff]  ;;  %v67_v57 = vld [vmem:[%s2184_s0 + $0x178] sm:$0xff] }
  0x29   :  { %432 = vmatmul.mubr.f32.gmra.mxu1 %v31_v11  ;;  %1027 = vmatpush3.msra.mxu0 %v179_v12  ;;  %v68_v53 = vld [vmem:[%s2184_s0 + $0x180] sm:$0xff]  ;;  %v220_v58 = vld [vmem:[%s2183_s1 + $0x3b8] sm:$0xff]  ;;  %v187_v59 = vld [vmem:[%s2183_s1 + $0x2b0] sm:$0xff] }
  0x2a   :  { %1084 = vmatpush3.msra.mxu1 %v212_v13  ;;  %1028 = vmatprep.subr.mxu0 %v194_v14  ;;  %v205_v55 = vld [vmem:[%s2183_s1 + $0x340] sm:$0xff]  ;;  %v204_v60 = vld [vmem:[%s2183_s1 + $0x338] sm:$0xff]  ;;  %v171_v61 = vld [vmem:[%s2183_s1 + $0x230] sm:$0xff] }
  0x2b   :  { %1085 = vmatprep.subr.mxu1 %v227_v15  ;;  %1029 = vmatpush3.msra.mxu0 %v178_v16  ;;  %v219_v62 = vld [vmem:[%s2183_s1 + $0x3b0] sm:$0xff]  ;;  %v75_v63 = vld [vmem:[%s2184_s0 + $0x1b8] sm:$0xff]  ;;  %v77_v0 = vld [vmem:[%s2184_s0 + $0x1c8] sm:$0xff] }
  0x2c   :  { %326 = vmatprep.mubr.f32.mxu0 %v39_v17  ;;  %436 = vmatprep.mubr.f32.mxu1 %v41_v18  ;;  %v186_v1 = vld [vmem:[%s2183_s1 + $0x2a8] sm:$0xff]  ;;  %v203_v2 = vld [vmem:[%s2183_s1 + $0x330] sm:$0xff]  ;;  %v76_v4 = vld [vmem:[%s2184_s0 + $0x1c0] sm:$0xff] }
  0x2d   :  { %1030 = vmatprep.subr.mxu0 %v193_v19  ;;  %1086 = vmatpush3.msra.mxu1 %v211_v20  ;;  %v74_v3 = vld [vmem:[%s2184_s0 + $0x1b0] sm:$0xff]  ;;  %v170_v5 = vld [vmem:[%s2183_s1 + $0x228] sm:$0xff]  ;;  %v185_v7 = vld [vmem:[%s2183_s1 + $0x2a0] sm:$0xff] }
  0x2e   :  { %327 = vmatmul.mubr.f32.gmra.mxu0 %v38_v21  ;;  %437 = vmatmul.mubr.f32.gmra.mxu1 %v40_v22  ;;  %v218_v6 = vld [vmem:[%s2183_s1 + $0x3a8] sm:$0xff]  ;;  %v169_v9 = vld [vmem:[%s2183_s1 + $0x220] sm:$0xff]  ;;  %v86_v12 = vld [vmem:[%s2184_s0 + $0x210] sm:$0xff] }
  0x2f   :  { %1031 = vmatpush3.msra.mxu0 %v177_v23  ;;  %1087 = vmatprep.subr.mxu1 %v226_v24  ;;  %v202_v8 = vld [vmem:[%s2183_s1 + $0x328] sm:$0xff]  ;;  %v217_v10 = vld [vmem:[%s2183_s1 + $0x3a0] sm:$0xff]  ;;  %v184_v13 = vld [vmem:[%s2183_s1 + $0x298] sm:$0xff] }
  0x30   :  { %1032 = vmatprep.subr.mxu0 %v192_v25  ;;  %1088 = vmatpush3.msra.mxu1 %v210_v26  ;;  %v84_v11 = vld [vmem:[%s2184_s0 + $0x200] sm:$0xff]  ;;  %v83_v15 = vld [vmem:[%s2184_s0 + $0x1f8] sm:$0xff]  ;;  %v85_v16 = vld [vmem:[%s2184_s0 + $0x208] sm:$0xff] }
  0x31   :  { %1033 = vmatpush3.msra.mxu0 %v176_v27  ;;  %1089 = vmatprep.subr.mxu1 %v225_v28  ;;  %v201_v14 = vld [vmem:[%s2183_s1 + $0x320] sm:$0xff]  ;;  %v168_v17 = vld [vmem:[%s2183_s1 + $0x218] sm:$0xff]  ;;  %v183_v19 = vld [vmem:[%s2183_s1 + $0x290] sm:$0xff] }
  0x32   :  { %331 = vmatprep.mubr.f32.mxu0 %v48_v29  ;;  %441 = vmatprep.mubr.f32.mxu1 %v50_v30  ;;  %v216_v18 = vld [vmem:[%s2183_s1 + $0x398] sm:$0xff]  ;;  %v93_v21 = vld [vmem:[%s2184_s0 + $0x248] sm:$0x3f]  ;;  %v215_v22 = vld [vmem:[%s2183_s1 + $0x390] sm:$0xff] }
  0x33   :  { %1090 = vmatpush3.msra.mxu1 %v209_v31  ;;  %332 = vmatmul.mubr.f32.gmra.mxu0 %v47_v32  ;;  %v200_v20 = vld [vmem:[%s2183_s1 + $0x318] sm:$0xff]  ;;  %v167_v24 = vld [vmem:[%s2183_s1 + $0x210] sm:$0xff]  ;;  %v92_v26 = vld [vmem:[%s2184_s0 + $0x240] sm:$0x3f] }
  0x34   :  { %442 = vmatmul.mubr.f32.gmra.mxu1 %v49_v33  ;;  %1034 = vmatprep.subr.mxu0 %v191_v34  ;;  %v95_v23 = vld [vmem:[%s2184_s0 + $0x258] sm:$0x3f]  ;;  %v199_v25 = vld [vmem:[%s2183_s1 + $0x310] sm:$0xff]  ;;  %v182_v28 = vld [vmem:[%s2183_s1 + $0x288] sm:$0xff] }
  0x35   :  { %1091 = vmatprep.subr.mxu1 %v224_v35  ;;  %1035 = vmatpush3.msra.mxu0 %v175_v36  ;;  %v94_v27 = vld [vmem:[%s2184_s0 + $0x250] sm:$0x3f]  ;;  %v214_v29 = vld [vmem:[%s2183_s1 + $0x388] sm:$0xff]  ;;  %v181_v32 = vld [vmem:[%s2183_s1 + $0x280] sm:$0xff] }
  0x36   :  { %1092 = vmatpush3.msra.mxu1 %v208_v37  ;;  %1036 = vmatprep.subr.mxu0 %v190_v38  ;;  %v166_v30 = vld [vmem:[%s2183_s1 + $0x208] sm:$0xff]  ;;  %v213_v33 = vld [vmem:[%s2183_s1 + $0x380] sm:$0xff]  ;;  %v27_v37 = vld [vmem:[%s2184_s0 + $0x38] sm:$0xff] }
  0x37   :  { %1093 = vmatprep.subr.mxu1 %v223_v39  ;;  %336 = vmatprep.mubr.f32.mxu0 %v57_v40  ;;  %v198_v31 = vld [vmem:[%s2183_s1 + $0x308] sm:$0xff]  ;;  %v165_v34 = vld [vmem:[%s2183_s1 + $0x200] sm:$0xff]  ;;  %v26_v39 = vld [vmem:[%s2184_s0 + $0x30] sm:$0xff] }
  0x38   :  { %446 = vmatprep.mubr.f32.mxu1 %v59_v41  ;;  %1037 = vmatpush3.msra.mxu0 %v174_v42  ;;  %v25_v35 = vld [vmem:[%s2184_s0 + $0x28] sm:$0xff]  ;;  %v197_v36 = vld [vmem:[%s2183_s1 + $0x300] sm:$0xff]  ;;  %v34_v40 = vld [vmem:[%s2184_s0 + $0x70] sm:$0xff] }
  0x39   :  { %1094 = vmatpush3.msra.mxu1 %v207_v43  ;;  %337 = vmatmul.mubr.f32.gmra.mxu0 %v56_v44  ;;  %v24_v38 = vld [vmem:[%s2184_s0 + $0x20] sm:$0xff]  ;;  %v244_v41 = vld [vmem:[%s2183_s1 + $0x478] sm:$0xff]  ;;  %v1262_v43 = vmov 0.0   ;;  %v33_v44 = vld [vmem:[%s2184_s0 + $0x68] sm:$0xff] }
  0x3a   :  { %447 = vmatmul.mubr.f32.gmra.mxu1 %v58_v45  ;;  %1038 = vmatprep.subr.mxu0 %v189_v46  ;;  %v36_v42 = vld [vmem:[%s2184_s0 + $0x80] sm:$0xff]  ;;  %v35_v45 = vld [vmem:[%s2184_s0 + $0x78] sm:$0xff]  ;;  %v243_v46 = vld [vmem:[%s2183_s1 + $0x470] sm:$0xff] }
  0x3b   :  { %1095 = vmatprep.subr.mxu1 %v222_v47  ;;  %1039 = vmatpush3.msra.mxu0 %v173_v48  ;;  %v242_v47 = vld [vmem:[%s2183_s1 + $0x468] sm:$0xff]  ;;  %v43_v48 = vld [vmem:[%s2184_s0 + $0xb8] sm:$0xff] }
  0x3c   :  { %1096 = vmatpush3.msra.mxu1 %v206_v49  ;;  %1040 = vmatprep.subr.mxu0 %v188_v50  ;;  %v45_v49 = vld [vmem:[%s2184_s0 + $0xc8] sm:$0xff]  ;;  %v42_v50 = vld [vmem:[%s2184_s0 + $0xb0] sm:$0xff] }
  0x3d   :  { %1097 = vmatprep.subr.mxu1 %v221_v51  ;;  %341 = vmatprep.mubr.f32.mxu0 %v66_v52  ;;  %v44_v51 = vld [vmem:[%s2184_s0 + $0xc0] sm:$0xff] }
  0x3e   :  { %451 = vmatprep.mubr.f32.mxu1 %v68_v53  ;;  %1041 = vmatpush3.msra.mxu0 %v172_v54  ;;  %v241_v52 = vld [vmem:[%s2183_s1 + $0x460] sm:$0xff]  ;;  %v240_v53 = vld [vmem:[%s2183_s1 + $0x458] sm:$0xff] }
  0x3f   :  { %1098 = vmatpush3.msra.mxu1 %v205_v55  ;;  %342 = vmatmul.mubr.f32.gmra.mxu0 %v65_v56  ;;  %v52_v54 = vld [vmem:[%s2184_s0 + $0x100] sm:$0xff]  ;;  %v54_v55 = vld [vmem:[%s2184_s0 + $0x110] sm:$0xff]  ;;  %v51_v56 = vld [vmem:[%s2184_s0 + $0xf8] sm:$0xff] }
  0x40   :  { %452 = vmatmul.mubr.f32.gmra.mxu1 %v67_v57  ;;  %1099 = vmatprep.subr.mxu1 %v220_v58  ;;  %v53_v57 = vld [vmem:[%s2184_s0 + $0x108] sm:$0xff]  ;;  %v239_v58 = vld [vmem:[%s2183_s1 + $0x450] sm:$0xff] }
  0x41   :  { %1042 = vmatprep.subr.mxu0 %v187_v59  ;;  %1100 = vmatpush3.msra.mxu1 %v204_v60  ;;  %v61_v59 = vld [vmem:[%s2184_s0 + $0x148] sm:$0xff]  ;;  %v63_v60 = vld [vmem:[%s2184_s0 + $0x158] sm:$0xff] }
  0x42   :  { %1043 = vmatpush3.msra.mxu0 %v171_v61  ;;  %1101 = vmatprep.subr.mxu1 %v219_v62  ;;  %v238_v61 = vld [vmem:[%s2183_s1 + $0x448] sm:$0xff]  ;;  %v60_v62 = vld [vmem:[%s2184_s0 + $0x140] sm:$0xff] }
  0x43   :  { %346 = vmatprep.mubr.f32.mxu0 %v75_v63  ;;  %456 = vmatprep.mubr.f32.mxu1 %v77_v0  ;;  %v62_v63 = vld [vmem:[%s2184_s0 + $0x150] sm:$0xff]  ;;  %v237_v0 = vld [vmem:[%s2183_s1 + $0x440] sm:$0xff] }
  0x44   :  { %1044 = vmatprep.subr.mxu0 %v186_v1  ;;  %1102 = vmatpush3.msra.mxu1 %v203_v2  ;;  %v70_v1 = vld [vmem:[%s2184_s0 + $0x190] sm:$0xff]  ;;  %v72_v2 = vld [vmem:[%s2184_s0 + $0x1a0] sm:$0xff] }
  0x45   :  { %347 = vmatmul.mubr.f32.gmra.mxu0 %v74_v3  ;;  %457 = vmatmul.mubr.f32.gmra.mxu1 %v76_v4  ;;  %v236_v3 = vld [vmem:[%s2183_s1 + $0x438] sm:$0xff]  ;;  %v69_v4 = vld [vmem:[%s2184_s0 + $0x188] sm:$0xff] }
  0x46   :  { %1045 = vmatpush3.msra.mxu0 %v170_v5  ;;  %1103 = vmatprep.subr.mxu1 %v218_v6  ;;  %v71_v5 = vld [vmem:[%s2184_s0 + $0x198] sm:$0xff]  ;;  %v235_v6 = vld [vmem:[%s2183_s1 + $0x430] sm:$0xff] }
  0x47   :  { %1046 = vmatprep.subr.mxu0 %v185_v7  ;;  %1104 = vmatpush3.msra.mxu1 %v202_v8  ;;  %v79_v7 = vld [vmem:[%s2184_s0 + $0x1d8] sm:$0xff]  ;;  %v81_v8 = vld [vmem:[%s2184_s0 + $0x1e8] sm:$0xff] }
  0x48   :  { %1047 = vmatpush3.msra.mxu0 %v169_v9  ;;  %1105 = vmatprep.subr.mxu1 %v217_v10  ;;  %v78_v9 = vld [vmem:[%s2184_s0 + $0x1d0] sm:$0xff]  ;;  %v80_v10 = vld [vmem:[%s2184_s0 + $0x1e0] sm:$0xff] }
  0x49   :  { %351 = vmatprep.mubr.f32.mxu0 %v84_v11  ;;  %461 = vmatprep.mubr.f32.mxu1 %v86_v12  ;;  %v234_v11 = vld [vmem:[%s2183_s1 + $0x428] sm:$0xff]  ;;  %v233_v12 = vld [vmem:[%s2183_s1 + $0x420] sm:$0xff] }
  0x4a   :  { %1048 = vmatprep.subr.mxu0 %v184_v13  ;;  %1106 = vmatpush3.msra.mxu1 %v201_v14  ;;  %v88_v13 = vld [vmem:[%s2184_s0 + $0x220] sm:$0xff]  ;;  %v90_v14 = vld [vmem:[%s2184_s0 + $0x230] sm:$0xff] }
  0x4b   :  { %352 = vmatmul.mubr.f32.gmra.mxu0 %v83_v15  ;;  %462 = vmatmul.mubr.f32.gmra.mxu1 %v85_v16  ;;  %v87_v15 = vld [vmem:[%s2184_s0 + $0x218] sm:$0xff]  ;;  %v89_v16 = vld [vmem:[%s2184_s0 + $0x228] sm:$0xff] }
  0x4c   :  { %1049 = vmatpush3.msra.mxu0 %v168_v17  ;;  %1107 = vmatprep.subr.mxu1 %v216_v18  ;;  %v232_v17 = vld [vmem:[%s2183_s1 + $0x418] sm:$0xff]  ;;  %v97_v18 = vld [vmem:[%s2184_s0 + $0x268] sm:$0x3f] }
  0x4d   :  { %1050 = vmatprep.subr.mxu0 %v183_v19  ;;  %1108 = vmatpush3.msra.mxu1 %v200_v20  ;;  %v99_v19 = vld [vmem:[%s2184_s0 + $0x278] sm:$0x3f]  ;;  %v231_v20 = vld [vmem:[%s2183_s1 + $0x410] sm:$0xff] }
  0x4e   :  { %356 = vmatprep.mubr.f32.mxu0 %v93_v21  ;;  %1109 = vmatprep.subr.mxu1 %v215_v22  ;;  %v96_v21 = vld [vmem:[%s2184_s0 + $0x260] sm:$0x3f]  ;;  %v98_v22 = vld [vmem:[%s2184_s0 + $0x270] sm:$0x3f] }
  0x4f   :  { %466 = vmatprep.mubr.f32.mxu1 %v95_v23  ;;  %1051 = vmatpush3.msra.mxu0 %v167_v24  ;;  %v230_v23 = vld [vmem:[%s2183_s1 + $0x408] sm:$0xff]  ;;  %v229_v24 = vld [vmem:[%s2183_s1 + $0x400] sm:$0xff] }
  0x50   :  { %1110 = vmatpush3.msra.mxu1 %v199_v25  ;;  %357 = vmatmul.mubr.f32.gmra.mxu0 %v92_v26  ;;  %v28_v25 = vld [vmem:[%s2184_s0 + $0x40] sm:$0xff]  ;;  %v73_v26 = vld [vmem:[%s2184_s0 + $0x1a8] sm:$0xff] }
  0x51   :  { %467 = vmatmul.mubr.f32.gmra.mxu1 %v94_v27  ;;  %1052 = vmatprep.subr.mxu0 %v182_v28  ;;  %v37_v27 = vld [vmem:[%s2184_s0 + $0x88] sm:$0xff]  ;;  %v82_v28 = vld [vmem:[%s2184_s0 + $0x1f0] sm:$0xff] }
  0x52   :  { %1111 = vmatprep.subr.mxu1 %v214_v29  ;;  %1053 = vmatpush3.msra.mxu0 %v166_v30  ;;  %v46_v29 = vld [vmem:[%s2184_s0 + $0xd0] sm:$0xff]  ;;  %v91_v30 = vld [vmem:[%s2184_s0 + $0x238] sm:$0xff] }
  0x53   :  { %1112 = vmatpush3.msra.mxu1 %v198_v31  ;;  %1054 = vmatprep.subr.mxu0 %v181_v32  ;;  %v55_v31 = vld [vmem:[%s2184_s0 + $0x118] sm:$0xff]  ;;  %v100_v32 = vld [vmem:[%s2184_s0 + $0x280] sm:$0x3f] }
  0x54   :  { %1113 = vmatprep.subr.mxu1 %v213_v33  ;;  %1055 = vmatpush3.msra.mxu0 %v165_v34  ;;  %v64_v33 = vld [vmem:[%s2184_s0 + $0x160] sm:$0xff] }
  0x55   :  { %536 = vmatprep.mubr.f32.mxu0 %v25_v35  ;;  %1114 = vmatpush3.msra.mxu1 %v197_v36  ;;  %v2022_v36 = vld [vmem:[%s2185_s2] ss:$0 sm:$0xff] }
  0x56   :  { %646 = vmatprep.mubr.f32.mxu1 %v27_v37  ;;  %537 = vmatmul.mubr.f32.vlgmr.msra.gmra.mxu0 %v24_v38 }
  0x57   :  { %647 = vmatmul.mubr.f32.vlgmr.msra.gmra.mxu1 %v26_v39  ;;  %1167 = vmatprep.subr.mxu0 %v1262_v43 }
  0x58   :  { %541 = vmatprep.mubr.f32.mxu0 %v34_v40  ;;  %1168 = vmatpush3.msra.mxu0 %v244_v41 }
  0x59   :  { %651 = vmatprep.mubr.f32.mxu1 %v36_v42  ;;  %1169 = vmatprep.subr.mxu0 %v1262_v43 }
  0x5a   :  { %1226 = vmatprep.subr.mxu1 %v1262_v43  ;;  %542 = vmatmul.mubr.f32.gmra.mxu0 %v33_v44 }
  0x5b   :  { %652 = vmatmul.mubr.f32.gmra.mxu1 %v35_v45  ;;  %1170 = vmatpush3.msra.mxu0 %v243_v46 }
  0x5c   :  { %1242 = vmatpush3.msra.mxu1 %v244_v41  ;;  %1171 = vmatprep.subr.mxu0 %v1262_v43 }
  0x5d   :  { %1227 = vmatprep.subr.mxu1 %v1262_v43  ;;  %1172 = vmatpush3.msra.mxu0 %v242_v47 }
  0x5e   :  { %546 = vmatprep.mubr.f32.mxu0 %v43_v48  ;;  %656 = vmatprep.mubr.f32.mxu1 %v45_v49 }
  0x5f   :  { %1243 = vmatpush3.msra.mxu1 %v243_v46  ;;  %1173 = vmatprep.subr.mxu0 %v1262_v43 }
  0x60   :  { %547 = vmatmul.mubr.f32.gmra.mxu0 %v42_v50  ;;  %657 = vmatmul.mubr.f32.gmra.mxu1 %v44_v51 }
  0x61   :  { %1228 = vmatprep.subr.mxu1 %v1262_v43  ;;  %1174 = vmatpush3.msra.mxu0 %v241_v52 }
  0x62   :  { %1244 = vmatpush3.msra.mxu1 %v242_v47  ;;  %1175 = vmatprep.subr.mxu0 %v1262_v43 }
  0x63   :  { %1229 = vmatprep.subr.mxu1 %v1262_v43  ;;  %1176 = vmatpush3.msra.mxu0 %v240_v53 }
  0x64   :  { %551 = vmatprep.mubr.f32.mxu0 %v52_v54  ;;  %661 = vmatprep.mubr.f32.mxu1 %v54_v55 }
  0x65   :  { %1245 = vmatpush3.msra.mxu1 %v241_v52  ;;  %552 = vmatmul.mubr.f32.gmra.mxu0 %v51_v56 }
  0x66   :  { %662 = vmatmul.mubr.f32.gmra.mxu1 %v53_v57  ;;  %1230 = vmatprep.subr.mxu1 %v1262_v43 }
  0x67   :  { %1177 = vmatprep.subr.mxu0 %v1262_v43  ;;  %1246 = vmatpush3.msra.mxu1 %v240_v53 }
  0x68   :  { %1178 = vmatpush3.msra.mxu0 %v239_v58  ;;  %1231 = vmatprep.subr.mxu1 %v1262_v43 }
  0x69   :  { %1179 = vmatprep.subr.mxu0 %v1262_v43  ;;  %556 = vmatprep.mubr.f32.mxu0 %v61_v59 }
  0x6a   :  { %666 = vmatprep.mubr.f32.mxu1 %v63_v60  ;;  %1247 = vmatpush3.msra.mxu1 %v239_v58 }
  0x6b   :  { %1180 = vmatpush3.msra.mxu0 %v238_v61  ;;  %667 = vmatmul.mubr.f32.gmra.mxu1 %v62_v63 }
  0x6c   :  { %557 = vmatmul.mubr.f32.gmra.mxu0 %v60_v62  ;;  %1232 = vmatprep.subr.mxu1 %v1262_v43 }
  0x6d   :  { %1181 = vmatprep.subr.mxu0 %v1262_v43  ;;  %1248 = vmatpush3.msra.mxu1 %v238_v61 }
  0x6e   :  { %1182 = vmatpush3.msra.mxu0 %v237_v0  ;;  %1233 = vmatprep.subr.mxu1 %v1262_v43 }
  0x6f   :  { %1183 = vmatprep.subr.mxu0 %v1262_v43  ;;  %561 = vmatprep.mubr.f32.mxu0 %v70_v1 }
  0x70   :  { %671 = vmatprep.mubr.f32.mxu1 %v72_v2  ;;  %1249 = vmatpush3.msra.mxu1 %v237_v0 }
  0x71   :  { %1184 = vmatpush3.msra.mxu0 %v236_v3  ;;  %672 = vmatmul.mubr.f32.gmra.mxu1 %v71_v5 }
  0x72   :  { %562 = vmatmul.mubr.f32.gmra.mxu0 %v69_v4  ;;  %1234 = vmatprep.subr.mxu1 %v1262_v43 }
  0x73   :  { %1185 = vmatprep.subr.mxu0 %v1262_v43  ;;  %1250 = vmatpush3.msra.mxu1 %v236_v3 }
  0x74   :  { %1186 = vmatpush3.msra.mxu0 %v235_v6  ;;  %1235 = vmatprep.subr.mxu1 %v1262_v43 }
  0x75   :  { %566 = vmatprep.mubr.f32.mxu0 %v79_v7  ;;  %676 = vmatprep.mubr.f32.mxu1 %v81_v8 }
  0x76   :  { %1251 = vmatpush3.msra.mxu1 %v235_v6  ;;  %1187 = vmatprep.subr.mxu0 %v1262_v43 }
  0x77   :  { %567 = vmatmul.mubr.f32.gmra.mxu0 %v78_v9  ;;  %677 = vmatmul.mubr.f32.gmra.mxu1 %v80_v10 }
  0x78   :  { %1236 = vmatprep.subr.mxu1 %v1262_v43  ;;  %1188 = vmatpush3.msra.mxu0 %v234_v11 }
  0x79   :  { %1252 = vmatpush3.msra.mxu1 %v234_v11  ;;  %1189 = vmatprep.subr.mxu0 %v1262_v43 }
  0x7a   :  { %1237 = vmatprep.subr.mxu1 %v1262_v43  ;;  %1190 = vmatpush3.msra.mxu0 %v233_v12 }
  0x7b   :  { %571 = vmatprep.mubr.f32.mxu0 %v88_v13  ;;  %681 = vmatprep.mubr.f32.mxu1 %v90_v14 }
  0x7c   :  { %1253 = vmatpush3.msra.mxu1 %v233_v12  ;;  %1191 = vmatprep.subr.mxu0 %v1262_v43 }
  0x7d   :  { %572 = vmatmul.mubr.f32.gmra.mxu0 %v87_v15  ;;  %682 = vmatmul.mubr.f32.gmra.mxu1 %v89_v16 }
  0x7e   :  { %1238 = vmatprep.subr.mxu1 %v1262_v43  ;;  %1192 = vmatpush3.msra.mxu0 %v232_v17 }
  0x7f   :  { %1254 = vmatpush3.msra.mxu1 %v232_v17  ;;  %1193 = vmatprep.subr.mxu0 %v1262_v43 }
  0x80   :  { %1239 = vmatprep.subr.mxu1 %v1262_v43  ;;  %576 = vmatprep.mubr.f32.mxu0 %v97_v18 }
  0x81   :  { %686 = vmatprep.mubr.f32.mxu1 %v99_v19  ;;  %1194 = vmatpush3.msra.mxu0 %v231_v20 }
  0x82   :  { %1255 = vmatpush3.msra.mxu1 %v231_v20  ;;  %577 = vmatmul.mubr.f32.gmra.mxu0 %v96_v21 }
  0x83   :  { %687 = vmatmul.mubr.f32.gmra.mxu1 %v98_v22  ;;  %1195 = vmatprep.subr.mxu0 %v1262_v43 }
  0x84   :  { %1240 = vmatprep.subr.mxu1 %v1262_v43  ;;  %1196 = vmatpush3.msra.mxu0 %v230_v23 }
  0x85   :  { %1256 = vmatpush3.msra.mxu1 %v230_v23  ;;  %1197 = vmatprep.subr.mxu0 %v1262_v43 }
  0x86   :  { %1241 = vmatprep.subr.mxu1 %v1262_v43  ;;  %1198 = vmatpush3.msra.mxu0 %v229_v24 }
  0x87   :  { %1257 = vmatpush3.msra.mxu1 %v229_v24  ;;  %1199 = vmatprep.mubr.msk.f32.mxu0 %vm1263_vm0, %v1262_v43 }
  0x88   :  { %1214 = vmatprep.mubr.msk.f32.mxu1 %vm1263_vm0, %v1262_v43  ;;  %1200 = vmatmul.mubr.f32.vlgmr.msra.gmra.mxu0 %v28_v25 }
  0x89   :  { %1215 = vmatmul.mubr.f32.vlgmr.msra.gmra.mxu1 %v73_v26  ;;  %1202 = vmatprep.mubr.msk.f32.mxu0 %vm1263_vm0, %v1262_v43 }
  0x8a   :  { %1217 = vmatprep.mubr.msk.f32.mxu1 %vm1263_vm0, %v1262_v43 }
  0x8c   :  { %1203 = vmatmul.mubr.f32.gmra.mxu0 %v37_v27 }
  0x8d   :  { %1218 = vmatmul.mubr.f32.gmra.mxu1 %v82_v28  ;;  %1205 = vmatprep.mubr.msk.f32.mxu0 %vm1263_vm0, %v1262_v43 }
  0x8e   :  { %1220 = vmatprep.mubr.msk.f32.mxu1 %vm1263_vm0, %v1262_v43 }
  0x90   :  { %1206 = vmatmul.mubr.f32.gmra.mxu0 %v46_v29 }
  0x91   :  { %1221 = vmatmul.mubr.f32.gmra.mxu1 %v91_v30  ;;  %1208 = vmatprep.mubr.msk.f32.mxu0 %vm1263_vm0, %v1262_v43 }
  0x92   :  { %1223 = vmatprep.mubr.msk.f32.mxu1 %vm1263_vm0, %v1262_v43 }
  0x94   :  { %1209 = vmatmul.mubr.f32.gmra.mxu0 %v55_v31 }
  0x95   :  { %1224 = vmatmul.mubr.f32.gmra.mxu1 %v100_v32  ;;  %1211 = vmatprep.mubr.msk.f32.mxu0 %vm1263_vm0, %v1262_v43 }
  0x98   :  { %1212 = vmatmul.mubr.f32.gmra.mxu0 %v64_v33 }
  0xe4   :  { %v938_v34 = vpop.f32.mrf.mxu0 }
  0xe5   :  { %v997_v35 = vpop.f32.mrf.mxu1 }
  0xe6   :  { %v939_v37 = vpop.f32.mrf.mxu0 }
  0xe7   :  { %v998_v38 = vpop.f32.mrf.mxu1  ;;  %v940_v39 = vadd.f32 %v939_v37, %v938_v34 }
  0xe8   :  { %v999_v40 = vadd.f32 %v998_v38, %v997_v35  ;;  %v941_v41 = vpop.f32.mrf.mxu0 }
  0xe9   :  { %v1000_v42 = vpop.f32.mrf.mxu1  ;;  %v319_v43 = vadd.f32 %v940_v39, %v2022_v36 }
  0xea   :  { %v942_v44 = vpop.f32.mrf.mxu0 }
  0xeb   :  { %v1001_v45 = vpop.f32.mrf.mxu1  ;;  %v2025_v46 = vadd.f32 %v999_v40, %v319_v43  ;;  %v943_v47 = vadd.f32 %v942_v44, %v941_v41 }
  0xec   :  { %v1002_v48 = vadd.f32 %v1001_v45, %v1000_v42 }
  0xed   :  { %v324_v49 = vadd.f32 %v943_v47, %v2022_v36 }
  0xee   :  { %v944_v50 = vpop.f32.mrf.mxu0  ;;  %v1003_v51 = vpop.f32.mrf.mxu1 }
  0xef   :  { %v2028_v52 = vadd.f32 %v1002_v48, %v324_v49 }
  0xf0   :  { %v945_v53 = vpop.f32.mrf.mxu0  ;;  %v1004_v55 = vpop.f32.mrf.mxu1 }
  0xf1   :  { %v946_v54 = vadd.f32 %v945_v53, %v944_v50  ;;  %v1005_v56 = vadd.f32 %v1004_v55, %v1003_v51 }
  0xf3   :  { %v329_v57 = vadd.f32 %v946_v54, %v2022_v36  ;;  %v947_v58 = vpop.f32.mrf.mxu0 }
  0xf4   :  { %v1006_v59 = vpop.f32.mrf.mxu1 }
  0xf5   :  { %v2031_v60 = vadd.f32 %v1005_v56, %v329_v57  ;;  %v948_v61 = vpop.f32.mrf.mxu0 }
  0xf6   :  { %v1007_v62 = vpop.f32.mrf.mxu1  ;;  %v949_v63 = vadd.f32 %v948_v61, %v947_v58 }
  0xf7   :  { %v1008_v0 = vadd.f32 %v1007_v62, %v1006_v59 }
  0xf8   :  { %v334_v1 = vadd.f32 %v949_v63, %v2022_v36 }
  0xf9   :  { %v950_v2 = vpop.f32.mrf.mxu0 }
  0xfa   :  { %v2034_v3 = vpop.f32.mrf.mxu1  ;;  %v2036_v4 = vadd.f32 %v1008_v0, %v334_v1 }
  0xfb   :  { %v951_v5 = vpop.f32.mrf.mxu0 }
  0xfc   :  { %v2038_v6 = vpop.f32.mrf.mxu1 }
  0xff   :  { %v953_v7 = vpop.f32.mrf.mxu0 }
 0x100   :  { %v2040_v8 = vpop.f32.mrf.mxu1 }
 0x101   :  { %v954_v9 = vpop.f32.mrf.mxu0 }
 0x102   :  { %v2042_v10 = vpop.f32.mrf.mxu1 }
 0x105   :  { %v956_v11 = vpop.f32.mrf.mxu0  ;;  %v2044_v12 = vpop.f32.mrf.mxu1 }
 0x107   :  { %v957_v13 = vpop.f32.mrf.mxu0  ;;  %v2046_v14 = vpop.f32.mrf.mxu1 }
 0x10b   :  { %v959_v15 = vpop.f32.mrf.mxu0  ;;  %v2048_v16 = vpop.f32.mrf.mxu1 }
 0x10d   :  { %v960_v17 = vpop.f32.mrf.mxu0  ;;  %v2050_v18 = vpop.f32.mrf.mxu1 }
 0x110   :  { %v962_v19 = vpop.f32.mrf.mxu0 }
 0x111   :  { %v2052_v20 = vpop.f32.mrf.mxu1 }
 0x112   :  { %v963_v21 = vpop.f32.mrf.mxu0 }
 0x113   :  { %v2054_v22 = vpop.f32.mrf.mxu1 }
 0x116   :  { %v1056_v23 = vpop.f32.mrf.mxu0 }
 0x117   :  { %v1115_v24 = vpop.f32.mrf.mxu1 }
 0x118   :  { %v1057_v25 = vpop.f32.mrf.mxu0 }
 0x119   :  { %v1116_v26 = vpop.f32.mrf.mxu1  ;;  %v1058_v57 = vadd.f32 %v1057_v25, %v1056_v23  ;;  %v1011_v25 = vadd.f32 %v2038_v6, %v2034_v3 }
 0x11a   :  { %v1059_v27 = vpop.f32.mrf.mxu0  ;;  %v1117_v63 = vadd.f32 %v1116_v26, %v1115_v24 }
 0x11b   :  { %v1118_v28 = vpop.f32.mrf.mxu1  ;;  %v539_v62 = vadd.f32 %v1058_v57, %v2025_v46 }
 0x11c   :  { %v1060_v29 = vpop.f32.mrf.mxu0 }
 0x11d   :  { %v1119_v30 = vpop.f32.mrf.mxu1  ;;  %v1061_v0 = vadd.f32 %v1060_v29, %v1059_v27  ;;  %v649_v23 = vadd.f32 %v1117_v63, %v539_v62  ;;  %v1020_v27 = vadd.f32 %v2050_v18, %v2048_v16 }
 0x120   :  { %v1062_v31 = vpop.f32.mrf.mxu0  ;;  %v1121_v32 = vpop.f32.mrf.mxu1 }
 0x122   :  { %v1063_v33 = vpop.f32.mrf.mxu0  ;;  %v1122_v34 = vpop.f32.mrf.mxu1 }
 0x125   :  { %v1065_v35 = vpop.f32.mrf.mxu0 }
 0x126   :  { %v2056_v37 = vpop.f32.mrf.mxu1 }
 0x127   :  { %v1066_v38 = vpop.f32.mrf.mxu0 }
 0x128   :  { %v2058_v39 = vpop.f32.mrf.mxu1 }
 0x129   :  { %v1126_v16 = vadd.f32 %v2058_v39, %v2056_v37 }
 0x12b   :  { %v2062_v41 = vpop.f32.mrf.mxu1 }
 0x12c   :  { %v2060_v40 = vpop.f32.mrf.mxu0  ;;  %2189 = vst [vmem:[#allocation2_spill] sm:$0xff] %v2062_v41  ;;  %v958_v41 = vadd.f32 %v957_v13, %v956_v11  ;;  %v1123_v13 = vadd.f32 %v1122_v34, %v1121_v32 }
 0x12d   :  { %v2066_v43 = vpop.f32.mrf.mxu1 }
 0x12e   :  { %v2064_v42 = vpop.f32.mrf.mxu0  ;;  %2190 = vst [vmem:[#allocation3_spill] sm:$0xff] %v2066_v43  ;;  %v955_v43 = vadd.f32 %v954_v9, %v953_v7  ;;  %v1017_v7 = vadd.f32 %v2046_v14, %v2044_v12  ;;  %v964_v9 = vadd.f32 %v963_v21, %v962_v19 }
 0x130   :  { %v344_v24 = vadd.f32 %v955_v43, %v2022_v36  ;;  %v359_v19 = vadd.f32 %v964_v9, %v2022_v36 }
 0x131   :  { %v2068_v45 = vpop.f32.mrf.mxu1 }
 0x132   :  { %v1071_v44 = vpop.f32.mrf.mxu0 }
 0x133   :  { %v2070_v48 = vpop.f32.mrf.mxu1 }
 0x134   :  { %v1072_v47 = vpop.f32.mrf.mxu0  ;;  %2191 = vst [vmem:[#allocation4_spill] sm:$0xff] %v2070_v48 }
 0x135   :  { %v1073_v21 = vadd.f32 %v1072_v47, %v1071_v44  ;;  %v2203_v57 = vld [vmem:[#allocation3_spill] sm:$0xff] }
 0x137   :  { %v1074_v49 = vpop.f32.mrf.mxu0  ;;  %v2072_v50 = vpop.f32.mrf.mxu1 }
 0x138   :  { %2192 = vst [vmem:[#allocation5_spill] sm:$0xff] %v2072_v50 }
 0x139   :  { %v1075_v51 = vpop.f32.mrf.mxu0  ;;  %v2074_v53 = vpop.f32.mrf.mxu1 }
 0x13a   :  { %2193 = vst [vmem:[#allocation6_spill] sm:$0xff] %v2074_v53  ;;  %v952_v53 = vadd.f32 %v951_v5, %v950_v2  ;;  %v1014_v2 = vadd.f32 %v2042_v10, %v2040_v8 }
 0x13b   :  { %v2199_v47 = vld [vmem:[#allocation4_spill] sm:$0xff] }
 0x13c   :  { %v339_v46 = vadd.f32 %v952_v53, %v2022_v36  ;;  %v454_v29 = vadd.f32 %v1014_v2, %v344_v24 }
 0x13d   :  { %v2076_v54 = vpop.f32.mrf.mxu0  ;;  %v2078_v55 = vpop.f32.mrf.mxu1 }
 0x13e   :  { %2194 = vst [vmem:[#allocation7_spill] sm:$0xff] %v2076_v54  ;;  %2195 = vst [vmem:[#allocation8_spill] sm:$0xff] %v2078_v55  ;;  %v544_v55 = vadd.f32 %v1061_v0, %v2028_v52  ;;  %v1120_v54 = vadd.f32 %v1119_v30, %v1118_v28  ;;  %v349_v52 = vadd.f32 %v958_v41, %v2022_v36 }
 0x13f   :  { %v2080_v56 = vpop.f32.mrf.mxu0  ;;  %v2082_v58 = vpop.f32.mrf.mxu1  ;;  %v449_v28 = vadd.f32 %v1011_v25, %v339_v46  ;;  %v1076_v41 = vadd.f32 %v1075_v51, %v1074_v49  ;;  %v564_v44 = vadd.f32 %v1073_v21, %v454_v29 }
 0x140   :  { %2196 = vst [vmem:[#allocation9_spill] sm:$0xff] %v2080_v56  ;;  %2197 = vst [vmem:[#allocation10_spill] sm:$0xff] %v2082_v58  ;;  %v1064_v56 = vadd.f32 %v1063_v33, %v1062_v31  ;;  %v961_v58 = vadd.f32 %v960_v17, %v959_v15  ;;  %v1067_v15 = vadd.f32 %v1066_v38, %v1065_v35 }
 0x141   :  { %v654_v17 = vadd.f32 %v1120_v54, %v544_v55  ;;  %v459_v14 = vadd.f32 %v1017_v7, %v349_v52  ;;  %v1070_v38 = vadd.f32 %v2064_v42, %v2060_v40  ;;  %v1132_v54 = vadd.f32 %v2199_v47, %v2068_v45 }
 0x142   :  { %v1080_v59 = vpop.f32.mrf.mxu0  ;;  %v549_v6 = vadd.f32 %v1064_v56, %v2031_v60  ;;  %v354_v26 = vadd.f32 %v961_v58, %v2022_v36  ;;  %v1023_v60 = vadd.f32 %v2054_v22, %v2052_v20  ;;  %v554_v33 = vadd.f32 %v1067_v15, %v2036_v4  ;;  %v2202_v56 = vld [vmem:[#allocation2_spill] sm:$0xff] }
 0x143   :  { %v2084_v61 = vpop.f32.mrf.mxu1  ;;  %v1129_v58 = vadd.f32 %v2203_v57, %v2202_v56  ;;  %v559_v63 = vadd.f32 %v1070_v38, %v449_v28  ;;  %v569_v0 = vadd.f32 %v1076_v41, %v459_v14  ;;  %v674_v15 = vadd.f32 %v1132_v54, %v564_v44 }
 0x144   :  { %2198 = vst [vmem:[#allocation11_spill] sm:$0xff] %v2084_v61  ;;  %v1081_v1 = vpop.f32.mrf.mxu0  ;;  %v659_v34 = vadd.f32 %v1123_v13, %v549_v6  ;;  %v464_v35 = vadd.f32 %v1020_v27, %v354_v26  ;;  %v469_v39 = vadd.f32 %v1023_v60, %v359_v19  ;;  %v664_v62 = vadd.f32 %v1126_v16, %v554_v33 }
 0x145   :  { %v2087_v50 = vpop.f32.mrf.mxu1  ;;  %v1082_v36 = vadd.f32 %v1081_v1, %v1080_v59  ;;  %v2200_v40 = vld [vmem:[#allocation7_spill] sm:$0xff]  ;;  %v2204_v1 = vld [vmem:[#allocation5_spill] sm:$0xff]  ;;  %v669_v29 = vadd.f32 %v1129_v58, %v559_v63 }
 0x147   :  { %v2201_v42 = vld [vmem:[#allocation9_spill] sm:$0xff]  ;;  %v2208_v6 = vld [vmem:[#allocation10_spill] sm:$0xff] }
 0x148   :  { %v758_v61 = vpop.f32.mrf.mxu0  ;;  %v1079_v49 = vadd.f32 %v2201_v42, %v2200_v40 }
 0x149   :  { %v2092_v48 = vpop.f32.mrf.mxu1  ;;  %v759_v5 = vadd.f32 %v758_v61, %v649_v23  ;;  %v2205_v23 = vld [vmem:[#allocation6_spill] sm:$0xff] }
 0x14a   :  { %v1201_v11 = vpop.f32.mrf.mxu0  ;;  %v1135_v25 = vadd.f32 %v2205_v23, %v2204_v1 }
 0x14b   :  { %v1216_v3 = vpop.f32.mrf.mxu1  ;;  %v2105_v30 = vmax.f32 %v759_v5, 0.0  ;;  %v2206_v46 = vld [vmem:[#allocation11_spill] sm:$0xff]  ;;  %v579_v5 = vadd.f32 %v1082_v36, %v469_v39  ;;  %v574_v11 = vadd.f32 %v1079_v49, %v464_v35 }
 0x14c   :  { %v763_v8 = vpop.f32.mrf.mxu0  ;;  %v1141_v45 = vadd.f32 %v2087_v50, %v2206_v46  ;;  %v2207_v3 = vld [vmem:[#allocation8_spill] sm:$0xff]  ;;  %v784_v50 = vadd.f32 %v2092_v48, %v674_v15  ;;  %v679_v28 = vadd.f32 %v1135_v25, %v569_v0 }
 0x14d   :  { %v788_v10 = vpop.f32.mrf.mxu1  ;;  %v764_v12 = vadd.f32 %v763_v8, %v654_v17  ;;  %v828_v20 = vmul.f32 %v2105_v30, %v2105_v30  ;;  %v1138_v13 = vadd.f32 %v2208_v6, %v2207_v3  ;;  %v863_v3 = vlaneseq }
 0x14e   :  { %v1204_v31 = vpop.f32.mrf.mxu0  ;;  %v689_v60 = vadd.f32 %v1141_v45, %v579_v5  ;;  %v789_v21 = vadd.f32 %v788_v10, %v679_v28  ;;  %v807_v35 = vmax.f32 %v784_v50, 0.0 }
 0x14f   :  { %v1219_v32 = vpop.f32.mrf.mxu1  ;;  %v2113_v18 = vmax.f32 %v764_v12, 0.0  ;;  %v684_v31 = vadd.f32 %v1138_v13, %v574_v11  ;;  %v864_v6 = vshrl.u32 %v863_v3, 7  ;;  %v855_v13 = vld [vmem:[%s2186_s3] sm:$0x1] }
 0x150   :  { %v768_v43 = vpop.f32.mrf.mxu0  ;;  %v808_v36 = vmax.f32 %v789_v21, 0.0 }
 0x151   :  { %v793_v53 = vpop.f32.mrf.mxu1  ;;  %v811_v4 = vadd.f32 %v2113_v18, %v2105_v30  ;;  %v829_v22 = vmul.f32 %v2113_v18, %v2113_v18  ;;  %v769_v37 = vadd.f32 %v768_v43, %v659_v34  ;;  %v865_v15 = vsub.s32 0, %v864_v6 }
 0x152   :  { %v1207_v51 = vpop.f32.mrf.mxu0  ;;  %v794_v38 = vadd.f32 %v793_v53, %v684_v31  ;;  %v834_v44 = vmul.f32 %v808_v36, %v808_v36 }
 0x153   :  { %v1222_v55 = vpop.f32.mrf.mxu1  ;;  %v837_v59 = vadd.f32 %v829_v22, %v828_v20  ;;  %v2129_v61 = vmax.f32 %v769_v37, 0.0 }
 0x154   :  { %v773_v24 = vpop.f32.mrf.mxu0  ;;  %v809_v22 = vmax.f32 %v794_v38, 0.0 }
 0x155   :  { %v798_v2 = vpop.f32.mrf.mxu1  ;;  %v812_v52 = vadd.f32 %v811_v4, %v2129_v61  ;;  %v830_v7 = vmul.f32 %v2129_v61, %v2129_v61  ;;  %v774_v9 = vadd.f32 %v773_v24, %v664_v62  ;;  %v833_v4 = vmul.f32 %v807_v35, %v807_v35 }
 0x156   :  { %v1210_v17 = vpop.f32.mrf.mxu0  ;;  %v799_v34 = vadd.f32 %v798_v2, %v689_v60  ;;  %v835_v40 = vmul.f32 %v809_v22, %v809_v22 }
 0x157   :  { %v1225_v26 = vpop.f32.mrf.mxu1  ;;  %v838_v27 = vadd.f32 %v837_v59, %v830_v7  ;;  %v2140_v8 = vmax.f32 %v774_v9, 0.0 }
 0x158   :  { %v778_v12 = vpop.f32.mrf.mxu0  ;;  %v810_v20 = vmax.f32 %v799_v34, 0.0 }
 0x159   :  { %v813_v14 = vadd.f32 %v812_v52, %v2140_v8  ;;  %v831_v19 = vmul.f32 %v2140_v8, %v2140_v8  ;;  %v779_v32 = vadd.f32 %v778_v12, %v669_v29 }
 0x15a   :  { %v1213_v33 = vpop.f32.mrf.mxu0  ;;  %v836_v54 = vmul.f32 %v810_v20, %v810_v20  ;;  %v819_v51 = vsel %vm818_vm1, %v810_v20, 0.0 }
 0x15b   :  { %v839_v16 = vadd.f32 %v838_v27, %v831_v19  ;;  %v806_v41 = vmax.f32 %v779_v32, 0.0  ;;  %v859_v27 = vld [vmem:[%s2187_s4] sm:$0x1] }
 0x15c   :  { %v844_v56 = vsel %vm818_vm1, %v836_v54, 0.0 }
 0x15d   :  { %v814_v48 = vadd.f32 %v813_v14, %v806_v41  ;;  %v832_v43 = vmul.f32 %v806_v41, %v806_v41 }
 0x15f   :  { %v815_v37 = vadd.f32 %v814_v48, %v807_v35  ;;  %v840_v39 = vadd.f32 %v839_v16, %v832_v43 }
 0x161   :  { %v816_v47 = vadd.f32 %v815_v37, %v808_v36  ;;  %v841_v10 = vadd.f32 %v840_v39, %v833_v4 }
 0x163   :  { %v817_v42 = vadd.f32 %v816_v47, %v809_v22  ;;  %v842_v49 = vadd.f32 %v841_v10, %v834_v44 }
 0x165   :  { %v820_v55 = vadd.f32 %v819_v51, %v817_v42  ;;  %v843_v53 = vadd.f32 %v842_v49, %v835_v40 }
 0x167   :  { %v821_v57 = vrot.slane %v820_v55, 4  ;;  %v845_v58 = vadd.f32 %v844_v56, %v843_v53 }
 0x169   :  { %v822_v59 = vadd.f32 %v821_v57, %v820_v55  ;;  %v846_v62 = vrot.slane %v845_v58, 4 }
 0x16b   :  { %v823_v63 = vrot.slane %v822_v59, 2  ;;  %v847_v0 = vadd.f32 %v846_v62, %v845_v58 }
 0x16d   :  { %v824_v1 = vadd.f32 %v823_v63, %v822_v59  ;;  %v848_v23 = vrot.slane %v847_v0, 2 }
 0x16f   :  { %v825_v25 = vrot.slane %v824_v1, 1  ;;  %v849_v46 = vadd.f32 %v848_v23, %v847_v0 }
 0x171   :  { %v826_v45 = vadd.f32 %v825_v25, %v824_v1  ;;  %v850_v24 = vrot.slane %v849_v46, 1 }
 0x173   :  { %v827_v2 = vmul.f32 0.014285714, %v826_v45  ;;  %v851_v5 = vadd.f32 %v850_v24, %v849_v46 }
 0x175   :  { %v852_v52 = vmul.f32 0.014285714, %v851_v5  ;;  %v853_v7 = vmul.f32 %v827_v2, %v827_v2 }
 0x177   :  { %v854_v9 = vsub.f32 %v852_v52, %v853_v7 }
 0x179   :  { %v856_v11 = vadd.f32 1e-05, %v854_v9 }
 0x17b   :  { %1260 = vrsqrt.f32 %v856_v11 }
 0x188   :  { %v1261_v17 = vpop.eup %1260 }
 0x189   :  { %v858_v26 = vmul.f32 %v1261_v17, %v855_v13 }
 0x18b   :  { %v860_v50 = vmul.f32 %v858_v26, %v827_v2  ;;  %v866_v28 = vrot.slane %v858_v26, %v865_v15 }
 0x18d   :  { %v861_v29 = vsub.f32 %v859_v27, %v860_v50  ;;  %v868_v12 = vmul.f32 %v866_v28, %v2105_v30  ;;  %v869_v14 = vmul.f32 %v866_v28, %v2113_v18  ;;  %v870_v19 = vmul.f32 %v866_v28, %v2129_v61 }
 0x18e   :  { %v871_v60 = vmul.f32 %v866_v28, %v2140_v8  ;;  %v872_v21 = vmul.f32 %v866_v28, %v806_v41  ;;  %v873_v32 = vmul.f32 %v866_v28, %v807_v35  ;;  %v874_v33 = vmul.f32 %v866_v28, %v808_v36 }
 0x18f   :  { %v881_v31 = vrot.slane %v861_v29, %v865_v15  ;;  %v875_v16 = vmul.f32 %v866_v28, %v809_v22  ;;  %v876_v34 = vmul.f32 %v866_v28, %v810_v20 }
 0x191   :  { %v883_v38 = vadd.f32 %v881_v31, %v868_v12  ;;  %v884_v48 = vadd.f32 %v881_v31, %v869_v14  ;;  %v885_v43 = vadd.f32 %v881_v31, %v870_v19  ;;  %v886_v4 = vadd.f32 %v881_v31, %v871_v60 }
 0x192   :  { %v887_v37 = vadd.f32 %v881_v31, %v872_v21  ;;  %v888_v39 = vadd.f32 %v881_v31, %v873_v32  ;;  %v889_v44 = vadd.f32 %v881_v31, %v874_v33  ;;  %v890_v30 = vadd.f32 %v881_v31, %v875_v16 }
 0x193   :  { %v891_v47 = vadd.f32 %v881_v31, %v876_v34  ;;  %892 = vst [vmem:[%s2188_s5] sm:$0xff] %v883_v38  ;;  %893 = vst [vmem:[%s2188_s5 + $0x8] sm:$0xff] %v884_v48 }
 0x194   :  { %894 = vst [vmem:[%s2188_s5 + $0x10] sm:$0xff] %v885_v43  ;;  %895 = vst [vmem:[%s2188_s5 + $0x18] sm:$0xff] %v886_v4 }
 0x195   :  { %896 = vst [vmem:[%s2188_s5 + $0x20] sm:$0xff] %v887_v37  ;;  %897 = vst [vmem:[%s2188_s5 + $0x28] sm:$0xff] %v888_v39 }
 0x196   :  { %898 = vst [vmem:[%s2188_s5 + $0x30] sm:$0xff] %v889_v44  ;;  %899 = vst [vmem:[%s2188_s5 + $0x38] sm:$0xff] %v890_v30 }
 0x197   :  { %900 = vst [vmem:[%s2188_s5 + $0x40] sm:$0x3f] %v891_v47 }

// kernel: forward.7
= control target key start
LH: loop header
LB: loop body
LE: loop exit
PB: predicated region body
PF: predicated region fallthrough
CT: control target
= control target key end

     0   :  { %v2745_v27 = vmov 1983009808   ;;  %v604_v29 = vlaneseq  ;;  %s4519_s0 = inlined_call_operand.vmem [shape: f32[2,4480], index: 0, kind: input, shape index: {}]   ;;  %s4520_s1 = inlined_call_operand.vmem [shape: f32[4480,128], index: 1, kind: input, shape index: {}]   ;;  %s4521_s2 = inlined_call_operand.vmem [shape: f32[1,128], index: 2, kind: input, shape index: {}]   ;;  %s4522_s3 = inlined_call_operand.hbm [shape: f32[2,128], index: 3, kind: output, shape index: {}]  }
   0x1   :  { %v55_v0 = vld [vmem:[%s4520_s1 + $0xf8] sm:$0xff]  ;;  %v54_v2 = vld [vmem:[%s4520_s1 + $0xf0] sm:$0xff]  ;;  %v53_v6 = vld [vmem:[%s4520_s1 + $0xe8] sm:$0xff]  ;;  %v602_v28 = vunpack.c.l.s4 %v2745_v27 }
   0x2   :  { %v39_v1 = vld [vmem:[%s4520_s1 + $0x78] sm:$0xff]  ;;  %2063 = vmatprep.subr.mxu0 %v55_v0  ;;  %v38_v4 = vld [vmem:[%s4520_s1 + $0x70] sm:$0xff]  ;;  %v37_v8 = vld [vmem:[%s4520_s1 + $0x68] sm:$0xff]  ;;  %v605_v39 = vshrl.u32 %v604_v29, 7 }
   0x3   :  { %v87_v3 = vld [vmem:[%s4520_s1 + $0x1f8] sm:$0xff]  ;;  %2064 = vmatpush3.msra.mxu0 %v39_v1  ;;  %v86_v7 = vld [vmem:[%s4520_s1 + $0x1f0] sm:$0xff]  ;;  %v85_v10 = vld [vmem:[%s4520_s1 + $0x1e8] sm:$0xff]  ;;  %v603_v38 = vunpack.c.0.s8 %v602_v28 }
   0x4   :  { %v71_v5 = vld [vmem:[%s4520_s1 + $0x178] sm:$0xff]  ;;  %2098 = vmatprep.subr.mxu1 %v87_v3  ;;  %2065 = vmatprep.subr.mxu0 %v54_v2  ;;  %v70_v9 = vld [vmem:[%s4520_s1 + $0x170] sm:$0xff]  ;;  %v52_v11 = vld [vmem:[%s4520_s1 + $0xe0] sm:$0xff] }
   0x5   :  { %2099 = vmatpush3.msra.mxu1 %v71_v5  ;;  %2066 = vmatpush3.msra.mxu0 %v38_v4  ;;  %v69_v12 = vld [vmem:[%s4520_s1 + $0x168] sm:$0xff]  ;;  %v36_v13 = vld [vmem:[%s4520_s1 + $0x60] sm:$0xff]  ;;  %v51_v15 = vld [vmem:[%s4520_s1 + $0xd8] sm:$0xff]  ;;  %v2898_v48 = vsub.s32 %v603_v38, %v605_v39 }
   0x6   :  { %2100 = vmatprep.subr.mxu1 %v86_v7  ;;  %2067 = vmatprep.subr.mxu0 %v53_v6  ;;  %v84_v14 = vld [vmem:[%s4520_s1 + $0x1e0] sm:$0xff]  ;;  %v35_v17 = vld [vmem:[%s4520_s1 + $0x58] sm:$0xff]  ;;  %v50_v19 = vld [vmem:[%s4520_s1 + $0xd0] sm:$0xff] }
   0x7   :  { %2101 = vmatpush3.msra.mxu1 %v70_v9  ;;  %2068 = vmatpush3.msra.mxu0 %v37_v8  ;;  %v68_v16 = vld [vmem:[%s4520_s1 + $0x160] sm:$0xff]  ;;  %v83_v18 = vld [vmem:[%s4520_s1 + $0x1d8] sm:$0xff]  ;;  %v34_v21 = vld [vmem:[%s4520_s1 + $0x50] sm:$0xff] }
   0x8   :  { %2102 = vmatprep.subr.mxu1 %v85_v10  ;;  %2069 = vmatprep.subr.mxu0 %v52_v11  ;;  %v67_v20 = vld [vmem:[%s4520_s1 + $0x158] sm:$0xff]  ;;  %v82_v22 = vld [vmem:[%s4520_s1 + $0x1d0] sm:$0xff]  ;;  %v49_v23 = vld [vmem:[%s4520_s1 + $0xc8] sm:$0xff] }
   0x9   :  { %2103 = vmatpush3.msra.mxu1 %v69_v12  ;;  %2070 = vmatpush3.msra.mxu0 %v36_v13  ;;  %v66_v24 = vld [vmem:[%s4520_s1 + $0x150] sm:$0xff]  ;;  %v33_v25 = vld [vmem:[%s4520_s1 + $0x48] sm:$0xff]  ;;  %v48_v30 = vld [vmem:[%s4520_s1 + $0xc0] sm:$0xff] }
   0xa   :  { %2104 = vmatprep.subr.mxu1 %v84_v14  ;;  %2071 = vmatprep.subr.mxu0 %v51_v15  ;;  %v81_v26 = vld [vmem:[%s4520_s1 + $0x1c8] sm:$0xff]  ;;  %v32_v32 = vld [vmem:[%s4520_s1 + $0x40] sm:$0xff]  ;;  %v47_v34 = vld [vmem:[%s4520_s1 + $0xb8] sm:$0xff] }
   0xb   :  { %2105 = vmatpush3.msra.mxu1 %v68_v16  ;;  %2072 = vmatpush3.msra.mxu0 %v35_v17  ;;  %v65_v31 = vld [vmem:[%s4520_s1 + $0x148] sm:$0xff]  ;;  %v80_v33 = vld [vmem:[%s4520_s1 + $0x1c0] sm:$0xff]  ;;  %v31_v36 = vld [vmem:[%s4520_s1 + $0x38] sm:$0xff] }
   0xc   :  { %2106 = vmatprep.subr.mxu1 %v83_v18  ;;  %2073 = vmatprep.subr.mxu0 %v50_v19  ;;  %v64_v35 = vld [vmem:[%s4520_s1 + $0x140] sm:$0xff]  ;;  %v79_v37 = vld [vmem:[%s4520_s1 + $0x1b8] sm:$0xff]  ;;  %v46_v40 = vld [vmem:[%s4520_s1 + $0xb0] sm:$0xff] }
   0xd   :  { %2107 = vmatpush3.msra.mxu1 %v67_v20  ;;  %2074 = vmatpush3.msra.mxu0 %v34_v21  ;;  %v63_v41 = vld [vmem:[%s4520_s1 + $0x138] sm:$0xff]  ;;  %v30_v42 = vld [vmem:[%s4520_s1 + $0x30] sm:$0xff]  ;;  %v45_v44 = vld [vmem:[%s4520_s1 + $0xa8] sm:$0xff] }
   0xe   :  { %2108 = vmatprep.subr.mxu1 %v82_v22  ;;  %2075 = vmatprep.subr.mxu0 %v49_v23  ;;  %v78_v43 = vld [vmem:[%s4520_s1 + $0x1b0] sm:$0xff]  ;;  %v29_v46 = vld [vmem:[%s4520_s1 + $0x28] sm:$0xff]  ;;  %v44_v49 = vld [vmem:[%s4520_s1 + $0xa0] sm:$0xff] }
   0xf   :  { %2109 = vmatpush3.msra.mxu1 %v66_v24  ;;  %2076 = vmatpush3.msra.mxu0 %v33_v25  ;;  %v62_v45 = vld [vmem:[%s4520_s1 + $0x130] sm:$0xff]  ;;  %v77_v47 = vld [vmem:[%s4520_s1 + $0x1a8] sm:$0xff]  ;;  %v15_v51 = vld [vmem:[%s4519_s0] sm:$0xff] }
  0x10   :  { %2110 = vmatprep.subr.mxu1 %v81_v26  ;;  %2077 = vmatprep.subr.mxu0 %v48_v30  ;;  %v61_v50 = vld [vmem:[%s4520_s1 + $0x128] sm:$0xff]  ;;  %v28_v52 = vld [vmem:[%s4520_s1 + $0x20] sm:$0xff]  ;;  %v43_v54 = vld [vmem:[%s4520_s1 + $0x98] sm:$0xff]  ;;  %v607_v58 = vrot.slane %v15_v51, %v2898_v48  ;;  %v600_v59 = vcombine.high %v15_v51, %v15_v51 }
  0x11   :  { %2111 = vmatpush3.msra.mxu1 %v65_v31  ;;  %2078 = vmatpush3.msra.mxu0 %v32_v32  ;;  %v76_v53 = vld [vmem:[%s4520_s1 + $0x1a0] sm:$0xff]  ;;  %v27_v56 = vld [vmem:[%s4520_s1 + $0x18] sm:$0xff]  ;;  %v42_v60 = vld [vmem:[%s4520_s1 + $0x90] sm:$0xff] }
  0x12   :  { %2112 = vmatprep.subr.mxu1 %v80_v33  ;;  %2079 = vmatprep.subr.mxu0 %v47_v34  ;;  %v60_v55 = vld [vmem:[%s4520_s1 + $0x120] sm:$0xff]  ;;  %v75_v57 = vld [vmem:[%s4520_s1 + $0x198] sm:$0xff]  ;;  %v26_v62 = vld [vmem:[%s4520_s1 + $0x10] sm:$0xff]  ;;  %v615_v4 = vcombine.high %v607_v58, %v607_v58  ;;  %v614_v5 = vrot.slane %v600_v59, %v2898_v48 }
  0x13   :  { %2113 = vmatpush3.msra.mxu1 %v64_v35  ;;  %2080 = vmatpush3.msra.mxu0 %v31_v36  ;;  %v59_v61 = vld [vmem:[%s4520_s1 + $0x118] sm:$0xff]  ;;  %v74_v63 = vld [vmem:[%s4520_s1 + $0x190] sm:$0xff]  ;;  %v41_v0 = vld [vmem:[%s4520_s1 + $0x88] sm:$0xff] }
  0x14   :  { %2114 = vmatprep.subr.mxu1 %v79_v37  ;;  %2081 = vmatprep.subr.mxu0 %v46_v40  ;;  %v58_v1 = vld [vmem:[%s4520_s1 + $0x110] sm:$0xff]  ;;  %v25_v2 = vld [vmem:[%s4520_s1 + $0x8] sm:$0xff]  ;;  %v40_v6 = vld [vmem:[%s4520_s1 + $0x80] sm:$0xff]  ;;  %v616_v12 = vcombine.high %v614_v5, %v614_v5 }
  0x15   :  { %2115 = vmatpush3.msra.mxu1 %v63_v41  ;;  %2082 = vmatpush3.msra.mxu0 %v30_v42  ;;  %v73_v3 = vld [vmem:[%s4520_s1 + $0x188] sm:$0xff]  ;;  %v24_v7 = vld [vmem:[%s4520_s1] sm:$0xff]  ;;  %v119_v10 = vld [vmem:[%s4520_s1 + $0x2f8] sm:$0xff] }
  0x16   :  { %2116 = vmatprep.subr.mxu1 %v78_v43  ;;  %2083 = vmatprep.subr.mxu0 %v45_v44  ;;  %v57_v8 = vld [vmem:[%s4520_s1 + $0x108] sm:$0xff]  ;;  %v72_v9 = vld [vmem:[%s4520_s1 + $0x180] sm:$0xff]  ;;  %v103_v13 = vld [vmem:[%s4520_s1 + $0x278] sm:$0xff] }
  0x17   :  { %2117 = vmatpush3.msra.mxu1 %v62_v45  ;;  %2084 = vmatpush3.msra.mxu0 %v29_v46  ;;  %v56_v11 = vld [vmem:[%s4520_s1 + $0x100] sm:$0xff]  ;;  %v118_v14 = vld [vmem:[%s4520_s1 + $0x2f0] sm:$0xff]  ;;  %v151_v15 = vld [vmem:[%s4520_s1 + $0x3f8] sm:$0xff] }
  0x18   :  { %2118 = vmatprep.subr.mxu1 %v77_v47  ;;  %2085 = vmatprep.subr.mxu0 %v44_v49  ;;  %v102_v16 = vld [vmem:[%s4520_s1 + $0x270] sm:$0xff]  ;;  %v135_v17 = vld [vmem:[%s4520_s1 + $0x378] sm:$0xff]  ;;  %v117_v18 = vld [vmem:[%s4520_s1 + $0x2e8] sm:$0xff] }
  0x19   :  { %2119 = vmatpush3.msra.mxu1 %v61_v50  ;;  %2086 = vmatpush3.msra.mxu0 %v28_v52  ;;  %v150_v19 = vld [vmem:[%s4520_s1 + $0x3f0] sm:$0xff]  ;;  %v101_v20 = vld [vmem:[%s4520_s1 + $0x268] sm:$0xff]  ;;  %v116_v22 = vld [vmem:[%s4520_s1 + $0x2e0] sm:$0xff] }
  0x1a   :  { %2120 = vmatprep.subr.mxu1 %v76_v53  ;;  %2087 = vmatprep.subr.mxu0 %v43_v54  ;;  %v134_v21 = vld [vmem:[%s4520_s1 + $0x370] sm:$0xff]  ;;  %v149_v23 = vld [vmem:[%s4520_s1 + $0x3e8] sm:$0xff]  ;;  %v100_v24 = vld [vmem:[%s4520_s1 + $0x260] sm:$0xff] }
  0x1b   :  { %2121 = vmatpush3.msra.mxu1 %v60_v55  ;;  %2088 = vmatpush3.msra.mxu0 %v27_v56  ;;  %v133_v25 = vld [vmem:[%s4520_s1 + $0x368] sm:$0xff]  ;;  %v115_v26 = vld [vmem:[%s4520_s1 + $0x2d8] sm:$0xff]  ;;  %v148_v27 = vld [vmem:[%s4520_s1 + $0x3e0] sm:$0xff] }
  0x1c   :  { %2122 = vmatprep.subr.mxu1 %v75_v57  ;;  %2089 = vmatprep.subr.mxu0 %v42_v60  ;;  %v99_v28 = vld [vmem:[%s4520_s1 + $0x258] sm:$0xff]  ;;  %v132_v29 = vld [vmem:[%s4520_s1 + $0x360] sm:$0xff]  ;;  %v114_v30 = vld [vmem:[%s4520_s1 + $0x2d0] sm:$0xff] }
  0x1d   :  { %2123 = vmatpush3.msra.mxu1 %v59_v61  ;;  %2090 = vmatpush3.msra.mxu0 %v26_v62  ;;  %v147_v31 = vld [vmem:[%s4520_s1 + $0x3d8] sm:$0xff]  ;;  %v98_v32 = vld [vmem:[%s4520_s1 + $0x250] sm:$0xff]  ;;  %v113_v34 = vld [vmem:[%s4520_s1 + $0x2c8] sm:$0xff] }
  0x1e   :  { %2124 = vmatprep.subr.mxu1 %v74_v63  ;;  %2091 = vmatprep.subr.mxu0 %v41_v0  ;;  %v131_v33 = vld [vmem:[%s4520_s1 + $0x358] sm:$0xff]  ;;  %v146_v35 = vld [vmem:[%s4520_s1 + $0x3d0] sm:$0xff]  ;;  %v97_v36 = vld [vmem:[%s4520_s1 + $0x248] sm:$0xff] }
  0x1f   :  { %2125 = vmatpush3.msra.mxu1 %v58_v1  ;;  %2092 = vmatpush3.msra.mxu0 %v25_v2  ;;  %v130_v37 = vld [vmem:[%s4520_s1 + $0x350] sm:$0xff]  ;;  %v112_v38 = vld [vmem:[%s4520_s1 + $0x2c0] sm:$0xff]  ;;  %v145_v39 = vld [vmem:[%s4520_s1 + $0x3c8] sm:$0xff] }
  0x20   :  { %2126 = vmatprep.subr.mxu1 %v73_v3  ;;  %2093 = vmatprep.subr.mxu0 %v40_v6  ;;  %v96_v40 = vld [vmem:[%s4520_s1 + $0x240] sm:$0xff]  ;;  %v129_v41 = vld [vmem:[%s4520_s1 + $0x348] sm:$0xff]  ;;  %v111_v42 = vld [vmem:[%s4520_s1 + $0x2b8] sm:$0xff] }
  0x21   :  { %851 = vmatprep.mubr.f32.mxu0 %v615_v4  ;;  %2094 = vmatpush3.msra.mxu0 %v24_v7  ;;  %v144_v43 = vld [vmem:[%s4520_s1 + $0x3c0] sm:$0xff]  ;;  %v95_v44 = vld [vmem:[%s4520_s1 + $0x238] sm:$0xff]  ;;  %v110_v46 = vld [vmem:[%s4520_s1 + $0x2b0] sm:$0xff] }
  0x22   :  { %2127 = vmatpush3.msra.mxu1 %v57_v8  ;;  %852 = vmatmul.mubr.f32.vlgmr.msra.gmra.mxu0 %v607_v58  ;;  %v128_v45 = vld [vmem:[%s4520_s1 + $0x340] sm:$0xff]  ;;  %v143_v47 = vld [vmem:[%s4520_s1 + $0x3b8] sm:$0xff]  ;;  %v94_v49 = vld [vmem:[%s4520_s1 + $0x230] sm:$0xff] }
  0x23   :  { %2128 = vmatprep.subr.mxu1 %v72_v9  ;;  %2133 = vmatprep.subr.mxu0 %v119_v10  ;;  %v127_v50 = vld [vmem:[%s4520_s1 + $0x338] sm:$0xff]  ;;  %v109_v51 = vld [vmem:[%s4520_s1 + $0x2a8] sm:$0xff]  ;;  %v142_v52 = vld [vmem:[%s4520_s1 + $0x3b0] sm:$0xff] }
  0x24   :  { %2129 = vmatpush3.msra.mxu1 %v56_v11  ;;  %921 = vmatprep.mubr.f32.mxu1 %v616_v12  ;;  %v93_v53 = vld [vmem:[%s4520_s1 + $0x228] sm:$0xff]  ;;  %v126_v54 = vld [vmem:[%s4520_s1 + $0x330] sm:$0xff]  ;;  %v108_v55 = vld [vmem:[%s4520_s1 + $0x2a0] sm:$0xff] }
  0x25   :  { %2134 = vmatpush3.msra.mxu0 %v103_v13  ;;  %922 = vmatmul.mubr.f32.vlgmr.msra.gmra.mxu1 %v614_v5  ;;  %v141_v56 = vld [vmem:[%s4520_s1 + $0x3a8] sm:$0xff]  ;;  %v92_v57 = vld [vmem:[%s4520_s1 + $0x220] sm:$0xff]  ;;  %v107_v60 = vld [vmem:[%s4520_s1 + $0x298] sm:$0xff] }
  0x26   :  { %2135 = vmatprep.subr.mxu0 %v118_v14  ;;  %2168 = vmatprep.subr.mxu1 %v151_v15  ;;  %v16_v58 = vld [vmem:[%s4519_s0 + $0x8] sm:$0xff]  ;;  %v140_v61 = vld [vmem:[%s4520_s1 + $0x3a0] sm:$0xff]  ;;  %v91_v62 = vld [vmem:[%s4520_s1 + $0x218] sm:$0xff] }
  0x27   :  { %2136 = vmatpush3.msra.mxu0 %v102_v16  ;;  %2169 = vmatpush3.msra.mxu1 %v135_v17  ;;  %v125_v59 = vld [vmem:[%s4520_s1 + $0x328] sm:$0xff]  ;;  %v124_v63 = vld [vmem:[%s4520_s1 + $0x320] sm:$0xff]  ;;  %v106_v0 = vld [vmem:[%s4520_s1 + $0x290] sm:$0xff]  ;;  %v617_v1 = vcombine.high %v16_v58, %v16_v58  ;;  %v624_v4 = vrot.slane %v16_v58, %v2898_v48 }
  0x28   :  { %2137 = vmatprep.subr.mxu0 %v117_v18  ;;  %2170 = vmatprep.subr.mxu1 %v150_v19  ;;  %v139_v2 = vld [vmem:[%s4520_s1 + $0x398] sm:$0xff]  ;;  %v90_v3 = vld [vmem:[%s4520_s1 + $0x210] sm:$0xff]  ;;  %v105_v6 = vld [vmem:[%s4520_s1 + $0x288] sm:$0xff] }
  0x29   :  { %2138 = vmatpush3.msra.mxu0 %v101_v20  ;;  %2171 = vmatpush3.msra.mxu1 %v134_v21  ;;  %v123_v5 = vld [vmem:[%s4520_s1 + $0x318] sm:$0xff]  ;;  %v138_v7 = vld [vmem:[%s4520_s1 + $0x390] sm:$0xff]  ;;  %v89_v8 = vld [vmem:[%s4520_s1 + $0x208] sm:$0xff]  ;;  %v631_v11 = vrot.slane %v617_v1, %v2898_v48  ;;  %v632_v14 = vcombine.high %v624_v4, %v624_v4 }
  0x2a   :  { %2139 = vmatprep.subr.mxu0 %v116_v22  ;;  %2172 = vmatprep.subr.mxu1 %v149_v23  ;;  %v122_v9 = vld [vmem:[%s4520_s1 + $0x310] sm:$0xff]  ;;  %v104_v10 = vld [vmem:[%s4520_s1 + $0x280] sm:$0xff]  ;;  %v137_v12 = vld [vmem:[%s4520_s1 + $0x388] sm:$0xff] }
  0x2b   :  { %2140 = vmatpush3.msra.mxu0 %v100_v24  ;;  %2173 = vmatpush3.msra.mxu1 %v133_v25  ;;  %v88_v13 = vld [vmem:[%s4520_s1 + $0x200] sm:$0xff]  ;;  %v121_v15 = vld [vmem:[%s4520_s1 + $0x308] sm:$0xff]  ;;  %v183_v17 = vld [vmem:[%s4520_s1 + $0x4f8] sm:$0xff]  ;;  %v633_v19 = vcombine.high %v631_v11, %v631_v11 }
  0x2c   :  { %2141 = vmatprep.subr.mxu0 %v115_v26  ;;  %2174 = vmatprep.subr.mxu1 %v148_v27  ;;  %v136_v16 = vld [vmem:[%s4520_s1 + $0x380] sm:$0xff]  ;;  %v167_v20 = vld [vmem:[%s4520_s1 + $0x478] sm:$0xff]  ;;  %v182_v21 = vld [vmem:[%s4520_s1 + $0x4f0] sm:$0xff] }
  0x2d   :  { %2142 = vmatpush3.msra.mxu0 %v99_v28  ;;  %2175 = vmatpush3.msra.mxu1 %v132_v29  ;;  %v120_v18 = vld [vmem:[%s4520_s1 + $0x300] sm:$0xff]  ;;  %v215_v22 = vld [vmem:[%s4520_s1 + $0x5f8] sm:$0xff]  ;;  %v166_v23 = vld [vmem:[%s4520_s1 + $0x470] sm:$0xff] }
  0x2e   :  { %2143 = vmatprep.subr.mxu0 %v114_v30  ;;  %2176 = vmatprep.subr.mxu1 %v147_v31  ;;  %v199_v24 = vld [vmem:[%s4520_s1 + $0x578] sm:$0xff]  ;;  %v181_v25 = vld [vmem:[%s4520_s1 + $0x4e8] sm:$0xff]  ;;  %v214_v26 = vld [vmem:[%s4520_s1 + $0x5f0] sm:$0xff] }
  0x2f   :  { %2144 = vmatpush3.msra.mxu0 %v98_v32  ;;  %2177 = vmatpush3.msra.mxu1 %v131_v33  ;;  %v165_v27 = vld [vmem:[%s4520_s1 + $0x468] sm:$0xff]  ;;  %v198_v28 = vld [vmem:[%s4520_s1 + $0x570] sm:$0xff]  ;;  %v180_v29 = vld [vmem:[%s4520_s1 + $0x4e0] sm:$0xff] }
  0x30   :  { %2145 = vmatprep.subr.mxu0 %v113_v34  ;;  %2178 = vmatprep.subr.mxu1 %v146_v35  ;;  %v213_v30 = vld [vmem:[%s4520_s1 + $0x5e8] sm:$0xff]  ;;  %v164_v31 = vld [vmem:[%s4520_s1 + $0x460] sm:$0xff]  ;;  %v179_v33 = vld [vmem:[%s4520_s1 + $0x4d8] sm:$0xff] }
  0x31   :  { %2146 = vmatpush3.msra.mxu0 %v97_v36  ;;  %2179 = vmatpush3.msra.mxu1 %v130_v37  ;;  %v197_v32 = vld [vmem:[%s4520_s1 + $0x568] sm:$0xff]  ;;  %v212_v34 = vld [vmem:[%s4520_s1 + $0x5e0] sm:$0xff]  ;;  %v163_v35 = vld [vmem:[%s4520_s1 + $0x458] sm:$0xff] }
  0x32   :  { %2147 = vmatprep.subr.mxu0 %v112_v38  ;;  %2180 = vmatprep.subr.mxu1 %v145_v39  ;;  %v196_v36 = vld [vmem:[%s4520_s1 + $0x560] sm:$0xff]  ;;  %v178_v37 = vld [vmem:[%s4520_s1 + $0x4d0] sm:$0xff]  ;;  %v211_v38 = vld [vmem:[%s4520_s1 + $0x5d8] sm:$0xff] }
  0x33   :  { %2148 = vmatpush3.msra.mxu0 %v96_v40  ;;  %2181 = vmatpush3.msra.mxu1 %v129_v41  ;;  %v162_v39 = vld [vmem:[%s4520_s1 + $0x450] sm:$0xff]  ;;  %v195_v40 = vld [vmem:[%s4520_s1 + $0x558] sm:$0xff]  ;;  %v177_v41 = vld [vmem:[%s4520_s1 + $0x4c8] sm:$0xff] }
  0x34   :  { %2149 = vmatprep.subr.mxu0 %v111_v42  ;;  %2182 = vmatprep.subr.mxu1 %v144_v43  ;;  %v210_v42 = vld [vmem:[%s4520_s1 + $0x5d0] sm:$0xff]  ;;  %v161_v43 = vld [vmem:[%s4520_s1 + $0x448] sm:$0xff] }
  0x35   :  { %2150 = vmatpush3.msra.mxu0 %v95_v44  ;;  %2183 = vmatpush3.msra.mxu1 %v128_v45  ;;  %v194_v44 = vld [vmem:[%s4520_s1 + $0x550] sm:$0xff]  ;;  %v176_v45 = vld [vmem:[%s4520_s1 + $0x4c0] sm:$0xff]  ;;  %v173_v58 = vld [vmem:[%s4520_s1 + $0x4a8] sm:$0xff] }
  0x36   :  { %2151 = vmatprep.subr.mxu0 %v110_v46  ;;  %2184 = vmatprep.subr.mxu1 %v143_v47  ;;  %v209_v46 = vld [vmem:[%s4520_s1 + $0x5c8] sm:$0xff]  ;;  %v160_v47 = vld [vmem:[%s4520_s1 + $0x440] sm:$0xff]  ;;  %v17_v1 = vld [vmem:[%s4519_s0 + $0x10] sm:$0xff] }
  0x37   :  { %2152 = vmatpush3.msra.mxu0 %v94_v49  ;;  %2185 = vmatpush3.msra.mxu1 %v127_v50  ;;  %v193_v49 = vld [vmem:[%s4520_s1 + $0x548] sm:$0xff]  ;;  %v175_v50 = vld [vmem:[%s4520_s1 + $0x4b8] sm:$0xff] }
  0x38   :  { %2153 = vmatprep.subr.mxu0 %v109_v51  ;;  %2186 = vmatprep.subr.mxu1 %v142_v52  ;;  %v208_v51 = vld [vmem:[%s4520_s1 + $0x5c0] sm:$0xff]  ;;  %v159_v52 = vld [vmem:[%s4520_s1 + $0x438] sm:$0xff] }
  0x39   :  { %2154 = vmatpush3.msra.mxu0 %v93_v53  ;;  %2187 = vmatpush3.msra.mxu1 %v126_v54  ;;  %v192_v53 = vld [vmem:[%s4520_s1 + $0x540] sm:$0xff]  ;;  %v174_v54 = vld [vmem:[%s4520_s1 + $0x4b0] sm:$0xff] }
  0x3a   :  { %2155 = vmatprep.subr.mxu0 %v108_v55  ;;  %2188 = vmatprep.subr.mxu1 %v141_v56  ;;  %v207_v55 = vld [vmem:[%s4520_s1 + $0x5b8] sm:$0xff]  ;;  %v158_v56 = vld [vmem:[%s4520_s1 + $0x430] sm:$0xff] }
  0x3b   :  { %2156 = vmatpush3.msra.mxu0 %v92_v57  ;;  %2189 = vmatpush3.msra.mxu1 %v125_v59  ;;  %v191_v57 = vld [vmem:[%s4520_s1 + $0x538] sm:$0xff]  ;;  %v206_v59 = vld [vmem:[%s4520_s1 + $0x5b0] sm:$0xff] }
  0x3c   :  { %2157 = vmatprep.subr.mxu0 %v107_v60  ;;  %2190 = vmatprep.subr.mxu1 %v140_v61  ;;  %v157_v60 = vld [vmem:[%s4520_s1 + $0x428] sm:$0xff]  ;;  %v190_v61 = vld [vmem:[%s4520_s1 + $0x530] sm:$0xff] }
  0x3d   :  { %2158 = vmatpush3.msra.mxu0 %v91_v62  ;;  %2191 = vmatpush3.msra.mxu1 %v124_v63  ;;  %v172_v62 = vld [vmem:[%s4520_s1 + $0x4a0] sm:$0xff]  ;;  %v205_v63 = vld [vmem:[%s4520_s1 + $0x5a8] sm:$0xff] }
  0x3e   :  { %2159 = vmatprep.subr.mxu0 %v106_v0  ;;  %2192 = vmatprep.subr.mxu1 %v139_v2  ;;  %v156_v0 = vld [vmem:[%s4520_s1 + $0x420] sm:$0xff]  ;;  %v189_v2 = vld [vmem:[%s4520_s1 + $0x528] sm:$0xff] }
  0x3f   :  { %2160 = vmatpush3.msra.mxu0 %v90_v3  ;;  %2193 = vmatpush3.msra.mxu1 %v123_v5  ;;  %v171_v3 = vld [vmem:[%s4520_s1 + $0x498] sm:$0xff] }
  0x40   :  { %2161 = vmatprep.subr.mxu0 %v105_v6  ;;  %2194 = vmatprep.subr.mxu1 %v138_v7  ;;  %v155_v5 = vld [vmem:[%s4520_s1 + $0x418] sm:$0xff]  ;;  %v188_v6 = vld [vmem:[%s4520_s1 + $0x520] sm:$0xff]  ;;  %v170_v7 = vld [vmem:[%s4520_s1 + $0x490] sm:$0xff] }
  0x41   :  { %2162 = vmatpush3.msra.mxu0 %v89_v8  ;;  %2195 = vmatpush3.msra.mxu1 %v122_v9  ;;  %v634_v8 = vcombine.high %v17_v1, %v17_v1  ;;  %v203_v9 = vld [vmem:[%s4520_s1 + $0x598] sm:$0xff] }
  0x42   :  { %2163 = vmatprep.subr.mxu0 %v104_v10  ;;  %2196 = vmatprep.subr.mxu1 %v137_v12  ;;  %v154_v10 = vld [vmem:[%s4520_s1 + $0x410] sm:$0xff]  ;;  %v187_v12 = vld [vmem:[%s4520_s1 + $0x518] sm:$0xff] }
  0x43   :  { %2164 = vmatpush3.msra.mxu0 %v88_v13  ;;  %991 = vmatprep.mubr.f32.mxu0 %v632_v14  ;;  %v169_v13 = vld [vmem:[%s4520_s1 + $0x488] sm:$0xff]  ;;  %v202_v14 = vld [vmem:[%s4520_s1 + $0x590] sm:$0xff] }
  0x44   :  { %2197 = vmatpush3.msra.mxu1 %v121_v15  ;;  %992 = vmatmul.mubr.f32.vlgmr.msra.gmra.mxu0 %v624_v4  ;;  %v204_v4 = vld [vmem:[%s4520_s1 + $0x5a0] sm:$0xff]  ;;  %v153_v15 = vld [vmem:[%s4520_s1 + $0x408] sm:$0xff] }
  0x45   :  { %2198 = vmatprep.subr.mxu1 %v136_v16  ;;  %2203 = vmatprep.subr.mxu0 %v183_v17  ;;  %v186_v16 = vld [vmem:[%s4520_s1 + $0x510] sm:$0xff]  ;;  %v168_v17 = vld [vmem:[%s4520_s1 + $0x480] sm:$0xff] }
  0x46   :  { %2199 = vmatpush3.msra.mxu1 %v120_v18  ;;  %1061 = vmatprep.mubr.f32.mxu1 %v633_v19  ;;  %v648_v18 = vrot.slane %v634_v8, %v2898_v48  ;;  %v201_v19 = vld [vmem:[%s4520_s1 + $0x588] sm:$0xff]  ;;  %v18_v8 = vld [vmem:[%s4519_s0 + $0x18] sm:$0xff] }
  0x47   :  { %2204 = vmatpush3.msra.mxu0 %v167_v20  ;;  %1062 = vmatmul.mubr.f32.vlgmr.msra.gmra.mxu1 %v631_v11  ;;  %v641_v11 = vrot.slane %v17_v1, %v2898_v48  ;;  %v152_v20 = vld [vmem:[%s4520_s1 + $0x400] sm:$0xff]  ;;  %v237_v1 = vld [vmem:[%s4520_s1 + $0x6a8] sm:$0xff] }
  0x48   :  { %2205 = vmatprep.subr.mxu0 %v182_v21  ;;  %2238 = vmatprep.subr.mxu1 %v215_v22  ;;  %v185_v22 = vld [vmem:[%s4520_s1 + $0x508] sm:$0xff] }
  0x49   :  { %2206 = vmatpush3.msra.mxu0 %v166_v23  ;;  %2239 = vmatpush3.msra.mxu1 %v199_v24  ;;  %v649_v21 = vcombine.high %v641_v11, %v641_v11  ;;  %v200_v23 = vld [vmem:[%s4520_s1 + $0x580] sm:$0xff]  ;;  %v247_v24 = vld [vmem:[%s4520_s1 + $0x6f8] sm:$0xff] }
  0x4a   :  { %2207 = vmatprep.subr.mxu0 %v181_v25  ;;  %2240 = vmatprep.subr.mxu1 %v214_v26  ;;  %v184_v25 = vld [vmem:[%s4520_s1 + $0x500] sm:$0xff]  ;;  %v650_v26 = vcombine.high %v648_v18, %v648_v18 }
  0x4b   :  { %2208 = vmatpush3.msra.mxu0 %v165_v27  ;;  %2241 = vmatpush3.msra.mxu1 %v198_v28  ;;  %v231_v27 = vld [vmem:[%s4520_s1 + $0x678] sm:$0xff]  ;;  %v246_v28 = vld [vmem:[%s4520_s1 + $0x6f0] sm:$0xff] }
  0x4c   :  { %2209 = vmatprep.subr.mxu0 %v180_v29  ;;  %2242 = vmatprep.subr.mxu1 %v213_v30  ;;  %v279_v29 = vld [vmem:[%s4520_s1 + $0x7f8] sm:$0xff]  ;;  %v230_v30 = vld [vmem:[%s4520_s1 + $0x670] sm:$0xff] }
  0x4d   :  { %2210 = vmatpush3.msra.mxu0 %v164_v31  ;;  %2243 = vmatpush3.msra.mxu1 %v197_v32  ;;  %v263_v31 = vld [vmem:[%s4520_s1 + $0x778] sm:$0xff]  ;;  %v245_v32 = vld [vmem:[%s4520_s1 + $0x6e8] sm:$0xff] }
  0x4e   :  { %2211 = vmatprep.subr.mxu0 %v179_v33  ;;  %2244 = vmatprep.subr.mxu1 %v212_v34  ;;  %v278_v33 = vld [vmem:[%s4520_s1 + $0x7f0] sm:$0xff]  ;;  %v229_v34 = vld [vmem:[%s4520_s1 + $0x668] sm:$0xff] }
  0x4f   :  { %2212 = vmatpush3.msra.mxu0 %v163_v35  ;;  %2245 = vmatpush3.msra.mxu1 %v196_v36  ;;  %v262_v35 = vld [vmem:[%s4520_s1 + $0x770] sm:$0xff]  ;;  %v244_v36 = vld [vmem:[%s4520_s1 + $0x6e0] sm:$0xff] }
  0x50   :  { %2213 = vmatprep.subr.mxu0 %v178_v37  ;;  %2246 = vmatprep.subr.mxu1 %v211_v38  ;;  %v277_v37 = vld [vmem:[%s4520_s1 + $0x7e8] sm:$0xff]  ;;  %v228_v38 = vld [vmem:[%s4520_s1 + $0x660] sm:$0xff] }
  0x51   :  { %2214 = vmatpush3.msra.mxu0 %v162_v39  ;;  %2247 = vmatpush3.msra.mxu1 %v195_v40  ;;  %v261_v39 = vld [vmem:[%s4520_s1 + $0x768] sm:$0xff]  ;;  %v243_v40 = vld [vmem:[%s4520_s1 + $0x6d8] sm:$0xff] }
  0x52   :  { %2215 = vmatprep.subr.mxu0 %v177_v41  ;;  %2248 = vmatprep.subr.mxu1 %v210_v42  ;;  %v276_v41 = vld [vmem:[%s4520_s1 + $0x7e0] sm:$0xff]  ;;  %v227_v42 = vld [vmem:[%s4520_s1 + $0x658] sm:$0xff] }
  0x53   :  { %2216 = vmatpush3.msra.mxu0 %v161_v43  ;;  %2249 = vmatpush3.msra.mxu1 %v194_v44  ;;  %v260_v43 = vld [vmem:[%s4520_s1 + $0x760] sm:$0xff]  ;;  %v242_v44 = vld [vmem:[%s4520_s1 + $0x6d0] sm:$0xff] }
  0x54   :  { %2217 = vmatprep.subr.mxu0 %v176_v45  ;;  %2250 = vmatprep.subr.mxu1 %v209_v46  ;;  %v275_v45 = vld [vmem:[%s4520_s1 + $0x7d8] sm:$0xff]  ;;  %v226_v46 = vld [vmem:[%s4520_s1 + $0x650] sm:$0xff] }
  0x55   :  { %2218 = vmatpush3.msra.mxu0 %v160_v47  ;;  %2251 = vmatpush3.msra.mxu1 %v193_v49  ;;  %v259_v47 = vld [vmem:[%s4520_s1 + $0x758] sm:$0xff]  ;;  %v241_v49 = vld [vmem:[%s4520_s1 + $0x6c8] sm:$0xff] }
  0x56   :  { %2219 = vmatprep.subr.mxu0 %v175_v50  ;;  %2252 = vmatprep.subr.mxu1 %v208_v51  ;;  %v274_v50 = vld [vmem:[%s4520_s1 + $0x7d0] sm:$0xff]  ;;  %v225_v51 = vld [vmem:[%s4520_s1 + $0x648] sm:$0xff] }
  0x57   :  { %2220 = vmatpush3.msra.mxu0 %v159_v52  ;;  %2253 = vmatpush3.msra.mxu1 %v192_v53  ;;  %v258_v52 = vld [vmem:[%s4520_s1 + $0x750] sm:$0xff]  ;;  %v240_v53 = vld [vmem:[%s4520_s1 + $0x6c0] sm:$0xff] }
  0x58   :  { %2221 = vmatprep.subr.mxu0 %v174_v54  ;;  %2254 = vmatprep.subr.mxu1 %v207_v55  ;;  %v273_v54 = vld [vmem:[%s4520_s1 + $0x7c8] sm:$0xff]  ;;  %v224_v55 = vld [vmem:[%s4520_s1 + $0x640] sm:$0xff] }
  0x59   :  { %2222 = vmatpush3.msra.mxu0 %v158_v56  ;;  %2255 = vmatpush3.msra.mxu1 %v191_v57  ;;  %v257_v56 = vld [vmem:[%s4520_s1 + $0x748] sm:$0xff]  ;;  %v239_v57 = vld [vmem:[%s4520_s1 + $0x6b8] sm:$0xff] }
  0x5a   :  { %2223 = vmatprep.subr.mxu0 %v173_v58  ;;  %2256 = vmatprep.subr.mxu1 %v206_v59  ;;  %v272_v58 = vld [vmem:[%s4520_s1 + $0x7c0] sm:$0xff]  ;;  %v223_v59 = vld [vmem:[%s4520_s1 + $0x638] sm:$0xff] }
  0x5b   :  { %2224 = vmatpush3.msra.mxu0 %v157_v60  ;;  %2257 = vmatpush3.msra.mxu1 %v190_v61  ;;  %v256_v60 = vld [vmem:[%s4520_s1 + $0x740] sm:$0xff]  ;;  %v238_v61 = vld [vmem:[%s4520_s1 + $0x6b0] sm:$0xff] }
  0x5c   :  { %2225 = vmatprep.subr.mxu0 %v172_v62  ;;  %2258 = vmatprep.subr.mxu1 %v205_v63  ;;  %v271_v62 = vld [vmem:[%s4520_s1 + $0x7b8] sm:$0xff]  ;;  %v222_v63 = vld [vmem:[%s4520_s1 + $0x630] sm:$0xff] }
  0x5d   :  { %2226 = vmatpush3.msra.mxu0 %v156_v0  ;;  %2259 = vmatpush3.msra.mxu1 %v189_v2  ;;  %v255_v0 = vld [vmem:[%s4520_s1 + $0x738] sm:$0xff]  ;;  %v270_v2 = vld [vmem:[%s4520_s1 + $0x7b0] sm:$0xff] }
  0x5e   :  { %2227 = vmatprep.subr.mxu0 %v171_v3  ;;  %2260 = vmatprep.subr.mxu1 %v204_v4  ;;  %v221_v3 = vld [vmem:[%s4520_s1 + $0x628] sm:$0xff]  ;;  %v254_v4 = vld [vmem:[%s4520_s1 + $0x730] sm:$0xff] }
  0x5f   :  { %2228 = vmatpush3.msra.mxu0 %v155_v5  ;;  %2261 = vmatpush3.msra.mxu1 %v188_v6  ;;  %v236_v5 = vld [vmem:[%s4520_s1 + $0x6a0] sm:$0xff]  ;;  %v269_v6 = vld [vmem:[%s4520_s1 + $0x7a8] sm:$0xff] }
  0x60   :  { %2229 = vmatprep.subr.mxu0 %v170_v7  ;;  %2262 = vmatprep.subr.mxu1 %v203_v9  ;;  %v220_v7 = vld [vmem:[%s4520_s1 + $0x620] sm:$0xff]  ;;  %v253_v9 = vld [vmem:[%s4520_s1 + $0x728] sm:$0xff] }
  0x61   :  { %2230 = vmatpush3.msra.mxu0 %v154_v10  ;;  %2263 = vmatpush3.msra.mxu1 %v187_v12  ;;  %v235_v10 = vld [vmem:[%s4520_s1 + $0x698] sm:$0xff] }
  0x62   :  { %2231 = vmatprep.subr.mxu0 %v169_v13  ;;  %2264 = vmatprep.subr.mxu1 %v202_v14  ;;  %v219_v12 = vld [vmem:[%s4520_s1 + $0x618] sm:$0xff]  ;;  %v252_v13 = vld [vmem:[%s4520_s1 + $0x720] sm:$0xff]  ;;  %v234_v14 = vld [vmem:[%s4520_s1 + $0x690] sm:$0xff] }
  0x63   :  { %2232 = vmatpush3.msra.mxu0 %v153_v15  ;;  %2265 = vmatpush3.msra.mxu1 %v186_v16  ;;  %v651_v15 = vcombine.high %v18_v8, %v18_v8  ;;  %v267_v16 = vld [vmem:[%s4520_s1 + $0x798] sm:$0xff] }
  0x64   :  { %2233 = vmatprep.subr.mxu0 %v168_v17  ;;  %2266 = vmatprep.subr.mxu1 %v201_v19  ;;  %v218_v17 = vld [vmem:[%s4520_s1 + $0x610] sm:$0xff]  ;;  %v251_v19 = vld [vmem:[%s4520_s1 + $0x718] sm:$0xff] }
  0x65   :  { %2234 = vmatpush3.msra.mxu0 %v152_v20  ;;  %1131 = vmatprep.mubr.f32.mxu0 %v649_v21  ;;  %v233_v20 = vld [vmem:[%s4520_s1 + $0x688] sm:$0xff]  ;;  %v266_v21 = vld [vmem:[%s4520_s1 + $0x790] sm:$0xff] }
  0x66   :  { %2267 = vmatpush3.msra.mxu1 %v185_v22  ;;  %1132 = vmatmul.mubr.f32.vlgmr.msra.gmra.mxu0 %v641_v11  ;;  %v268_v11 = vld [vmem:[%s4520_s1 + $0x7a0] sm:$0xff]  ;;  %v217_v22 = vld [vmem:[%s4520_s1 + $0x608] sm:$0xff] }
  0x67   :  { %2268 = vmatprep.subr.mxu1 %v200_v23  ;;  %2273 = vmatprep.subr.mxu0 %v247_v24  ;;  %v250_v23 = vld [vmem:[%s4520_s1 + $0x710] sm:$0xff]  ;;  %v232_v24 = vld [vmem:[%s4520_s1 + $0x680] sm:$0xff] }
  0x68   :  { %2269 = vmatpush3.msra.mxu1 %v184_v25  ;;  %1201 = vmatprep.mubr.f32.mxu1 %v650_v26  ;;  %v665_v25 = vrot.slane %v651_v15, %v2898_v48  ;;  %v265_v26 = vld [vmem:[%s4520_s1 + $0x788] sm:$0xff]  ;;  %v19_v15 = vld [vmem:[%s4519_s0 + $0x20] sm:$0xff] }
  0x69   :  { %2274 = vmatpush3.msra.mxu0 %v231_v27  ;;  %1202 = vmatmul.mubr.f32.vlgmr.msra.gmra.mxu1 %v648_v18  ;;  %v658_v18 = vrot.slane %v18_v8, %v2898_v48  ;;  %v216_v27 = vld [vmem:[%s4520_s1 + $0x600] sm:$0xff]  ;;  %v301_v8 = vld [vmem:[%s4520_s1 + $0x8a8] sm:$0xff] }
  0x6a   :  { %2275 = vmatprep.subr.mxu0 %v246_v28  ;;  %2308 = vmatprep.subr.mxu1 %v279_v29  ;;  %v249_v29 = vld [vmem:[%s4520_s1 + $0x708] sm:$0xff] }
  0x6b   :  { %2276 = vmatpush3.msra.mxu0 %v230_v30  ;;  %2309 = vmatpush3.msra.mxu1 %v263_v31  ;;  %v666_v28 = vcombine.high %v658_v18, %v658_v18  ;;  %v264_v30 = vld [vmem:[%s4520_s1 + $0x780] sm:$0xff]  ;;  %v311_v31 = vld [vmem:[%s4520_s1 + $0x8f8] sm:$0xff] }
  0x6c   :  { %2277 = vmatprep.subr.mxu0 %v245_v32  ;;  %2310 = vmatprep.subr.mxu1 %v278_v33  ;;  %v248_v32 = vld [vmem:[%s4520_s1 + $0x700] sm:$0xff]  ;;  %v667_v33 = vcombine.high %v665_v25, %v665_v25 }
  0x6d   :  { %2278 = vmatpush3.msra.mxu0 %v229_v34  ;;  %2311 = vmatpush3.msra.mxu1 %v262_v35  ;;  %v295_v34 = vld [vmem:[%s4520_s1 + $0x878] sm:$0xff]  ;;  %v310_v35 = vld [vmem:[%s4520_s1 + $0x8f0] sm:$0xff] }
  0x6e   :  { %2279 = vmatprep.subr.mxu0 %v244_v36  ;;  %2312 = vmatprep.subr.mxu1 %v277_v37  ;;  %v343_v36 = vld [vmem:[%s4520_s1 + $0x9f8] sm:$0xff]  ;;  %v294_v37 = vld [vmem:[%s4520_s1 + $0x870] sm:$0xff] }
  0x6f   :  { %2280 = vmatpush3.msra.mxu0 %v228_v38  ;;  %2313 = vmatpush3.msra.mxu1 %v261_v39  ;;  %v327_v38 = vld [vmem:[%s4520_s1 + $0x978] sm:$0xff]  ;;  %v309_v39 = vld [vmem:[%s4520_s1 + $0x8e8] sm:$0xff] }
  0x70   :  { %2281 = vmatprep.subr.mxu0 %v243_v40  ;;  %2314 = vmatprep.subr.mxu1 %v276_v41  ;;  %v342_v40 = vld [vmem:[%s4520_s1 + $0x9f0] sm:$0xff]  ;;  %v293_v41 = vld [vmem:[%s4520_s1 + $0x868] sm:$0xff] }
  0x71   :  { %2282 = vmatpush3.msra.mxu0 %v227_v42  ;;  %2315 = vmatpush3.msra.mxu1 %v260_v43  ;;  %v326_v42 = vld [vmem:[%s4520_s1 + $0x970] sm:$0xff]  ;;  %v308_v43 = vld [vmem:[%s4520_s1 + $0x8e0] sm:$0xff] }
  0x72   :  { %2283 = vmatprep.subr.mxu0 %v242_v44  ;;  %2316 = vmatprep.subr.mxu1 %v275_v45  ;;  %v341_v44 = vld [vmem:[%s4520_s1 + $0x9e8] sm:$0xff]  ;;  %v292_v45 = vld [vmem:[%s4520_s1 + $0x860] sm:$0xff] }
  0x73   :  { %2284 = vmatpush3.msra.mxu0 %v226_v46  ;;  %2317 = vmatpush3.msra.mxu1 %v259_v47  ;;  %v325_v46 = vld [vmem:[%s4520_s1 + $0x968] sm:$0xff]  ;;  %v307_v47 = vld [vmem:[%s4520_s1 + $0x8d8] sm:$0xff] }
  0x74   :  { %2285 = vmatprep.subr.mxu0 %v241_v49  ;;  %2318 = vmatprep.subr.mxu1 %v274_v50  ;;  %v340_v49 = vld [vmem:[%s4520_s1 + $0x9e0] sm:$0xff]  ;;  %v291_v50 = vld [vmem:[%s4520_s1 + $0x858] sm:$0xff] }
  0x75   :  { %2286 = vmatpush3.msra.mxu0 %v225_v51  ;;  %2319 = vmatpush3.msra.mxu1 %v258_v52  ;;  %v324_v51 = vld [vmem:[%s4520_s1 + $0x960] sm:$0xff]  ;;  %v306_v52 = vld [vmem:[%s4520_s1 + $0x8d0] sm:$0xff] }
  0x76   :  { %2287 = vmatprep.subr.mxu0 %v240_v53  ;;  %2320 = vmatprep.subr.mxu1 %v273_v54  ;;  %v339_v53 = vld [vmem:[%s4520_s1 + $0x9d8] sm:$0xff]  ;;  %v290_v54 = vld [vmem:[%s4520_s1 + $0x850] sm:$0xff] }
  0x77   :  { %2288 = vmatpush3.msra.mxu0 %v224_v55  ;;  %2321 = vmatpush3.msra.mxu1 %v257_v56  ;;  %v323_v55 = vld [vmem:[%s4520_s1 + $0x958] sm:$0xff]  ;;  %v305_v56 = vld [vmem:[%s4520_s1 + $0x8c8] sm:$0xff] }
  0x78   :  { %2289 = vmatprep.subr.mxu0 %v239_v57  ;;  %2322 = vmatprep.subr.mxu1 %v272_v58  ;;  %v338_v57 = vld [vmem:[%s4520_s1 + $0x9d0] sm:$0xff]  ;;  %v289_v58 = vld [vmem:[%s4520_s1 + $0x848] sm:$0xff] }
  0x79   :  { %2290 = vmatpush3.msra.mxu0 %v223_v59  ;;  %2323 = vmatpush3.msra.mxu1 %v256_v60  ;;  %v322_v59 = vld [vmem:[%s4520_s1 + $0x950] sm:$0xff]  ;;  %v304_v60 = vld [vmem:[%s4520_s1 + $0x8c0] sm:$0xff] }
  0x7a   :  { %2291 = vmatprep.subr.mxu0 %v238_v61  ;;  %2324 = vmatprep.subr.mxu1 %v271_v62  ;;  %v337_v61 = vld [vmem:[%s4520_s1 + $0x9c8] sm:$0xff]  ;;  %v288_v62 = vld [vmem:[%s4520_s1 + $0x840] sm:$0xff] }
  0x7b   :  { %2292 = vmatpush3.msra.mxu0 %v222_v63  ;;  %2325 = vmatpush3.msra.mxu1 %v255_v0  ;;  %v321_v63 = vld [vmem:[%s4520_s1 + $0x948] sm:$0xff]  ;;  %v303_v0 = vld [vmem:[%s4520_s1 + $0x8b8] sm:$0xff] }
  0x7c   :  { %2293 = vmatprep.subr.mxu0 %v237_v1  ;;  %2326 = vmatprep.subr.mxu1 %v270_v2  ;;  %v336_v1 = vld [vmem:[%s4520_s1 + $0x9c0] sm:$0xff]  ;;  %v287_v2 = vld [vmem:[%s4520_s1 + $0x838] sm:$0xff] }
  0x7d   :  { %2294 = vmatpush3.msra.mxu0 %v221_v3  ;;  %2327 = vmatpush3.msra.mxu1 %v254_v4  ;;  %v320_v3 = vld [vmem:[%s4520_s1 + $0x940] sm:$0xff]  ;;  %v302_v4 = vld [vmem:[%s4520_s1 + $0x8b0] sm:$0xff] }
  0x7e   :  { %2295 = vmatprep.subr.mxu0 %v236_v5  ;;  %2328 = vmatprep.subr.mxu1 %v269_v6  ;;  %v335_v5 = vld [vmem:[%s4520_s1 + $0x9b8] sm:$0xff]  ;;  %v286_v6 = vld [vmem:[%s4520_s1 + $0x830] sm:$0xff] }
  0x7f   :  { %2296 = vmatpush3.msra.mxu0 %v220_v7  ;;  %2329 = vmatpush3.msra.mxu1 %v253_v9  ;;  %v319_v7 = vld [vmem:[%s4520_s1 + $0x938] sm:$0xff]  ;;  %v334_v9 = vld [vmem:[%s4520_s1 + $0x9b0] sm:$0xff] }
  0x80   :  { %2297 = vmatprep.subr.mxu0 %v235_v10  ;;  %2330 = vmatprep.subr.mxu1 %v268_v11  ;;  %v285_v10 = vld [vmem:[%s4520_s1 + $0x828] sm:$0xff]  ;;  %v318_v11 = vld [vmem:[%s4520_s1 + $0x930] sm:$0xff] }
  0x81   :  { %2298 = vmatpush3.msra.mxu0 %v219_v12  ;;  %2331 = vmatpush3.msra.mxu1 %v252_v13  ;;  %v300_v12 = vld [vmem:[%s4520_s1 + $0x8a0] sm:$0xff]  ;;  %v333_v13 = vld [vmem:[%s4520_s1 + $0x9a8] sm:$0xff] }
  0x82   :  { %2299 = vmatprep.subr.mxu0 %v234_v14  ;;  %2332 = vmatprep.subr.mxu1 %v267_v16  ;;  %v284_v14 = vld [vmem:[%s4520_s1 + $0x820] sm:$0xff]  ;;  %v317_v16 = vld [vmem:[%s4520_s1 + $0x928] sm:$0xff] }
  0x83   :  { %2300 = vmatpush3.msra.mxu0 %v218_v17  ;;  %2333 = vmatpush3.msra.mxu1 %v251_v19  ;;  %v299_v17 = vld [vmem:[%s4520_s1 + $0x898] sm:$0xff] }
  0x84   :  { %2301 = vmatprep.subr.mxu0 %v233_v20  ;;  %2334 = vmatprep.subr.mxu1 %v266_v21  ;;  %v283_v19 = vld [vmem:[%s4520_s1 + $0x818] sm:$0xff]  ;;  %v316_v20 = vld [vmem:[%s4520_s1 + $0x920] sm:$0xff]  ;;  %v298_v21 = vld [vmem:[%s4520_s1 + $0x890] sm:$0xff] }
  0x85   :  { %2302 = vmatpush3.msra.mxu0 %v217_v22  ;;  %2335 = vmatpush3.msra.mxu1 %v250_v23  ;;  %v668_v22 = vcombine.high %v19_v15, %v19_v15  ;;  %v331_v23 = vld [vmem:[%s4520_s1 + $0x998] sm:$0xff] }
  0x86   :  { %2303 = vmatprep.subr.mxu0 %v232_v24  ;;  %2336 = vmatprep.subr.mxu1 %v265_v26  ;;  %v282_v24 = vld [vmem:[%s4520_s1 + $0x810] sm:$0xff]  ;;  %v315_v26 = vld [vmem:[%s4520_s1 + $0x918] sm:$0xff] }
  0x87   :  { %2304 = vmatpush3.msra.mxu0 %v216_v27  ;;  %1271 = vmatprep.mubr.f32.mxu0 %v666_v28  ;;  %v297_v27 = vld [vmem:[%s4520_s1 + $0x888] sm:$0xff]  ;;  %v330_v28 = vld [vmem:[%s4520_s1 + $0x990] sm:$0xff] }
  0x88   :  { %2337 = vmatpush3.msra.mxu1 %v249_v29  ;;  %1272 = vmatmul.mubr.f32.vlgmr.msra.gmra.mxu0 %v658_v18  ;;  %v332_v18 = vld [vmem:[%s4520_s1 + $0x9a0] sm:$0xff]  ;;  %v281_v29 = vld [vmem:[%s4520_s1 + $0x808] sm:$0xff] }
  0x89   :  { %2338 = vmatprep.subr.mxu1 %v264_v30  ;;  %2343 = vmatprep.subr.mxu0 %v311_v31  ;;  %v314_v30 = vld [vmem:[%s4520_s1 + $0x910] sm:$0xff]  ;;  %v296_v31 = vld [vmem:[%s4520_s1 + $0x880] sm:$0xff] }
  0x8a   :  { %2339 = vmatpush3.msra.mxu1 %v248_v32  ;;  %1341 = vmatprep.mubr.f32.mxu1 %v667_v33  ;;  %v682_v32 = vrot.slane %v668_v22, %v2898_v48  ;;  %v329_v33 = vld [vmem:[%s4520_s1 + $0x988] sm:$0xff] }
  0x8b   :  { %2344 = vmatpush3.msra.mxu0 %v295_v34  ;;  %1342 = vmatmul.mubr.f32.vlgmr.msra.gmra.mxu1 %v665_v25  ;;  %v675_v25 = vrot.slane %v19_v15, %v2898_v48  ;;  %v280_v34 = vld [vmem:[%s4520_s1 + $0x800] sm:$0xff]  ;;  %v365_v15 = vld [vmem:[%s4520_s1 + $0xaa8] sm:$0xff] }
  0x8c   :  { %2345 = vmatprep.subr.mxu0 %v310_v35  ;;  %2378 = vmatprep.subr.mxu1 %v343_v36  ;;  %v313_v36 = vld [vmem:[%s4520_s1 + $0x908] sm:$0xff] }
  0x8d   :  { %2346 = vmatpush3.msra.mxu0 %v294_v37  ;;  %2379 = vmatpush3.msra.mxu1 %v327_v38  ;;  %v683_v35 = vcombine.high %v675_v25, %v675_v25  ;;  %v328_v37 = vld [vmem:[%s4520_s1 + $0x980] sm:$0xff]  ;;  %v375_v38 = vld [vmem:[%s4520_s1 + $0xaf8] sm:$0xff]  ;;  %v20_v22 = vld [vmem:[%s4519_s0 + $0x28] sm:$0xff] }
  0x8e   :  { %2347 = vmatprep.subr.mxu0 %v309_v39  ;;  %2380 = vmatprep.subr.mxu1 %v342_v40  ;;  %v312_v39 = vld [vmem:[%s4520_s1 + $0x900] sm:$0xff]  ;;  %v684_v40 = vcombine.high %v682_v32, %v682_v32 }
  0x8f   :  { %2348 = vmatpush3.msra.mxu0 %v293_v41  ;;  %2381 = vmatpush3.msra.mxu1 %v326_v42  ;;  %v359_v41 = vld [vmem:[%s4520_s1 + $0xa78] sm:$0xff]  ;;  %v374_v42 = vld [vmem:[%s4520_s1 + $0xaf0] sm:$0xff] }
  0x90   :  { %2349 = vmatprep.subr.mxu0 %v308_v43  ;;  %2382 = vmatprep.subr.mxu1 %v341_v44  ;;  %v407_v43 = vld [vmem:[%s4520_s1 + $0xbf8] sm:$0xff]  ;;  %v358_v44 = vld [vmem:[%s4520_s1 + $0xa70] sm:$0xff] }
  0x91   :  { %2350 = vmatpush3.msra.mxu0 %v292_v45  ;;  %2383 = vmatpush3.msra.mxu1 %v325_v46  ;;  %v391_v45 = vld [vmem:[%s4520_s1 + $0xb78] sm:$0xff]  ;;  %v373_v46 = vld [vmem:[%s4520_s1 + $0xae8] sm:$0xff] }
  0x92   :  { %2351 = vmatprep.subr.mxu0 %v307_v47  ;;  %2384 = vmatprep.subr.mxu1 %v340_v49  ;;  %v406_v47 = vld [vmem:[%s4520_s1 + $0xbf0] sm:$0xff]  ;;  %v357_v49 = vld [vmem:[%s4520_s1 + $0xa68] sm:$0xff] }
  0x93   :  { %2352 = vmatpush3.msra.mxu0 %v291_v50  ;;  %2385 = vmatpush3.msra.mxu1 %v324_v51  ;;  %v390_v50 = vld [vmem:[%s4520_s1 + $0xb70] sm:$0xff]  ;;  %v372_v51 = vld [vmem:[%s4520_s1 + $0xae0] sm:$0xff] }
  0x94   :  { %2353 = vmatprep.subr.mxu0 %v306_v52  ;;  %2386 = vmatprep.subr.mxu1 %v339_v53  ;;  %v405_v52 = vld [vmem:[%s4520_s1 + $0xbe8] sm:$0xff]  ;;  %v356_v53 = vld [vmem:[%s4520_s1 + $0xa60] sm:$0xff] }
  0x95   :  { %2354 = vmatpush3.msra.mxu0 %v290_v54  ;;  %2387 = vmatpush3.msra.mxu1 %v323_v55  ;;  %v389_v54 = vld [vmem:[%s4520_s1 + $0xb68] sm:$0xff]  ;;  %v371_v55 = vld [vmem:[%s4520_s1 + $0xad8] sm:$0xff] }
  0x96   :  { %2355 = vmatprep.subr.mxu0 %v305_v56  ;;  %2388 = vmatprep.subr.mxu1 %v338_v57  ;;  %v404_v56 = vld [vmem:[%s4520_s1 + $0xbe0] sm:$0xff]  ;;  %v355_v57 = vld [vmem:[%s4520_s1 + $0xa58] sm:$0xff] }
  0x97   :  { %2356 = vmatpush3.msra.mxu0 %v289_v58  ;;  %2389 = vmatpush3.msra.mxu1 %v322_v59  ;;  %v388_v58 = vld [vmem:[%s4520_s1 + $0xb60] sm:$0xff]  ;;  %v370_v59 = vld [vmem:[%s4520_s1 + $0xad0] sm:$0xff] }
  0x98   :  { %2357 = vmatprep.subr.mxu0 %v304_v60  ;;  %2390 = vmatprep.subr.mxu1 %v337_v61  ;;  %v403_v60 = vld [vmem:[%s4520_s1 + $0xbd8] sm:$0xff]  ;;  %v354_v61 = vld [vmem:[%s4520_s1 + $0xa50] sm:$0xff] }
  0x99   :  { %2358 = vmatpush3.msra.mxu0 %v288_v62  ;;  %2391 = vmatpush3.msra.mxu1 %v321_v63  ;;  %v387_v62 = vld [vmem:[%s4520_s1 + $0xb58] sm:$0xff]  ;;  %v369_v63 = vld [vmem:[%s4520_s1 + $0xac8] sm:$0xff] }
  0x9a   :  { %2359 = vmatprep.subr.mxu0 %v303_v0  ;;  %2392 = vmatprep.subr.mxu1 %v336_v1  ;;  %v402_v0 = vld [vmem:[%s4520_s1 + $0xbd0] sm:$0xff]  ;;  %v353_v1 = vld [vmem:[%s4520_s1 + $0xa48] sm:$0xff] }
  0x9b   :  { %2360 = vmatpush3.msra.mxu0 %v287_v2  ;;  %2393 = vmatpush3.msra.mxu1 %v320_v3  ;;  %v386_v2 = vld [vmem:[%s4520_s1 + $0xb50] sm:$0xff]  ;;  %v368_v3 = vld [vmem:[%s4520_s1 + $0xac0] sm:$0xff] }
  0x9c   :  { %2361 = vmatprep.subr.mxu0 %v302_v4  ;;  %2394 = vmatprep.subr.mxu1 %v335_v5  ;;  %v401_v4 = vld [vmem:[%s4520_s1 + $0xbc8] sm:$0xff]  ;;  %v352_v5 = vld [vmem:[%s4520_s1 + $0xa40] sm:$0xff] }
  0x9d   :  { %2362 = vmatpush3.msra.mxu0 %v286_v6  ;;  %2395 = vmatpush3.msra.mxu1 %v319_v7  ;;  %v385_v6 = vld [vmem:[%s4520_s1 + $0xb48] sm:$0xff]  ;;  %v367_v7 = vld [vmem:[%s4520_s1 + $0xab8] sm:$0xff] }
  0x9e   :  { %2363 = vmatprep.subr.mxu0 %v301_v8  ;;  %2396 = vmatprep.subr.mxu1 %v334_v9  ;;  %v400_v8 = vld [vmem:[%s4520_s1 + $0xbc0] sm:$0xff]  ;;  %v351_v9 = vld [vmem:[%s4520_s1 + $0xa38] sm:$0xff] }
  0x9f   :  { %2364 = vmatpush3.msra.mxu0 %v285_v10  ;;  %2397 = vmatpush3.msra.mxu1 %v318_v11  ;;  %v384_v10 = vld [vmem:[%s4520_s1 + $0xb40] sm:$0xff]  ;;  %v366_v11 = vld [vmem:[%s4520_s1 + $0xab0] sm:$0xff] }
  0xa0   :  { %2365 = vmatprep.subr.mxu0 %v300_v12  ;;  %2398 = vmatprep.subr.mxu1 %v333_v13  ;;  %v399_v12 = vld [vmem:[%s4520_s1 + $0xbb8] sm:$0xff]  ;;  %v350_v13 = vld [vmem:[%s4520_s1 + $0xa30] sm:$0xff] }
  0xa1   :  { %2366 = vmatpush3.msra.mxu0 %v284_v14  ;;  %2399 = vmatpush3.msra.mxu1 %v317_v16  ;;  %v383_v14 = vld [vmem:[%s4520_s1 + $0xb38] sm:$0xff]  ;;  %v398_v16 = vld [vmem:[%s4520_s1 + $0xbb0] sm:$0xff] }
  0xa2   :  { %2367 = vmatprep.subr.mxu0 %v299_v17  ;;  %2400 = vmatprep.subr.mxu1 %v332_v18  ;;  %v349_v17 = vld [vmem:[%s4520_s1 + $0xa28] sm:$0xff]  ;;  %v382_v18 = vld [vmem:[%s4520_s1 + $0xb30] sm:$0xff] }
  0xa3   :  { %2368 = vmatpush3.msra.mxu0 %v283_v19  ;;  %2401 = vmatpush3.msra.mxu1 %v316_v20  ;;  %v364_v19 = vld [vmem:[%s4520_s1 + $0xaa0] sm:$0xff]  ;;  %v397_v20 = vld [vmem:[%s4520_s1 + $0xba8] sm:$0xff] }
  0xa4   :  { %2369 = vmatprep.subr.mxu0 %v298_v21  ;;  %2402 = vmatprep.subr.mxu1 %v331_v23  ;;  %v348_v21 = vld [vmem:[%s4520_s1 + $0xa20] sm:$0xff] }
  0xa5   :  { %2370 = vmatpush3.msra.mxu0 %v282_v24  ;;  %2403 = vmatpush3.msra.mxu1 %v315_v26 }
  0xa6   :  { %2371 = vmatprep.subr.mxu0 %v297_v27  ;;  %2404 = vmatprep.subr.mxu1 %v330_v28 }
  0xa7   :  { %2372 = vmatpush3.msra.mxu0 %v281_v29  ;;  %2405 = vmatpush3.msra.mxu1 %v314_v30 }
  0xa8   :  { %2373 = vmatprep.subr.mxu0 %v296_v31  ;;  %2406 = vmatprep.subr.mxu1 %v329_v33 }
  0xa9   :  { %2374 = vmatpush3.msra.mxu0 %v280_v34  ;;  %1411 = vmatprep.mubr.f32.mxu0 %v683_v35 }
  0xaa   :  { %2407 = vmatpush3.msra.mxu1 %v313_v36  ;;  %1412 = vmatmul.mubr.f32.vlgmr.msra.gmra.mxu0 %v675_v25 }
  0xab   :  { %2408 = vmatprep.subr.mxu1 %v328_v37  ;;  %2413 = vmatprep.subr.mxu0 %v375_v38 }
  0xac   :  { %2409 = vmatpush3.msra.mxu1 %v312_v39  ;;  %1481 = vmatprep.mubr.f32.mxu1 %v684_v40 }
  0xad   :  { %2414 = vmatpush3.msra.mxu0 %v359_v41  ;;  %1482 = vmatmul.mubr.f32.vlgmr.msra.gmra.mxu1 %v682_v32 }
  0xae   :  { %2415 = vmatprep.subr.mxu0 %v374_v42  ;;  %2448 = vmatprep.subr.mxu1 %v407_v43 }
  0xaf   :  { %2416 = vmatpush3.msra.mxu0 %v358_v44  ;;  %2449 = vmatpush3.msra.mxu1 %v391_v45 }
  0xb0   :  { %2417 = vmatprep.subr.mxu0 %v373_v46  ;;  %2450 = vmatprep.subr.mxu1 %v406_v47 }
  0xb1   :  { %2418 = vmatpush3.msra.mxu0 %v357_v49  ;;  %2451 = vmatpush3.msra.mxu1 %v390_v50 }
  0xb2   :  { %2419 = vmatprep.subr.mxu0 %v372_v51  ;;  %2452 = vmatprep.subr.mxu1 %v405_v52 }
  0xb3   :  { %2420 = vmatpush3.msra.mxu0 %v356_v53  ;;  %2453 = vmatpush3.msra.mxu1 %v389_v54 }
  0xb4   :  { %2421 = vmatprep.subr.mxu0 %v371_v55  ;;  %2454 = vmatprep.subr.mxu1 %v404_v56 }
  0xb5   :  { %2422 = vmatpush3.msra.mxu0 %v355_v57  ;;  %2455 = vmatpush3.msra.mxu1 %v388_v58 }
  0xb6   :  { %2423 = vmatprep.subr.mxu0 %v370_v59  ;;  %2456 = vmatprep.subr.mxu1 %v403_v60 }
  0xb7   :  { %2424 = vmatpush3.msra.mxu0 %v354_v61  ;;  %2457 = vmatpush3.msra.mxu1 %v387_v62 }
  0xb8   :  { %2425 = vmatprep.subr.mxu0 %v369_v63  ;;  %2458 = vmatprep.subr.mxu1 %v402_v0 }
  0xb9   :  { %2426 = vmatpush3.msra.mxu0 %v353_v1  ;;  %2459 = vmatpush3.msra.mxu1 %v386_v2 }
  0xba   :  { %2427 = vmatprep.subr.mxu0 %v368_v3  ;;  %2460 = vmatprep.subr.mxu1 %v401_v4 }
  0xbb   :  { %2428 = vmatpush3.msra.mxu0 %v352_v5  ;;  %2461 = vmatpush3.msra.mxu1 %v385_v6 }
  0xbc   :  { %2429 = vmatprep.subr.mxu0 %v367_v7  ;;  %2462 = vmatprep.subr.mxu1 %v400_v8 }
  0xbd   :  { %2430 = vmatpush3.msra.mxu0 %v351_v9  ;;  %2463 = vmatpush3.msra.mxu1 %v384_v10 }
  0xbe   :  { %2431 = vmatprep.subr.mxu0 %v366_v11  ;;  %2464 = vmatprep.subr.mxu1 %v399_v12 }
  0xbf   :  { %2432 = vmatpush3.msra.mxu0 %v350_v13  ;;  %2465 = vmatpush3.msra.mxu1 %v383_v14 }
  0xc0   :  { %2433 = vmatprep.subr.mxu0 %v365_v15 }
  0xc1   :  { %8 = vsyncpa [#allocation3], 0  ;;  %2466 = vmatprep.subr.mxu1 %v398_v16  ;;  %2434 = vmatpush3.msra.mxu0 %v349_v17  ;;  %v381_v23 = vld [vmem:[%s4520_s1 + $0xb28] sm:$0xff]  ;;  %v363_v24 = vld [vmem:[%s4520_s1 + $0xa98] sm:$0xff]  ;;  %v685_v29 = vcombine.high %v20_v22, %v20_v22  ;;  %v692_v32 = vrot.slane %v20_v22, %v2898_v48  ;;  %vm2747_vm0 = vmmov 0  }
  0xc2   :  { %2467 = vmatpush3.msra.mxu1 %v382_v18  ;;  %2435 = vmatprep.subr.mxu0 %v364_v19  ;;  %v396_v25 = vld [vmem:[%s4520_s1 + $0xba0] sm:$0xff]  ;;  %v347_v26 = vld [vmem:[%s4520_s1 + $0xa18] sm:$0xff]  ;;  %v362_v28 = vld [vmem:[%s4520_s1 + $0xa90] sm:$0xff] }
  0xc3   :  { %2468 = vmatprep.subr.mxu1 %v397_v20  ;;  %2436 = vmatpush3.msra.mxu0 %v348_v21  ;;  %v380_v27 = vld [vmem:[%s4520_s1 + $0xb20] sm:$0xff]  ;;  %v395_v30 = vld [vmem:[%s4520_s1 + $0xb98] sm:$0xff]  ;;  %v346_v31 = vld [vmem:[%s4520_s1 + $0xa10] sm:$0xff]  ;;  %v699_v39 = vrot.slane %v685_v29, %v2898_v48  ;;  %v700_v42 = vcombine.high %v692_v32, %v692_v32 }
  0xc4   :  { %2469 = vmatpush3.msra.mxu1 %v381_v23  ;;  %2437 = vmatprep.subr.mxu0 %v363_v24  ;;  %v379_v33 = vld [vmem:[%s4520_s1 + $0xb18] sm:$0xff]  ;;  %v361_v34 = vld [vmem:[%s4520_s1 + $0xa88] sm:$0xff]  ;;  %v394_v35 = vld [vmem:[%s4520_s1 + $0xb90] sm:$0xff] }
  0xc5   :  { %2470 = vmatprep.subr.mxu1 %v396_v25  ;;  %2438 = vmatpush3.msra.mxu0 %v347_v26  ;;  %v345_v36 = vld [vmem:[%s4520_s1 + $0xa08] sm:$0xff]  ;;  %v378_v37 = vld [vmem:[%s4520_s1 + $0xb10] sm:$0xff]  ;;  %v360_v38 = vld [vmem:[%s4520_s1 + $0xa80] sm:$0xff]  ;;  %v701_v47 = vcombine.high %v699_v39, %v699_v39 }
  0xc6   :  { %2471 = vmatpush3.msra.mxu1 %v380_v27  ;;  %2439 = vmatprep.subr.mxu0 %v362_v28  ;;  %v393_v40 = vld [vmem:[%s4520_s1 + $0xb88] sm:$0xff]  ;;  %v344_v41 = vld [vmem:[%s4520_s1 + $0xa00] sm:$0xff]  ;;  %v439_v45 = vld [vmem:[%s4520_s1 + $0xcf8] sm:$0xff] }
  0xc7   :  { %2472 = vmatprep.subr.mxu1 %v395_v30  ;;  %2440 = vmatpush3.msra.mxu0 %v346_v31  ;;  %v377_v43 = vld [vmem:[%s4520_s1 + $0xb08] sm:$0xff]  ;;  %v392_v44 = vld [vmem:[%s4520_s1 + $0xb80] sm:$0xff]  ;;  %v423_v49 = vld [vmem:[%s4520_s1 + $0xc78] sm:$0xff] }
  0xc8   :  { %2473 = vmatpush3.msra.mxu1 %v379_v33  ;;  %2441 = vmatprep.subr.mxu0 %v361_v34  ;;  %v376_v46 = vld [vmem:[%s4520_s1 + $0xb00] sm:$0xff]  ;;  %v438_v50 = vld [vmem:[%s4520_s1 + $0xcf0] sm:$0xff]  ;;  %v471_v51 = vld [vmem:[%s4520_s1 + $0xdf8] sm:$0xff] }
  0xc9   :  { %2474 = vmatprep.subr.mxu1 %v394_v35  ;;  %2442 = vmatpush3.msra.mxu0 %v345_v36  ;;  %v422_v52 = vld [vmem:[%s4520_s1 + $0xc70] sm:$0xff]  ;;  %v455_v53 = vld [vmem:[%s4520_s1 + $0xd78] sm:$0xff]  ;;  %v437_v54 = vld [vmem:[%s4520_s1 + $0xce8] sm:$0xff] }
  0xca   :  { %2475 = vmatpush3.msra.mxu1 %v378_v37  ;;  %2443 = vmatprep.subr.mxu0 %v360_v38  ;;  %v470_v55 = vld [vmem:[%s4520_s1 + $0xdf0] sm:$0xff]  ;;  %v421_v56 = vld [vmem:[%s4520_s1 + $0xc68] sm:$0xff]  ;;  %v436_v58 = vld [vmem:[%s4520_s1 + $0xce0] sm:$0xff] }
  0xcb   :  { %2476 = vmatprep.subr.mxu1 %v393_v40  ;;  %2444 = vmatpush3.msra.mxu0 %v344_v41  ;;  %v454_v57 = vld [vmem:[%s4520_s1 + $0xd70] sm:$0xff]  ;;  %v469_v59 = vld [vmem:[%s4520_s1 + $0xde8] sm:$0xff]  ;;  %v420_v60 = vld [vmem:[%s4520_s1 + $0xc60] sm:$0xff] }
  0xcc   :  { %1551 = vmatprep.mubr.f32.mxu0 %v700_v42  ;;  %2477 = vmatpush3.msra.mxu1 %v377_v43  ;;  %v453_v61 = vld [vmem:[%s4520_s1 + $0xd68] sm:$0xff]  ;;  %v435_v62 = vld [vmem:[%s4520_s1 + $0xcd8] sm:$0xff]  ;;  %v468_v63 = vld [vmem:[%s4520_s1 + $0xde0] sm:$0xff] }
  0xcd   :  { %1552 = vmatmul.mubr.f32.vlgmr.msra.gmra.mxu0 %v692_v32  ;;  %2478 = vmatprep.subr.mxu1 %v392_v44  ;;  %v419_v0 = vld [vmem:[%s4520_s1 + $0xc58] sm:$0xff]  ;;  %v452_v1 = vld [vmem:[%s4520_s1 + $0xd60] sm:$0xff]  ;;  %v434_v2 = vld [vmem:[%s4520_s1 + $0xcd0] sm:$0xff] }
  0xce   :  { %2483 = vmatprep.subr.mxu0 %v439_v45  ;;  %2479 = vmatpush3.msra.mxu1 %v376_v46  ;;  %v467_v3 = vld [vmem:[%s4520_s1 + $0xdd8] sm:$0xff]  ;;  %v418_v4 = vld [vmem:[%s4520_s1 + $0xc50] sm:$0xff]  ;;  %v433_v6 = vld [vmem:[%s4520_s1 + $0xcc8] sm:$0xff] }
  0xcf   :  { %1621 = vmatprep.mubr.f32.mxu1 %v701_v47  ;;  %2484 = vmatpush3.msra.mxu0 %v423_v49  ;;  %v451_v5 = vld [vmem:[%s4520_s1 + $0xd58] sm:$0xff]  ;;  %v466_v7 = vld [vmem:[%s4520_s1 + $0xdd0] sm:$0xff]  ;;  %v417_v8 = vld [vmem:[%s4520_s1 + $0xc48] sm:$0xff] }
  0xd0   :  { %1622 = vmatmul.mubr.f32.vlgmr.msra.gmra.mxu1 %v699_v39  ;;  %2485 = vmatprep.subr.mxu0 %v438_v50  ;;  %v450_v9 = vld [vmem:[%s4520_s1 + $0xd50] sm:$0xff]  ;;  %v432_v10 = vld [vmem:[%s4520_s1 + $0xcc0] sm:$0xff]  ;;  %v465_v11 = vld [vmem:[%s4520_s1 + $0xdc8] sm:$0xff] }
  0xd1   :  { %2518 = vmatprep.subr.mxu1 %v471_v51  ;;  %2486 = vmatpush3.msra.mxu0 %v422_v52  ;;  %v416_v12 = vld [vmem:[%s4520_s1 + $0xc40] sm:$0xff]  ;;  %v449_v13 = vld [vmem:[%s4520_s1 + $0xd48] sm:$0xff]  ;;  %v431_v14 = vld [vmem:[%s4520_s1 + $0xcb8] sm:$0xff] }
  0xd2   :  { %2519 = vmatpush3.msra.mxu1 %v455_v53  ;;  %2487 = vmatprep.subr.mxu0 %v437_v54  ;;  %v464_v15 = vld [vmem:[%s4520_s1 + $0xdc0] sm:$0xff]  ;;  %v415_v16 = vld [vmem:[%s4520_s1 + $0xc38] sm:$0xff]  ;;  %v430_v18 = vld [vmem:[%s4520_s1 + $0xcb0] sm:$0xff] }
  0xd3   :  { %2520 = vmatprep.subr.mxu1 %v470_v55  ;;  %2488 = vmatpush3.msra.mxu0 %v421_v56  ;;  %v448_v17 = vld [vmem:[%s4520_s1 + $0xd40] sm:$0xff]  ;;  %v463_v19 = vld [vmem:[%s4520_s1 + $0xdb8] sm:$0xff]  ;;  %v414_v20 = vld [vmem:[%s4520_s1 + $0xc30] sm:$0xff] }
  0xd4   :  { %2521 = vmatpush3.msra.mxu1 %v454_v57  ;;  %2489 = vmatprep.subr.mxu0 %v436_v58  ;;  %v447_v21 = vld [vmem:[%s4520_s1 + $0xd38] sm:$0xff]  ;;  %v429_v22 = vld [vmem:[%s4520_s1 + $0xca8] sm:$0xff]  ;;  %v462_v23 = vld [vmem:[%s4520_s1 + $0xdb0] sm:$0xff] }
  0xd5   :  { %2522 = vmatprep.subr.mxu1 %v469_v59  ;;  %2490 = vmatpush3.msra.mxu0 %v420_v60  ;;  %v413_v24 = vld [vmem:[%s4520_s1 + $0xc28] sm:$0xff]  ;;  %v446_v25 = vld [vmem:[%s4520_s1 + $0xd30] sm:$0xff]  ;;  %v428_v26 = vld [vmem:[%s4520_s1 + $0xca0] sm:$0xff] }
  0xd6   :  { %2523 = vmatpush3.msra.mxu1 %v453_v61  ;;  %2491 = vmatprep.subr.mxu0 %v435_v62  ;;  %v461_v27 = vld [vmem:[%s4520_s1 + $0xda8] sm:$0xff]  ;;  %v412_v28 = vld [vmem:[%s4520_s1 + $0xc20] sm:$0xff]  ;;  %v21_v29 = vld [vmem:[%s4519_s0 + $0x30] sm:$0xff] }
  0xd7   :  { %2524 = vmatprep.subr.mxu1 %v468_v63  ;;  %2492 = vmatpush3.msra.mxu0 %v419_v0  ;;  %v445_v30 = vld [vmem:[%s4520_s1 + $0xd28] sm:$0xff]  ;;  %v427_v31 = vld [vmem:[%s4520_s1 + $0xc98] sm:$0xff]  ;;  %v460_v32 = vld [vmem:[%s4520_s1 + $0xda0] sm:$0xff]  ;;  %v702_v36 = vcombine.high %v21_v29, %v21_v29  ;;  %v709_v39 = vrot.slane %v21_v29, %v2898_v48 }
  0xd8   :  { %2525 = vmatpush3.msra.mxu1 %v452_v1  ;;  %2493 = vmatprep.subr.mxu0 %v434_v2  ;;  %v411_v33 = vld [vmem:[%s4520_s1 + $0xc18] sm:$0xff]  ;;  %v444_v34 = vld [vmem:[%s4520_s1 + $0xd20] sm:$0xff]  ;;  %v426_v35 = vld [vmem:[%s4520_s1 + $0xc90] sm:$0xff] }
  0xd9   :  { %2526 = vmatprep.subr.mxu1 %v467_v3  ;;  %2494 = vmatpush3.msra.mxu0 %v418_v4  ;;  %v459_v37 = vld [vmem:[%s4520_s1 + $0xd98] sm:$0xff]  ;;  %v410_v38 = vld [vmem:[%s4520_s1 + $0xc10] sm:$0xff]  ;;  %v425_v41 = vld [vmem:[%s4520_s1 + $0xc88] sm:$0xff]  ;;  %v716_v46 = vrot.slane %v702_v36, %v2898_v48  ;;  %v717_v50 = vcombine.high %v709_v39, %v709_v39 }
  0xda   :  { %2527 = vmatpush3.msra.mxu1 %v451_v5  ;;  %2495 = vmatprep.subr.mxu0 %v433_v6  ;;  %v443_v40 = vld [vmem:[%s4520_s1 + $0xd18] sm:$0xff]  ;;  %v458_v42 = vld [vmem:[%s4520_s1 + $0xd90] sm:$0xff]  ;;  %v409_v43 = vld [vmem:[%s4520_s1 + $0xc08] sm:$0xff] }
  0xdb   :  { %2528 = vmatprep.subr.mxu1 %v466_v7  ;;  %2496 = vmatpush3.msra.mxu0 %v417_v8  ;;  %v442_v44 = vld [vmem:[%s4520_s1 + $0xd10] sm:$0xff]  ;;  %v424_v45 = vld [vmem:[%s4520_s1 + $0xc80] sm:$0xff]  ;;  %v457_v47 = vld [vmem:[%s4520_s1 + $0xd88] sm:$0xff]  ;;  %v718_v55 = vcombine.high %v716_v46, %v716_v46 }
  0xdc   :  { %2529 = vmatpush3.msra.mxu1 %v450_v9  ;;  %2497 = vmatprep.subr.mxu0 %v432_v10  ;;  %v408_v49 = vld [vmem:[%s4520_s1 + $0xc00] sm:$0xff]  ;;  %v441_v51 = vld [vmem:[%s4520_s1 + $0xd08] sm:$0xff]  ;;  %v503_v53 = vld [vmem:[%s4520_s1 + $0xef8] sm:$0xff] }
  0xdd   :  { %2530 = vmatprep.subr.mxu1 %v465_v11  ;;  %2498 = vmatpush3.msra.mxu0 %v416_v12  ;;  %v456_v52 = vld [vmem:[%s4520_s1 + $0xd80] sm:$0xff]  ;;  %v487_v56 = vld [vmem:[%s4520_s1 + $0xe78] sm:$0xff]  ;;  %v502_v57 = vld [vmem:[%s4520_s1 + $0xef0] sm:$0xff] }
  0xde   :  { %2531 = vmatpush3.msra.mxu1 %v449_v13  ;;  %2499 = vmatprep.subr.mxu0 %v431_v14  ;;  %v440_v54 = vld [vmem:[%s4520_s1 + $0xd00] sm:$0xff]  ;;  %v535_v58 = vld [vmem:[%s4520_s1 + $0xff8] sm:$0xff]  ;;  %v486_v59 = vld [vmem:[%s4520_s1 + $0xe70] sm:$0xff] }
  0xdf   :  { %2532 = vmatprep.subr.mxu1 %v464_v15  ;;  %2500 = vmatpush3.msra.mxu0 %v415_v16  ;;  %v519_v60 = vld [vmem:[%s4520_s1 + $0xf78] sm:$0xff]  ;;  %v501_v61 = vld [vmem:[%s4520_s1 + $0xee8] sm:$0xff]  ;;  %v534_v62 = vld [vmem:[%s4520_s1 + $0xff0] sm:$0xff] }
  0xe0   :  { %2533 = vmatpush3.msra.mxu1 %v448_v17  ;;  %2501 = vmatprep.subr.mxu0 %v430_v18  ;;  %v485_v63 = vld [vmem:[%s4520_s1 + $0xe68] sm:$0xff]  ;;  %v518_v0 = vld [vmem:[%s4520_s1 + $0xf70] sm:$0xff]  ;;  %v500_v1 = vld [vmem:[%s4520_s1 + $0xee0] sm:$0xff] }
  0xe1   :  { %2534 = vmatprep.subr.mxu1 %v463_v19  ;;  %2502 = vmatpush3.msra.mxu0 %v414_v20  ;;  %v533_v2 = vld [vmem:[%s4520_s1 + $0xfe8] sm:$0xff]  ;;  %v484_v3 = vld [vmem:[%s4520_s1 + $0xe60] sm:$0xff]  ;;  %v499_v5 = vld [vmem:[%s4520_s1 + $0xed8] sm:$0xff] }
  0xe2   :  { %2535 = vmatpush3.msra.mxu1 %v447_v21  ;;  %2503 = vmatprep.subr.mxu0 %v429_v22  ;;  %v517_v4 = vld [vmem:[%s4520_s1 + $0xf68] sm:$0xff]  ;;  %v532_v6 = vld [vmem:[%s4520_s1 + $0xfe0] sm:$0xff]  ;;  %v483_v7 = vld [vmem:[%s4520_s1 + $0xe58] sm:$0xff] }
  0xe3   :  { %2536 = vmatprep.subr.mxu1 %v462_v23  ;;  %2504 = vmatpush3.msra.mxu0 %v413_v24  ;;  %v516_v8 = vld [vmem:[%s4520_s1 + $0xf60] sm:$0xff]  ;;  %v498_v9 = vld [vmem:[%s4520_s1 + $0xed0] sm:$0xff]  ;;  %v531_v10 = vld [vmem:[%s4520_s1 + $0xfd8] sm:$0xff] }
  0xe4   :  { %2537 = vmatpush3.msra.mxu1 %v446_v25  ;;  %2505 = vmatprep.subr.mxu0 %v428_v26  ;;  %v482_v11 = vld [vmem:[%s4520_s1 + $0xe50] sm:$0xff]  ;;  %v515_v12 = vld [vmem:[%s4520_s1 + $0xf58] sm:$0xff]  ;;  %v497_v13 = vld [vmem:[%s4520_s1 + $0xec8] sm:$0xff] }
  0xe5   :  { %2538 = vmatprep.subr.mxu1 %v461_v27  ;;  %2506 = vmatpush3.msra.mxu0 %v412_v28  ;;  %v530_v14 = vld [vmem:[%s4520_s1 + $0xfd0] sm:$0xff]  ;;  %v481_v15 = vld [vmem:[%s4520_s1 + $0xe48] sm:$0xff]  ;;  %v496_v17 = vld [vmem:[%s4520_s1 + $0xec0] sm:$0xff] }
  0xe6   :  { %2539 = vmatpush3.msra.mxu1 %v445_v30  ;;  %2507 = vmatprep.subr.mxu0 %v427_v31  ;;  %v514_v16 = vld [vmem:[%s4520_s1 + $0xf50] sm:$0xff]  ;;  %v529_v18 = vld [vmem:[%s4520_s1 + $0xfc8] sm:$0xff]  ;;  %v480_v19 = vld [vmem:[%s4520_s1 + $0xe40] sm:$0xff] }
  0xe7   :  { %2540 = vmatprep.subr.mxu1 %v460_v32  ;;  %2508 = vmatpush3.msra.mxu0 %v411_v33  ;;  %v513_v20 = vld [vmem:[%s4520_s1 + $0xf48] sm:$0xff]  ;;  %v495_v21 = vld [vmem:[%s4520_s1 + $0xeb8] sm:$0xff]  ;;  %v528_v22 = vld [vmem:[%s4520_s1 + $0xfc0] sm:$0xff] }
  0xe8   :  { %2541 = vmatpush3.msra.mxu1 %v444_v34  ;;  %2509 = vmatprep.subr.mxu0 %v426_v35  ;;  %v479_v23 = vld [vmem:[%s4520_s1 + $0xe38] sm:$0xff]  ;;  %v512_v24 = vld [vmem:[%s4520_s1 + $0xf40] sm:$0xff]  ;;  %v494_v25 = vld [vmem:[%s4520_s1 + $0xeb0] sm:$0xff] }
  0xe9   :  { %2542 = vmatprep.subr.mxu1 %v459_v37  ;;  %2510 = vmatpush3.msra.mxu0 %v410_v38  ;;  %v527_v26 = vld [vmem:[%s4520_s1 + $0xfb8] sm:$0xff]  ;;  %v478_v27 = vld [vmem:[%s4520_s1 + $0xe30] sm:$0xff]  ;;  %v493_v29 = vld [vmem:[%s4520_s1 + $0xea8] sm:$0xff] }
  0xea   :  { %2543 = vmatpush3.msra.mxu1 %v443_v40  ;;  %2511 = vmatprep.subr.mxu0 %v425_v41  ;;  %v511_v28 = vld [vmem:[%s4520_s1 + $0xf38] sm:$0xff]  ;;  %v526_v30 = vld [vmem:[%s4520_s1 + $0xfb0] sm:$0xff]  ;;  %v477_v31 = vld [vmem:[%s4520_s1 + $0xe28] sm:$0xff] }
  0xeb   :  { %2544 = vmatprep.subr.mxu1 %v458_v42  ;;  %2512 = vmatpush3.msra.mxu0 %v409_v43  ;;  %v510_v32 = vld [vmem:[%s4520_s1 + $0xf30] sm:$0xff]  ;;  %v492_v33 = vld [vmem:[%s4520_s1 + $0xea0] sm:$0xff]  ;;  %v525_v34 = vld [vmem:[%s4520_s1 + $0xfa8] sm:$0xff] }
  0xec   :  { %2545 = vmatpush3.msra.mxu1 %v442_v44  ;;  %2513 = vmatprep.subr.mxu0 %v424_v45  ;;  %v476_v35 = vld [vmem:[%s4520_s1 + $0xe20] sm:$0xff]  ;;  %v22_v36 = vld [vmem:[%s4519_s0 + $0x38] sm:$0xff]  ;;  %v509_v37 = vld [vmem:[%s4520_s1 + $0xf28] sm:$0xff] }
  0xed   :  { %2546 = vmatprep.subr.mxu1 %v457_v47  ;;  %2514 = vmatpush3.msra.mxu0 %v408_v49  ;;  %v491_v38 = vld [vmem:[%s4520_s1 + $0xe98] sm:$0xff]  ;;  %v508_v41 = vld [vmem:[%s4520_s1 + $0xf20] sm:$0xff]  ;;  %v490_v42 = vld [vmem:[%s4520_s1 + $0xe90] sm:$0xff]  ;;  %v719_v43 = vcombine.high %v22_v36, %v22_v36 }
  0xee   :  { %1691 = vmatprep.mubr.f32.mxu0 %v717_v50  ;;  %2547 = vmatpush3.msra.mxu1 %v441_v51  ;;  %v475_v40 = vld [vmem:[%s4520_s1 + $0xe18] sm:$0xff]  ;;  %v474_v45 = vld [vmem:[%s4520_s1 + $0xe10] sm:$0xff]  ;;  %v489_v49 = vld [vmem:[%s4520_s1 + $0xe88] sm:$0xff] }
  0xef   :  { %1692 = vmatmul.mubr.f32.vlgmr.msra.gmra.mxu0 %v709_v39  ;;  %2548 = vmatprep.subr.mxu1 %v456_v52  ;;  %v524_v39 = vld [vmem:[%s4520_s1 + $0xfa0] sm:$0xff]  ;;  %v523_v44 = vld [vmem:[%s4520_s1 + $0xf98] sm:$0xff]  ;;  %v522_v50 = vld [vmem:[%s4520_s1 + $0xf90] sm:$0xff] }
  0xf0   :  { %2553 = vmatprep.subr.mxu0 %v503_v53  ;;  %2549 = vmatpush3.msra.mxu1 %v440_v54  ;;  %v507_v47 = vld [vmem:[%s4520_s1 + $0xf18] sm:$0xff]  ;;  %v473_v51 = vld [vmem:[%s4520_s1 + $0xe08] sm:$0xff]  ;;  %v506_v52 = vld [vmem:[%s4520_s1 + $0xf10] sm:$0xff]  ;;  %v733_v54 = vrot.slane %v719_v43, %v2898_v48 }
  0xf1   :  { %1761 = vmatprep.mubr.f32.mxu1 %v718_v55  ;;  %2554 = vmatpush3.msra.mxu0 %v487_v56  ;;  %v488_v53 = vld [vmem:[%s4520_s1 + $0xe80] sm:$0xff]  ;;  %v521_v55 = vld [vmem:[%s4520_s1 + $0xf88] sm:$0xff] }
  0xf2   :  { %1762 = vmatmul.mubr.f32.vlgmr.msra.gmra.mxu1 %v716_v46  ;;  %2555 = vmatprep.subr.mxu0 %v502_v57  ;;  %v726_v46 = vrot.slane %v22_v36, %v2898_v48  ;;  %v472_v56 = vld [vmem:[%s4520_s1 + $0xe00] sm:$0xff]  ;;  %v539_v36 = vld [vmem:[%s4520_s1 + $0x1018] sm:$0xff]  ;;  %v537_v43 = vld [vmem:[%s4520_s1 + $0x1008] sm:$0xff] }
  0xf3   :  { %2588 = vmatprep.subr.mxu1 %v535_v58  ;;  %2556 = vmatpush3.msra.mxu0 %v486_v59  ;;  %v505_v58 = vld [vmem:[%s4520_s1 + $0xf08] sm:$0xff]  ;;  %v520_v59 = vld [vmem:[%s4520_s1 + $0xf80] sm:$0xff] }
  0xf4   :  { %2589 = vmatpush3.msra.mxu1 %v519_v60  ;;  %2557 = vmatprep.subr.mxu0 %v501_v61  ;;  %v734_v57 = vcombine.high %v726_v46, %v726_v46  ;;  %v567_v60 = vld [vmem:[%s4520_s1 + $0x10f8] sm:$0xff]  ;;  %v504_v61 = vld [vmem:[%s4520_s1 + $0xf00] sm:$0xff] }
  0xf5   :  { %2590 = vmatprep.subr.mxu1 %v534_v62  ;;  %2558 = vmatpush3.msra.mxu0 %v485_v63  ;;  %v735_v62 = vcombine.high %v733_v54, %v733_v54  ;;  %v551_v63 = vld [vmem:[%s4520_s1 + $0x1078] sm:$0xff] }
  0xf6   :  { %2591 = vmatpush3.msra.mxu1 %v518_v0  ;;  %2559 = vmatprep.subr.mxu0 %v500_v1  ;;  %v566_v0 = vld [vmem:[%s4520_s1 + $0x10f0] sm:$0xff] }
  0xf7   :  { %2592 = vmatprep.subr.mxu1 %v533_v2  ;;  %2560 = vmatpush3.msra.mxu0 %v484_v3  ;;  %v550_v1 = vld [vmem:[%s4520_s1 + $0x1070] sm:$0xff]  ;;  %v565_v2 = vld [vmem:[%s4520_s1 + $0x10e8] sm:$0xff]  ;;  %v583_v3 = vld [vmem:[%s4520_s1 + $0x1178] sm:$0xff] }
  0xf8   :  { %2593 = vmatpush3.msra.mxu1 %v517_v4  ;;  %2561 = vmatprep.subr.mxu0 %v499_v5  ;;  %v549_v4 = vld [vmem:[%s4520_s1 + $0x1068] sm:$0xff]  ;;  %v2746_v5 = vmov 0.0  }
  0xf9   :  { %2594 = vmatprep.subr.mxu1 %v532_v6  ;;  %2562 = vmatpush3.msra.mxu0 %v483_v7  ;;  %v564_v6 = vld [vmem:[%s4520_s1 + $0x10e0] sm:$0xff]  ;;  %v582_v7 = vld [vmem:[%s4520_s1 + $0x1170] sm:$0xff] }
  0xfa   :  { %2595 = vmatpush3.msra.mxu1 %v516_v8  ;;  %2563 = vmatprep.subr.mxu0 %v498_v9  ;;  %v548_v8 = vld [vmem:[%s4520_s1 + $0x1060] sm:$0xff]  ;;  %v563_v9 = vld [vmem:[%s4520_s1 + $0x10d8] sm:$0xff] }
  0xfb   :  { %2596 = vmatprep.subr.mxu1 %v531_v10  ;;  %2564 = vmatpush3.msra.mxu0 %v482_v11  ;;  %v581_v10 = vld [vmem:[%s4520_s1 + $0x1168] sm:$0xff]  ;;  %v547_v11 = vld [vmem:[%s4520_s1 + $0x1058] sm:$0xff] }
  0xfc   :  { %2597 = vmatpush3.msra.mxu1 %v515_v12  ;;  %2565 = vmatprep.subr.mxu0 %v497_v13  ;;  %v562_v12 = vld [vmem:[%s4520_s1 + $0x10d0] sm:$0xff]  ;;  %v580_v13 = vld [vmem:[%s4520_s1 + $0x1160] sm:$0xff] }
  0xfd   :  { %2598 = vmatprep.subr.mxu1 %v530_v14  ;;  %2566 = vmatpush3.msra.mxu0 %v481_v15  ;;  %v546_v14 = vld [vmem:[%s4520_s1 + $0x1050] sm:$0xff]  ;;  %v561_v15 = vld [vmem:[%s4520_s1 + $0x10c8] sm:$0xff] }
  0xfe   :  { %2599 = vmatpush3.msra.mxu1 %v514_v16  ;;  %2567 = vmatprep.subr.mxu0 %v496_v17  ;;  %v579_v16 = vld [vmem:[%s4520_s1 + $0x1158] sm:$0xff]  ;;  %v545_v17 = vld [vmem:[%s4520_s1 + $0x1048] sm:$0xff] }
  0xff   :  { %2600 = vmatprep.subr.mxu1 %v529_v18  ;;  %2568 = vmatpush3.msra.mxu0 %v480_v19  ;;  %v560_v18 = vld [vmem:[%s4520_s1 + $0x10c0] sm:$0xff]  ;;  %v578_v19 = vld [vmem:[%s4520_s1 + $0x1150] sm:$0xff] }
 0x100   :  { %2601 = vmatpush3.msra.mxu1 %v513_v20  ;;  %2569 = vmatprep.subr.mxu0 %v495_v21  ;;  %v544_v20 = vld [vmem:[%s4520_s1 + $0x1040] sm:$0xff]  ;;  %v559_v21 = vld [vmem:[%s4520_s1 + $0x10b8] sm:$0xff] }
 0x101   :  { %2602 = vmatprep.subr.mxu1 %v528_v22  ;;  %2570 = vmatpush3.msra.mxu0 %v479_v23  ;;  %v577_v22 = vld [vmem:[%s4520_s1 + $0x1148] sm:$0xff]  ;;  %v543_v23 = vld [vmem:[%s4520_s1 + $0x1038] sm:$0xff] }
 0x102   :  { %2603 = vmatpush3.msra.mxu1 %v512_v24  ;;  %2571 = vmatprep.subr.mxu0 %v494_v25  ;;  %v558_v24 = vld [vmem:[%s4520_s1 + $0x10b0] sm:$0xff]  ;;  %v576_v25 = vld [vmem:[%s4520_s1 + $0x1140] sm:$0xff] }
 0x103   :  { %2604 = vmatprep.subr.mxu1 %v527_v26  ;;  %2572 = vmatpush3.msra.mxu0 %v478_v27  ;;  %v542_v26 = vld [vmem:[%s4520_s1 + $0x1030] sm:$0xff]  ;;  %v557_v27 = vld [vmem:[%s4520_s1 + $0x10a8] sm:$0xff] }
 0x104   :  { %2605 = vmatpush3.msra.mxu1 %v511_v28  ;;  %2573 = vmatprep.subr.mxu0 %v493_v29  ;;  %v575_v28 = vld [vmem:[%s4520_s1 + $0x1138] sm:$0xff]  ;;  %v541_v29 = vld [vmem:[%s4520_s1 + $0x1028] sm:$0xff] }
 0x105   :  { %2606 = vmatprep.subr.mxu1 %v526_v30  ;;  %2574 = vmatpush3.msra.mxu0 %v477_v31  ;;  %v556_v30 = vld [vmem:[%s4520_s1 + $0x10a0] sm:$0xff]  ;;  %v574_v31 = vld [vmem:[%s4520_s1 + $0x1130] sm:$0xff] }
 0x106   :  { %2607 = vmatpush3.msra.mxu1 %v510_v32  ;;  %2575 = vmatprep.subr.mxu0 %v492_v33  ;;  %v23_v32 = vld [vmem:[%s4519_s0 + $0x40] sm:$0x3f] }
 0x107   :  { %2608 = vmatprep.subr.mxu1 %v525_v34  ;;  %2576 = vmatpush3.msra.mxu0 %v476_v35  ;;  %v540_v33 = vld [vmem:[%s4520_s1 + $0x1020] sm:$0xff]  ;;  %v555_v34 = vld [vmem:[%s4520_s1 + $0x1098] sm:$0xff]  ;;  %v573_v35 = vld [vmem:[%s4520_s1 + $0x1128] sm:$0xff] }
 0x108   :  { %2609 = vmatpush3.msra.mxu1 %v509_v37  ;;  %2577 = vmatprep.subr.mxu0 %v491_v38  ;;  %v743_v37 = vrot.slane %v23_v32, %v2898_v48  ;;  %v554_v38 = vld [vmem:[%s4520_s1 + $0x1090] sm:$0xff] }
 0x109   :  { %2610 = vmatprep.subr.mxu1 %v524_v39  ;;  %2578 = vmatpush3.msra.mxu0 %v475_v40  ;;  %v572_v39 = vld [vmem:[%s4520_s1 + $0x1120] sm:$0xff]  ;;  %v538_v40 = vld [vmem:[%s4520_s1 + $0x1010] sm:$0xff] }
 0x10a   :  { %2611 = vmatpush3.msra.mxu1 %v508_v41  ;;  %2579 = vmatprep.subr.mxu0 %v490_v42  ;;  %v553_v41 = vld [vmem:[%s4520_s1 + $0x1088] sm:$0xff]  ;;  %v571_v42 = vld [vmem:[%s4520_s1 + $0x1118] sm:$0xff] }
 0x10b   :  { %2612 = vmatprep.subr.mxu1 %v523_v44  ;;  %2580 = vmatpush3.msra.mxu0 %v474_v45  ;;  %v751_v44 = vcombine.high %v743_v37, %v743_v37  ;;  %v552_v45 = vld [vmem:[%s4520_s1 + $0x1080] sm:$0xff] }
 0x10c   :  { %2613 = vmatpush3.msra.mxu1 %v507_v47  ;;  %2581 = vmatprep.subr.mxu0 %v489_v49  ;;  %v736_v47 = vcombine.high %v23_v32, %v23_v32  ;;  %v570_v49 = vld [vmem:[%s4520_s1 + $0x1110] sm:$0xff] }
 0x10d   :  { %2614 = vmatprep.subr.mxu1 %v522_v50  ;;  %2582 = vmatpush3.msra.mxu0 %v473_v51  ;;  %v569_v50 = vld [vmem:[%s4520_s1 + $0x1108] sm:$0xff]  ;;  %v568_v51 = vld [vmem:[%s4520_s1 + $0x1100] sm:$0xff] }
 0x10e   :  { %2615 = vmatpush3.msra.mxu1 %v506_v52  ;;  %2583 = vmatprep.subr.mxu0 %v488_v53  ;;  %v750_v52 = vrot.slane %v736_v47, %v2898_v48  ;;  %v2095_v53 = vpop.f32.mrf.mxu0 }
 0x10f   :  { %2616 = vmatprep.subr.mxu1 %v521_v55  ;;  %2584 = vmatpush3.msra.mxu0 %v472_v56  ;;  %v2130_v55 = vpop.f32.mrf.mxu1 }
 0x110   :  { %1831 = vmatprep.mubr.f32.mxu0 %v734_v57  ;;  %2617 = vmatpush3.msra.mxu1 %v505_v58  ;;  %v2062_v58 = vld [vmem:[%s4521_s2] ss:$0 sm:$0xff] }
 0x111   :  { %1832 = vmatmul.mubr.f32.vlgmr.msra.gmra.mxu0 %v726_v46  ;;  %2618 = vmatprep.subr.mxu1 %v520_v59  ;;  %v536_v46 = vld [vmem:[%s4520_s1 + $0x1000] sm:$0xff]  ;;  %v2131_v59 = vpop.f32.mrf.mxu1  ;;  %s2748_s1 = smov [#allocation2]  }
 0x112   :  { %2623 = vmatprep.subr.mxu0 %v567_v60  ;;  %2619 = vmatpush3.msra.mxu1 %v504_v61  ;;  %s2054_s2 = sshll.u32 %s2748_s1, 4  ;;  %s2055_s2 = int_to_ptr.vmem [resolvable:$true] %s2054_s2 }
 0x113   :  { %1901 = vmatprep.mubr.f32.mxu1 %v735_v62  ;;  %2624 = vmatpush3.msra.mxu0 %v551_v63  ;;  %v2200_v48 = vpop.f32.mrf.mxu1  ;;  %v2132_v62 = vadd.f32 %v2131_v59, %v2130_v55  ;;  %s2723_s17 = scalar_lea.vmem %s2055_s2, 32  ;;  %p2728_p1 = scmp.lt.s32.totalorder %s2055_s2, %s2055_s2 }
 0x114   :  { %1902 = vmatmul.mubr.f32.vlgmr.msra.gmra.mxu1 %v733_v54  ;;  %2625 = vmatprep.subr.mxu0 %v566_v0  ;;  %v2096_v54 = vpop.f32.mrf.mxu0  ;;  %p2724_p0 = scmp.ne.s32.totalorder %s2055_s2, %s2723_s17  ;;  %p2729_p2 = scmp.lt.s32.totalorder %s2723_s17, %s2723_s17 }
 0x115   :  { %2626 = vmatpush3.msra.mxu0 %v550_v1  ;;  %2675 = vmatprep.subr.mxu1 %v2746_v5  ;;  %v2097_v57 = vadd.f32 %v2096_v54, %v2095_v53  ;;  %v2201_v1 = vpop.f32.mrf.mxu1 }
 0x116   :  { %2627 = vmatprep.subr.mxu0 %v565_v2  ;;  %2676 = vmatpush3.msra.mxu1 %v583_v3  ;;  %v2165_v56 = vpop.f32.mrf.mxu0  ;;  %p2730_p3 = por %p2729_p2, %p2728_p1 }
 0x117   :  { %2628 = vmatpush3.msra.mxu0 %v549_v4  ;;  %2677 = vmatprep.subr.mxu1 %v2746_v5  ;;  %v854_v61 = vadd.f32 %v2097_v57, %v2062_v58 }
 0x118   :  { %2629 = vmatprep.subr.mxu0 %v564_v6  ;;  %2678 = vmatpush3.msra.mxu1 %v582_v7  ;;  %v2166_v60 = vpop.f32.mrf.mxu0  ;;  %v2202_v6 = vadd.f32 %v2201_v1, %v2200_v48  ;;  %p2731_p4 = pnand %p2730_p3, %p2724_p0 }
 0x119   :  { %2630 = vmatpush3.msra.mxu0 %v548_v8  ;;  %2679 = vmatprep.subr.mxu1 %v2746_v5  ;;  %v2167_v0 = vadd.f32 %v2166_v60, %v2165_v56  ;;  %v924_v2 = vadd.f32 %v2132_v62, %v854_v61 }
 0x11a   :  { %2631 = vmatprep.subr.mxu0 %v563_v9  ;;  %2680 = vmatpush3.msra.mxu1 %v581_v10 }
 0x11b   :  { %2632 = vmatpush3.msra.mxu0 %v547_v11  ;;  %2681 = vmatprep.subr.mxu1 %v2746_v5 }
 0x11c   :  { %2633 = vmatprep.subr.mxu0 %v562_v12  ;;  %2682 = vmatpush3.msra.mxu1 %v580_v13 }
 0x11d   :  { %2634 = vmatpush3.msra.mxu0 %v546_v14  ;;  %2683 = vmatprep.subr.mxu1 %v2746_v5 }
 0x11e   :  { %2635 = vmatprep.subr.mxu0 %v561_v15  ;;  %2684 = vmatpush3.msra.mxu1 %v579_v16 }
 0x11f   :  { %2636 = vmatpush3.msra.mxu0 %v545_v17  ;;  %2685 = vmatprep.subr.mxu1 %v2746_v5 }
 0x120   :  { %2637 = vmatprep.subr.mxu0 %v560_v18  ;;  %2686 = vmatpush3.msra.mxu1 %v578_v19 }
 0x121   :  { %2638 = vmatpush3.msra.mxu0 %v544_v20  ;;  %2687 = vmatprep.subr.mxu1 %v2746_v5 }
 0x122   :  { %2639 = vmatprep.subr.mxu0 %v559_v21  ;;  %2688 = vmatpush3.msra.mxu1 %v577_v22 }
 0x123   :  { %2640 = vmatpush3.msra.mxu0 %v543_v23  ;;  %2689 = vmatprep.subr.mxu1 %v2746_v5 }
 0x124   :  { %2641 = vmatprep.subr.mxu0 %v558_v24  ;;  %2690 = vmatpush3.msra.mxu1 %v576_v25 }
 0x125   :  { %2642 = vmatpush3.msra.mxu0 %v542_v26  ;;  %2691 = vmatprep.subr.mxu1 %v2746_v5 }
 0x126   :  { %2643 = vmatprep.subr.mxu0 %v557_v27  ;;  %2692 = vmatpush3.msra.mxu1 %v575_v28  ;;  %v2235_v63 = vpop.f32.mrf.mxu0 }
 0x127   :  { %2644 = vmatpush3.msra.mxu0 %v541_v29  ;;  %2693 = vmatprep.subr.mxu1 %v2746_v5 }
 0x128   :  { %2645 = vmatprep.subr.mxu0 %v556_v30  ;;  %2694 = vmatpush3.msra.mxu1 %v574_v31  ;;  %v2236_v3 = vpop.f32.mrf.mxu0 }
 0x129   :  { %2646 = vmatpush3.msra.mxu0 %v540_v33  ;;  %2695 = vmatprep.subr.mxu1 %v2746_v5  ;;  %v2270_v4 = vpop.f32.mrf.mxu1  ;;  %v2237_v8 = vadd.f32 %v2236_v3, %v2235_v63 }
 0x12a   :  { %2647 = vmatprep.subr.mxu0 %v555_v34  ;;  %2696 = vmatpush3.msra.mxu1 %v573_v35 }
 0x12b   :  { %2648 = vmatpush3.msra.mxu0 %v539_v36  ;;  %2697 = vmatprep.subr.mxu1 %v2746_v5  ;;  %v2271_v9 = vpop.f32.mrf.mxu1 }
 0x12c   :  { %2649 = vmatprep.subr.mxu0 %v554_v38  ;;  %2698 = vmatpush3.msra.mxu1 %v572_v39  ;;  %v2272_v14 = vadd.f32 %v2271_v9, %v2270_v4 }
 0x12d   :  { %2650 = vmatpush3.msra.mxu0 %v538_v40  ;;  %2699 = vmatprep.subr.mxu1 %v2746_v5 }
 0x12e   :  { %2651 = vmatprep.subr.mxu0 %v553_v41  ;;  %2700 = vmatpush3.msra.mxu1 %v571_v42 }
 0x12f   :  { %2652 = vmatpush3.msra.mxu0 %v537_v43  ;;  %2701 = vmatprep.subr.mxu1 %v2746_v5 }
 0x130   :  { %2653 = vmatprep.subr.mxu0 %v552_v45  ;;  %1971 = vmatprep.mubr.f32.mxu0 %v751_v44 }
 0x131   :  { %2654 = vmatpush3.msra.mxu0 %v536_v46  ;;  %2702 = vmatpush3.msra.mxu1 %v570_v49 }
 0x132   :  { %1972 = vmatmul.mubr.f32.vlgmr.msra.gmra.mxu0 %v743_v37  ;;  %2703 = vmatprep.subr.mxu1 %v2746_v5 }
 0x133   :  { %2704 = vmatpush3.msra.mxu1 %v569_v50  ;;  %2707 = vmatprep.mubr.msk.f32.mxu1 %vm2747_vm0, %v2746_v5 }
 0x134   :  { %2705 = vmatprep.subr.mxu1 %v2746_v5  ;;  %v994_v5 = vadd.f32 %v2167_v0, %v924_v2 }
 0x135   :  { %2706 = vmatpush3.msra.mxu1 %v568_v51 }
 0x136   :  { %2708 = vmatmul.mubr.f32.vlgmr.msra.gmra.mxu1 %v750_v52  ;;  %v1064_v10 = vadd.f32 %v2202_v6, %v994_v5 }
 0x138   :  { %v1134_v13 = vadd.f32 %v2237_v8, %v1064_v10 }
 0x13a   :  { %v1204_v18 = vadd.f32 %v2272_v14, %v1134_v13 }
 0x148   :  { %v2305_v7 = vpop.f32.mrf.mxu0 }
 0x14a   :  { %v2306_v11 = vpop.f32.mrf.mxu0 }
 0x14b   :  { %v2340_v12 = vpop.f32.mrf.mxu1  ;;  %v2307_v16 = vadd.f32 %v2306_v11, %v2305_v7 }
 0x14d   :  { %v2341_v17 = vpop.f32.mrf.mxu1  ;;  %v1274_v21 = vadd.f32 %v2307_v16, %v1204_v18 }
 0x14e   :  { %v2342_v22 = vadd.f32 %v2341_v17, %v2340_v12 }
 0x150   :  { %v1344_v26 = vadd.f32 %v2342_v22, %v1274_v21 }
 0x16a   :  { %v2375_v15 = vpop.f32.mrf.mxu0 }
 0x16c   :  { %v2376_v19 = vpop.f32.mrf.mxu0 }
 0x16d   :  { %v2410_v20 = vpop.f32.mrf.mxu1  ;;  %v2377_v24 = vadd.f32 %v2376_v19, %v2375_v15 }
 0x16f   :  { %v2411_v25 = vpop.f32.mrf.mxu1  ;;  %v1414_v29 = vadd.f32 %v2377_v24, %v1344_v26 }
 0x170   :  { %v2412_v30 = vadd.f32 %v2411_v25, %v2410_v20 }
 0x172   :  { %v1484_v34 = vadd.f32 %v2412_v30, %v1414_v29 }
 0x18d   :  { %v2445_v23 = vpop.f32.mrf.mxu0 }
 0x18f   :  { %v2446_v27 = vpop.f32.mrf.mxu0 }
 0x190   :  { %v2480_v28 = vpop.f32.mrf.mxu1  ;;  %v2447_v32 = vadd.f32 %v2446_v27, %v2445_v23 }
 0x192   :  { %v2481_v33 = vpop.f32.mrf.mxu1  ;;  %v1554_v37 = vadd.f32 %v2447_v32, %v1484_v34 }
 0x193   :  { %v2482_v38 = vadd.f32 %v2481_v33, %v2480_v28 }
 0x195   :  { %v1624_v42 = vadd.f32 %v2482_v38, %v1554_v37 }
 0x1af   :  { %v2515_v31 = vpop.f32.mrf.mxu0 }
 0x1b1   :  { %v2516_v35 = vpop.f32.mrf.mxu0 }
 0x1b2   :  { %v2550_v36 = vpop.f32.mrf.mxu1  ;;  %v2517_v40 = vadd.f32 %v2516_v35, %v2515_v31 }
 0x1b4   :  { %v2551_v41 = vpop.f32.mrf.mxu1  ;;  %v1694_v45 = vadd.f32 %v2517_v40, %v1624_v42 }
 0x1b5   :  { %v2552_v46 = vadd.f32 %v2551_v41, %v2550_v36 }
 0x1b7   :  { %v1764_v50 = vadd.f32 %v2552_v46, %v1694_v45 }
 0x1d1   :  { %v2585_v39 = vpop.f32.mrf.mxu0 }
 0x1d3   :  { %v2586_v43 = vpop.f32.mrf.mxu0 }
 0x1d4   :  { %v2620_v44 = vpop.f32.mrf.mxu1  ;;  %v2587_v47 = vadd.f32 %v2586_v43, %v2585_v39 }
 0x1d6   :  { %v2621_v49 = vpop.f32.mrf.mxu1  ;;  %v1834_v51 = vadd.f32 %v2587_v47, %v1764_v50 }
 0x1d7   :  { %v2622_v52 = vadd.f32 %v2621_v49, %v2620_v44 }
 0x1d9   :  { %v1904_v55 = vadd.f32 %v2622_v52, %v1834_v51 }
 0x1f2   :  { %v2655_v53 = vpop.f32.mrf.mxu0 }
 0x1f4   :  { %v2656_v54 = vpop.f32.mrf.mxu0 }
 0x1f5   :  { %v2657_v56 = vadd.f32 %v2656_v54, %v2655_v53 }
 0x1f6   :  { %v2043_v57 = vpop.f32.mrf.mxu1 }
 0x1f7   :  { %v1974_v58 = vadd.f32 %v2657_v56, %v1904_v55 }
 0x1f8   :  { %v2709_v59 = vpop.f32.mrf.mxu1 }
 0x1f9   :  { %v2044_v60 = vadd.f32 %v2043_v57, %v1974_v58 }
 0x1fb   :  { %2047 = vst [vmem:[#allocation2] sm:$0x3] %v2044_v60 }
 0x1fc   :  { %2734 = shalt.err (!%p2731_p4)
}
 0x1fd   :  { %2057 = dma.vmem_to_hbm [thread:$0]  %s2055_s2, 32, %s4522_s3, [#allocation3]  }
 0x1fe   :  { %2743 = dma.done.wait [#allocation3], 32  }
 0x1ff   :  { %2744 = vsyncadd [#allocation3], 4294967264 }
 0x200   :  { %2061 = vsyncpa [#allocation3], 1 }

</bundles_post_ra>
